<compile_context>
chip_gen: v5e
topology: v5e:2x2
jax: 0.10.0
libtpu: 0.0.40
codegen_flags: <defaults>
</compile_context>

<pallas_src>
import functools

import jax
import jax.numpy as jnp
from jax.experimental import pallas as pl
from jax.experimental.pallas import tpu as pltpu


def resblock_kernel(x_ref, w1_ref, b1_ref, w2_ref, b2_ref, o_ref, spad_ref,
                    *, H, W, S, Cp):
    # x_ref   : (1, M, Cp)  flattened activation, M = H*S; image pixel (y, x)
    #           lives at row y*S + x for x < W, rows with x >= W are zero.
    # w*_ref  : (9, Cp, Cp) per-tap weights, w[t][ci, co], t = ky*3 + kx.
    # b*_ref  : (1, Cp)
    # o_ref   : (1, M, Cp)  same flattened layout as x_ref.
    # spad_ref: (R, Cp)     flattened zero-padded activation, R = (H+2)*S + 8;
    #           padded coord (r, c) -> flat row r*S + c.
    M = H * S
    R = (H + 2) * S + 8
    f32 = jnp.float32

    # Zero only the halo rows the interior writes below do not cover (top
    # padded row + start of row 1, bottom padded row + overrun slack).
    # ~10 vregs/step; redone every step so it is megacore/grid-shard safe.
    spad_ref[0:2 * S, :] = jnp.zeros((2 * S, Cp), f32)
    spad_ref[(H + 1) * S:R, :] = jnp.zeros((R - (H + 1) * S, Cp), f32)

    # Place x into the interior: input flat row y*S + c maps to padded coord
    # (y+1, c+1), i.e. ONE contiguous slab store shifted by S+1.  The zero
    # columns c >= W of the input land exactly on the halo columns.
    spad_ref[S + 1:S + 1 + M, :] = x_ref[0]

    # Row-validity mask: flat row q = y*S + x is a real pixel iff x < W.
    col = jax.lax.broadcasted_iota(jnp.int32, (M, Cp), 0) % S
    valid = col < W

    def conv3x3(w_ref, bias):
        # 9 accumulated (M, Cp) x (Cp, Cp) MXU matmuls; output row q reads
        # padded flat row q + ky*S + kx for tap (ky, kx).
        acc = None
        for ky in range(3):
            for kx in range(3):
                d = ky * S + kx
                p = jnp.dot(spad_ref[d:d + M, :], w_ref[ky * 3 + kx],
                            preferred_element_type=jnp.float32)
                acc = p if acc is None else acc + p
        return acc + bias

    # conv1 + ReLU; mask junk rows to zero so the halo stays zero when the
    # hidden activation is reused as conv2's padded input.
    h = jnp.maximum(conv3x3(w1_ref, b1_ref[0]), 0.0)
    spad_ref[S + 1:S + 1 + M, :] = jnp.where(valid, h, 0.0)

    # conv2 + bias + residual + ReLU; single unmasked lane-dense slab store.
    out = conv3x3(w2_ref, b2_ref[0]) + x_ref[0]
    o_ref[0] = jnp.maximum(out, 0.0).astype(o_ref.dtype)


def _round_up(n, m):
    return ((n + m - 1) // m) * m


def _tap_weights(w_oihw, Cp):
    """OIHW (Co,Ci,3,3) -> (9, Cp, Cp) with w[t][ci, co] = W[co, ci, ky, kx]."""
    Co, Ci = w_oihw.shape[0], w_oihw.shape[1]
    w = jnp.transpose(w_oihw, (2, 3, 1, 0))                    # (3, 3, Ci, Co)
    w = jnp.pad(w, ((0, 0), (0, 0), (0, Cp - Ci), (0, Cp - Co)))
    return w.reshape(9, Cp, Cp)


def resblock_apply_padded(x_flat, w1t, b1p, w2t, b2p, *, H, W, S, Cp):
    """Production entry: activations stay in the flattened padded (B, H*S, Cp)
    layout across consecutive ResBlocks (convert once at the model edges)."""
    B, M, _ = x_flat.shape
    assert M == H * S
    R = (H + 2) * S + 8
    kernel = functools.partial(resblock_kernel, H=H, W=W, S=S, Cp=Cp)

    return pl.pallas_call(
        kernel,
        out_shape=jax.ShapeDtypeStruct((B, M, Cp), x_flat.dtype),
        grid_spec=pltpu.PrefetchScalarGridSpec(
            num_scalar_prefetch=0,
            grid=(B,),
            in_specs=[
                pl.BlockSpec((1, M, Cp), lambda b: (b, 0, 0)),
                pl.BlockSpec((9, Cp, Cp), lambda b: (0, 0, 0)),
                pl.BlockSpec((1, Cp), lambda b: (0, 0)),
                pl.BlockSpec((9, Cp, Cp), lambda b: (0, 0, 0)),
                pl.BlockSpec((1, Cp), lambda b: (0, 0)),
            ],
            out_specs=pl.BlockSpec((1, M, Cp), lambda b: (b, 0, 0)),
            scratch_shapes=[pltpu.VMEM((R, Cp), jnp.float32)],
        ),
        compiler_params=pltpu.CompilerParams(
            dimension_semantics=("parallel",),
            vmem_limit_bytes=32 * 1024 * 1024),
    )(x_flat, w1t, b1p, w2t, b2p)


def resblock_forward(x_nchw, w1_oihw, b1, w2_oihw, b2):
    """x_nchw: (B, C, H, W) float32 -> (B, C, H, W) float32."""
    B, C, H, W = x_nchw.shape
    Cp = _round_up(C, 128)        # lane-dense channels (assumes prod C ~>= 128)
    S = _round_up(W + 2, 8)       # 8-aligned padded row stride (incl. halo)

    # Single fused relayout pass at the model edge: NCHW -> NHWC, pad W -> S
    # and C -> Cp with zeros, flatten (H, S) -> H*S rows.
    x_nhwc = jnp.transpose(x_nchw, (0, 2, 3, 1))
    x_flat = jnp.pad(x_nhwc, ((0, 0), (0, 0), (0, S - W), (0, Cp - C))
                     ).reshape(B, H * S, Cp)

    w1t = _tap_weights(w1_oihw, Cp)
    w2t = _tap_weights(w2_oihw, Cp)
    b1p = jnp.pad(b1, (0, Cp - C)).reshape(1, Cp)
    b2p = jnp.pad(b2, (0, Cp - C)).reshape(1, Cp)

    out_flat = resblock_apply_padded(x_flat, w1t, b1p, w2t, b2p,
                                     H=H, W=W, S=S, Cp=Cp)

    # Drop row/channel padding, NHWC -> NCHW.
    out = out_flat.reshape(B, H, S, Cp)[:, :, :W, :C]
    return jnp.transpose(out, (0, 3, 1, 2))


def _reference_forward(x_nchw, w1_oihw, b1, w2_oihw, b2):
    """Pure-JAX reference (same math as the PyTorch module)."""
    dn = jax.lax.conv_dimension_numbers(x_nchw.shape, w1_oihw.shape,
                                        ("NCHW", "OIHW", "NCHW"))
    h = jax.lax.conv_general_dilated(x_nchw, w1_oihw, (1, 1), "SAME",
                                     dimension_numbers=dn)
    h = jnp.maximum(h + b1[None, :, None, None], 0.0)
    o = jax.lax.conv_general_dilated(h, w2_oihw, (1, 1), "SAME",
                                     dimension_numbers=dn)
    o = o + b2[None, :, None, None] + x_nchw
    return jnp.maximum(o, 0.0)


if __name__ == "__main__":
    B, C, H, W = 2, 4, 16, 16

    key = jax.random.PRNGKey(0)
    kx_, kw1, kb1, kw2, kb2 = jax.random.split(key, 5)

    x = jax.random.normal(kx_, (B, C, H, W), dtype=jnp.float32)
    # Deterministic param init (roughly matches nn.Conv2d's fan-in scale).
    fan_in = C * 3 * 3
    scale = 1.0 / jnp.sqrt(jnp.float32(fan_in))
    w1 = jax.random.uniform(kw1, (C, C, 3, 3), jnp.float32, -scale, scale)
    b1 = jax.random.uniform(kb1, (C,), jnp.float32, -scale, scale)
    w2 = jax.random.uniform(kw2, (C, C, 3, 3), jnp.float32, -scale, scale)
    b2 = jax.random.uniform(kb2, (C,), jnp.float32, -scale, scale)

    out = jax.jit(resblock_forward)(x, w1, b1, w2, b2)
    out = jax.block_until_ready(out)

    ref = _reference_forward(x, w1, b1, w2, b2)
    assert out.shape == (B, C, H, W)
    assert jnp.allclose(out, ref, atol=1e-4, rtol=1e-4), "mismatch vs reference"

    print("KERNEL_OK")
</pallas_src>

<mosaic_0001>
module attributes {stable_mosaic.version = 11 : i64} {
  func.func @resblock_kernel(%arg0: i32, %arg1: memref<1x384x128xf32, #tpu.memory_space<vmem>>, %arg2: memref<9x128x128xf32, #tpu.memory_space<vmem>>, %arg3: memref<1x128xf32, #tpu.memory_space<vmem>>, %arg4: memref<9x128x128xf32, #tpu.memory_space<vmem>>, %arg5: memref<1x128xf32, #tpu.memory_space<vmem>>, %arg6: memref<1x384x128xf32, #tpu.memory_space<vmem>>, %arg7: memref<440x128xf32, #tpu.memory_space<vmem>>) attributes {dimension_semantics = [#tpu.dimension_semantics<parallel>], iteration_bounds = array<i64: 2>, scalar_prefetch = 0 : i64, scratch_operands = 1 : i64, tpu.core_type = #tpu.core_type<tc>, window_params = [{transform_indices = @transform_0, window_bounds = array<i64: 1, 384, 128>}, {pipeline_mode = #tpu.pipeline_mode<synchronous>, transform_indices = @transform_1, window_bounds = array<i64: 9, 128, 128>}, {pipeline_mode = #tpu.pipeline_mode<synchronous>, transform_indices = @transform_2, window_bounds = array<i64: 1, 128>}, {pipeline_mode = #tpu.pipeline_mode<synchronous>, transform_indices = @transform_3, window_bounds = array<i64: 9, 128, 128>}, {pipeline_mode = #tpu.pipeline_mode<synchronous>, transform_indices = @transform_4, window_bounds = array<i64: 1, 128>}, {transform_indices = @transform_5, window_bounds = array<i64: 1, 384, 128>}]} {
    %cst = arith.constant 0.000000e+00 : f32
    %0 = vector.broadcast %cst : f32 to vector<48x128xf32>
    %c0 = arith.constant 0 : index
    %c0_0 = arith.constant 0 : index
    %1 = vector.load %arg7[%c0, %c0_0] : memref<440x128xf32, #tpu.memory_space<vmem>>, vector<48x128xf32>
    tpu.vector_store %arg7[%c0, %c0_0], %0 {strides = array<i32>} : memref<440x128xf32, #tpu.memory_space<vmem>>, vector<48x128xf32>,
    %cst_1 = arith.constant 0.000000e+00 : f32
    %2 = vector.broadcast %cst_1 : f32 to vector<32x128xf32>
    %c408 = arith.constant 408 : index
    %c0_2 = arith.constant 0 : index
    %3 = vector.load %arg7[%c408, %c0_2] : memref<440x128xf32, #tpu.memory_space<vmem>>, vector<32x128xf32>
    tpu.vector_store %arg7[%c408, %c0_2], %2 {strides = array<i32>} : memref<440x128xf32, #tpu.memory_space<vmem>>, vector<32x128xf32>,
    %c0_3 = arith.constant 0 : index
    %c0_4 = arith.constant 0 : index
    %c0_5 = arith.constant 0 : index
    %4 = vector.load %arg1[%c0_3, %c0_4, %c0_5] : memref<1x384x128xf32, #tpu.memory_space<vmem>>, vector<1x384x128xf32>
    %5 = vector.shape_cast %4 : vector<1x384x128xf32> to vector<384x128xf32>
    %c25 = arith.constant 25 : index
    %c0_6 = arith.constant 0 : index
    %6 = vector.load %arg7[%c25, %c0_6] : memref<440x128xf32, #tpu.memory_space<vmem>>, vector<384x128xf32>
    tpu.vector_store %arg7[%c25, %c0_6], %5 {strides = array<i32>} : memref<440x128xf32, #tpu.memory_space<vmem>>, vector<384x128xf32>,
    %7 = tpu.iota {dimensions = array<i32: 0>} : vector<384x128xi32>
    %c24_i32 = arith.constant 24 : i32
    %c0_i32 = arith.constant 0 : i32
    %8 = arith.cmpi eq, %c24_i32, %c0_i32 : i32
    %c1_i32 = arith.constant 1 : i32
    %9 = arith.select %8, %c1_i32, %c24_i32 : i32
    %10 = vector.broadcast %9 : i32 to vector<384x128xi32>
    %11 = arith.remsi %7, %10 : vector<384x128xi32>
    %c0_i32_7 = arith.constant 0 : i32
    %12 = vector.broadcast %c0_i32_7 : i32 to vector<384x128xi32>
    %13 = arith.cmpi ne, %11, %12 : vector<384x128xi32>
    %c0_i32_8 = arith.constant 0 : i32
    %14 = vector.broadcast %c0_i32_8 : i32 to vector<384x128xi32>
    %15 = arith.cmpi slt, %11, %14 : vector<384x128xi32>
    %c0_i32_9 = arith.constant 0 : i32
    %16 = arith.cmpi slt, %9, %c0_i32_9 : i32
    %17 = vector.broadcast %16 : i1 to vector<384x128xi1>
    %18 = vector.broadcast %17 : vector<384x128xi1> to vector<384x128xi1>
    %19 = arith.xori %15, %18 : vector<384x128xi1>
    %20 = arith.andi %19, %13 : vector<384x128xi1>
    %21 = vector.broadcast %9 : i32 to vector<384x128xi32>
    %22 = arith.addi %11, %21 : vector<384x128xi32>
    %23 = arith.select %20, %22, %11 : vector<384x128xi1>, vector<384x128xi32>
    %c16_i32 = arith.constant 16 : i32
    %24 = vector.broadcast %c16_i32 : i32 to vector<384x128xi32>
    %25 = arith.cmpi slt, %23, %24 : vector<384x128xi32>
    %c0_10 = arith.constant 0 : index
    %c0_11 = arith.constant 0 : index
    %26 = vector.load %arg3[%c0_10, %c0_11] : memref<1x128xf32, #tpu.memory_space<vmem>>, vector<1x128xf32>
    %27 = vector.shape_cast %26 : vector<1x128xf32> to vector<128xf32>
    %c0_12 = arith.constant 0 : index
    %c0_13 = arith.constant 0 : index
    %28 = vector.load %arg7[%c0_12, %c0_13] : memref<440x128xf32, #tpu.memory_space<vmem>>, vector<384x128xf32>
    %c0_14 = arith.constant 0 : index
    %c0_15 = arith.constant 0 : index
    %c0_16 = arith.constant 0 : index
    %29 = vector.load %arg2[%c0_14, %c0_15, %c0_16] : memref<9x128x128xf32, #tpu.memory_space<vmem>>, vector<1x128x128xf32>
    %30 = vector.shape_cast %29 : vector<1x128x128xf32> to vector<128x128xf32>
    %cst_17 = arith.constant dense<0.000000e+00> : vector<384x128xf32>
    %31 = tpu.matmul %28, %30, %cst_17 {dimension_numbers = #tpu.dot_dimension_numbers<[1], [0], [0], [1], [0, 0, 1, 1], [], []>} : vector<384x128xf32>, vector<128x128xf32>, vector<384x128xf32> -> vector<384x128xf32>
    %c1 = arith.constant 1 : index
    %c0_18 = arith.constant 0 : index
    %32 = vector.load %arg7[%c1, %c0_18] : memref<440x128xf32, #tpu.memory_space<vmem>>, vector<384x128xf32>
    %c1_19 = arith.constant 1 : index
    %c0_20 = arith.constant 0 : index
    %c0_21 = arith.constant 0 : index
    %33 = vector.load %arg2[%c1_19, %c0_20, %c0_21] : memref<9x128x128xf32, #tpu.memory_space<vmem>>, vector<1x128x128xf32>
    %34 = vector.shape_cast %33 : vector<1x128x128xf32> to vector<128x128xf32>
    %cst_22 = arith.constant dense<0.000000e+00> : vector<384x128xf32>
    %35 = tpu.matmul %32, %34, %cst_22 {dimension_numbers = #tpu.dot_dimension_numbers<[1], [0], [0], [1], [0, 0, 1, 1], [], []>} : vector<384x128xf32>, vector<128x128xf32>, vector<384x128xf32> -> vector<384x128xf32>
    %36 = arith.addf %31, %35 : vector<384x128xf32>
    %c2 = arith.constant 2 : index
    %c0_23 = arith.constant 0 : index
    %37 = vector.load %arg7[%c2, %c0_23] : memref<440x128xf32, #tpu.memory_space<vmem>>, vector<384x128xf32>
    %c2_24 = arith.constant 2 : index
    %c0_25 = arith.constant 0 : index
    %c0_26 = arith.constant 0 : index
    %38 = vector.load %arg2[%c2_24, %c0_25, %c0_26] : memref<9x128x128xf32, #tpu.memory_space<vmem>>, vector<1x128x128xf32>
    %39 = vector.shape_cast %38 : vector<1x128x128xf32> to vector<128x128xf32>
    %cst_27 = arith.constant dense<0.000000e+00> : vector<384x128xf32>
    %40 = tpu.matmul %37, %39, %cst_27 {dimension_numbers = #tpu.dot_dimension_numbers<[1], [0], [0], [1], [0, 0, 1, 1], [], []>} : vector<384x128xf32>, vector<128x128xf32>, vector<384x128xf32> -> vector<384x128xf32>
    %41 = arith.addf %36, %40 : vector<384x128xf32>
    %c24 = arith.constant 24 : index
    %c0_28 = arith.constant 0 : index
    %42 = vector.load %arg7[%c24, %c0_28] : memref<440x128xf32, #tpu.memory_space<vmem>>, vector<384x128xf32>
    %c3 = arith.constant 3 : index
    %c0_29 = arith.constant 0 : index
    %c0_30 = arith.constant 0 : index
    %43 = vector.load %arg2[%c3, %c0_29, %c0_30] : memref<9x128x128xf32, #tpu.memory_space<vmem>>, vector<1x128x128xf32>
    %44 = vector.shape_cast %43 : vector<1x128x128xf32> to vector<128x128xf32>
    %cst_31 = arith.constant dense<0.000000e+00> : vector<384x128xf32>
    %45 = tpu.matmul %42, %44, %cst_31 {dimension_numbers = #tpu.dot_dimension_numbers<[1], [0], [0], [1], [0, 0, 1, 1], [], []>} : vector<384x128xf32>, vector<128x128xf32>, vector<384x128xf32> -> vector<384x128xf32>
    %46 = arith.addf %41, %45 : vector<384x128xf32>
    %c25_32 = arith.constant 25 : index
    %c0_33 = arith.constant 0 : index
    %47 = vector.load %arg7[%c25_32, %c0_33] : memref<440x128xf32, #tpu.memory_space<vmem>>, vector<384x128xf32>
    %c4 = arith.constant 4 : index
    %c0_34 = arith.constant 0 : index
    %c0_35 = arith.constant 0 : index
    %48 = vector.load %arg2[%c4, %c0_34, %c0_35] : memref<9x128x128xf32, #tpu.memory_space<vmem>>, vector<1x128x128xf32>
    %49 = vector.shape_cast %48 : vector<1x128x128xf32> to vector<128x128xf32>
    %cst_36 = arith.constant dense<0.000000e+00> : vector<384x128xf32>
    %50 = tpu.matmul %47, %49, %cst_36 {dimension_numbers = #tpu.dot_dimension_numbers<[1], [0], [0], [1], [0, 0, 1, 1], [], []>} : vector<384x128xf32>, vector<128x128xf32>, vector<384x128xf32> -> vector<384x128xf32>
    %51 = arith.addf %46, %50 : vector<384x128xf32>
    %c26 = arith.constant 26 : index
    %c0_37 = arith.constant 0 : index
    %52 = vector.load %arg7[%c26, %c0_37] : memref<440x128xf32, #tpu.memory_space<vmem>>, vector<384x128xf32>
    %c5 = arith.constant 5 : index
    %c0_38 = arith.constant 0 : index
    %c0_39 = arith.constant 0 : index
    %53 = vector.load %arg2[%c5, %c0_38, %c0_39] : memref<9x128x128xf32, #tpu.memory_space<vmem>>, vector<1x128x128xf32>
    %54 = vector.shape_cast %53 : vector<1x128x128xf32> to vector<128x128xf32>
    %cst_40 = arith.constant dense<0.000000e+00> : vector<384x128xf32>
    %55 = tpu.matmul %52, %54, %cst_40 {dimension_numbers = #tpu.dot_dimension_numbers<[1], [0], [0], [1], [0, 0, 1, 1], [], []>} : vector<384x128xf32>, vector<128x128xf32>, vector<384x128xf32> -> vector<384x128xf32>
    %56 = arith.addf %51, %55 : vector<384x128xf32>
    %c48 = arith.constant 48 : index
    %c0_41 = arith.constant 0 : index
    %57 = vector.load %arg7[%c48, %c0_41] : memref<440x128xf32, #tpu.memory_space<vmem>>, vector<384x128xf32>
    %c6 = arith.constant 6 : index
    %c0_42 = arith.constant 0 : index
    %c0_43 = arith.constant 0 : index
    %58 = vector.load %arg2[%c6, %c0_42, %c0_43] : memref<9x128x128xf32, #tpu.memory_space<vmem>>, vector<1x128x128xf32>
    %59 = vector.shape_cast %58 : vector<1x128x128xf32> to vector<128x128xf32>
    %cst_44 = arith.constant dense<0.000000e+00> : vector<384x128xf32>
    %60 = tpu.matmul %57, %59, %cst_44 {dimension_numbers = #tpu.dot_dimension_numbers<[1], [0], [0], [1], [0, 0, 1, 1], [], []>} : vector<384x128xf32>, vector<128x128xf32>, vector<384x128xf32> -> vector<384x128xf32>
    %61 = arith.addf %56, %60 : vector<384x128xf32>
    %c49 = arith.constant 49 : index
    %c0_45 = arith.constant 0 : index
    %62 = vector.load %arg7[%c49, %c0_45] : memref<440x128xf32, #tpu.memory_space<vmem>>, vector<384x128xf32>
    %c7 = arith.constant 7 : index
    %c0_46 = arith.constant 0 : index
    %c0_47 = arith.constant 0 : index
    %63 = vector.load %arg2[%c7, %c0_46, %c0_47] : memref<9x128x128xf32, #tpu.memory_space<vmem>>, vector<1x128x128xf32>
    %64 = vector.shape_cast %63 : vector<1x128x128xf32> to vector<128x128xf32>
    %cst_48 = arith.constant dense<0.000000e+00> : vector<384x128xf32>
    %65 = tpu.matmul %62, %64, %cst_48 {dimension_numbers = #tpu.dot_dimension_numbers<[1], [0], [0], [1], [0, 0, 1, 1], [], []>} : vector<384x128xf32>, vector<128x128xf32>, vector<384x128xf32> -> vector<384x128xf32>
    %66 = arith.addf %61, %65 : vector<384x128xf32>
    %c50 = arith.constant 50 : index
    %c0_49 = arith.constant 0 : index
    %67 = vector.load %arg7[%c50, %c0_49] : memref<440x128xf32, #tpu.memory_space<vmem>>, vector<384x128xf32>
    %c8 = arith.constant 8 : index
    %c0_50 = arith.constant 0 : index
    %c0_51 = arith.constant 0 : index
    %68 = vector.load %arg2[%c8, %c0_50, %c0_51] : memref<9x128x128xf32, #tpu.memory_space<vmem>>, vector<1x128x128xf32>
    %69 = vector.shape_cast %68 : vector<1x128x128xf32> to vector<128x128xf32>
    %cst_52 = arith.constant dense<0.000000e+00> : vector<384x128xf32>
    %70 = tpu.matmul %67, %69, %cst_52 {dimension_numbers = #tpu.dot_dimension_numbers<[1], [0], [0], [1], [0, 0, 1, 1], [], []>} : vector<384x128xf32>, vector<128x128xf32>, vector<384x128xf32> -> vector<384x128xf32>
    %71 = arith.addf %66, %70 : vector<384x128xf32>
    %72 = vector.shape_cast %27 : vector<128xf32> to vector<1x128xf32>
    %73 = vector.broadcast %72 : vector<1x128xf32> to vector<384x128xf32>
    %74 = arith.addf %71, %73 : vector<384x128xf32>
    %cst_53 = arith.constant 0.000000e+00 : f32
    %75 = vector.broadcast %cst_53 : f32 to vector<384x128xf32>
    %76 = arith.maximumf %74, %75 : vector<384x128xf32>
    %cst_54 = arith.constant 0.000000e+00 : f32
    %77 = vector.broadcast %cst_54 : f32 to vector<384x128xf32>
    %78 = arith.select %25, %76, %77 : vector<384x128xi1>, vector<384x128xf32>
    %c25_55 = arith.constant 25 : index
    %c0_56 = arith.constant 0 : index
    %79 = vector.load %arg7[%c25_55, %c0_56] : memref<440x128xf32, #tpu.memory_space<vmem>>, vector<384x128xf32>
    tpu.vector_store %arg7[%c25_55, %c0_56], %78 {strides = array<i32>} : memref<440x128xf32, #tpu.memory_space<vmem>>, vector<384x128xf32>,
    %c0_57 = arith.constant 0 : index
    %c0_58 = arith.constant 0 : index
    %80 = vector.load %arg5[%c0_57, %c0_58] : memref<1x128xf32, #tpu.memory_space<vmem>>, vector<1x128xf32>
    %81 = vector.shape_cast %80 : vector<1x128xf32> to vector<128xf32>
    %c0_59 = arith.constant 0 : index
    %c0_60 = arith.constant 0 : index
    %82 = vector.load %arg7[%c0_59, %c0_60] : memref<440x128xf32, #tpu.memory_space<vmem>>, vector<384x128xf32>
    %c0_61 = arith.constant 0 : index
    %c0_62 = arith.constant 0 : index
    %c0_63 = arith.constant 0 : index
    %83 = vector.load %arg4[%c0_61, %c0_62, %c0_63] : memref<9x128x128xf32, #tpu.memory_space<vmem>>, vector<1x128x128xf32>
    %84 = vector.shape_cast %83 : vector<1x128x128xf32> to vector<128x128xf32>
    %cst_64 = arith.constant dense<0.000000e+00> : vector<384x128xf32>
    %85 = tpu.matmul %82, %84, %cst_64 {dimension_numbers = #tpu.dot_dimension_numbers<[1], [0], [0], [1], [0, 0, 1, 1], [], []>} : vector<384x128xf32>, vector<128x128xf32>, vector<384x128xf32> -> vector<384x128xf32>
    %c1_65 = arith.constant 1 : index
    %c0_66 = arith.constant 0 : index
    %86 = vector.load %arg7[%c1_65, %c0_66] : memref<440x128xf32, #tpu.memory_space<vmem>>, vector<384x128xf32>
    %c1_67 = arith.constant 1 : index
    %c0_68 = arith.constant 0 : index
    %c0_69 = arith.constant 0 : index
    %87 = vector.load %arg4[%c1_67, %c0_68, %c0_69] : memref<9x128x128xf32, #tpu.memory_space<vmem>>, vector<1x128x128xf32>
    %88 = vector.shape_cast %87 : vector<1x128x128xf32> to vector<128x128xf32>
    %cst_70 = arith.constant dense<0.000000e+00> : vector<384x128xf32>
    %89 = tpu.matmul %86, %88, %cst_70 {dimension_numbers = #tpu.dot_dimension_numbers<[1], [0], [0], [1], [0, 0, 1, 1], [], []>} : vector<384x128xf32>, vector<128x128xf32>, vector<384x128xf32> -> vector<384x128xf32>
    %90 = arith.addf %85, %89 : vector<384x128xf32>
    %c2_71 = arith.constant 2 : index
    %c0_72 = arith.constant 0 : index
    %91 = vector.load %arg7[%c2_71, %c0_72] : memref<440x128xf32, #tpu.memory_space<vmem>>, vector<384x128xf32>
    %c2_73 = arith.constant 2 : index
    %c0_74 = arith.constant 0 : index
    %c0_75 = arith.constant 0 : index
    %92 = vector.load %arg4[%c2_73, %c0_74, %c0_75] : memref<9x128x128xf32, #tpu.memory_space<vmem>>, vector<1x128x128xf32>
    %93 = vector.shape_cast %92 : vector<1x128x128xf32> to vector<128x128xf32>
    %cst_76 = arith.constant dense<0.000000e+00> : vector<384x128xf32>
    %94 = tpu.matmul %91, %93, %cst_76 {dimension_numbers = #tpu.dot_dimension_numbers<[1], [0], [0], [1], [0, 0, 1, 1], [], []>} : vector<384x128xf32>, vector<128x128xf32>, vector<384x128xf32> -> vector<384x128xf32>
    %95 = arith.addf %90, %94 : vector<384x128xf32>
    %c24_77 = arith.constant 24 : index
    %c0_78 = arith.constant 0 : index
    %96 = vector.load %arg7[%c24_77, %c0_78] : memref<440x128xf32, #tpu.memory_space<vmem>>, vector<384x128xf32>
    %c3_79 = arith.constant 3 : index
    %c0_80 = arith.constant 0 : index
    %c0_81 = arith.constant 0 : index
    %97 = vector.load %arg4[%c3_79, %c0_80, %c0_81] : memref<9x128x128xf32, #tpu.memory_space<vmem>>, vector<1x128x128xf32>
    %98 = vector.shape_cast %97 : vector<1x128x128xf32> to vector<128x128xf32>
    %cst_82 = arith.constant dense<0.000000e+00> : vector<384x128xf32>
    %99 = tpu.matmul %96, %98, %cst_82 {dimension_numbers = #tpu.dot_dimension_numbers<[1], [0], [0], [1], [0, 0, 1, 1], [], []>} : vector<384x128xf32>, vector<128x128xf32>, vector<384x128xf32> -> vector<384x128xf32>
    %100 = arith.addf %95, %99 : vector<384x128xf32>
    %c25_83 = arith.constant 25 : index
    %c0_84 = arith.constant 0 : index
    %101 = vector.load %arg7[%c25_83, %c0_84] : memref<440x128xf32, #tpu.memory_space<vmem>>, vector<384x128xf32>
    %c4_85 = arith.constant 4 : index
    %c0_86 = arith.constant 0 : index
    %c0_87 = arith.constant 0 : index
    %102 = vector.load %arg4[%c4_85, %c0_86, %c0_87] : memref<9x128x128xf32, #tpu.memory_space<vmem>>, vector<1x128x128xf32>
    %103 = vector.shape_cast %102 : vector<1x128x128xf32> to vector<128x128xf32>
    %cst_88 = arith.constant dense<0.000000e+00> : vector<384x128xf32>
    %104 = tpu.matmul %101, %103, %cst_88 {dimension_numbers = #tpu.dot_dimension_numbers<[1], [0], [0], [1], [0, 0, 1, 1], [], []>} : vector<384x128xf32>, vector<128x128xf32>, vector<384x128xf32> -> vector<384x128xf32>
    %105 = arith.addf %100, %104 : vector<384x128xf32>
    %c26_89 = arith.constant 26 : index
    %c0_90 = arith.constant 0 : index
    %106 = vector.load %arg7[%c26_89, %c0_90] : memref<440x128xf32, #tpu.memory_space<vmem>>, vector<384x128xf32>
    %c5_91 = arith.constant 5 : index
    %c0_92 = arith.constant 0 : index
    %c0_93 = arith.constant 0 : index
    %107 = vector.load %arg4[%c5_91, %c0_92, %c0_93] : memref<9x128x128xf32, #tpu.memory_space<vmem>>, vector<1x128x128xf32>
    %108 = vector.shape_cast %107 : vector<1x128x128xf32> to vector<128x128xf32>
    %cst_94 = arith.constant dense<0.000000e+00> : vector<384x128xf32>
    %109 = tpu.matmul %106, %108, %cst_94 {dimension_numbers = #tpu.dot_dimension_numbers<[1], [0], [0], [1], [0, 0, 1, 1], [], []>} : vector<384x128xf32>, vector<128x128xf32>, vector<384x128xf32> -> vector<384x128xf32>
    %110 = arith.addf %105, %109 : vector<384x128xf32>
    %c48_95 = arith.constant 48 : index
    %c0_96 = arith.constant 0 : index
    %111 = vector.load %arg7[%c48_95, %c0_96] : memref<440x128xf32, #tpu.memory_space<vmem>>, vector<384x128xf32>
    %c6_97 = arith.constant 6 : index
    %c0_98 = arith.constant 0 : index
    %c0_99 = arith.constant 0 : index
    %112 = vector.load %arg4[%c6_97, %c0_98, %c0_99] : memref<9x128x128xf32, #tpu.memory_space<vmem>>, vector<1x128x128xf32>
    %113 = vector.shape_cast %112 : vector<1x128x128xf32> to vector<128x128xf32>
    %cst_100 = arith.constant dense<0.000000e+00> : vector<384x128xf32>
    %114 = tpu.matmul %111, %113, %cst_100 {dimension_numbers = #tpu.dot_dimension_numbers<[1], [0], [0], [1], [0, 0, 1, 1], [], []>} : vector<384x128xf32>, vector<128x128xf32>, vector<384x128xf32> -> vector<384x128xf32>
    %115 = arith.addf %110, %114 : vector<384x128xf32>
    %c49_101 = arith.constant 49 : index
    %c0_102 = arith.constant 0 : index
    %116 = vector.load %arg7[%c49_101, %c0_102] : memref<440x128xf32, #tpu.memory_space<vmem>>, vector<384x128xf32>
    %c7_103 = arith.constant 7 : index
    %c0_104 = arith.constant 0 : index
    %c0_105 = arith.constant 0 : index
    %117 = vector.load %arg4[%c7_103, %c0_104, %c0_105] : memref<9x128x128xf32, #tpu.memory_space<vmem>>, vector<1x128x128xf32>
    %118 = vector.shape_cast %117 : vector<1x128x128xf32> to vector<128x128xf32>
    %cst_106 = arith.constant dense<0.000000e+00> : vector<384x128xf32>
    %119 = tpu.matmul %116, %118, %cst_106 {dimension_numbers = #tpu.dot_dimension_numbers<[1], [0], [0], [1], [0, 0, 1, 1], [], []>} : vector<384x128xf32>, vector<128x128xf32>, vector<384x128xf32> -> vector<384x128xf32>
    %120 = arith.addf %115, %119 : vector<384x128xf32>
    %c50_107 = arith.constant 50 : index
    %c0_108 = arith.constant 0 : index
    %121 = vector.load %arg7[%c50_107, %c0_108] : memref<440x128xf32, #tpu.memory_space<vmem>>, vector<384x128xf32>
    %c8_109 = arith.constant 8 : index
    %c0_110 = arith.constant 0 : index
    %c0_111 = arith.constant 0 : index
    %122 = vector.load %arg4[%c8_109, %c0_110, %c0_111] : memref<9x128x128xf32, #tpu.memory_space<vmem>>, vector<1x128x128xf32>
    %123 = vector.shape_cast %122 : vector<1x128x128xf32> to vector<128x128xf32>
    %cst_112 = arith.constant dense<0.000000e+00> : vector<384x128xf32>
    %124 = tpu.matmul %121, %123, %cst_112 {dimension_numbers = #tpu.dot_dimension_numbers<[1], [0], [0], [1], [0, 0, 1, 1], [], []>} : vector<384x128xf32>, vector<128x128xf32>, vector<384x128xf32> -> vector<384x128xf32>
    %125 = arith.addf %120, %124 : vector<384x128xf32>
    %126 = vector.shape_cast %81 : vector<128xf32> to vector<1x128xf32>
    %127 = vector.broadcast %126 : vector<1x128xf32> to vector<384x128xf32>
    %128 = arith.addf %125, %127 : vector<384x128xf32>
    %c0_113 = arith.constant 0 : index
    %c0_114 = arith.constant 0 : index
    %c0_115 = arith.constant 0 : index
    %129 = vector.load %arg1[%c0_113, %c0_114, %c0_115] : memref<1x384x128xf32, #tpu.memory_space<vmem>>, vector<1x384x128xf32>
    %130 = vector.shape_cast %129 : vector<1x384x128xf32> to vector<384x128xf32>
    %131 = arith.addf %128, %130 : vector<384x128xf32>
    %cst_116 = arith.constant 0.000000e+00 : f32
    %132 = vector.broadcast %cst_116 : f32 to vector<384x128xf32>
    %133 = arith.maximumf %131, %132 : vector<384x128xf32>
    %c0_117 = arith.constant 0 : index
    %c0_118 = arith.constant 0 : index
    %c0_119 = arith.constant 0 : index
    %134 = vector.load %arg6[%c0_117, %c0_118, %c0_119] : memref<1x384x128xf32, #tpu.memory_space<vmem>>, vector<1x384x128xf32>
    %135 = vector.shape_cast %134 : vector<1x384x128xf32> to vector<384x128xf32>
    %136 = vector.shape_cast %133 : vector<384x128xf32> to vector<1x384x128xf32>
    tpu.vector_store %arg6[%c0_117, %c0_118, %c0_119], %136 {strides = array<i32>} : memref<1x384x128xf32, #tpu.memory_space<vmem>>, vector<1x384x128xf32>,
    return
  }
  func.func @transform_0(%arg0: i32) -> (i32, i32, i32) {
    %c0_i32 = arith.constant 0 : i32
    %c0_i32_0 = arith.constant 0 : i32
    %c0_i32_1 = arith.constant 0 : i32
    return %arg0, %c0_i32, %c0_i32_0 : i32, i32, i32
  }
  func.func @transform_1(%arg0: i32) -> (i32, i32, i32) {
    %c0_i32 = arith.constant 0 : i32
    %c0_i32_0 = arith.constant 0 : i32
    %c0_i32_1 = arith.constant 0 : i32
    %c0_i32_2 = arith.constant 0 : i32
    return %c0_i32, %c0_i32_0, %c0_i32_1 : i32, i32, i32
  }
  func.func @transform_2(%arg0: i32) -> (i32, i32) {
    %c0_i32 = arith.constant 0 : i32
    %c0_i32_0 = arith.constant 0 : i32
    %c0_i32_1 = arith.constant 0 : i32
    return %c0_i32, %c0_i32_0 : i32, i32
  }
  func.func @transform_3(%arg0: i32) -> (i32, i32, i32) {
    %c0_i32 = arith.constant 0 : i32
    %c0_i32_0 = arith.constant 0 : i32
    %c0_i32_1 = arith.constant 0 : i32
    %c0_i32_2 = arith.constant 0 : i32
    return %c0_i32, %c0_i32_0, %c0_i32_1 : i32, i32, i32
  }
  func.func @transform_4(%arg0: i32) -> (i32, i32) {
    %c0_i32 = arith.constant 0 : i32
    %c0_i32_0 = arith.constant 0 : i32
    %c0_i32_1 = arith.constant 0 : i32
    return %c0_i32, %c0_i32_0 : i32, i32
  }
  func.func @transform_5(%arg0: i32) -> (i32, i32, i32) {
    %c0_i32 = arith.constant 0 : i32
    %c0_i32_0 = arith.constant 0 : i32
    %c0_i32_1 = arith.constant 0 : i32
    return %arg0, %c0_i32, %c0_i32_0 : i32, i32, i32
  }
}

</mosaic_0001>

<bundles_post_ra>
// kernel: resblock_forward.1
= control target key start
LH: loop header
LB: loop body
LE: loop exit
PB: predicated region body
PF: predicated region fallthrough
CT: control target
= control target key end

     0   :  { %s7695_s18 = smov 0   ;;  %s12350_s0 = inlined_call_operand.vmem [shape: f32[2,384,128], index: 0, kind: input, shape index: {}]   ;;  %s12351_s1 = inlined_call_operand.vmem [shape: f32[9,128,128], index: 1, kind: input, shape index: {}]   ;;  %s12352_s2 = inlined_call_operand.vmem [shape: f32[1,128], index: 2, kind: input, shape index: {}]   ;;  %s12353_s3 = inlined_call_operand.vmem [shape: f32[9,128,128], index: 3, kind: input, shape index: {}]   ;;  %s12354_s4 = inlined_call_operand.vmem [shape: f32[1,128], index: 4, kind: input, shape index: {}]   ;;  %s12355_s5 = inlined_call_operand.vmem [shape: f32[2,384,128], index: 5, kind: output, shape index: {}]  }
   0x1 LB: > { %s7293_s19 = sadd.s32 4294967295, %s7661_s18   ;;  %p7297_p0 = scmp.ge.s32.totalorder %s7661_s18, 1  ;;  %s7661_s18 = sphi %s7695_s18, %s15_s18  }
   0x2   : > { %p187_p1 = scmp.lt.s32.totalorder %s7661_s18, 3 }
   0x4   : > { %p188_p2 = pnand %p7297_p0, %p187_p1 }
   0x6   : > { %191 = sbr.rel (%p188_p2) target bundleno = 2018 (0x7e2), region = 40 }
   0xb   : > { %v7315_v0 = vld [vmem:[%s12351_s1 + $0xf8] sm:$0xff]  ;;  %v7314_v2 = vld [vmem:[%s12351_s1 + $0xf0] sm:$0xff]  ;;  %p215_p3 = scmp.lt.s32.totalorder %s7293_s19, 1  ;;  %v7663_v4 = vmov 0.0   ;;  %v7313_v5 = vld [vmem:[%s12351_s1 + $0xe8] sm:$0xff] }
   0xc   : > { %v2124_v1 = vld [vmem:[%s12351_s1 + $0x78] sm:$0xff]  ;;  %2190 = vmatpush.msra.mxu0 %v7315_v0  ;;  %7558 = vmatpush.msra.mxu2 %v7315_v0  ;;  %v2123_v3 = vld [vmem:[%s12351_s1 + $0x70] sm:$0xff]  ;;  %225 = vst [vmem:[#allocation2] sm:$0xff] %v7663_v4  ;;  %v2122_v6 = vld [vmem:[%s12351_s1 + $0x68] sm:$0xff] }
   0xd   : > { %7574 = vmatpush.msra.mxu3 %v2124_v1  ;;  %2351 = vmatpush.msra.mxu1 %v2124_v1  ;;  %226 = vst [vmem:[#allocation2 + $0x8] sm:$0xff] %v7663_v4  ;;  %s12831_s19 = smov (!%p215_p3, %s7293_s19), 1  ;;  %v7312_v7 = vld [vmem:[%s12351_s1 + $0xe0] sm:$0xff]  ;;  %v7311_v9 = vld [vmem:[%s12351_s1 + $0xd8] sm:$0xff]  ;;  %v7310_v11 = vld [vmem:[%s12351_s1 + $0xd0] sm:$0xff] }
   0xe   : > { %2191 = vmatpush.msra.mxu0 %v7314_v2  ;;  %7559 = vmatpush.msra.mxu2 %v7314_v2  ;;  %227 = vst [vmem:[#allocation2 + $0x10] sm:$0xff] %v7663_v4  ;;  %s7590_s9 = smul.u32 384, %s12831_s19  ;;  %v2121_v8 = vld [vmem:[%s12351_s1 + $0x60] sm:$0xff]  ;;  %v2120_v10 = vld [vmem:[%s12351_s1 + $0x58] sm:$0xff]  ;;  %v2119_v12 = vld [vmem:[%s12351_s1 + $0x50] sm:$0xff] }
   0xf   : > { %7575 = vmatpush.msra.mxu3 %v2123_v3  ;;  %2352 = vmatpush.msra.mxu1 %v2123_v3  ;;  %228 = vst [vmem:[#allocation2 + $0x18] sm:$0xff] %v7663_v4  ;;  %v7309_v13 = vld [vmem:[%s12351_s1 + $0xc8] sm:$0xff]  ;;  %v7308_v17 = vld [vmem:[%s12351_s1 + $0xc0] sm:$0xff]  ;;  %v7307_v20 = vld [vmem:[%s12351_s1 + $0xb8] sm:$0xff] }
  0x10   : > { %2192 = vmatpush.msra.mxu0 %v7313_v5  ;;  %7560 = vmatpush.msra.mxu2 %v7313_v5  ;;  %229 = vst [vmem:[#allocation2 + $0x20] sm:$0xff] %v7663_v4  ;;  %s7752_s22 = scalar_lea.vmem %s12350_s0, %s7590_s9  ;;  %v2118_v14 = vld [vmem:[%s12351_s1 + $0x48] sm:$0xff]  ;;  %v2117_v19 = vld [vmem:[%s12351_s1 + $0x40] sm:$0xff]  ;;  %v2116_v22 = vld [vmem:[%s12351_s1 + $0x38] sm:$0xff]  ;;  %s11813_s24 = scalar_lea.vmem %s12355_s5, %s7590_s9 }
  0x11   : > { %7576 = vmatpush.msra.mxu3 %v2122_v6  ;;  %2353 = vmatpush.msra.mxu1 %v2122_v6  ;;  %230 = vst [vmem:[#allocation2 + $0x28] sm:$0xff] %v7663_v4  ;;  %v7766_v15 = vld [vmem:[%s7752_s22 + $0xa8] sm:$0xff]  ;;  %v7769_v16 = vld [vmem:[%s7752_s22 + $0xa0] sm:$0xff]  ;;  %v7776_v18 = vld [vmem:[%s7752_s22 + $0xb0] sm:$0xff] }
  0x12   : > { %2193 = vmatpush.msra.mxu0 %v7312_v7  ;;  %7561 = vmatpush.msra.mxu2 %v7312_v7  ;;  %231 = vst [vmem:[#allocation2 + $0x198] sm:$0xff] %v7663_v4  ;;  %v7787_v21 = vld [vmem:[%s7752_s22 + $0xb8] sm:$0xff]  ;;  %v7306_v23 = vld [vmem:[%s12351_s1 + $0xb0] sm:$0xff]  ;;  %v7797_v24 = vld [vmem:[%s7752_s22 + $0xc0] sm:$0xff] }
  0x13   : > { %7577 = vmatpush.msra.mxu3 %v2121_v8  ;;  %2354 = vmatpush.msra.mxu1 %v2121_v8  ;;  %232 = vst [vmem:[#allocation2 + $0x1a0] sm:$0xff] %v7663_v4  ;;  %v2115_v25 = vld [vmem:[%s12351_s1 + $0x30] sm:$0xff]  ;;  %v7803_v26 = vld [vmem:[%s7752_s22] sm:$0xff]  ;;  %v7305_v27 = vld [vmem:[%s12351_s1 + $0xa8] sm:$0xff] }
  0x14   : > { %2194 = vmatpush.msra.mxu0 %v7311_v9  ;;  %7562 = vmatpush.msra.mxu2 %v7311_v9  ;;  %233 = vst [vmem:[#allocation2 + $0x1a8] sm:$0xff] %v7663_v4  ;;  %v2114_v28 = vld [vmem:[%s12351_s1 + $0x28] sm:$0xff]  ;;  %v7304_v29 = vld [vmem:[%s12351_s1 + $0xa0] sm:$0xff]  ;;  %v7303_v31 = vld [vmem:[%s12351_s1 + $0x98] sm:$0xff] }
  0x15   : > { %7578 = vmatpush.msra.mxu3 %v2120_v10  ;;  %2355 = vmatpush.msra.mxu1 %v2120_v10  ;;  %234 = vst [vmem:[#allocation2 + $0x1b0] sm:$0xff] %v7663_v4  ;;  %v2113_v30 = vld [vmem:[%s12351_s1 + $0x20] sm:$0xff]  ;;  %v2112_v32 = vld [vmem:[%s12351_s1 + $0x18] sm:$0xff]  ;;  %v7302_v33 = vld [vmem:[%s12351_s1 + $0x90] sm:$0xff] }
  0x16   : > { %2195 = vmatpush.msra.mxu0 %v7310_v11  ;;  %7563 = vmatpush.msra.mxu2 %v7310_v11  ;;  %304 = vst [vmem:[#allocation2 + $0xc1] sm:$0xff] %v7766_v15  ;;  %v7829_v34 = vld [vmem:[%s7752_s22 + $0xc8] sm:$0xff]  ;;  %v2111_v35 = vld [vmem:[%s12351_s1 + $0x10] sm:$0xff]  ;;  %v7300_v39 = vld [vmem:[%s12351_s1 + $0x80] sm:$0xff] }
  0x17   : > { %7579 = vmatpush.msra.mxu3 %v2119_v12  ;;  %2356 = vmatpush.msra.mxu1 %v2119_v12  ;;  %303 = vst [vmem:[#allocation2 + $0xb9] sm:$0xff] %v7769_v16  ;;  %v7835_v36 = vld [vmem:[%s7752_s22 + $0x8] sm:$0xff]  ;;  %v2109_v40 = vld [vmem:[%s12351_s1] sm:$0xff]  ;;  %v7331_v43 = vld [vmem:[%s12351_s1 + $0x178] sm:$0xff] }
  0x18   : > { %2196 = vmatpush.msra.mxu0 %v7309_v13  ;;  %7564 = vmatpush.msra.mxu2 %v7309_v13  ;;  %305 = vst [vmem:[#allocation2 + $0xc9] sm:$0xff] %v7776_v18  ;;  %v7301_v37 = vld [vmem:[%s12351_s1 + $0x88] sm:$0xff]  ;;  %v7347_v44 = vld [vmem:[%s12351_s1 + $0x1f8] sm:$0xff]  ;;  %v7861_v46 = vld [vmem:[%s7752_s22 + $0xd0] sm:$0xff] }
  0x19   : > { %7580 = vmatpush.msra.mxu3 %v2118_v14  ;;  %2357 = vmatpush.msra.mxu1 %v2118_v14  ;;  %306 = vst [vmem:[#allocation2 + $0xd1] sm:$0xff] %v7787_v21  ;;  %v2110_v38 = vld [vmem:[%s12351_s1 + $0x8] sm:$0xff]  ;;  %v7363_v45 = vld [vmem:[%s12351_s1 + $0x278] sm:$0xff]  ;;  %v7330_v47 = vld [vmem:[%s12351_s1 + $0x170] sm:$0xff] }
  0x1a   : > { %2197 = vmatpush.msra.mxu0 %v7308_v17  ;;  %7565 = vmatpush.msra.mxu2 %v7308_v17  ;;  %307 = vst [vmem:[#allocation2 + $0xd9] sm:$0xff] %v7797_v24  ;;  %v2125_v41 = vld [vmem:[#allocation2 + $0x1] sm:$0xff]  ;;  %v7346_v48 = vld [vmem:[%s12351_s1 + $0x1f0] sm:$0xff]  ;;  %v7895_v58 = vld [vmem:[%s7752_s22 + $0xd8] sm:$0xff] }
  0x1b   : > { %7581 = vmatpush.msra.mxu3 %v2117_v19  ;;  %2358 = vmatpush.msra.mxu1 %v2117_v19  ;;  %283 = vst [vmem:[#allocation2 + $0x19] sm:$0xff] %v7803_v26  ;;  %v7362_v49 = vld [vmem:[%s12351_s1 + $0x270] sm:$0xff]  ;;  %v7329_v51 = vld [vmem:[%s12351_s1 + $0x168] sm:$0xff]  ;;  %v7328_v55 = vld [vmem:[%s12351_s1 + $0x160] sm:$0xff] }
  0x1c   : > { %2198 = vmatpush.msra.mxu0 %v7307_v20  ;;  %7566 = vmatpush.msra.mxu2 %v7307_v20  ;;  %308 = vst [vmem:[#allocation2 + $0xe1] sm:$0xff] %v7829_v34  ;;  %v7875_v50 = vld [vmem:[%s7752_s22 + $0x10] sm:$0xff]  ;;  %v7345_v52 = vld [vmem:[%s12351_s1 + $0x1e8] sm:$0xff]  ;;  %v7344_v57 = vld [vmem:[%s12351_s1 + $0x1e0] sm:$0xff] }
  0x1d   : > { %7582 = vmatpush.msra.mxu3 %v2116_v22  ;;  %2359 = vmatpush.msra.mxu1 %v2116_v22  ;;  %284 = vst [vmem:[#allocation2 + $0x21] sm:$0xff] %v7835_v36  ;;  %v7361_v53 = vld [vmem:[%s12351_s1 + $0x268] sm:$0xff]  ;;  %v7360_v59 = vld [vmem:[%s12351_s1 + $0x260] sm:$0xff]  ;;  %v7902_v60 = vld [vmem:[%s7752_s22 + $0x18] sm:$0xff] }
  0x1e   : > { %2199 = vmatpush.msra.mxu0 %v7306_v23  ;;  %7567 = vmatpush.msra.mxu2 %v7306_v23  ;;  %v2085_v42 = vld [vmem:[#allocation2 + $0xc0] sm:$0xff]  ;;  %309 = vst [vmem:[#allocation2 + $0xe9] sm:$0xff] %v7861_v46  ;;  %v2126_v54 = vld [vmem:[#allocation2 + $0x9] sm:$0xff]  ;;  %v2127_v61 = vld [vmem:[#allocation2 + $0x11] sm:$0xff] }
  0x1f   : > { %7583 = vmatpush.msra.mxu3 %v2115_v25  ;;  %2360 = vmatpush.msra.mxu1 %v2115_v25  ;;  %285 = vst [vmem:[#allocation2 + $0x29] sm:$0xff] %v7875_v50  ;;  %v2086_v56 = vld [vmem:[#allocation2 + $0xc8] sm:$0xff]  ;;  %v7908_v63 = vld [vmem:[%s7752_s22 + $0xe0] sm:$0xff]  ;;  %v7327_v0 = vld [vmem:[%s12351_s1 + $0x158] sm:$0xff] }
  0x20   : > { %2200 = vmatpush.msra.mxu0 %v7305_v27  ;;  %7568 = vmatpush.msra.mxu2 %v7305_v27  ;;  %310 = vst [vmem:[#allocation2 + $0xf1] sm:$0xff] %v7895_v58  ;;  %v2087_v62 = vld [vmem:[#allocation2 + $0xd0] sm:$0xff]  ;;  %v7343_v1 = vld [vmem:[%s12351_s1 + $0x1d8] sm:$0xff]  ;;  %v7919_v2 = vld [vmem:[%s7752_s22 + $0x20] sm:$0xff] }
  0x21   : > { %7584 = vmatpush.msra.mxu3 %v2114_v28  ;;  %2361 = vmatpush.msra.mxu1 %v2114_v28  ;;  %286 = vst [vmem:[#allocation2 + $0x31] sm:$0xff] %v7902_v60  ;;  %v2088_v3 = vld [vmem:[#allocation2 + $0xd8] sm:$0xff]  ;;  %v7925_v5 = vld [vmem:[%s7752_s22 + $0xe8] sm:$0xff]  ;;  %v7326_v8 = vld [vmem:[%s12351_s1 + $0x150] sm:$0xff] }
  0x22   : > { %2201 = vmatpush.msra.mxu0 %v7304_v29  ;;  %7569 = vmatpush.msra.mxu2 %v7304_v29  ;;  %311 = vst [vmem:[#allocation2 + $0xf9] sm:$0xff] %v7908_v63  ;;  %v7928_v6 = vld [vmem:[#allocation2 + $0x18] sm:$0xff]  ;;  %v7941_v9 = vld [vmem:[%s7752_s22 + $0x28] sm:$0xff]  ;;  %v7947_v11 = vld [vmem:[%s7752_s22 + $0xf0] sm:$0xff] }
  0x23   : > { %7585 = vmatpush.msra.mxu3 %v2113_v30  ;;  %2362 = vmatpush.msra.mxu1 %v2113_v30  ;;  %287 = vst [vmem:[#allocation2 + $0x39] sm:$0xff] %v7919_v2  ;;  %v7359_v7 = vld [vmem:[%s12351_s1 + $0x258] sm:$0xff]  ;;  %v2089_v10 = vld [vmem:[#allocation2 + $0xe0] sm:$0xff]  ;;  %v7358_v13 = vld [vmem:[%s12351_s1 + $0x250] sm:$0xff] }
  0x24   : > { %2202 = vmatpush.msra.mxu0 %v7303_v31  ;;  %7570 = vmatpush.msra.mxu2 %v7303_v31  ;;  %312 = vst [vmem:[#allocation2 + $0x101] sm:$0xff] %v7925_v5  ;;  %v7950_v12 = vld [vmem:[#allocation2 + $0x20] sm:$0xff]  ;;  %v7956_v14 = vld [vmem:[%s7752_s22 + $0x30] sm:$0xff]  ;;  %v7963_v17 = vld [vmem:[%s7752_s22 + $0xf8] sm:$0xff] }
  0x25   : > { %7586 = vmatpush.msra.mxu3 %v2112_v32  ;;  %2363 = vmatpush.msra.mxu1 %v2112_v32  ;;  %288 = vst [vmem:[#allocation2 + $0x41] sm:$0xff] %v7941_v9  ;;  %v7325_v19 = vld [vmem:[%s12351_s1 + $0x148] sm:$0xff]  ;;  %v7982_v23 = vld [vmem:[%s7752_s22 + $0x100] sm:$0xff] }
  0x26   : > { %2203 = vmatpush.msra.mxu0 %v7302_v33  ;;  %7571 = vmatpush.msra.mxu2 %v7302_v33  ;;  %313 = vst [vmem:[#allocation2 + $0x109] sm:$0xff] %v7947_v11  ;;  %v7341_v20 = vld [vmem:[%s12351_s1 + $0x1c8] sm:$0xff]  ;;  %v7324_v27 = vld [vmem:[%s12351_s1 + $0x140] sm:$0xff] }
  0x27   : > { %7587 = vmatpush.msra.mxu3 %v2111_v35  ;;  %2364 = vmatpush.msra.mxu1 %v2111_v35  ;;  %289 = vst [vmem:[#allocation2 + $0x49] sm:$0xff] %v7956_v14  ;;  %v2091_v22 = vld [vmem:[#allocation2 + $0xf0] sm:$0xff]  ;;  %v7357_v25 = vld [vmem:[%s12351_s1 + $0x248] sm:$0xff]  ;;  %v7340_v28 = vld [vmem:[%s12351_s1 + $0x1c0] sm:$0xff] }
  0x28   : > { %2204 = vmatpush.msra.mxu0 %v7301_v37  ;;  %7572 = vmatpush.msra.mxu2 %v7301_v37  ;;  %314 = vst [vmem:[#allocation2 + $0x111] sm:$0xff] %v7963_v17  ;;  %v7998_v29 = vld [vmem:[%s7752_s22 + $0x40] sm:$0xff]  ;;  %v8004_v31 = vld [vmem:[%s7752_s22 + $0x108] sm:$0xff]  ;;  %v8020_v37 = vld [vmem:[%s7752_s22 + $0x110] sm:$0xff] }
  0x29   : > { %7588 = vmatpush.msra.mxu3 %v2110_v38  ;;  %2365 = vmatpush.msra.mxu1 %v2110_v38  ;;  %315 = vst [vmem:[#allocation2 + $0x119] sm:$0xff] %v7982_v23  ;;  %v2092_v30 = vld [vmem:[#allocation2 + $0xf8] sm:$0xff]  ;;  %v7356_v33 = vld [vmem:[%s12351_s1 + $0x240] sm:$0xff] }
  0x2a   : > { %2205 = vmatpush.msra.mxu0 %v7300_v39  ;;  %7573 = vmatpush.msra.mxu2 %v7300_v39  ;;  %291 = vst [vmem:[#allocation2 + $0x59] sm:$0xff] %v7998_v29  ;;  %v8007_v32 = vld [vmem:[#allocation2 + $0x38] sm:$0xff] }
  0x2b   : > { %7589 = vmatpush.msra.mxu3 %v2109_v40  ;;  %2206 = vmatmul.f32.vlgmr.msra.gmra.mxu0 %v2125_v41  ;;  %316 = vst [vmem:[#allocation2 + $0x121] sm:$0xff] %v8004_v31  ;;  %v2093_v35 = vld [vmem:[#allocation2 + $0x100] sm:$0xff]  ;;  %v7323_v39 = vld [vmem:[%s12351_s1 + $0x138] sm:$0xff]  ;;  %v8033_v41 = vld [vmem:[%s7752_s22 + $0x50] sm:$0xff] }
  0x2c   : > { %2278 = vmatmul.f32.vlgmr.msra.gmra.mxu2 %v7766_v15  ;;  %2439 = vmatmul.f32.vlgmr.msra.gmra.mxu3 %v2085_v42  ;;  %v2090_v15 = vld [vmem:[#allocation2 + $0xe8] sm:$0xff]  ;;  %v8023_v38 = vld [vmem:[#allocation2 + $0x40] sm:$0xff]  ;;  %317 = vst [vmem:[#allocation2 + $0x129] sm:$0xff] %v8020_v37 }
  0x2d   : > { %2577 = vmatpush.msrb.mxu2 %v7331_v43  ;;  %2851 = vmatpush.msrb.mxu3 %v7347_v44  ;;  %293 = vst [vmem:[#allocation2 + $0x69] sm:$0xff] %v8033_v41  ;;  %v2094_v42 = vld [vmem:[#allocation2 + $0x108] sm:$0xff]  ;;  %v8039_v43 = vld [vmem:[%s7752_s22 + $0x118] sm:$0xff] }
  0x2e   : > { %2366 = vmatpush.msra.mxu1 %v2109_v40  ;;  %3125 = vmatpush.msrb.mxu0 %v7363_v45  ;;  %v7339_v40 = vld [vmem:[%s12351_s1 + $0x1b8] sm:$0xff]  ;;  %v8042_v44 = vld [vmem:[#allocation2 + $0x48] sm:$0xff]  ;;  %318 = vst [vmem:[#allocation2 + $0x131] sm:$0xff] %v8039_v43 }
  0x2f   : > { %2367 = vmatmul.f32.vlgmr.msra.gmra.mxu1 %v7663_v4  ;;  %2578 = vmatpush.msrb.mxu2 %v7330_v47  ;;  %v7355_v45 = vld [vmem:[%s12351_s1 + $0x238] sm:$0xff]  ;;  %v7338_v47 = vld [vmem:[%s12351_s1 + $0x1b0] sm:$0xff] }
  0x30   : > { %2852 = vmatpush.msrb.mxu3 %v7346_v48  ;;  %3126 = vmatpush.msrb.mxu0 %v7362_v49  ;;  %v8055_v48 = vld [vmem:[%s7752_s22 + $0x58] sm:$0xff]  ;;  %v2095_v49 = vld [vmem:[#allocation2 + $0x110] sm:$0xff] }
  0x31   : > { %2579 = vmatpush.msrb.mxu2 %v7329_v51  ;;  %294 = vst [vmem:[#allocation2 + $0x71] sm:$0xff] %v8055_v48  ;;  %v8061_v51 = vld [vmem:[%s7752_s22 + $0x120] sm:$0xff] }
  0x32   : > { %2853 = vmatpush.msrb.mxu3 %v7345_v52  ;;  %3127 = vmatpush.msrb.mxu0 %v7361_v53  ;;  %v7354_v53 = vld [vmem:[%s12351_s1 + $0x230] sm:$0xff]  ;;  %319 = vst [vmem:[#allocation2 + $0x139] sm:$0xff] %v8061_v51 }
  0x33   : > { %2209 = vmatmul.f32.gmra.mxu0 %v2126_v54  ;;  %2580 = vmatpush.msrb.mxu2 %v7328_v55  ;;  %v8070_v54 = vld [vmem:[%s7752_s22 + $0x60] sm:$0xff]  ;;  %v2096_v55 = vld [vmem:[#allocation2 + $0x118] sm:$0xff] }
  0x34   : > { %2281 = vmatmul.f32.gmra.mxu2 %v7776_v18  ;;  %2442 = vmatmul.f32.gmra.mxu3 %v2086_v56  ;;  %v7966_v18 = vld [vmem:[#allocation2 + $0x28] sm:$0xff]  ;;  %295 = vst [vmem:[#allocation2 + $0x79] sm:$0xff] %v8070_v54 }
  0x35   : > { %2854 = vmatpush.msrb.mxu3 %v7344_v57  ;;  %3128 = vmatpush.msrb.mxu0 %v7360_v59  ;;  %v8077_v56 = vld [vmem:[%s7752_s22 + $0x128] sm:$0xff] }
  0x36   : > { %2581 = vmatpush.msrb.mxu2 %v7327_v0  ;;  %v7337_v59 = vld [vmem:[%s12351_s1 + $0x1a8] sm:$0xff]  ;;  %320 = vst [vmem:[#allocation2 + $0x141] sm:$0xff] %v8077_v56  ;;  %v8099_v0 = vld [vmem:[%s7752_s22 + $0x130] sm:$0xff] }
  0x37   : > { %2370 = vmatmul.f32.gmra.mxu1 %v7663_v4  ;;  %2855 = vmatpush.msrb.mxu3 %v7343_v1  ;;  %321 = vst [vmem:[#allocation2 + $0x149] sm:$0xff] %v8099_v0 }
  0x38   : > { %3129 = vmatpush.msrb.mxu0 %v7359_v7  ;;  %2582 = vmatpush.msrb.mxu2 %v7326_v8  ;;  %v7336_v7 = vld [vmem:[%s12351_s1 + $0x1a0] sm:$0xff]  ;;  %v8116_v8 = vld [vmem:[%s7752_s22 + $0x70] sm:$0xff] }
  0x39   : > { %297 = vst [vmem:[#allocation2 + $0x89] sm:$0xff] %v8116_v8 }
  0x3a   : > { %3130 = vmatpush.msrb.mxu0 %v7358_v13  ;;  %2583 = vmatpush.msrb.mxu2 %v7325_v19  ;;  %v7378_v13 = vld [vmem:[%s12351_s1 + $0x2f0] sm:$0xff] }
  0x3b   : > { %2212 = vmatmul.f32.gmra.mxu0 %v2127_v61  ;;  %v7379_v61 = vld [vmem:[%s12351_s1 + $0x2f8] sm:$0xff]  ;;  %v2099_v19 = vld [vmem:[#allocation2 + $0x130] sm:$0xff] }
  0x3c   : > { %2284 = vmatmul.f32.gmra.mxu2 %v7787_v21  ;;  %2445 = vmatmul.f32.gmra.mxu3 %v2087_v62  ;;  %v7976_v21 = vld [vmem:[%s7752_s22 + $0x38] sm:$0xff]  ;;  %v8094_v62 = vld [vmem:[%s7752_s22 + $0x68] sm:$0xff] }
  0x3d   : > { %290 = vst [vmem:[#allocation2 + $0x51] sm:$0xff] %v7976_v21  ;;  %3131 = vmatpush.msrb.mxu0 %v7357_v25  ;;  %2584 = vmatpush.msrb.mxu2 %v7324_v27  ;;  %v7335_v25 = vld [vmem:[%s12351_s1 + $0x198] sm:$0xff]  ;;  %v7377_v27 = vld [vmem:[%s12351_s1 + $0x2e8] sm:$0xff] }
  0x3e   : > { %3399 = vmatpush.msrb.mxu1 %v7379_v61  ;;  %296 = vst [vmem:[#allocation2 + $0x81] sm:$0xff] %v8094_v62  ;;  %v2102_v61 = vld [vmem:[#allocation2 + $0x148] sm:$0xff] }
  0x3f   : > { %2373 = vmatmul.f32.gmra.mxu1 %v7663_v4  ;;  %v7342_v4 = vld [vmem:[%s12351_s1 + $0x1d0] sm:$0xff]  ;;  %3132 = vmatpush.msrb.mxu0 %v7356_v33  ;;  %v8165_v33 = vld [vmem:[#allocation2 + $0x78] sm:$0xff] }
  0x40   : > { %2856 = vmatpush.msrb.mxu3 %v7342_v4  ;;  %2585 = vmatpush.msrb.mxu2 %v7323_v39  ;;  %v2098_v4 = vld [vmem:[#allocation2 + $0x128] sm:$0xff]  ;;  %v7318_v39 = vld [vmem:[%s12351_s1 + $0x110] sm:$0xff] }
  0x41   : > { %3133 = vmatpush.msrb.mxu0 %v7355_v45  ;;  %3400 = vmatpush.msrb.mxu1 %v7378_v13  ;;  %v8186_v45 = vld [vmem:[%s7752_s22 + $0x150] sm:$0xff] }
  0x42   : > { %2857 = vmatpush.msrb.mxu3 %v7341_v20  ;;  %v8140_v20 = vld [vmem:[%s7752_s22 + $0x140] sm:$0xff]  ;;  %325 = vst [vmem:[#allocation2 + $0x169] sm:$0xff] %v8186_v45 }
  0x43   : > { %2215 = vmatmul.f32.gmra.mxu0 %v7803_v26  ;;  %323 = vst [vmem:[#allocation2 + $0x159] sm:$0xff] %v8140_v20  ;;  %3401 = vmatpush.msrb.mxu1 %v7377_v27 }
  0x44   : > { %2287 = vmatmul.f32.gmra.mxu2 %v7797_v24  ;;  %2448 = vmatmul.f32.gmra.mxu3 %v2088_v3  ;;  %v7985_v24 = vld [vmem:[#allocation2 + $0x30] sm:$0xff]  ;;  %v8080_v57 = vld [vmem:[#allocation2 + $0x58] sm:$0xff]  ;;  %v7353_v3 = vld [vmem:[%s12351_s1 + $0x228] sm:$0xff] }
  0x45   : > { %2858 = vmatpush.msrb.mxu3 %v7340_v28  ;;  %v8064_v52 = vld [vmem:[#allocation2 + $0x50] sm:$0xff]  ;;  %3134 = vmatpush.msrb.mxu0 %v7354_v53  ;;  %v8157_v28 = vld [vmem:[%s7752_s22 + $0x80] sm:$0xff] }
  0x46   : > { %299 = vst [vmem:[#allocation2 + $0x99] sm:$0xff] %v8157_v28 }
  0x47   : > { %2376 = vmatmul.f32.gmra.mxu1 %v7928_v6  ;;  %2859 = vmatpush.msrb.mxu3 %v7339_v40  ;;  %v7334_v40 = vld [vmem:[%s12351_s1 + $0x190] sm:$0xff] }
  0x48   : > { %3135 = vmatpush.msrb.mxu0 %v7353_v3 }
  0x49   : > { %2860 = vmatpush.msrb.mxu3 %v7338_v47  ;;  %v8191_v47 = vld [vmem:[#allocation2 + $0x80] sm:$0xff] }
  0x4b   : > { %2218 = vmatmul.f32.gmra.mxu0 %v7835_v36  ;;  %2861 = vmatpush.msrb.mxu3 %v7337_v59  ;;  %v8206_v59 = vld [vmem:[%s7752_s22 + $0x90] sm:$0xff] }
  0x4c   : > { %2290 = vmatmul.f32.gmra.mxu2 %v7829_v34  ;;  %2451 = vmatmul.f32.gmra.mxu3 %v2089_v10  ;;  %v8013_v34 = vld [vmem:[%s7752_s22 + $0x48] sm:$0xff]  ;;  %v8121_v10 = vld [vmem:[%s7752_s22 + $0x138] sm:$0xff]  ;;  %301 = vst [vmem:[#allocation2 + $0xa9] sm:$0xff] %v8206_v59 }
  0x4d   : > { %292 = vst [vmem:[#allocation2 + $0x61] sm:$0xff] %v8013_v34  ;;  %2862 = vmatpush.msrb.mxu3 %v7336_v7  ;;  %v7317_v7 = vld [vmem:[%s12351_s1 + $0x108] sm:$0xff] }
  0x4e   : > { %322 = vst [vmem:[#allocation2 + $0x151] sm:$0xff] %v8121_v10 }
  0x4f   : > { %2379 = vmatmul.f32.gmra.mxu1 %v7950_v12  ;;  %2863 = vmatpush.msrb.mxu3 %v7335_v25  ;;  %v8234_v25 = vld [vmem:[%s7752_s22 + $0x98] sm:$0xff] }
  0x50   : > { %302 = vst [vmem:[#allocation2 + $0xb1] sm:$0xff] %v8234_v25 }
  0x51   : > { %2864 = vmatpush.msrb.mxu3 %v7334_v40  ;;  %v7349_v40 = vld [vmem:[%s12351_s1 + $0x208] sm:$0xff] }
  0x53   : > { %2221 = vmatmul.f32.gmra.mxu0 %v7875_v50 }
  0x54   : > { %2293 = vmatmul.f32.gmra.mxu2 %v7861_v46  ;;  %2454 = vmatmul.f32.gmra.mxu3 %v2090_v15  ;;  %v7322_v46 = vld [vmem:[%s12351_s1 + $0x130] sm:$0xff]  ;;  %v8102_v1 = vld [vmem:[#allocation2 + $0x60] sm:$0xff] }
  0x55   : > { %2586 = vmatpush.msrb.mxu2 %v7322_v46  ;;  %v7352_v15 = vld [vmem:[%s12351_s1 + $0x220] sm:$0xff]  ;;  %v2103_v27 = vld [vmem:[#allocation2 + $0x150] sm:$0xff] }
  0x56   : > { %3136 = vmatpush.msrb.mxu0 %v7352_v15 }
  0x57   : > { %2382 = vmatmul.f32.gmra.mxu1 %v7966_v18 }
  0x5b   : > { %2224 = vmatmul.f32.gmra.mxu0 %v7902_v60 }
  0x5c   : > { %2296 = vmatmul.f32.gmra.mxu2 %v7895_v58  ;;  %2457 = vmatmul.f32.gmra.mxu3 %v2091_v22  ;;  %v7321_v58 = vld [vmem:[%s12351_s1 + $0x128] sm:$0xff]  ;;  %v8143_v22 = vld [vmem:[#allocation2 + $0x70] sm:$0xff] }
  0x5d   : > { %2587 = vmatpush.msrb.mxu2 %v7321_v58  ;;  %v7350_v58 = vld [vmem:[%s12351_s1 + $0x210] sm:$0xff] }
  0x5f   : > { %2385 = vmatmul.f32.gmra.mxu1 %v7985_v24 }
  0x63   : > { %2227 = vmatmul.f32.gmra.mxu0 %v7919_v2 }
  0x64   : > { %2299 = vmatmul.f32.gmra.mxu2 %v7908_v63  ;;  %2460 = vmatmul.f32.gmra.mxu3 %v2092_v30  ;;  %v2097_v63 = vld [vmem:[#allocation2 + $0x120] sm:$0xff]  ;;  %v2100_v30 = vld [vmem:[#allocation2 + $0x138] sm:$0xff] }
  0x67   : > { %2388 = vmatmul.f32.gmra.mxu1 %v8007_v32 }
  0x6b   : > { %2230 = vmatmul.f32.gmra.mxu0 %v7941_v9 }
  0x6c   : > { %2302 = vmatmul.f32.gmra.mxu2 %v7925_v5  ;;  %2463 = vmatmul.f32.gmra.mxu3 %v2093_v35  ;;  %v7320_v5 = vld [vmem:[%s12351_s1 + $0x120] sm:$0xff]  ;;  %v7351_v35 = vld [vmem:[%s12351_s1 + $0x218] sm:$0xff] }
  0x6d   : > { %2588 = vmatpush.msrb.mxu2 %v7320_v5  ;;  %3137 = vmatpush.msrb.mxu0 %v7351_v35  ;;  %v8216_v5 = vld [vmem:[#allocation2 + $0x88] sm:$0xff] }
  0x6f   : > { %2391 = vmatmul.f32.gmra.mxu1 %v8023_v38  ;;  %3138 = vmatpush.msrb.mxu0 %v7350_v58  ;;  %v7332_v58 = vld [vmem:[%s12351_s1 + $0x180] sm:$0xff] }
  0x71   : > { %3139 = vmatpush.msrb.mxu0 %v7349_v40 }
  0x73   : > { %2233 = vmatmul.f32.gmra.mxu0 %v7956_v14 }
  0x74   : > { %2305 = vmatmul.f32.gmra.mxu2 %v7947_v11  ;;  %2466 = vmatmul.f32.gmra.mxu3 %v2094_v42  ;;  %v8124_v11 = vld [vmem:[#allocation2 + $0x68] sm:$0xff] }
  0x75   : > { %v8181_v42 = vld [vmem:[%s7752_s22 + $0x88] sm:$0xff] }
  0x76   : > { %300 = vst [vmem:[#allocation2 + $0xa1] sm:$0xff] %v8181_v42 }
  0x77   : > { %2394 = vmatmul.f32.gmra.mxu1 %v8042_v44 }
  0x7b   : > { %2236 = vmatmul.f32.gmra.mxu0 %v7976_v21 }
  0x7c   : > { %2308 = vmatmul.f32.gmra.mxu2 %v7963_v17  ;;  %2469 = vmatmul.f32.gmra.mxu3 %v2095_v49  ;;  %v8135_v17 = vld [vmem:[%s7752_s22 + $0x78] sm:$0xff] }
  0x7d   : > { %298 = vst [vmem:[#allocation2 + $0x91] sm:$0xff] %v8135_v17 }
  0x7f   : > { %2397 = vmatmul.f32.gmra.mxu1 %v8064_v52 }
  0x83   : > { %2239 = vmatmul.f32.gmra.mxu0 %v7998_v29 }
  0x84   : > { %2311 = vmatmul.f32.gmra.mxu2 %v7982_v23  ;;  %2472 = vmatmul.f32.gmra.mxu3 %v2096_v55  ;;  %v7319_v23 = vld [vmem:[%s12351_s1 + $0x118] sm:$0xff] }
  0x85   : > { %2589 = vmatpush.msrb.mxu2 %v7319_v23  ;;  %v7375_v23 = vld [vmem:[%s12351_s1 + $0x2d8] sm:$0xff] }
  0x87   : > { %2400 = vmatmul.f32.gmra.mxu1 %v8080_v57  ;;  %2590 = vmatpush.msrb.mxu2 %v7318_v39  ;;  %v8244_v39 = vld [vmem:[#allocation2 + $0x90] sm:$0xff] }
  0x89   : > { %2591 = vmatpush.msrb.mxu2 %v7317_v7  ;;  %v2104_v7 = vld [vmem:[#allocation2 + $0x158] sm:$0xff] }
  0x8b   : > { %2242 = vmatmul.f32.gmra.mxu0 %v8013_v34 }
  0x8c   : > { %2314 = vmatmul.f32.gmra.mxu2 %v8004_v31  ;;  %2475 = vmatmul.f32.gmra.mxu3 %v2097_v63  ;;  %v8162_v31 = vld [vmem:[%s7752_s22 + $0x148] sm:$0xff]  ;;  %v8211_v63 = vld [vmem:[%s7752_s22 + $0x158] sm:$0xff] }
  0x8d   : > { %324 = vst [vmem:[#allocation2 + $0x161] sm:$0xff] %v8162_v31 }
  0x8e   : > { %326 = vst [vmem:[#allocation2 + $0x171] sm:$0xff] %v8211_v63 }
  0x8f   : > { %2403 = vmatmul.f32.gmra.mxu1 %v8102_v1 }
  0x93   : > { %2245 = vmatmul.f32.gmra.mxu0 %v8033_v41 }
  0x94   : > { %2317 = vmatmul.f32.gmra.mxu2 %v8020_v37  ;;  %2478 = vmatmul.f32.gmra.mxu3 %v2098_v4  ;;  %v7333_v4 = vld [vmem:[%s12351_s1 + $0x188] sm:$0xff] }
  0x95   : > { %2865 = vmatpush.msrb.mxu3 %v7333_v4 }
  0x97   : > { %2406 = vmatmul.f32.gmra.mxu1 %v8124_v11  ;;  %2866 = vmatpush.msrb.mxu3 %v7332_v58  ;;  %v2105_v58 = vld [vmem:[#allocation2 + $0x160] sm:$0xff] }
  0x9b   : > { %2248 = vmatmul.f32.gmra.mxu0 %v8055_v48 }
  0x9c   : > { %2320 = vmatmul.f32.gmra.mxu2 %v8039_v43  ;;  %2481 = vmatmul.f32.gmra.mxu3 %v2099_v19  ;;  %v2101_v43 = vld [vmem:[#allocation2 + $0x140] sm:$0xff] }
  0x9f   : > { %2409 = vmatmul.f32.gmra.mxu1 %v8143_v22 }
  0xa3   : > { %2251 = vmatmul.f32.gmra.mxu0 %v8070_v54 }
  0xa4   : > { %2323 = vmatmul.f32.gmra.mxu2 %v8061_v51  ;;  %2484 = vmatmul.f32.gmra.mxu3 %v2100_v30  ;;  %v8239_v30 = vld [vmem:[%s7752_s22 + $0x160] sm:$0xff] }
  0xa5   : > { %327 = vst [vmem:[#allocation2 + $0x179] sm:$0xff] %v8239_v30 }
  0xa7   : > { %2412 = vmatmul.f32.gmra.mxu1 %v8165_v33 }
  0xa8   : > { %v8172_v37 = vpop.f32.mrf.mxu0 }
  0xab   : > { %2254 = vmatmul.f32.gmra.mxu0 %v8094_v62 }
  0xac   : > { %2326 = vmatmul.f32.gmra.mxu2 %v8077_v56  ;;  %2487 = vmatmul.f32.gmra.mxu3 %v2101_v43  ;;  %v8189_v46 = vpop.f32.mrf.mxu1  ;;  %v7376_v56 = vld [vmem:[%s12351_s1 + $0x2e0] sm:$0xff] }
  0xad   : > { %3402 = vmatpush.msrb.mxu1 %v7376_v56 }
  0xaf   : > { %v2279_v49 = vpop.f32.mrf.mxu2  ;;  %v2440_v51 = vpop.f32.mrf.mxu3  ;;  %2415 = vmatmul.f32.gmra.mxu1 %v8191_v47 }
  0xb0   : > { %v8195_v53 = vadd.f32 %v2440_v51, %v2279_v49  ;;  %v8197_v55 = vpop.f32.mrf.mxu0  ;;  %3403 = vmatpush.msrb.mxu1 %v7375_v23  ;;  %v7372_v23 = vld [vmem:[%s12351_s1 + $0x2c0] sm:$0xff] }
  0xb2   : > { %12364 = vst [vmem:[#allocation3_spill] sm:$0xff] %v8195_v53  ;;  %v8343_v53 = vld [vmem:[#allocation2 + $0xb0] sm:$0xff] }
  0xb3   : > { %2257 = vmatmul.f32.gmra.mxu0 %v8116_v8 }
  0xb4   : > { %2329 = vmatmul.f32.gmra.mxu2 %v8099_v0  ;;  %2490 = vmatmul.f32.gmra.mxu3 %v2102_v61  ;;  %v8214_v3 = vpop.f32.mrf.mxu1  ;;  %v7374_v61 = vld [vmem:[%s12351_s1 + $0x2d0] sm:$0xff] }
  0xb5   : > { %3404 = vmatpush.msrb.mxu1 %v7374_v61  ;;  %v7370_v61 = vld [vmem:[%s12351_s1 + $0x2b0] sm:$0xff] }
  0xb7   : > { %v2282_v13 = vpop.f32.mrf.mxu2  ;;  %v2443_v0 = vpop.f32.mrf.mxu3  ;;  %2418 = vmatmul.f32.gmra.mxu1 %v8216_v5 }
  0xb8   : > { %v8226_v15 = vadd.f32 %v2443_v0, %v2282_v13  ;;  %v8228_v19 = vpop.f32.mrf.mxu0  ;;  %v8268_v13 = vld [vmem:[#allocation2 + $0x98] sm:$0xff]  ;;  %v7373_v0 = vld [vmem:[%s12351_s1 + $0x2c8] sm:$0xff] }
  0xb9   : > { %3405 = vmatpush.msrb.mxu1 %v7373_v0  ;;  %v8294_v0 = vld [vmem:[#allocation2 + $0xa0] sm:$0xff] }
  0xba   : > { %12365 = vst [vmem:[#allocation4_spill] sm:$0xff] %v8226_v15  ;;  %v2107_v15 = vld [vmem:[#allocation2 + $0x170] sm:$0xff] }
  0xbb   : > { %2260 = vmatmul.f32.gmra.mxu0 %v8135_v17  ;;  %3406 = vmatpush.msrb.mxu1 %v7372_v23  ;;  %v7395_v23 = vld [vmem:[%s12351_s1 + $0x378] sm:$0xff] }
  0xbc   : > { %2332 = vmatmul.f32.gmra.mxu2 %v8121_v10  ;;  %2493 = vmatmul.f32.gmra.mxu3 %v2103_v27  ;;  %v8242_v35 = vpop.f32.mrf.mxu1  ;;  %v7316_v10 = vld [vmem:[%s12351_s1 + $0x100] sm:$0xff] }
  0xbd   : > { %2592 = vmatpush.msrb.mxu2 %v7316_v10  ;;  %v7348_v10 = vld [vmem:[%s12351_s1 + $0x200] sm:$0xff] }
  0xbe   : > { %3140 = vmatpush.msrb.mxu0 %v7348_v10  ;;  %v7368_v10 = vld [vmem:[%s12351_s1 + $0x2a0] sm:$0xff] }
  0xbf   : > { %v2285_v43 = vpop.f32.mrf.mxu2  ;;  %v2446_v49 = vpop.f32.mrf.mxu3  ;;  %2421 = vmatmul.f32.gmra.mxu1 %v8244_v39  ;;  %3673 = vmatpush.msra.mxu2 %v7395_v23  ;;  %v2106_v23 = vld [vmem:[#allocation2 + $0x168] sm:$0xff] }
  0xc0   : > { %v8251_v51 = vadd.f32 %v2446_v49, %v2285_v43  ;;  %v8253_v56 = vpop.f32.mrf.mxu0  ;;  %v7371_v49 = vld [vmem:[%s12351_s1 + $0x2b8] sm:$0xff] }
  0xc1   : > { %3407 = vmatpush.msrb.mxu1 %v7371_v49 }
  0xc2   : > { %12366 = vst [vmem:[#allocation5_spill] sm:$0xff] %v8251_v51  ;;  %v8320_v51 = vld [vmem:[#allocation2 + $0xa8] sm:$0xff] }
  0xc3   : > { %2263 = vmatmul.f32.gmra.mxu0 %v8157_v28  ;;  %3408 = vmatpush.msrb.mxu1 %v7370_v61 }
  0xc4   : > { %2335 = vmatmul.f32.gmra.mxu2 %v8140_v20  ;;  %2496 = vmatmul.f32.gmra.mxu3 %v2104_v7  ;;  %v8266_v4 = vpop.f32.mrf.mxu1 }
  0xc7   : > { %v2288_v27 = vpop.f32.mrf.mxu2  ;;  %v2449_v40 = vpop.f32.mrf.mxu3  ;;  %2424 = vmatmul.f32.gmra.mxu1 %v8268_v13 }
  0xc8   : > { %v8277_v43 = vadd.f32 %v2449_v40, %v2288_v27  ;;  %v8279_v20 = vpop.f32.mrf.mxu0  ;;  %v7369_v27 = vld [vmem:[%s12351_s1 + $0x2a8] sm:$0xff]  ;;  %v7411_v40 = vld [vmem:[%s12351_s1 + $0x3f8] sm:$0xff] }
  0xc9   : > { %3947 = vmatpush.msra.mxu3 %v7411_v40  ;;  %3409 = vmatpush.msrb.mxu1 %v7369_v27  ;;  %v7366_v27 = vld [vmem:[%s12351_s1 + $0x290] sm:$0xff] }
  0xca   : > { %12367 = vst [vmem:[#allocation6_spill] sm:$0xff] %v8277_v43  ;;  %v7367_v43 = vld [vmem:[%s12351_s1 + $0x298] sm:$0xff] }
  0xcb   : > { %2266 = vmatmul.f32.gmra.mxu0 %v8181_v42  ;;  %3410 = vmatpush.msrb.mxu1 %v7368_v10 }
  0xcc   : > { %2338 = vmatmul.f32.gmra.mxu2 %v8162_v31  ;;  %2499 = vmatmul.f32.gmra.mxu3 %v2105_v58  ;;  %v8292_v7 = vpop.f32.mrf.mxu1 }
  0xcd   : > { %3411 = vmatpush.msrb.mxu1 %v7367_v43  ;;  %v7364_v43 = vld [vmem:[%s12351_s1 + $0x280] sm:$0xff] }
  0xcf   : > { %v2291_v31 = vpop.f32.mrf.mxu2  ;;  %v2452_v49 = vpop.f32.mrf.mxu3  ;;  %2427 = vmatmul.f32.gmra.mxu1 %v8294_v0 }
  0xd0   : > { %v8309_v58 = vadd.f32 %v2452_v49, %v2291_v31  ;;  %v8311_v61 = vpop.f32.mrf.mxu0  ;;  %v7427_v31 = vld [vmem:[%s12351_s1 + $0x478] sm:$0xff]  ;;  %3412 = vmatpush.msrb.mxu1 %v7366_v27 }
  0xd1   : > { %4221 = vmatpush.msra.mxu0 %v7427_v31 }
  0xd2   : > { %12368 = vst [vmem:[#allocation7_spill] sm:$0xff] %v8309_v58 }
  0xd3   : > { %2269 = vmatmul.f32.gmra.mxu0 %v8206_v59 }
  0xd4   : > { %2341 = vmatmul.f32.gmra.mxu2 %v8186_v45  ;;  %2502 = vmatmul.f32.gmra.mxu3 %v2106_v23  ;;  %v8318_v40 = vpop.f32.mrf.mxu1  ;;  %v7365_v45 = vld [vmem:[%s12351_s1 + $0x288] sm:$0xff] }
  0xd5   : > { %3413 = vmatpush.msrb.mxu1 %v7365_v45 }
  0xd7   : > { %v2294_v49 = vpop.f32.mrf.mxu2  ;;  %v2455_v10 = vpop.f32.mrf.mxu3  ;;  %2430 = vmatmul.f32.gmra.mxu1 %v8320_v51 }
  0xd8   : > { %v8332_v23 = vadd.f32 %v2455_v10, %v2294_v49  ;;  %v8334_v58 = vpop.f32.mrf.mxu0  ;;  %3414 = vmatpush.msrb.mxu1 %v7364_v43  ;;  %v7394_v43 = vld [vmem:[%s12351_s1 + $0x370] sm:$0xff] }
  0xd9   : > { %3674 = vmatpush.msra.mxu2 %v7394_v43  ;;  %v7426_v43 = vld [vmem:[%s12351_s1 + $0x470] sm:$0xff] }
  0xda   : > { %12369 = vst [vmem:[#allocation8_spill] sm:$0xff] %v8332_v23  ;;  %v2108_v23 = vld [vmem:[#allocation2 + $0x178] sm:$0xff]  ;;  %4222 = vmatpush.msra.mxu0 %v7426_v43 }
  0xdb   : > { %2272 = vmatmul.f32.gmra.mxu0 %v8234_v25 }
  0xdc   : > { %2344 = vmatmul.f32.gmra.mxu2 %v8211_v63  ;;  %2505 = vmatmul.f32.gmra.mxu3 %v2107_v15  ;;  %v8341_v31 = vpop.f32.mrf.mxu1  ;;  %v8354_v15 = vld [vmem:[#allocation2 + $0xb8] sm:$0xff] }
  0xdd   : > { %12370 = vst [vmem:[#allocation9_spill] sm:$0xff] %v8341_v31 }
  0xdf   : > { %v2297_v49 = vpop.f32.mrf.mxu2  ;;  %v2458_v10 = vpop.f32.mrf.mxu3  ;;  %2433 = vmatmul.f32.gmra.mxu1 %v8343_v53 }
  0xe0   : > { %v8346_v27 = vadd.f32 %v2458_v10, %v2297_v49  ;;  %v8348_v45 = vpop.f32.mrf.mxu0  ;;  %v7410_v49 = vld [vmem:[%s12351_s1 + $0x3f0] sm:$0xff] }
  0xe1   : > { %12372 = vst [vmem:[#allocation11_spill] sm:$0xff] %v8348_v45  ;;  %3948 = vmatpush.msra.mxu3 %v7410_v49  ;;  %v3334_v45 = vld [vmem:[#allocation2 + $0x1a] sm:$0xff] }
  0xe2   : > { %12371 = vst [vmem:[#allocation10_spill] sm:$0xff] %v8346_v27 }
  0xe3   : > { %2275 = vmatmul.f32.gmra.mxu0 %v7769_v16 }
  0xe4   : > { %2347 = vmatmul.f32.gmra.mxu2 %v8239_v30  ;;  %2508 = vmatmul.f32.gmra.mxu3 %v2108_v23  ;;  %v8352_v63 = vpop.f32.mrf.mxu1  ;;  %v2512_v23 = vld [vmem:[#allocation2 + $0x2] sm:$0xff] }
  0xe5   : > { %12373 = vst [vmem:[#allocation12_spill] sm:$0xff] %v8352_v63 }
  0xe7   : > { %v2300_v10 = vpop.f32.mrf.mxu2  ;;  %v2461_v27 = vpop.f32.mrf.mxu3  ;;  %2436 = vmatmul.f32.gmra.mxu1 %v8354_v15 }
  0xe8   : > { %v8363_v16 = vadd.f32 %v2461_v27, %v2300_v10  ;;  %v8365_v30 = vpop.f32.mrf.mxu0 }
  0xe9   : > { %12375 = vst [vmem:[#allocation14_spill] sm:$0xff] %v8365_v30 }
  0xea   : > { %12374 = vst [vmem:[#allocation13_spill] sm:$0xff] %v8363_v16  ;;  %v2513_v16 = vld [vmem:[#allocation2 + $0xa] sm:$0xff] }
  0xeb   : > { %3141 = vmatmul.f32.vlgmr.msrb.gmra.mxu0 %v7803_v26 }
  0xec   : > { %2593 = vmatmul.f32.vlgmr.msrb.gmra.mxu2 %v2512_v23  ;;  %2867 = vmatmul.f32.vlgmr.msrb.gmra.mxu3 %v7928_v6  ;;  %v8369_v63 = vpop.f32.mrf.mxu1  ;;  %v3335_v6 = vld [vmem:[#allocation2 + $0x22] sm:$0xff] }
  0xed   : > { %12376 = vst [vmem:[#allocation15_spill] sm:$0xff] %v8369_v63 }
  0xef   : > { %v2303_v49 = vpop.f32.mrf.mxu2  ;;  %v2464_v31 = vpop.f32.mrf.mxu3  ;;  %3415 = vmatmul.f32.vlgmr.msrb.gmra.mxu1 %v3334_v45 }
  0xf0   : > { %v8374_v27 = vadd.f32 %v2464_v31, %v2303_v49  ;;  %v8376_v10 = vpop.f32.mrf.mxu0  ;;  %v2514_v31 = vld [vmem:[#allocation2 + $0x12] sm:$0xff] }
  0xf2   : > { %12377 = vst [vmem:[#allocation16_spill] sm:$0xff] %v8374_v27 }
  0xf3   : > { %3144 = vmatmul.f32.gmra.mxu0 %v7835_v36 }
  0xf4   : > { %2596 = vmatmul.f32.gmra.mxu2 %v2513_v16  ;;  %2870 = vmatmul.f32.gmra.mxu3 %v7950_v12  ;;  %v8380_v26 = vpop.f32.mrf.mxu1  ;;  %v3336_v16 = vld [vmem:[#allocation2 + $0x2a] sm:$0xff] }
  0xf5   : > { %v7393_v12 = vld [vmem:[%s12351_s1 + $0x368] sm:$0xff] }
  0xf6   : > { %3675 = vmatpush.msra.mxu2 %v7393_v12  ;;  %v7425_v12 = vld [vmem:[%s12351_s1 + $0x468] sm:$0xff] }
  0xf7   : > { %v2306_v23 = vpop.f32.mrf.mxu2  ;;  %v2467_v63 = vpop.f32.mrf.mxu3  ;;  %3418 = vmatmul.f32.gmra.mxu1 %v3335_v6  ;;  %4223 = vmatpush.msra.mxu0 %v7425_v12 }
  0xf8   : > { %v8382_v43 = vadd.f32 %v2467_v63, %v2306_v23  ;;  %v8384_v30 = vpop.f32.mrf.mxu0  ;;  %v7409_v63 = vld [vmem:[%s12351_s1 + $0x3e8] sm:$0xff] }
  0xf9   : > { %3949 = vmatpush.msra.mxu3 %v7409_v63 }
  0xfa   : > { %12378 = vst [vmem:[#allocation17_spill] sm:$0xff] %v8382_v43  ;;  %v3337_v43 = vld [vmem:[#allocation2 + $0x32] sm:$0xff] }
  0xfb   : > { %3147 = vmatmul.f32.gmra.mxu0 %v7875_v50 }
  0xfc   : > { %2599 = vmatmul.f32.gmra.mxu2 %v2514_v31  ;;  %2873 = vmatmul.f32.gmra.mxu3 %v7966_v18  ;;  %v8388_v36 = vpop.f32.mrf.mxu1 }
  0xff   : > { %v2309_v49 = vpop.f32.mrf.mxu2  ;;  %v2470_v23 = vpop.f32.mrf.mxu3  ;;  %3421 = vmatmul.f32.gmra.mxu1 %v3336_v16 }
 0x100   : > { %v8396_v50 = vadd.f32 %v2470_v23, %v2309_v49  ;;  %v8398_v31 = vpop.f32.mrf.mxu0 }
 0x102   : > { %12379 = vst [vmem:[#allocation18_spill] sm:$0xff] %v8396_v50 }
 0x103   : > { %3150 = vmatmul.f32.gmra.mxu0 %v7902_v60 }
 0x104   : > { %2602 = vmatmul.f32.gmra.mxu2 %v3334_v45  ;;  %2876 = vmatmul.f32.gmra.mxu3 %v7985_v24  ;;  %v8402_v18 = vpop.f32.mrf.mxu1  ;;  %v3338_v24 = vld [vmem:[#allocation2 + $0x3a] sm:$0xff] }
 0x105   : > { %12380 = vst [vmem:[#allocation19_spill] sm:$0xff] %v8402_v18 }
 0x107   : > { %v2312_v63 = vpop.f32.mrf.mxu2  ;;  %v2473_v27 = vpop.f32.mrf.mxu3  ;;  %3424 = vmatmul.f32.gmra.mxu1 %v3337_v43 }
 0x108   : > { %v8407_v49 = vadd.f32 %v2473_v27, %v2312_v63  ;;  %v8409_v23 = vpop.f32.mrf.mxu0 }
 0x10a   : > { %12381 = vst [vmem:[#allocation20_spill] sm:$0xff] %v8407_v49 }
 0x10b   : > { %3153 = vmatmul.f32.gmra.mxu0 %v7919_v2  ;;  %v3339_v2 = vld [vmem:[#allocation2 + $0x42] sm:$0xff] }
 0x10c   : > { %2605 = vmatmul.f32.gmra.mxu2 %v3335_v6  ;;  %2879 = vmatmul.f32.gmra.mxu3 %v8007_v32  ;;  %v8413_v60 = vpop.f32.mrf.mxu1  ;;  %v7392_v32 = vld [vmem:[%s12351_s1 + $0x360] sm:$0xff] }
 0x10d   : > { %v7408_v6 = vld [vmem:[%s12351_s1 + $0x3e0] sm:$0xff]  ;;  %3676 = vmatpush.msra.mxu2 %v7392_v32 }
 0x10e   : > { %3950 = vmatpush.msra.mxu3 %v7408_v6  ;;  %v7424_v32 = vld [vmem:[%s12351_s1 + $0x460] sm:$0xff] }
 0x10f   : > { %v2315_v45 = vpop.f32.mrf.mxu2  ;;  %v2476_v50 = vpop.f32.mrf.mxu3  ;;  %3427 = vmatmul.f32.gmra.mxu1 %v3338_v24  ;;  %4224 = vmatpush.msra.mxu0 %v7424_v32 }
 0x110   : > { %v8415_v18 = vadd.f32 %v2476_v50, %v2315_v45  ;;  %v8417_v12 = vpop.f32.mrf.mxu0  ;;  %v3340_v45 = vld [vmem:[#allocation2 + $0x4a] sm:$0xff] }
 0x112   : > { %12382 = vst [vmem:[#allocation21_spill] sm:$0xff] %v8415_v18 }
 0x113   : > { %3156 = vmatmul.f32.gmra.mxu0 %v7941_v9 }
 0x114   : > { %2608 = vmatmul.f32.gmra.mxu2 %v3336_v16  ;;  %2882 = vmatmul.f32.gmra.mxu3 %v8023_v38  ;;  %v8421_v27 = vpop.f32.mrf.mxu1 }
 0x117   : > { %v2318_v50 = vpop.f32.mrf.mxu2  ;;  %v2479_v63 = vpop.f32.mrf.mxu3  ;;  %3430 = vmatmul.f32.gmra.mxu1 %v3339_v2 }
 0x118   : > { %v8429_v9 = vadd.f32 %v2479_v63, %v2318_v50  ;;  %v8431_v16 = vpop.f32.mrf.mxu0 }
 0x11a   : > { %12383 = vst [vmem:[#allocation22_spill] sm:$0xff] %v8429_v9 }
 0x11b   : > { %3159 = vmatmul.f32.gmra.mxu0 %v7956_v14 }
 0x11c   : > { %2611 = vmatmul.f32.gmra.mxu2 %v3337_v43  ;;  %2885 = vmatmul.f32.gmra.mxu3 %v8042_v44  ;;  %v8435_v38 = vpop.f32.mrf.mxu1  ;;  %v3341_v44 = vld [vmem:[#allocation2 + $0x52] sm:$0xff] }
 0x11f   : > { %v2321_v6 = vpop.f32.mrf.mxu2  ;;  %v2482_v18 = vpop.f32.mrf.mxu3  ;;  %3433 = vmatmul.f32.gmra.mxu1 %v3340_v45 }
 0x120   : > { %v8440_v50 = vadd.f32 %v2482_v18, %v2321_v6  ;;  %v8442_v63 = vpop.f32.mrf.mxu0 }
 0x122   : > { %12384 = vst [vmem:[#allocation23_spill] sm:$0xff] %v8440_v50 }
 0x123   : > { %3162 = vmatmul.f32.gmra.mxu0 %v7976_v21  ;;  %v3342_v21 = vld [vmem:[#allocation2 + $0x5a] sm:$0xff] }
 0x124   : > { %2614 = vmatmul.f32.gmra.mxu2 %v3338_v24  ;;  %2888 = vmatmul.f32.gmra.mxu3 %v8064_v52  ;;  %v8446_v14 = vpop.f32.mrf.mxu1  ;;  %v7391_v52 = vld [vmem:[%s12351_s1 + $0x358] sm:$0xff] }
 0x125   : > { %v7407_v24 = vld [vmem:[%s12351_s1 + $0x3d8] sm:$0xff]  ;;  %3677 = vmatpush.msra.mxu2 %v7391_v52 }
 0x126   : > { %3951 = vmatpush.msra.mxu3 %v7407_v24  ;;  %v7423_v52 = vld [vmem:[%s12351_s1 + $0x458] sm:$0xff] }
 0x127   : > { %v2324_v43 = vpop.f32.mrf.mxu2  ;;  %v2485_v9 = vpop.f32.mrf.mxu3  ;;  %3436 = vmatmul.f32.gmra.mxu1 %v3341_v44  ;;  %4225 = vmatpush.msra.mxu0 %v7423_v52 }
 0x128   : > { %v8448_v49 = vadd.f32 %v2485_v9, %v2324_v43  ;;  %v8450_v32 = vpop.f32.mrf.mxu0  ;;  %v3343_v43 = vld [vmem:[#allocation2 + $0x62] sm:$0xff] }
 0x12a   : > { %12385 = vst [vmem:[#allocation24_spill] sm:$0xff] %v8448_v49 }
 0x12b   : > { %3165 = vmatmul.f32.gmra.mxu0 %v7998_v29 }
 0x12c   : > { %2617 = vmatmul.f32.gmra.mxu2 %v3339_v2  ;;  %2891 = vmatmul.f32.gmra.mxu3 %v8080_v57  ;;  %v8454_v18 = vpop.f32.mrf.mxu1 }
 0x12f   : > { %v2327_v9 = vpop.f32.mrf.mxu2  ;;  %v2488_v6 = vpop.f32.mrf.mxu3  ;;  %3439 = vmatmul.f32.gmra.mxu1 %v3342_v21 }
 0x130   : > { %v8462_v29 = vadd.f32 %v2488_v6, %v2327_v9  ;;  %v8464_v2 = vpop.f32.mrf.mxu0 }
 0x132   : > { %12386 = vst [vmem:[#allocation25_spill] sm:$0xff] %v8462_v29 }
 0x133   : > { %3168 = vmatmul.f32.gmra.mxu0 %v8013_v34 }
 0x134   : > { %2620 = vmatmul.f32.gmra.mxu2 %v3340_v45  ;;  %2894 = vmatmul.f32.gmra.mxu3 %v8102_v1  ;;  %v8468_v57 = vpop.f32.mrf.mxu1  ;;  %v3344_v1 = vld [vmem:[#allocation2 + $0x6a] sm:$0xff] }
 0x137   : > { %v2330_v24 = vpop.f32.mrf.mxu2  ;;  %v2491_v49 = vpop.f32.mrf.mxu3  ;;  %3442 = vmatmul.f32.gmra.mxu1 %v3343_v43 }
 0x138   : > { %v8473_v9 = vadd.f32 %v2491_v49, %v2330_v24  ;;  %v8475_v6 = vpop.f32.mrf.mxu0 }
 0x13a   : > { %12387 = vst [vmem:[#allocation26_spill] sm:$0xff] %v8473_v9 }
 0x13b   : > { %3171 = vmatmul.f32.gmra.mxu0 %v8033_v41  ;;  %v3345_v41 = vld [vmem:[#allocation2 + $0x72] sm:$0xff] }
 0x13c   : > { %2623 = vmatmul.f32.gmra.mxu2 %v3341_v44  ;;  %2897 = vmatmul.f32.gmra.mxu3 %v8124_v11  ;;  %v8479_v34 = vpop.f32.mrf.mxu1  ;;  %v7390_v11 = vld [vmem:[%s12351_s1 + $0x350] sm:$0xff] }
 0x13d   : > { %v7406_v44 = vld [vmem:[%s12351_s1 + $0x3d0] sm:$0xff]  ;;  %3678 = vmatpush.msra.mxu2 %v7390_v11  ;;  %v3346_v11 = vld [vmem:[#allocation2 + $0x7a] sm:$0xff] }
 0x13e   : > { %3952 = vmatpush.msra.mxu3 %v7406_v44  ;;  %v7422_v44 = vld [vmem:[%s12351_s1 + $0x450] sm:$0xff] }
 0x13f   : > { %v2333_v45 = vpop.f32.mrf.mxu2  ;;  %v2494_v29 = vpop.f32.mrf.mxu3  ;;  %3445 = vmatmul.f32.gmra.mxu1 %v3344_v1  ;;  %4226 = vmatpush.msra.mxu0 %v7422_v44 }
 0x140   : > { %v8481_v50 = vadd.f32 %v2494_v29, %v2333_v45  ;;  %v8483_v52 = vpop.f32.mrf.mxu0 }
 0x142   : > { %12388 = vst [vmem:[#allocation27_spill] sm:$0xff] %v8481_v50 }
 0x143   : > { %3174 = vmatmul.f32.gmra.mxu0 %v8055_v48 }
 0x144   : > { %2626 = vmatmul.f32.gmra.mxu2 %v3342_v21  ;;  %2900 = vmatmul.f32.gmra.mxu3 %v8143_v22  ;;  %v8487_v49 = vpop.f32.mrf.mxu1  ;;  %v7443_v22 = vld [vmem:[%s12353_s3 + $0xf8] sm:$0xff] }
 0x145   : > { %4755 = vmatpush.msra.mxu1 %v7443_v22 }
 0x147   : > { %v2336_v29 = vpop.f32.mrf.mxu2  ;;  %v2497_v24 = vpop.f32.mrf.mxu3  ;;  %3448 = vmatmul.f32.gmra.mxu1 %v3345_v41 }
 0x148   : > { %v8495_v48 = vadd.f32 %v2497_v24, %v2336_v29  ;;  %v8497_v21 = vpop.f32.mrf.mxu0 }
 0x14a   : > { %12389 = vst [vmem:[#allocation28_spill] sm:$0xff] %v8495_v48 }
 0x14b   : > { %3177 = vmatmul.f32.gmra.mxu0 %v8070_v54 }
 0x14c   : > { %2629 = vmatmul.f32.gmra.mxu2 %v3343_v43  ;;  %2903 = vmatmul.f32.gmra.mxu3 %v8165_v33  ;;  %v8504_v45 = vpop.f32.mrf.mxu1  ;;  %v3347_v33 = vld [vmem:[#allocation2 + $0x82] sm:$0xff] }
 0x14f   : > { %v2339_v29 = vpop.f32.mrf.mxu2  ;;  %v2500_v24 = vpop.f32.mrf.mxu3  ;;  %3451 = vmatmul.f32.gmra.mxu1 %v3346_v11 }
 0x150   : > { %v8509_v48 = vadd.f32 %v2500_v24, %v2339_v29  ;;  %v8511_v50 = vpop.f32.mrf.mxu0 }
 0x152   : > { %12390 = vst [vmem:[#allocation29_spill] sm:$0xff] %v8509_v48 }
 0x153   : > { %3180 = vmatmul.f32.gmra.mxu0 %v8094_v62  ;;  %v3348_v62 = vld [vmem:[#allocation2 + $0x8a] sm:$0xff] }
 0x154   : > { %2632 = vmatmul.f32.gmra.mxu2 %v3344_v1  ;;  %2906 = vmatmul.f32.gmra.mxu3 %v8191_v47  ;;  %v8515_v54 = vpop.f32.mrf.mxu1  ;;  %v7389_v47 = vld [vmem:[%s12351_s1 + $0x348] sm:$0xff] }
 0x155   : > { %3679 = vmatpush.msra.mxu2 %v7389_v47  ;;  %v7405_v1 = vld [vmem:[%s12351_s1 + $0x3c8] sm:$0xff]  ;;  %v3349_v47 = vld [vmem:[#allocation2 + $0x92] sm:$0xff] }
 0x156   : > { %3953 = vmatpush.msra.mxu3 %v7405_v1  ;;  %v7421_v1 = vld [vmem:[%s12351_s1 + $0x448] sm:$0xff] }
 0x157   : > { %v2342_v43 = vpop.f32.mrf.mxu2  ;;  %v2503_v22 = vpop.f32.mrf.mxu3  ;;  %3454 = vmatmul.f32.gmra.mxu1 %v3347_v33  ;;  %4227 = vmatpush.msra.mxu0 %v7421_v1  ;;  %v3351_v1 = vld [vmem:[#allocation2 + $0xa2] sm:$0xff] }
 0x158   : > { %v8517_v9 = vadd.f32 %v2503_v22, %v2342_v43  ;;  %v8519_v44 = vpop.f32.mrf.mxu0 }
 0x15a   : > { %12391 = vst [vmem:[#allocation30_spill] sm:$0xff] %v8517_v9 }
 0x15b   : > { %3183 = vmatmul.f32.gmra.mxu0 %v8116_v8 }
 0x15c   : > { %2635 = vmatmul.f32.gmra.mxu2 %v3345_v41  ;;  %2909 = vmatmul.f32.gmra.mxu3 %v8216_v5  ;;  %v8523_v29 = vpop.f32.mrf.mxu1  ;;  %v7442_v5 = vld [vmem:[%s12353_s3 + $0xf0] sm:$0xff] }
 0x15d   : > { %12392 = vst [vmem:[#allocation31_spill] sm:$0xff] %v8523_v29  ;;  %4756 = vmatpush.msra.mxu1 %v7442_v5 }
 0x15f   : > { %v2345_v24 = vpop.f32.mrf.mxu2  ;;  %v2506_v43 = vpop.f32.mrf.mxu3  ;;  %3457 = vmatmul.f32.gmra.mxu1 %v3348_v62 }
 0x160   : > { %v8531_v8 = vadd.f32 %v2506_v43, %v2345_v24  ;;  %v8533_v41 = vpop.f32.mrf.mxu0 }
 0x161   : > { %12394 = vst [vmem:[#allocation33_spill] sm:$0xff] %v8533_v41 }
 0x162   : > { %12393 = vst [vmem:[#allocation32_spill] sm:$0xff] %v8531_v8 }
 0x163   : > { %3186 = vmatmul.f32.gmra.mxu0 %v8135_v17 }
 0x164   : > { %2638 = vmatmul.f32.gmra.mxu2 %v3346_v11  ;;  %2912 = vmatmul.f32.gmra.mxu3 %v8244_v39  ;;  %v8540_v22 = vpop.f32.mrf.mxu1  ;;  %v3350_v39 = vld [vmem:[#allocation2 + $0x9a] sm:$0xff]  ;;  %v2369_v11 = vadd.f32 %v8189_v46, %v8172_v37  ;;  %v2372_v37 = vadd.f32 %v8214_v3, %v8197_v55 }
 0x165   : > { %12395 = vst [vmem:[#allocation34_spill] sm:$0xff] %v8540_v22 }
 0x167   : > { %v2348_v24 = vpop.f32.mrf.mxu2  ;;  %v2509_v43 = vpop.f32.mrf.mxu3  ;;  %3460 = vmatmul.f32.gmra.mxu1 %v3349_v47 }
 0x168   : > { %v8545_v8 = vadd.f32 %v2509_v43, %v2348_v24  ;;  %v3142_v9 = vpop.f32.mrf.mxu0  ;;  %v3352_v24 = vld [vmem:[#allocation2 + $0xaa] sm:$0xff]  ;;  %v2375_v43 = vadd.f32 %v8242_v35, %v8228_v19  ;;  %v3353_v35 = vld [vmem:[#allocation2 + $0xb2] sm:$0xff] }
 0x16b   : > { %3189 = vmatmul.f32.gmra.mxu0 %v8157_v28 }
 0x16c   : > { %2641 = vmatmul.f32.gmra.mxu2 %v3347_v33  ;;  %2915 = vmatmul.f32.gmra.mxu3 %v8268_v13  ;;  %v3416_v17 = vpop.f32.mrf.mxu1  ;;  %v7388_v13 = vld [vmem:[%s12351_s1 + $0x340] sm:$0xff] }
 0x16d   : > { %3680 = vmatpush.msra.mxu2 %v7388_v13 }
 0x16f   : > { %v2594_v5 = vpop.f32.mrf.mxu2  ;;  %v2868_v48 = vpop.f32.mrf.mxu3  ;;  %3463 = vmatmul.f32.gmra.mxu1 %v3350_v39 }
 0x170   : > { %v2738_v22 = vadd.f32 %v2594_v5, %v2369_v11  ;;  %v3145_v41 = vpop.f32.mrf.mxu0  ;;  %v7420_v11 = vld [vmem:[%s12351_s1 + $0x440] sm:$0xff] }
 0x171   : > { %4228 = vmatpush.msra.mxu0 %v7420_v11  ;;  %v2807_v11 = vld [vmem:[#allocation2 + $0xc0] sm:$0xff] }
 0x172   : > { %v3012_v29 = vadd.f32 %v2868_v48, %v2738_v22  ;;  %v7441_v22 = vld [vmem:[%s12353_s3 + $0xe8] sm:$0xff] }
 0x173   : > { %3192 = vmatmul.f32.gmra.mxu0 %v8181_v42  ;;  %v7404_v42 = vld [vmem:[%s12351_s1 + $0x3c0] sm:$0xff]  ;;  %4757 = vmatpush.msra.mxu1 %v7441_v22  ;;  %v7403_v22 = vld [vmem:[%s12351_s1 + $0x3b8] sm:$0xff] }
 0x174   : > { %2644 = vmatmul.f32.gmra.mxu2 %v3348_v62  ;;  %2918 = vmatmul.f32.gmra.mxu3 %v8294_v0  ;;  %v3286_v28 = vadd.f32 %v3142_v9, %v3012_v29  ;;  %v3419_v33 = vpop.f32.mrf.mxu1 }
 0x175   : > { %3954 = vmatpush.msra.mxu3 %v7404_v42 }
 0x176   : > { %v8558_v46 = vadd.f32 %v3416_v17, %v3286_v28 }
 0x177   : > { %v2597_v48 = vpop.f32.mrf.mxu2  ;;  %v2871_v62 = vpop.f32.mrf.mxu3  ;;  %3466 = vmatmul.f32.gmra.mxu1 %v3351_v1  ;;  %3955 = vmatpush.msra.mxu3 %v7403_v22 }
 0x178   : > { %v2739_v0 = vadd.f32 %v2597_v48, %v2372_v37  ;;  %v3148_v9 = vpop.f32.mrf.mxu0 }
 0x17a   : > { %v3013_v29 = vadd.f32 %v2871_v62, %v2739_v0  ;;  %v3080_v0 = vld [vmem:[#allocation2 + $0xb9] sm:$0xff] }
 0x17b   : > { %3195 = vmatmul.f32.gmra.mxu0 %v8206_v59 }
 0x17c   : > { %2647 = vmatmul.f32.gmra.mxu2 %v3349_v47  ;;  %2921 = vmatmul.f32.gmra.mxu3 %v8320_v51  ;;  %v3287_v55 = vadd.f32 %v3145_v41, %v3013_v29  ;;  %v3422_v3 = vpop.f32.mrf.mxu1  ;;  %v2378_v41 = vadd.f32 %v8266_v4, %v8253_v56  ;;  %v7387_v56 = vld [vmem:[%s12351_s1 + $0x338] sm:$0xff]  ;;  %v2381_v4 = vadd.f32 %v8292_v7, %v8279_v20 }
 0x17d   : > { %3681 = vmatpush.msra.mxu2 %v7387_v56 }
 0x17e   : > { %v8570_v17 = vadd.f32 %v3419_v33, %v3287_v55 }
 0x17f   : > { %v2600_v5 = vpop.f32.mrf.mxu2  ;;  %v2874_v28 = vpop.f32.mrf.mxu3  ;;  %3469 = vmatmul.f32.gmra.mxu1 %v3352_v24 }
 0x180   : > { %v2740_v59 = vadd.f32 %v2600_v5, %v2375_v43  ;;  %v3151_v47 = vpop.f32.mrf.mxu0  ;;  %v3081_v43 = vld [vmem:[#allocation2 + $0xc1] sm:$0xff] }
 0x182   : > { %v3014_v13 = vadd.f32 %v2874_v28, %v2740_v59  ;;  %v7440_v28 = vld [vmem:[%s12353_s3 + $0xe0] sm:$0xff] }
 0x183   : > { %3198 = vmatmul.f32.gmra.mxu0 %v8234_v25  ;;  %4758 = vmatpush.msra.mxu1 %v7440_v28  ;;  %v3355_v59 = vld [vmem:[#allocation2 + $0xc2] sm:$0xff] }
 0x184   : > { %2650 = vmatmul.f32.gmra.mxu2 %v3350_v39  ;;  %2924 = vmatmul.f32.gmra.mxu3 %v8343_v53  ;;  %v3288_v51 = vadd.f32 %v3148_v9, %v3014_v13  ;;  %v3425_v19 = vpop.f32.mrf.mxu1  ;;  %v3354_v39 = vld [vmem:[#allocation2 + $0xba] sm:$0xff] }
 0x185   : > { %v12400_v28 = vld [vmem:[#allocation12_spill] sm:$0xff] }
 0x186   : > { %v8579_v33 = vadd.f32 %v3422_v3, %v3288_v51  ;;  %v7419_v51 = vld [vmem:[%s12351_s1 + $0x438] sm:$0xff] }
 0x187   : > { %v2603_v37 = vpop.f32.mrf.mxu2  ;;  %v2877_v42 = vpop.f32.mrf.mxu3  ;;  %3472 = vmatmul.f32.gmra.mxu1 %v3353_v35  ;;  %4229 = vmatpush.msra.mxu0 %v7419_v51 }
 0x188   : > { %v2741_v48 = vadd.f32 %v2603_v37, %v2378_v41  ;;  %v3154_v62 = vpop.f32.mrf.mxu0 }
 0x18a   : > { %v3015_v29 = vadd.f32 %v2877_v42, %v2741_v48  ;;  %v2808_v48 = vld [vmem:[#allocation2 + $0xc8] sm:$0xff] }
 0x18b   : > { %3201 = vmatmul.f32.gmra.mxu0 %v3080_v0 }
 0x18c   : > { %2653 = vmatmul.f32.gmra.mxu2 %v3351_v1  ;;  %2927 = vmatmul.f32.gmra.mxu3 %v8354_v15  ;;  %v3289_v53 = vadd.f32 %v3151_v47, %v3015_v29  ;;  %v3428_v25 = vpop.f32.mrf.mxu1  ;;  %v2384_v47 = vadd.f32 %v8318_v40, %v8311_v61  ;;  %v3356_v40 = vld [vmem:[#allocation2 + $0xca] sm:$0xff] }
 0x18d   : > { %v12397_v29 = vld [vmem:[#allocation9_spill] sm:$0xff] }
 0x18e   : > { %v8587_v9 = vadd.f32 %v3425_v19, %v3289_v53  ;;  %v2387_v53 = vadd.f32 %v12397_v29, %v8334_v58  ;;  %v7386_v58 = vld [vmem:[%s12351_s1 + $0x330] sm:$0xff] }
 0x18f   : > { %v2606_v1 = vpop.f32.mrf.mxu2  ;;  %v2880_v55 = vpop.f32.mrf.mxu3  ;;  %3475 = vmatmul.f32.gmra.mxu1 %v3354_v39  ;;  %3682 = vmatpush.msra.mxu2 %v7386_v58  ;;  %v12402_v29 = vld [vmem:[#allocation14_spill] sm:$0xff]  ;;  %v2811_v58 = vld [vmem:[#allocation2 + $0xe0] sm:$0xff] }
 0x190   : > { %v2742_v15 = vadd.f32 %v2606_v1, %v2381_v4  ;;  %v3157_v3 = vpop.f32.mrf.mxu0 }
 0x192   : > { %v3016_v5 = vadd.f32 %v2880_v55, %v2742_v15  ;;  %v3083_v55 = vld [vmem:[#allocation2 + $0xd1] sm:$0xff] }
 0x193   : > { %3204 = vmatmul.f32.gmra.mxu0 %v3081_v43  ;;  %v2809_v15 = vld [vmem:[#allocation2 + $0xd0] sm:$0xff] }
 0x194   : > { %2656 = vmatmul.f32.gmra.mxu2 %v3352_v24  ;;  %2930 = vmatmul.f32.gmra.mxu3 %v2807_v11  ;;  %v3290_v20 = vadd.f32 %v3154_v62, %v3016_v5  ;;  %v3431_v7 = vpop.f32.mrf.mxu1  ;;  %v3082_v24 = vld [vmem:[#allocation2 + $0xc9] sm:$0xff]  ;;  %v3357_v11 = vld [vmem:[#allocation2 + $0xd2] sm:$0xff] }
 0x195   : > { %v12399_v5 = vld [vmem:[#allocation11_spill] sm:$0xff] }
 0x196   : > { %v8597_v13 = vadd.f32 %v3428_v25, %v3290_v20  ;;  %v2390_v20 = vadd.f32 %v12400_v28, %v12399_v5 }
 0x197   : > { %v2609_v19 = vpop.f32.mrf.mxu2  ;;  %v2883_v41 = vpop.f32.mrf.mxu3  ;;  %3478 = vmatmul.f32.gmra.mxu1 %v3355_v59 }
 0x198   : > { %12396 = vst [vmem:[#allocation35_spill] sm:$0xff] %v8597_v13  ;;  %v2743_v37 = vadd.f32 %v2609_v19, %v2384_v47  ;;  %v3160_v42 = vpop.f32.mrf.mxu0  ;;  %v7402_v47 = vld [vmem:[%s12351_s1 + $0x3b0] sm:$0xff] }
 0x199   : > { %3956 = vmatpush.msra.mxu3 %v7402_v47 }
 0x19a   : > { %v3017_v62 = vadd.f32 %v2883_v41, %v2743_v37  ;;  %v3084_v37 = vld [vmem:[#allocation2 + $0xd9] sm:$0xff] }
 0x19b   : > { %3207 = vmatmul.f32.gmra.mxu0 %v3082_v24 }
 0x19c   : > { %2659 = vmatmul.f32.gmra.mxu2 %v3353_v35  ;;  %2933 = vmatmul.f32.gmra.mxu3 %v2808_v48  ;;  %v3291_v0 = vadd.f32 %v3157_v3, %v3017_v62  ;;  %v3434_v61 = vpop.f32.mrf.mxu1  ;;  %v7439_v48 = vld [vmem:[%s12353_s3 + $0xd8] sm:$0xff] }
 0x19d   : > { %4759 = vmatpush.msra.mxu1 %v7439_v48 }
 0x19e   : > { %v8604_v25 = vadd.f32 %v3431_v7, %v3291_v0 }
 0x19f   : > { %v2612_v56 = vpop.f32.mrf.mxu2  ;;  %v2886_v4 = vpop.f32.mrf.mxu3  ;;  %3481 = vmatmul.f32.gmra.mxu1 %v3356_v40 }
 0x1a0   : > { %12398 = vst [vmem:[#allocation9_spill] sm:$0xff] %v8604_v25  ;;  %v2744_v22 = vadd.f32 %v2612_v56, %v2387_v53  ;;  %v3163_v1 = vpop.f32.mrf.mxu0  ;;  %v12403_v53 = vld [vmem:[#allocation15_spill] sm:$0xff] }
 0x1a1   : > { %v2393_v56 = vadd.f32 %v12403_v53, %v12402_v29  ;;  %v7401_v29 = vld [vmem:[%s12351_s1 + $0x3a8] sm:$0xff] }
 0x1a2   : > { %v3018_v43 = vadd.f32 %v2886_v4, %v2744_v22  ;;  %v7418_v22 = vld [vmem:[%s12351_s1 + $0x430] sm:$0xff]  ;;  %3957 = vmatpush.msra.mxu3 %v7401_v29 }
 0x1a3   : > { %3210 = vmatmul.f32.gmra.mxu0 %v3083_v55 }
 0x1a4   : > { %2662 = vmatmul.f32.gmra.mxu2 %v3354_v39  ;;  %2936 = vmatmul.f32.gmra.mxu3 %v2809_v15  ;;  %v3292_v35 = vadd.f32 %v3160_v42, %v3018_v43  ;;  %v3437_v3 = vpop.f32.mrf.mxu1  ;;  %v2810_v42 = vld [vmem:[#allocation2 + $0xd8] sm:$0xff] }
 0x1a5   : > { %4230 = vmatpush.msra.mxu0 %v7418_v22 }
 0x1a6   : > { %v8611_v7 = vadd.f32 %v3434_v61, %v3292_v35  ;;  %v3358_v61 = vld [vmem:[#allocation2 + $0xda] sm:$0xff] }
 0x1a7   : > { %v2615_v51 = vpop.f32.mrf.mxu2  ;;  %v2889_v39 = vpop.f32.mrf.mxu3  ;;  %3484 = vmatmul.f32.gmra.mxu1 %v3357_v11 }
 0x1a8   : > { %12401 = vst [vmem:[#allocation11_spill] sm:$0xff] %v8611_v7  ;;  %v2745_v19 = vadd.f32 %v2615_v51, %v2390_v20  ;;  %v3166_v41 = vpop.f32.mrf.mxu0  ;;  %v2396_v20 = vadd.f32 %v8380_v26, %v8376_v10  ;;  %v7385_v10 = vld [vmem:[%s12351_s1 + $0x328] sm:$0xff]  ;;  %v2399_v26 = vadd.f32 %v8388_v36, %v8384_v30 }
 0x1a9   : > { %3683 = vmatpush.msra.mxu2 %v7385_v10 }
 0x1aa   : > { %v3019_v24 = vadd.f32 %v2889_v39, %v2745_v19 }
 0x1ab   : > { %3213 = vmatmul.f32.gmra.mxu0 %v3084_v37 }
 0x1ac   : > { %2665 = vmatmul.f32.gmra.mxu2 %v3355_v59  ;;  %2939 = vmatmul.f32.gmra.mxu3 %v2810_v42  ;;  %v3293_v62 = vadd.f32 %v3163_v1, %v3019_v24  ;;  %v3440_v0 = vpop.f32.mrf.mxu1  ;;  %v3085_v59 = vld [vmem:[#allocation2 + $0xe1] sm:$0xff]  ;;  %v3086_v42 = vld [vmem:[#allocation2 + $0xe9] sm:$0xff] }
 0x1ad   : > { %v2812_v24 = vld [vmem:[#allocation2 + $0xe8] sm:$0xff] }
 0x1ae   : > { %v8621_v4 = vadd.f32 %v3437_v3, %v3293_v62  ;;  %v3359_v3 = vld [vmem:[#allocation2 + $0xe2] sm:$0xff]  ;;  %v3360_v62 = vld [vmem:[#allocation2 + $0xea] sm:$0xff] }
 0x1af   : > { %v2618_v55 = vpop.f32.mrf.mxu2  ;;  %v2892_v15 = vpop.f32.mrf.mxu3  ;;  %3487 = vmatmul.f32.gmra.mxu1 %v3358_v61 }
 0x1b0   : > { %12404 = vst [vmem:[#allocation12_spill] sm:$0xff] %v8621_v4  ;;  %v2746_v43 = vadd.f32 %v2618_v55, %v2393_v56  ;;  %v3169_v35 = vpop.f32.mrf.mxu0  ;;  %v3087_v55 = vld [vmem:[#allocation2 + $0xf1] sm:$0xff] }
 0x1b2   : > { %v3020_v1 = vadd.f32 %v2892_v15, %v2746_v43  ;;  %v2813_v15 = vld [vmem:[#allocation2 + $0xf0] sm:$0xff] }
 0x1b3   : > { %3216 = vmatmul.f32.gmra.mxu0 %v3085_v59  ;;  %v3361_v59 = vld [vmem:[#allocation2 + $0xf2] sm:$0xff] }
 0x1b4   : > { %2668 = vmatmul.f32.gmra.mxu2 %v3356_v40  ;;  %2942 = vmatmul.f32.gmra.mxu3 %v2811_v58  ;;  %v3294_v5 = vadd.f32 %v3166_v41, %v3020_v1  ;;  %v3443_v28 = vpop.f32.mrf.mxu1  ;;  %v12407_v58 = vld [vmem:[#allocation19_spill] sm:$0xff] }
 0x1b5   : > { %v2402_v1 = vadd.f32 %v12407_v58, %v8398_v31 }
 0x1b6   : > { %v8628_v47 = vadd.f32 %v3440_v0, %v3294_v5 }
 0x1b7   : > { %v2621_v51 = vpop.f32.mrf.mxu2  ;;  %v2895_v39 = vpop.f32.mrf.mxu3  ;;  %3490 = vmatmul.f32.gmra.mxu1 %v3359_v3 }
 0x1b8   : > { %12405 = vst [vmem:[#allocation14_spill] sm:$0xff] %v8628_v47  ;;  %v2747_v19 = vadd.f32 %v2621_v51, %v2396_v20  ;;  %v3172_v37 = vpop.f32.mrf.mxu0 }
 0x1ba   : > { %v3021_v48 = vadd.f32 %v2895_v39, %v2747_v19 }
 0x1bb   : > { %3219 = vmatmul.f32.gmra.mxu0 %v3086_v42  ;;  %v2814_v42 = vld [vmem:[#allocation2 + $0xf8] sm:$0xff] }
 0x1bc   : > { %2671 = vmatmul.f32.gmra.mxu2 %v3357_v11  ;;  %2945 = vmatmul.f32.gmra.mxu3 %v2812_v24  ;;  %v3295_v40 = vadd.f32 %v3169_v35, %v3021_v48  ;;  %v3446_v41 = vpop.f32.mrf.mxu1  ;;  %v7438_v35 = vld [vmem:[%s12353_s3 + $0xd0] sm:$0xff]  ;;  %v3362_v48 = vld [vmem:[#allocation2 + $0xfa] sm:$0xff] }
 0x1bd   : > { %4760 = vmatpush.msra.mxu1 %v7438_v35  ;;  %v7400_v35 = vld [vmem:[%s12351_s1 + $0x3a0] sm:$0xff] }
 0x1be   : > { %v8635_v0 = vadd.f32 %v3443_v28, %v3295_v40  ;;  %v7417_v28 = vld [vmem:[%s12351_s1 + $0x428] sm:$0xff]  ;;  %v2405_v40 = vadd.f32 %v8413_v60, %v8409_v23  ;;  %v7384_v23 = vld [vmem:[%s12351_s1 + $0x320] sm:$0xff]  ;;  %v2408_v60 = vadd.f32 %v8421_v27, %v8417_v12  ;;  %3958 = vmatpush.msra.mxu3 %v7400_v35 }
 0x1bf   : > { %v2624_v53 = vpop.f32.mrf.mxu2  ;;  %v2898_v11 = vpop.f32.mrf.mxu3  ;;  %3493 = vmatmul.f32.gmra.mxu1 %v3360_v62  ;;  %4231 = vmatpush.msra.mxu0 %v7417_v28  ;;  %v2816_v28 = vld [vmem:[#allocation2 + $0x108] sm:$0xff] }
 0x1c0   : > { %12406 = vst [vmem:[#allocation15_spill] sm:$0xff] %v8635_v0  ;;  %v2748_v56 = vadd.f32 %v2624_v53, %v2399_v26  ;;  %v3175_v22 = vpop.f32.mrf.mxu0  ;;  %3684 = vmatpush.msra.mxu2 %v7384_v23  ;;  %v3092_v23 = vld [vmem:[#allocation2 + $0x119] sm:$0xff] }
 0x1c2   : > { %v3022_v43 = vadd.f32 %v2898_v11, %v2748_v56  ;;  %v3089_v11 = vld [vmem:[#allocation2 + $0x101] sm:$0xff] }
 0x1c3   : > { %3222 = vmatmul.f32.gmra.mxu0 %v3087_v55  ;;  %v2815_v56 = vld [vmem:[#allocation2 + $0x100] sm:$0xff] }
 0x1c4   : > { %2674 = vmatmul.f32.gmra.mxu2 %v3358_v61  ;;  %2948 = vmatmul.f32.gmra.mxu3 %v2813_v15  ;;  %v3296_v30 = vadd.f32 %v3172_v37, %v3022_v43  ;;  %v3449_v36 = vpop.f32.mrf.mxu1  ;;  %v3088_v61 = vld [vmem:[#allocation2 + $0xf9] sm:$0xff]  ;;  %v3363_v15 = vld [vmem:[#allocation2 + $0x102] sm:$0xff] }
 0x1c6   : > { %v8645_v5 = vadd.f32 %v3446_v41, %v3296_v30 }
 0x1c7   : > { %v2627_v20 = vpop.f32.mrf.mxu2  ;;  %v2901_v51 = vpop.f32.mrf.mxu3  ;;  %3496 = vmatmul.f32.gmra.mxu1 %v3361_v59 }
 0x1c8   : > { %12408 = vst [vmem:[#allocation19_spill] sm:$0xff] %v8645_v5  ;;  %v2749_v39 = vadd.f32 %v2627_v20, %v2402_v1  ;;  %v3178_v19 = vpop.f32.mrf.mxu0  ;;  %v3090_v1 = vld [vmem:[#allocation2 + $0x109] sm:$0xff] }
 0x1ca   : > { %v3023_v37 = vadd.f32 %v2901_v51, %v2749_v39  ;;  %v7437_v51 = vld [vmem:[%s12353_s3 + $0xc8] sm:$0xff] }
 0x1cb   : > { %3225 = vmatmul.f32.gmra.mxu0 %v3088_v61  ;;  %4761 = vmatpush.msra.mxu1 %v7437_v51  ;;  %v3364_v39 = vld [vmem:[#allocation2 + $0x10a] sm:$0xff]  ;;  %v3093_v51 = vld [vmem:[#allocation2 + $0x121] sm:$0xff] }
 0x1cc   : > { %2677 = vmatmul.f32.gmra.mxu2 %v3359_v3  ;;  %2951 = vmatmul.f32.gmra.mxu3 %v2814_v42  ;;  %v3297_v24 = vadd.f32 %v3175_v22, %v3023_v37  ;;  %v3452_v31 = vpop.f32.mrf.mxu1  ;;  %v7416_v42 = vld [vmem:[%s12351_s1 + $0x420] sm:$0xff] }
 0x1cd   : > { %4232 = vmatpush.msra.mxu0 %v7416_v42  ;;  %v3367_v42 = vld [vmem:[#allocation2 + $0x122] sm:$0xff] }
 0x1ce   : > { %v8652_v41 = vadd.f32 %v3449_v36, %v3297_v24 }
 0x1cf   : > { %v2630_v10 = vpop.f32.mrf.mxu2  ;;  %v2904_v26 = vpop.f32.mrf.mxu3  ;;  %3499 = vmatmul.f32.gmra.mxu1 %v3362_v48 }
 0x1d0   : > { %12409 = vst [vmem:[#allocation36_spill] sm:$0xff] %v8652_v41  ;;  %v2750_v29 = vadd.f32 %v2630_v10, %v2405_v40  ;;  %v3181_v53 = vpop.f32.mrf.mxu0  ;;  %v2817_v10 = vld [vmem:[#allocation2 + $0x110] sm:$0xff] }
 0x1d2   : > { %v3024_v55 = vadd.f32 %v2904_v26, %v2750_v29 }
 0x1d3   : > { %3228 = vmatmul.f32.gmra.mxu0 %v3089_v11 }
 0x1d4   : > { %2680 = vmatmul.f32.gmra.mxu2 %v3360_v62  ;;  %2954 = vmatmul.f32.gmra.mxu3 %v2815_v56  ;;  %v3298_v3 = vadd.f32 %v3178_v19, %v3024_v55  ;;  %v3455_v22 = vpop.f32.mrf.mxu1  ;;  %v2411_v19 = vadd.f32 %v8435_v38, %v8431_v16  ;;  %v3365_v38 = vld [vmem:[#allocation2 + $0x112] sm:$0xff] }
 0x1d6   : > { %v8659_v43 = vadd.f32 %v3452_v31, %v3298_v3 }
 0x1d7   : > { %v2633_v30 = vpop.f32.mrf.mxu2  ;;  %v2907_v62 = vpop.f32.mrf.mxu3  ;;  %3502 = vmatmul.f32.gmra.mxu1 %v3363_v15 }
 0x1d8   : > { %12410 = vst [vmem:[#allocation37_spill] sm:$0xff] %v8659_v43  ;;  %v2751_v36 = vadd.f32 %v2633_v30, %v2408_v60  ;;  %v3184_v58 = vpop.f32.mrf.mxu0  ;;  %v2818_v60 = vld [vmem:[#allocation2 + $0x118] sm:$0xff] }
 0x1da   : > { %v3025_v20 = vadd.f32 %v2907_v62, %v2751_v36  ;;  %v3366_v62 = vld [vmem:[#allocation2 + $0x11a] sm:$0xff] }
 0x1db   : > { %3231 = vmatmul.f32.gmra.mxu0 %v3090_v1 }
 0x1dc   : > { %2683 = vmatmul.f32.gmra.mxu2 %v3361_v59  ;;  %2957 = vmatmul.f32.gmra.mxu3 %v2816_v28  ;;  %v3299_v12 = vadd.f32 %v3181_v53, %v3025_v20  ;;  %v3458_v27 = vpop.f32.mrf.mxu1  ;;  %v3091_v59 = vld [vmem:[#allocation2 + $0x111] sm:$0xff]  ;;  %v2414_v53 = vadd.f32 %v8446_v14, %v8442_v63  ;;  %v2417_v14 = vadd.f32 %v8454_v18, %v8450_v32 }
 0x1dd   : > { %v7383_v63 = vld [vmem:[%s12351_s1 + $0x318] sm:$0xff] }
 0x1de   : > { %v8669_v61 = vadd.f32 %v3455_v22, %v3299_v12  ;;  %3685 = vmatpush.msra.mxu2 %v7383_v63  ;;  %v2819_v12 = vld [vmem:[#allocation2 + $0x120] sm:$0xff] }
 0x1df   : > { %v2636_v37 = vpop.f32.mrf.mxu2  ;;  %v2910_v24 = vpop.f32.mrf.mxu3  ;;  %3505 = vmatmul.f32.gmra.mxu1 %v3364_v39 }
 0x1e0   : > { %12411 = vst [vmem:[#allocation38_spill] sm:$0xff] %v8669_v61  ;;  %v2752_v31 = vadd.f32 %v2636_v37, %v2411_v19  ;;  %v3187_v40 = vpop.f32.mrf.mxu0  ;;  %v7436_v19 = vld [vmem:[%s12353_s3 + $0xc0] sm:$0xff]  ;;  %v2420_v37 = vadd.f32 %v8468_v57, %v8464_v2  ;;  %v3368_v57 = vld [vmem:[#allocation2 + $0x12a] sm:$0xff] }
 0x1e1   : > { %4762 = vmatpush.msra.mxu1 %v7436_v19  ;;  %v7435_v19 = vld [vmem:[%s12353_s3 + $0xb8] sm:$0xff] }
 0x1e2   : > { %v3026_v26 = vadd.f32 %v2910_v24, %v2752_v31  ;;  %v7415_v31 = vld [vmem:[%s12351_s1 + $0x418] sm:$0xff] }
 0x1e3   : > { %3234 = vmatmul.f32.gmra.mxu0 %v3091_v59  ;;  %4763 = vmatpush.msra.mxu1 %v7435_v19  ;;  %v12421_v19 = vld [vmem:[#allocation33_spill] sm:$0xff]  ;;  %v3894_v61 = vld [vmem:[#allocation2 + $0x91] sm:$0xff] }
 0x1e4   : > { %2686 = vmatmul.f32.gmra.mxu2 %v3362_v48  ;;  %2960 = vmatmul.f32.gmra.mxu3 %v2817_v10  ;;  %v3300_v29 = vadd.f32 %v3184_v58, %v3026_v26  ;;  %v3461_v16 = vpop.f32.mrf.mxu1  ;;  %v7399_v58 = vld [vmem:[%s12351_s1 + $0x398] sm:$0xff] }
 0x1e5   : > { %3959 = vmatpush.msra.mxu3 %v7399_v58  ;;  %4233 = vmatpush.msra.mxu0 %v7415_v31  ;;  %v7414_v31 = vld [vmem:[%s12351_s1 + $0x410] sm:$0xff] }
 0x1e6   : > { %v8676_v11 = vadd.f32 %v3458_v27, %v3300_v29  ;;  %v2820_v29 = vld [vmem:[#allocation2 + $0x128] sm:$0xff] }
 0x1e7   : > { %v2639_v56 = vpop.f32.mrf.mxu2  ;;  %v2913_v55 = vpop.f32.mrf.mxu3  ;;  %3508 = vmatmul.f32.gmra.mxu1 %v3365_v38  ;;  %4234 = vmatpush.msra.mxu0 %v7414_v31  ;;  %v7413_v31 = vld [vmem:[%s12351_s1 + $0x408] sm:$0xff] }
 0x1e8   : > { %12412 = vst [vmem:[#allocation39_spill] sm:$0xff] %v8676_v11  ;;  %v2753_v3 = vadd.f32 %v2639_v56, %v2414_v53  ;;  %v3190_v22 = vpop.f32.mrf.mxu0  ;;  %v2423_v56 = vadd.f32 %v8479_v34, %v8475_v6  ;;  %v7382_v6 = vld [vmem:[%s12351_s1 + $0x310] sm:$0xff]  ;;  %v2426_v34 = vadd.f32 %v8487_v49, %v8483_v52  ;;  %v12356_v11 = vmov 0  }
 0x1e9   : > { %3686 = vmatpush.msra.mxu2 %v7382_v6  ;;  %v7397_v6 = vld [vmem:[%s12351_s1 + $0x388] sm:$0xff]  ;;  %4235 = vmatpush.msra.mxu0 %v7413_v31 }
 0x1ea   : > { %v3027_v35 = vadd.f32 %v2913_v55, %v2753_v3 }
 0x1eb   : > { %3237 = vmatmul.f32.gmra.mxu0 %v3092_v23 }
 0x1ec   : > { %2689 = vmatmul.f32.gmra.mxu2 %v3363_v15  ;;  %2963 = vmatmul.f32.gmra.mxu3 %v2818_v60  ;;  %v3301_v48 = vadd.f32 %v3187_v40, %v3027_v35  ;;  %v3464_v30 = vpop.f32.mrf.mxu1  ;;  %v3095_v35 = vld [vmem:[#allocation2 + $0x131] sm:$0xff] }
 0x1ee   : > { %v8683_v36 = vadd.f32 %v3461_v16, %v3301_v48  ;;  %v2821_v48 = vld [vmem:[#allocation2 + $0x130] sm:$0xff] }
 0x1ef   : > { %v2642_v1 = vpop.f32.mrf.mxu2  ;;  %v2916_v15 = vpop.f32.mrf.mxu3  ;;  %3511 = vmatmul.f32.gmra.mxu1 %v3366_v62 }
 0x1f0   : > { %12413 = vst [vmem:[#allocation40_spill] sm:$0xff] %v8683_v36  ;;  %v2754_v28 = vadd.f32 %v2642_v1, %v2417_v14  ;;  %v3193_v20 = vpop.f32.mrf.mxu0  ;;  %v3369_v14 = vld [vmem:[#allocation2 + $0x132] sm:$0xff] }
 0x1f1   : > { %v7398_v1 = vld [vmem:[%s12351_s1 + $0x390] sm:$0xff] }
 0x1f2   : > { %v3028_v27 = vadd.f32 %v2916_v15, %v2754_v28  ;;  %3960 = vmatpush.msra.mxu3 %v7398_v1 }
 0x1f3   : > { %3240 = vmatmul.f32.gmra.mxu0 %v3093_v51  ;;  %v3096_v51 = vld [vmem:[#allocation2 + $0x139] sm:$0xff] }
 0x1f4   : > { %2692 = vmatmul.f32.gmra.mxu2 %v3364_v39  ;;  %2966 = vmatmul.f32.gmra.mxu3 %v2819_v12  ;;  %v3302_v32 = vadd.f32 %v3190_v22, %v3028_v27  ;;  %v3467_v18 = vpop.f32.mrf.mxu1  ;;  %v3094_v39 = vld [vmem:[#allocation2 + $0x129] sm:$0xff]  ;;  %v2822_v12 = vld [vmem:[#allocation2 + $0x138] sm:$0xff] }
 0x1f5   : > { %3961 = vmatpush.msra.mxu3 %v7397_v6  ;;  %v7380_v6 = vld [vmem:[%s12351_s1 + $0x300] sm:$0xff] }
 0x1f6   : > { %v8693_v24 = vadd.f32 %v3464_v30, %v3302_v32  ;;  %v3370_v32 = vld [vmem:[#allocation2 + $0x13a] sm:$0xff] }
 0x1f7   : > { %v2645_v40 = vpop.f32.mrf.mxu2  ;;  %v2919_v59 = vpop.f32.mrf.mxu3  ;;  %3514 = vmatmul.f32.gmra.mxu1 %v3367_v42 }
 0x1f8   : > { %12414 = vst [vmem:[#allocation41_spill] sm:$0xff] %v8693_v24  ;;  %v2755_v10 = vadd.f32 %v2645_v40, %v2420_v37  ;;  %v3196_v26 = vpop.f32.mrf.mxu0 }
 0x1fa   : > { %v3029_v16 = vadd.f32 %v2919_v59, %v2755_v10 }
 0x1fb   : > { %3243 = vmatmul.f32.gmra.mxu0 %v3094_v39  ;;  %v2823_v39 = vld [vmem:[#allocation2 + $0x140] sm:$0xff] }
 0x1fc   : > { %2695 = vmatmul.f32.gmra.mxu2 %v3365_v38  ;;  %2969 = vmatmul.f32.gmra.mxu3 %v2820_v29  ;;  %v3303_v53 = vadd.f32 %v3193_v20, %v3029_v16  ;;  %v3470_v2 = vpop.f32.mrf.mxu1 }
 0x1fe   : > { %v8700_v55 = vadd.f32 %v3467_v18, %v3303_v53  ;;  %v2429_v18 = vadd.f32 %v8504_v45, %v8497_v21  ;;  %v3371_v21 = vld [vmem:[#allocation2 + $0x142] sm:$0xff]  ;;  %v2432_v45 = vadd.f32 %v8515_v54, %v8511_v50  ;;  %v12419_v54 = vld [vmem:[#allocation31_spill] sm:$0xff] }
 0x1ff   : > { %v2648_v3 = vpop.f32.mrf.mxu2  ;;  %v2922_v22 = vpop.f32.mrf.mxu3  ;;  %3517 = vmatmul.f32.gmra.mxu1 %v3368_v57  ;;  %v7381_v50 = vld [vmem:[%s12351_s1 + $0x308] sm:$0xff] }
 0x200   : > { %12415 = vst [vmem:[#allocation42_spill] sm:$0xff] %v8700_v55  ;;  %v2756_v23 = vadd.f32 %v2648_v3, %v2423_v56  ;;  %v3199_v60 = vpop.f32.mrf.mxu0  ;;  %3687 = vmatpush.msra.mxu2 %v7381_v50 }
 0x202   : > { %v3030_v30 = vadd.f32 %v2922_v22, %v2756_v23  ;;  %3688 = vmatpush.msra.mxu2 %v7380_v6 }
 0x203   : > { %3246 = vmatmul.f32.gmra.mxu0 %v3095_v35  ;;  %v2824_v35 = vld [vmem:[#allocation2 + $0x148] sm:$0xff] }
 0x204   : > { %2698 = vmatmul.f32.gmra.mxu2 %v3366_v62  ;;  %2972 = vmatmul.f32.gmra.mxu3 %v2821_v48  ;;  %v3304_v38 = vadd.f32 %v3196_v26, %v3030_v30  ;;  %v3473_v63 = vpop.f32.mrf.mxu1  ;;  %v3372_v30 = vld [vmem:[#allocation2 + $0x14a] sm:$0xff] }
 0x206   : > { %v8707_v58 = vadd.f32 %v3470_v2, %v3304_v38  ;;  %v2435_v38 = vadd.f32 %v12419_v54, %v8519_v44  ;;  %v7434_v44 = vld [vmem:[%s12353_s3 + $0xb0] sm:$0xff] }
 0x207   : > { %v2651_v15 = vpop.f32.mrf.mxu2  ;;  %v2925_v62 = vpop.f32.mrf.mxu3  ;;  %3520 = vmatmul.f32.gmra.mxu1 %v3369_v14  ;;  %v8754_v54 = vld [vmem:[%s7752_s22 + $0x170] sm:$0xff] }
 0x208   : > { %12416 = vst [vmem:[#allocation43_spill] sm:$0xff] %v8707_v58  ;;  %v2757_v28 = vadd.f32 %v2651_v15, %v2426_v34  ;;  %v3202_v20 = vpop.f32.mrf.mxu0  ;;  %4764 = vmatpush.msra.mxu1 %v7434_v44  ;;  %v7433_v44 = vld [vmem:[%s12353_s3 + $0xa8] sm:$0xff] }
 0x209   : > { %329 = vst [vmem:[#allocation2 + $0x189] sm:$0xff] %v8754_v54  ;;  %v3619_v58 = vld [vmem:[#allocation2 + $0x88] sm:$0xff] }
 0x20a   : > { %v3031_v27 = vadd.f32 %v2925_v62, %v2757_v28  ;;  %v3099_v62 = vld [vmem:[#allocation2 + $0x151] sm:$0xff]  ;;  %4765 = vmatpush.msra.mxu1 %v7433_v44 }
 0x20b   : > { %3249 = vmatmul.f32.gmra.mxu0 %v3096_v51  ;;  %v2825_v28 = vld [vmem:[#allocation2 + $0x150] sm:$0xff] }
 0x20c   : > { %2701 = vmatmul.f32.gmra.mxu2 %v3367_v42  ;;  %2975 = vmatmul.f32.gmra.mxu3 %v2822_v12  ;;  %v3305_v52 = vadd.f32 %v3199_v60, %v3031_v27  ;;  %v3476_v49 = vpop.f32.mrf.mxu1  ;;  %v3097_v42 = vld [vmem:[#allocation2 + $0x141] sm:$0xff]  ;;  %v3098_v60 = vld [vmem:[#allocation2 + $0x149] sm:$0xff]  ;;  %v3373_v27 = vld [vmem:[#allocation2 + $0x152] sm:$0xff] }
 0x20e   : > { %v8717_v37 = vadd.f32 %v3473_v63, %v3305_v52  ;;  %v12422_v52 = vld [vmem:[#allocation34_spill] sm:$0xff] }
 0x20f   : > { %v2654_v40 = vpop.f32.mrf.mxu2  ;;  %v2928_v59 = vpop.f32.mrf.mxu3  ;;  %3523 = vmatmul.f32.gmra.mxu1 %v3370_v32 }
 0x210   : > { %12417 = vst [vmem:[#allocation44_spill] sm:$0xff] %v8717_v37  ;;  %v2758_v10 = vadd.f32 %v2654_v40, %v2429_v18  ;;  %v3205_v26 = vpop.f32.mrf.mxu0 }
 0x212   : > { %v3032_v29 = vadd.f32 %v2928_v59, %v2758_v10 }
 0x213   : > { %3252 = vmatmul.f32.gmra.mxu0 %v3097_v42  ;;  %v2826_v42 = vld [vmem:[#allocation2 + $0x158] sm:$0xff] }
 0x214   : > { %2704 = vmatmul.f32.gmra.mxu2 %v3368_v57  ;;  %2978 = vmatmul.f32.gmra.mxu3 %v2823_v39  ;;  %v3306_v16 = vadd.f32 %v3202_v20, %v3032_v29  ;;  %v3479_v2 = vpop.f32.mrf.mxu1 }
 0x216   : > { %v8724_v53 = vadd.f32 %v3476_v49, %v3306_v16  ;;  %v2438_v49 = vadd.f32 %v12422_v52, %v12421_v19  ;;  %v8747_v16 = vld [vmem:[%s7752_s22 + $0x168] sm:$0xff] }
 0x217   : > { %v2657_v56 = vpop.f32.mrf.mxu2  ;;  %v2931_v3 = vpop.f32.mrf.mxu3  ;;  %3526 = vmatmul.f32.gmra.mxu1 %v3371_v21  ;;  %328 = vst [vmem:[#allocation2 + $0x181] sm:$0xff] %v8747_v16  ;;  %v3376_v52 = vld [vmem:[#allocation2 + $0x16a] sm:$0xff] }
 0x218   : > { %12418 = vst [vmem:[#allocation45_spill] sm:$0xff] %v8724_v53  ;;  %v2759_v22 = vadd.f32 %v2657_v56, %v2432_v45  ;;  %v3208_v23 = vpop.f32.mrf.mxu0 }
 0x21a   : > { %v3033_v48 = vadd.f32 %v2931_v3, %v2759_v22 }
 0x21b   : > { %3255 = vmatmul.f32.gmra.mxu0 %v3098_v60 }
 0x21c   : > { %2707 = vmatmul.f32.gmra.mxu2 %v3369_v14  ;;  %2981 = vmatmul.f32.gmra.mxu3 %v2824_v35  ;;  %v3307_v57 = vadd.f32 %v3205_v26, %v3033_v48  ;;  %v3482_v20 = vpop.f32.mrf.mxu1  ;;  %v3101_v48 = vld [vmem:[#allocation2 + $0x161] sm:$0xff] }
 0x21e   : > { %v8731_v63 = vadd.f32 %v3479_v2, %v3307_v57  ;;  %v3374_v2 = vld [vmem:[#allocation2 + $0x15a] sm:$0xff] }
 0x21f   : > { %v2660_v34 = vpop.f32.mrf.mxu2  ;;  %v2934_v1 = vpop.f32.mrf.mxu3  ;;  %3529 = vmatmul.f32.gmra.mxu1 %v3372_v30  ;;  %v2827_v57 = vld [vmem:[#allocation2 + $0x160] sm:$0xff] }
 0x220   : > { %12420 = vst [vmem:[#allocation31_spill] sm:$0xff] %v8731_v63  ;;  %v2760_v14 = vadd.f32 %v2660_v34, %v2435_v38  ;;  %v3211_v15 = vpop.f32.mrf.mxu0  ;;  %v3375_v38 = vld [vmem:[#allocation2 + $0x162] sm:$0xff]  ;;  %v3378_v6 = vld [vmem:[#allocation2 + $0x17a] sm:$0xff] }
 0x221   : > { %v7396_v34 = vld [vmem:[%s12351_s1 + $0x380] sm:$0xff] }
 0x222   : > { %v3034_v51 = vadd.f32 %v2934_v1, %v2760_v14  ;;  %3962 = vmatpush.msra.mxu3 %v7396_v34 }
 0x223   : > { %3258 = vmatmul.f32.gmra.mxu0 %v3099_v62 }
 0x224   : > { %2710 = vmatmul.f32.gmra.mxu2 %v3370_v32  ;;  %2984 = vmatmul.f32.gmra.mxu3 %v2825_v28  ;;  %v3308_v12 = vadd.f32 %v3208_v23, %v3034_v51  ;;  %v3100_v32 = vld [vmem:[#allocation2 + $0x159] sm:$0xff]  ;;  %v3485_v29 = vpop.f32.mrf.mxu1  ;;  %v3102_v28 = vld [vmem:[#allocation2 + $0x169] sm:$0xff] }
 0x225   : > { %v12425_v23 = vld [vmem:[#allocation3_spill] sm:$0xff] }
 0x226   : > { %v8741_v18 = vadd.f32 %v3482_v20, %v3308_v12  ;;  %v2828_v20 = vld [vmem:[#allocation2 + $0x168] sm:$0xff]  ;;  %v8770_v12 = vld [vmem:[%s7752_s22 + $0x178] sm:$0xff] }
 0x227   : > { %v2663_v40 = vpop.f32.mrf.mxu2  ;;  %v2937_v59 = vpop.f32.mrf.mxu3  ;;  %3532 = vmatmul.f32.gmra.mxu1 %v3373_v27  ;;  %330 = vst [vmem:[#allocation2 + $0x191] sm:$0xff] %v8770_v12 }
 0x228   : > { %12423 = vst [vmem:[#allocation33_spill] sm:$0xff] %v8741_v18  ;;  %v2761_v10 = vadd.f32 %v2663_v40, %v2438_v49  ;;  %v3214_v26 = vpop.f32.mrf.mxu0  ;;  %v7412_v49 = vld [vmem:[%s12351_s1 + $0x400] sm:$0xff] }
 0x229   : > { %4236 = vmatpush.msra.mxu0 %v7412_v49  ;;  %v12430_v49 = vld [vmem:[#allocation8_spill] sm:$0xff] }
 0x22a   : > { %v3035_v39 = vadd.f32 %v2937_v59, %v2761_v10  ;;  %v12427_v59 = vld [vmem:[#allocation5_spill] sm:$0xff]  ;;  %v3891_v18 = vld [vmem:[#allocation2 + $0x79] sm:$0xff] }
 0x22b   : > { %3261 = vmatmul.f32.gmra.mxu0 %v3100_v32  ;;  %v3103_v32 = vld [vmem:[#allocation2 + $0x171] sm:$0xff] }
 0x22c   : > { %2713 = vmatmul.f32.gmra.mxu2 %v3371_v21  ;;  %2987 = vmatmul.f32.gmra.mxu3 %v2826_v42  ;;  %v3309_v45 = vadd.f32 %v3211_v15, %v3035_v39  ;;  %v2829_v42 = vld [vmem:[#allocation2 + $0x170] sm:$0xff] }
 0x22e   : > { %v8750_v56 = vadd.f32 %v3485_v29, %v3309_v45  ;;  %v3377_v29 = vld [vmem:[#allocation2 + $0x172] sm:$0xff] }
 0x22f   : > { %v2666_v3 = vpop.f32.mrf.mxu2  ;;  %v2940_v22 = vpop.f32.mrf.mxu3  ;;  %3535 = vmatmul.f32.gmra.mxu1 %v3374_v2 }
 0x230   : > { %12424 = vst [vmem:[#allocation34_spill] sm:$0xff] %v8750_v56  ;;  %v2762_v60 = vadd.f32 %v2666_v3, %v12425_v23  ;;  %v3217_v35 = vpop.f32.mrf.mxu0  ;;  %v3617_v56 = vld [vmem:[#allocation2 + $0x78] sm:$0xff] }
 0x232   : > { %v3036_v50 = vadd.f32 %v2940_v22, %v2762_v60  ;;  %v12428_v22 = vld [vmem:[#allocation6_spill] sm:$0xff] }
 0x233   : > { %3264 = vmatmul.f32.gmra.mxu0 %v3101_v48  ;;  %v2830_v48 = vld [vmem:[#allocation2 + $0x178] sm:$0xff] }
 0x234   : > { %2716 = vmatmul.f32.gmra.mxu2 %v3372_v30  ;;  %2990 = vmatmul.f32.gmra.mxu3 %v2827_v57  ;;  %v8756_v21 = vadd.f32 %v3214_v26, %v3036_v50  ;;  %v12426_v30 = vld [vmem:[#allocation4_spill] sm:$0xff] }
 0x237   : > { %v2669_v1 = vpop.f32.mrf.mxu2  ;;  %v2943_v14 = vpop.f32.mrf.mxu3  ;;  %3538 = vmatmul.f32.gmra.mxu1 %v3375_v38 }
 0x238   : > { %v2763_v15 = vadd.f32 %v2669_v1, %v12426_v30  ;;  %v3220_v62 = vpop.f32.mrf.mxu0  ;;  %v12429_v1 = vld [vmem:[#allocation7_spill] sm:$0xff] }
 0x23a   : > { %v3037_v51 = vadd.f32 %v2943_v14, %v2763_v15  ;;  %v2831_v15 = vld [vmem:[#allocation2 + $0x180] sm:$0xff] }
 0x23b   : > { %3267 = vmatmul.f32.gmra.mxu0 %v3102_v28  ;;  %v7432_v28 = vld [vmem:[%s12353_s3 + $0xa0] sm:$0xff] }
 0x23c   : > { %2719 = vmatmul.f32.gmra.mxu2 %v3373_v27  ;;  %2993 = vmatmul.f32.gmra.mxu3 %v2828_v20  ;;  %v8772_v19 = vadd.f32 %v3217_v35, %v3037_v51  ;;  %v3104_v35 = vld [vmem:[#allocation2 + $0x179] sm:$0xff]  ;;  %v3379_v20 = vld [vmem:[#allocation2 + $0x182] sm:$0xff] }
 0x23d   : > { %4766 = vmatpush.msra.mxu1 %v7432_v28  ;;  %v12433_v28 = vld [vmem:[#allocation16_spill] sm:$0xff] }
 0x23f   : > { %v2672_v31 = vpop.f32.mrf.mxu2  ;;  %v2946_v40 = vpop.f32.mrf.mxu3  ;;  %3541 = vmatmul.f32.gmra.mxu1 %v3376_v52 }
 0x240   : > { %v2764_v10 = vadd.f32 %v2672_v31, %v12427_v59  ;;  %v3223_v26 = vpop.f32.mrf.mxu0  ;;  %v2832_v59 = vld [vmem:[#allocation2 + $0x188] sm:$0xff] }
 0x242   : > { %v3038_v27 = vadd.f32 %v2946_v40, %v2764_v10 }
 0x243   : > { %3270 = vmatmul.f32.gmra.mxu0 %v3103_v32 }
 0x244   : > { %2722 = vmatmul.f32.gmra.mxu2 %v3374_v2  ;;  %2996 = vmatmul.f32.gmra.mxu3 %v2829_v42  ;;  %v8779_v39 = vadd.f32 %v3220_v62, %v3038_v27  ;;  %v12431_v42 = vld [vmem:[#allocation10_spill] sm:$0xff] }
 0x247   : > { %v2675_v45 = vpop.f32.mrf.mxu2  ;;  %v2949_v3 = vpop.f32.mrf.mxu3  ;;  %3544 = vmatmul.f32.gmra.mxu1 %v3377_v29 }
 0x248   : > { %v2765_v23 = vadd.f32 %v2675_v45, %v12428_v22  ;;  %v3226_v60 = vpop.f32.mrf.mxu0 }
 0x24a   : > { %v3039_v57 = vadd.f32 %v2949_v3, %v2765_v23  ;;  %v2833_v3 = vld [vmem:[#allocation2 + $0x190] sm:$0xff] }
 0x24b   : > { %3273 = vmatmul.f32.gmra.mxu0 %v3104_v35  ;;  %v12432_v35 = vld [vmem:[#allocation13_spill] sm:$0xff] }
 0x24c   : > { %2725 = vmatmul.f32.gmra.mxu2 %v3375_v38  ;;  %2999 = vmatmul.f32.gmra.mxu3 %v2830_v48  ;;  %v8782_v50 = vadd.f32 %v3223_v26, %v3039_v57 }
 0x24f   : > { %v2678_v2 = vpop.f32.mrf.mxu2  ;;  %v2952_v34 = vpop.f32.mrf.mxu3  ;;  %3547 = vmatmul.f32.gmra.mxu1 %v3378_v6 }
 0x250   : > { %v2766_v14 = vadd.f32 %v2678_v2, %v12429_v1  ;;  %v3229_v30 = vpop.f32.mrf.mxu0  ;;  %v4156_v2 = vld [vmem:[#allocation2 + $0x32] sm:$0xff] }
 0x251   : > { %v3882_v1 = vld [vmem:[#allocation2 + $0x31] sm:$0xff] }
 0x252   : > { %v3040_v62 = vadd.f32 %v2952_v34, %v2766_v14  ;;  %v3608_v34 = vld [vmem:[#allocation2 + $0x30] sm:$0xff] }
 0x253   : > { %3276 = vmatmul.f32.gmra.mxu0 %v8747_v16  ;;  %v3380_v16 = vld [vmem:[#allocation2 + $0x18a] sm:$0xff] }
 0x254   : > { %2728 = vmatmul.f32.gmra.mxu2 %v3376_v52  ;;  %3002 = vmatmul.f32.gmra.mxu3 %v2831_v15  ;;  %v8789_v38 = vadd.f32 %v3226_v60, %v3040_v62 }
 0x257   : > { %v2681_v51 = vpop.f32.mrf.mxu2  ;;  %v2955_v44 = vpop.f32.mrf.mxu3  ;;  %3550 = vmatmul.f32.gmra.mxu1 %v3379_v20 }
 0x258   : > { %v2767_v31 = vadd.f32 %v2681_v51, %v12430_v49  ;;  %v3232_v40 = vpop.f32.mrf.mxu0  ;;  %v3609_v49 = vld [vmem:[#allocation2 + $0x38] sm:$0xff] }
 0x25a   : > { %v3041_v10 = vadd.f32 %v2955_v44, %v2767_v31  ;;  %v4157_v44 = vld [vmem:[#allocation2 + $0x3a] sm:$0xff] }
 0x25b   : > { %3279 = vmatmul.f32.gmra.mxu0 %v8754_v54  ;;  %v3381_v54 = vld [vmem:[#allocation2 + $0x192] sm:$0xff] }
 0x25c   : > { %2731 = vmatmul.f32.gmra.mxu2 %v3377_v29  ;;  %3005 = vmatmul.f32.gmra.mxu3 %v2832_v59  ;;  %v8793_v26 = vadd.f32 %v3229_v30, %v3041_v10  ;;  %v7431_v30 = vld [vmem:[%s12353_s3 + $0x98] sm:$0xff] }
 0x25d   : > { %4767 = vmatpush.msra.mxu1 %v7431_v30  ;;  %v3883_v31 = vld [vmem:[#allocation2 + $0x39] sm:$0xff]  ;;  %v3885_v30 = vld [vmem:[#allocation2 + $0x49] sm:$0xff] }
 0x25f   : > { %v2684_v52 = vpop.f32.mrf.mxu2  ;;  %v2958_v32 = vpop.f32.mrf.mxu3  ;;  %3553 = vmatmul.f32.gmra.mxu1 %v3380_v16 }
 0x260   : > { %v2768_v27 = vadd.f32 %v2684_v52, %v12431_v42  ;;  %v3235_v45 = vpop.f32.mrf.mxu0 }
 0x262   : > { %v3042_v22 = vadd.f32 %v2958_v32, %v2768_v27  ;;  %v12434_v32 = vld [vmem:[#allocation17_spill] sm:$0xff] }
 0x263   : > { %3282 = vmatmul.f32.gmra.mxu0 %v8770_v12  ;;  %v8803_v12 = vpop.f32.mrf.mxu1 }
 0x264   : > { %2734 = vmatmul.f32.gmra.mxu2 %v3378_v6  ;;  %3008 = vmatmul.f32.gmra.mxu3 %v2833_v3  ;;  %v8797_v23 = vadd.f32 %v3232_v40, %v3042_v22  ;;  %v3610_v3 = vld [vmem:[#allocation2 + $0x40] sm:$0xff] }
 0x265   : > { %v3884_v22 = vld [vmem:[#allocation2 + $0x41] sm:$0xff] }
 0x267   : > { %v2687_v29 = vpop.f32.mrf.mxu2  ;;  %v2961_v60 = vpop.f32.mrf.mxu3  ;;  %3556 = vmatmul.f32.gmra.mxu1 %v3381_v54 }
 0x268   : > { %v2769_v48 = vadd.f32 %v2687_v29, %v12432_v35  ;;  %v3238_v57 = vpop.f32.mrf.mxu0 }
 0x26a   : > { %v3043_v14 = vadd.f32 %v2961_v60, %v2769_v48 }
 0x26b   : > { %4237 = vmatmul.f32.vlgmr.msra.gmra.mxu0 %v4156_v2  ;;  %v8810_v10 = vpop.f32.mrf.mxu1 }
 0x26c   : > { %3689 = vmatmul.f32.vlgmr.msra.gmra.mxu2 %v3608_v34  ;;  %3963 = vmatmul.f32.vlgmr.msra.gmra.mxu3 %v3882_v1  ;;  %v8805_v6 = vadd.f32 %v3235_v45, %v3043_v14  ;;  %v4158_v45 = vld [vmem:[#allocation2 + $0x42] sm:$0xff]  ;;  %v4159_v1 = vld [vmem:[#allocation2 + $0x4a] sm:$0xff] }
 0x26d   : > { %v3611_v14 = vld [vmem:[#allocation2 + $0x48] sm:$0xff] }
 0x26f   : > { %v2690_v15 = vpop.f32.mrf.mxu2  ;;  %v2964_v62 = vpop.f32.mrf.mxu3 }
 0x270   : > { %v2770_v20 = vadd.f32 %v2690_v15, %v12433_v28  ;;  %v3241_v51 = vpop.f32.mrf.mxu0 }
 0x272   : > { %v3044_v40 = vadd.f32 %v2964_v62, %v2770_v20  ;;  %v7430_v62 = vld [vmem:[%s12353_s3 + $0x90] sm:$0xff] }
 0x273   : > { %4240 = vmatmul.f32.gmra.mxu0 %v4157_v44  ;;  %v8815_v48 = vpop.f32.mrf.mxu1  ;;  %4768 = vmatpush.msra.mxu1 %v7430_v62  ;;  %v12436_v44 = vld [vmem:[#allocation20_spill] sm:$0xff] }
 0x274   : > { %3692 = vmatmul.f32.gmra.mxu2 %v3609_v49  ;;  %3966 = vmatmul.f32.gmra.mxu3 %v3883_v31  ;;  %v8808_v59 = vadd.f32 %v3238_v57, %v3044_v40  ;;  %v12435_v57 = vld [vmem:[#allocation18_spill] sm:$0xff] }
 0x275   : > { %v4160_v40 = vld [vmem:[#allocation2 + $0x52] sm:$0xff] }
 0x277   : > { %v2693_v16 = vpop.f32.mrf.mxu2  ;;  %v2967_v52 = vpop.f32.mrf.mxu3 }
 0x278   : > { %v2771_v42 = vadd.f32 %v2693_v16, %v12434_v32  ;;  %v3244_v27 = vpop.f32.mrf.mxu0  ;;  %v3612_v16 = vld [vmem:[#allocation2 + $0x50] sm:$0xff] }
 0x27a   : > { %v3045_v54 = vadd.f32 %v2967_v52, %v2771_v42  ;;  %v3886_v52 = vld [vmem:[#allocation2 + $0x51] sm:$0xff] }
 0x27b   : > { %4243 = vmatmul.f32.gmra.mxu0 %v4158_v45  ;;  %v8824_v32 = vpop.f32.mrf.mxu1 }
 0x27c   : > { %3695 = vmatmul.f32.gmra.mxu2 %v3610_v3  ;;  %3969 = vmatmul.f32.gmra.mxu3 %v3884_v22  ;;  %v8813_v29 = vadd.f32 %v3241_v51, %v3045_v54 }
 0x27f   : > { %v2696_v60 = vpop.f32.mrf.mxu2  ;;  %v2970_v35 = vpop.f32.mrf.mxu3 }
 0x280   : > { %v2772_v2 = vadd.f32 %v2696_v60, %v12435_v57  ;;  %v3247_v34 = vpop.f32.mrf.mxu0  ;;  %v3613_v57 = vld [vmem:[#allocation2 + $0x58] sm:$0xff] }
 0x282   : > { %v3046_v15 = vadd.f32 %v2970_v35, %v2772_v2  ;;  %v4161_v35 = vld [vmem:[#allocation2 + $0x5a] sm:$0xff] }
 0x283   : > { %4246 = vmatmul.f32.gmra.mxu0 %v4159_v1  ;;  %v3887_v2 = vld [vmem:[#allocation2 + $0x59] sm:$0xff] }
 0x284   : > { %3698 = vmatmul.f32.gmra.mxu2 %v3611_v14  ;;  %3972 = vmatmul.f32.gmra.mxu3 %v3885_v30  ;;  %v8821_v28 = vadd.f32 %v3244_v27, %v3046_v15  ;;  %v12437_v27 = vld [vmem:[#allocation21_spill] sm:$0xff]  ;;  %v8829_v14 = vpop.f32.mrf.mxu1 }
 0x287   : > { %v2699_v20 = vpop.f32.mrf.mxu2  ;;  %v2973_v51 = vpop.f32.mrf.mxu3 }
 0x288   : > { %v2773_v49 = vadd.f32 %v2699_v20, %v12436_v44  ;;  %v3250_v31 = vpop.f32.mrf.mxu0  ;;  %v4162_v44 = vld [vmem:[#allocation2 + $0x62] sm:$0xff] }
 0x28a   : > { %v3047_v42 = vadd.f32 %v2973_v51, %v2773_v49  ;;  %v3614_v49 = vld [vmem:[#allocation2 + $0x60] sm:$0xff] }
 0x28b   : > { %4249 = vmatmul.f32.gmra.mxu0 %v4160_v40  ;;  %v3888_v40 = vld [vmem:[#allocation2 + $0x61] sm:$0xff] }
 0x28c   : > { %3701 = vmatmul.f32.gmra.mxu2 %v3612_v16  ;;  %3975 = vmatmul.f32.gmra.mxu3 %v3886_v52  ;;  %v8826_v45 = vadd.f32 %v3247_v34, %v3047_v42  ;;  %v12438_v34 = vld [vmem:[#allocation22_spill] sm:$0xff]  ;;  %v7429_v52 = vld [vmem:[%s12353_s3 + $0x88] sm:$0xff] }
 0x28d   : > { %4769 = vmatpush.msra.mxu1 %v7429_v52  ;;  %v3616_v52 = vld [vmem:[#allocation2 + $0x70] sm:$0xff] }
 0x28f   : > { %v2702_v3 = vpop.f32.mrf.mxu2  ;;  %v2976_v22 = vpop.f32.mrf.mxu3 }
 0x290   : > { %v2774_v54 = vadd.f32 %v2702_v3, %v12437_v27  ;;  %v3253_v60 = vpop.f32.mrf.mxu0  ;;  %v12439_v27 = vld [vmem:[#allocation23_spill] sm:$0xff] }
 0x292   : > { %v3048_v1 = vadd.f32 %v2976_v22, %v2774_v54 }
 0x293   : > { %4252 = vmatmul.f32.gmra.mxu0 %v4161_v35 }
 0x294   : > { %3704 = vmatmul.f32.gmra.mxu2 %v3613_v57  ;;  %3978 = vmatmul.f32.gmra.mxu3 %v3887_v2  ;;  %v8831_v30 = vadd.f32 %v3250_v31, %v3048_v1  ;;  %v8839_v31 = vpop.f32.mrf.mxu1  ;;  %v4163_v57 = vld [vmem:[#allocation2 + $0x6a] sm:$0xff] }
 0x295   : > { %v3615_v2 = vld [vmem:[#allocation2 + $0x68] sm:$0xff] }
 0x296   : > { %v3889_v1 = vld [vmem:[#allocation2 + $0x69] sm:$0xff] }
 0x297   : > { %v2705_v15 = vpop.f32.mrf.mxu2  ;;  %v2979_v62 = vpop.f32.mrf.mxu3 }
 0x298   : > { %v2775_v20 = vadd.f32 %v2705_v15, %v12438_v34  ;;  %v3256_v51 = vpop.f32.mrf.mxu0 }
 0x29a   : > { %v3049_v16 = vadd.f32 %v2979_v62, %v2775_v20 }
 0x29b   : > { %4255 = vmatmul.f32.gmra.mxu0 %v4162_v44  ;;  %v12441_v44 = vld [vmem:[#allocation24_spill] sm:$0xff] }
 0x29c   : > { %3707 = vmatmul.f32.gmra.mxu2 %v3614_v49  ;;  %3981 = vmatmul.f32.gmra.mxu3 %v3888_v40  ;;  %v8837_v42 = vadd.f32 %v3253_v60, %v3049_v16  ;;  %v8844_v60 = vpop.f32.mrf.mxu1  ;;  %v4164_v16 = vld [vmem:[#allocation2 + $0x72] sm:$0xff] }
 0x29f   : > { %v2708_v3 = vpop.f32.mrf.mxu2  ;;  %v2982_v22 = vpop.f32.mrf.mxu3 }
 0x2a0   : > { %v2776_v54 = vadd.f32 %v2708_v3, %v12439_v27  ;;  %v3259_v35 = vpop.f32.mrf.mxu0  ;;  %v3890_v3 = vld [vmem:[#allocation2 + $0x71] sm:$0xff] }
 0x2a2   : > { %v3050_v15 = vadd.f32 %v2982_v22, %v2776_v54 }
 0x2a3   : > { %4258 = vmatmul.f32.gmra.mxu0 %v4163_v57 }
 0x2a4   : > { %3710 = vmatmul.f32.gmra.mxu2 %v3615_v2  ;;  %3984 = vmatmul.f32.gmra.mxu3 %v3889_v1  ;;  %v8842_v62 = vadd.f32 %v3256_v51, %v3050_v15  ;;  %v12443_v51 = vld [vmem:[#allocation25_spill] sm:$0xff]  ;;  %v4165_v15 = vld [vmem:[#allocation2 + $0x7a] sm:$0xff]  ;;  %v8850_v63 = vpop.f32.mrf.mxu1 }
 0x2a6   : > { %12440 = vst [vmem:[#allocation3_spill] sm:$0xff] %v8842_v62 }
 0x2a7   : > { %v2711_v34 = vpop.f32.mrf.mxu2  ;;  %v2985_v20 = vpop.f32.mrf.mxu3 }
 0x2a8   : > { %v2777_v49 = vadd.f32 %v2711_v34, %v12441_v44  ;;  %v3262_v40 = vpop.f32.mrf.mxu0 }
 0x2aa   : > { %v3051_v27 = vadd.f32 %v2985_v20, %v2777_v49  ;;  %v7428_v20 = vld [vmem:[%s12353_s3 + $0x80] sm:$0xff] }
 0x2ab   : > { %4261 = vmatmul.f32.gmra.mxu0 %v4164_v16  ;;  %4770 = vmatpush.msra.mxu1 %v7428_v20  ;;  %v12445_v16 = vld [vmem:[#allocation26_spill] sm:$0xff] }
 0x2ac   : > { %3713 = vmatmul.f32.gmra.mxu2 %v3616_v52  ;;  %3987 = vmatmul.f32.gmra.mxu3 %v3890_v3  ;;  %v8847_v22 = vadd.f32 %v3259_v35, %v3051_v27  ;;  %v4166_v27 = vld [vmem:[#allocation2 + $0x82] sm:$0xff] }
 0x2ae   : > { %12442 = vst [vmem:[#allocation4_spill] sm:$0xff] %v8847_v22 }
 0x2af   : > { %v2714_v54 = vpop.f32.mrf.mxu2  ;;  %v2988_v57 = vpop.f32.mrf.mxu3 }
 0x2b0   : > { %v2778_v2 = vadd.f32 %v2714_v54, %v12443_v51  ;;  %v3265_v1 = vpop.f32.mrf.mxu0  ;;  %v3618_v54 = vld [vmem:[#allocation2 + $0x80] sm:$0xff] }
 0x2b1   : > { %v3892_v51 = vld [vmem:[#allocation2 + $0x81] sm:$0xff] }
 0x2b2   : > { %v3052_v34 = vadd.f32 %v2988_v57, %v2778_v2  ;;  %v8858_v57 = vpop.f32.mrf.mxu1 }
 0x2b3   : > { %4264 = vmatmul.f32.gmra.mxu0 %v4165_v15 }
 0x2b4   : > { %3716 = vmatmul.f32.gmra.mxu2 %v3617_v56  ;;  %3990 = vmatmul.f32.gmra.mxu3 %v3891_v18  ;;  %v8855_v35 = vadd.f32 %v3262_v40, %v3052_v34  ;;  %v331_v56 = vlaneseq  ;;  %v12447_v34 = vld [vmem:[#allocation27_spill] sm:$0xff] }
 0x2b6   : > { %12444 = vst [vmem:[#allocation5_spill] sm:$0xff] %v8855_v35  ;;  %v8862_v18 = vshrl.u32 %v331_v56, 7 }
 0x2b7   : > { %v2717_v44 = vpop.f32.mrf.mxu2  ;;  %v2991_v49 = vpop.f32.mrf.mxu3 }
 0x2b8   : > { %v2779_v52 = vadd.f32 %v2717_v44, %v12445_v16  ;;  %v3268_v3 = vpop.f32.mrf.mxu0  ;;  %v4167_v16 = vld [vmem:[#allocation2 + $0x8a] sm:$0xff]  ;;  %v383_v37 = vand.u32 65535, %v8862_v18 }
 0x2ba   : > { %v3053_v53 = vadd.f32 %v2991_v49, %v2779_v52  ;;  %v3893_v49 = vld [vmem:[#allocation2 + $0x89] sm:$0xff] }
 0x2bb   : > { %4267 = vmatmul.f32.gmra.mxu0 %v4166_v27  ;;  %v4689_v27 = vld [vmem:[%s12353_s3 + $0x78] sm:$0xff] }
 0x2bc   : > { %3719 = vmatmul.f32.gmra.mxu2 %v3618_v54  ;;  %3993 = vmatmul.f32.gmra.mxu3 %v3892_v51  ;;  %v8860_v2 = vadd.f32 %v3265_v1, %v3053_v53  ;;  %v7459_v53 = vld [vmem:[%s12353_s3 + $0x178] sm:$0xff]  ;;  %v384_v1 = vshrl.u32 %v8862_v18, 16  ;;  %v8873_v54 = vmul.u32 43690, %v383_v37  ;;  %v4690_v51 = vld [vmem:[#allocation2 + $0x1] sm:$0xff] }
 0x2bd   : > { %4916 = vmatpush.msrb.mxu2 %v4689_v27  ;;  %5142 = vmatpush.msrb.mxu3 %v7459_v53 }
 0x2be   : > { %12446 = vst [vmem:[#allocation6_spill] sm:$0xff] %v8860_v2  ;;  %4771 = vmatmul.f32.vlgmr.msra.gmra.mxu1 %v4690_v51  ;;  %v389_v55 = vmul.u32 43690, %v384_v1  ;;  %v3620_v51 = vld [vmem:[#allocation2 + $0x90] sm:$0xff] }
 0x2bf   : > { %v2720_v40 = vpop.f32.mrf.mxu2  ;;  %v2994_v15 = vpop.f32.mrf.mxu3 }
 0x2c0   : > { %v2780_v20 = vadd.f32 %v2720_v40, %v12447_v34  ;;  %v3271_v44 = vpop.f32.mrf.mxu0  ;;  %v386_v40 = vmul.u32 43691, %v383_v37  ;;  %v390_v34 = vshll.u32 %v8873_v54, 16 }
 0x2c2   : > { %v3054_v52 = vadd.f32 %v2994_v15, %v2780_v20  ;;  %v8877_v15 = vmul.u32 43691, %v384_v1  ;;  %v8880_v20 = vpop.f32.mrf.mxu1  ;;  %vm394_vm0 = vc.u32 %v386_v40, %v390_v34  ;;  %v396_v36 = vadd.s32 %v390_v34, %v386_v40  ;;  %v7475_v40 = vld [vmem:[%s12353_s3 + $0x1f8] sm:$0xff] }
 0x2c3   : > { %4270 = vmatmul.f32.gmra.mxu0 %v4167_v16  ;;  %v395_v53 = vsel %vm394_vm0, 1, %v12356_v11  ;;  %v7491_v34 = vld [vmem:[%s12353_s3 + $0x278] sm:$0xff] }
 0x2c4   : > { %3722 = vmatmul.f32.gmra.mxu2 %v3619_v58  ;;  %3996 = vmatmul.f32.gmra.mxu3 %v3893_v49  ;;  %v8875_v56 = vadd.f32 %v3268_v3, %v3054_v52  ;;  %v392_v24 = vshll.u32 %v8877_v15, 16  ;;  %v8884_v58 = vadd.s32 8, %v8862_v18  ;;  %v12449_v3 = vld [vmem:[#allocation28_spill] sm:$0xff]  ;;  %v4168_v52 = vld [vmem:[#allocation2 + $0x92] sm:$0xff]  ;;  %v397_v43 = vadd.s32 %v395_v53, %v389_v55 }
 0x2c5   : > { %5690 = vmatpush.msrb.mxu1 %v7491_v34  ;;  %5416 = vmatpush.msrb.mxu0 %v7475_v40  ;;  %v393_v35 = vshrl.u32 %v8877_v15, 16 }
 0x2c6   : > { %12448 = vst [vmem:[#allocation7_spill] sm:$0xff] %v8875_v56  ;;  %vm398_vm1 = vc.u32 %v396_v36, %v392_v24  ;;  %v412_v1 = vand.u32 65535, %v8884_v58  ;;  %v4691_v56 = vld [vmem:[#allocation2 + $0x9] sm:$0xff] }
 0x2c7   : > { %v2723_v16 = vpop.f32.mrf.mxu2  ;;  %v2997_v27 = vpop.f32.mrf.mxu3  ;;  %4774 = vmatmul.f32.gmra.mxu1 %v4691_v56 }
 0x2c8   : > { %v2781_v37 = vadd.f32 %v2723_v16, %v12449_v3  ;;  %v3274_v49 = vpop.f32.mrf.mxu0  ;;  %v399_v16 = vsel %vm398_vm1, 1, %v12356_v11  ;;  %v413_v3 = vshrl.u32 %v8884_v58, 16  ;;  %v416_v55 = vmul.u32 43690, %v412_v1 }
 0x2c9   : > { %v415_v24 = vmul.u32 43691, %v412_v1  ;;  %v401_v53 = vadd.s32 %v399_v16, %v397_v43  ;;  %v3621_v16 = vld [vmem:[#allocation2 + $0x98] sm:$0xff] }
 0x2ca   : > { %v3055_v41 = vadd.f32 %v2997_v27, %v2781_v37  ;;  %v8899_v27 = vmul.u32 43691, %v413_v3  ;;  %v391_v37 = vshrl.u32 %v8873_v54, 16  ;;  %v419_v5 = vshll.u32 %v416_v55, 16 }
 0x2cb   : > { %4273 = vmatmul.f32.gmra.mxu0 %v4168_v52  ;;  %v418_v11 = vmul.u32 43690, %v413_v3  ;;  %v8904_v52 = vadd.s32 16, %v8862_v18  ;;  %v12452_v54 = vmov 0   ;;  %v3895_v3 = vld [vmem:[#allocation2 + $0x99] sm:$0xff]  ;;  %v420_v22 = vshrl.u32 %v416_v55, 16 }
 0x2cc   : > { %3725 = vmatmul.f32.gmra.mxu2 %v3620_v51  ;;  %3999 = vmatmul.f32.gmra.mxu3 %v3894_v61  ;;  %v8897_v36 = vadd.f32 %v3271_v44, %v3055_v41  ;;  %v421_v2 = vshll.u32 %v8899_v27, 16  ;;  %vm423_vm2 = vc.u32 %v415_v24, %v419_v5  ;;  %v425_v41 = vadd.s32 %v419_v5, %v415_v24  ;;  %v8906_v61 = vpop.f32.mrf.mxu1  ;;  %v12451_v44 = vld [vmem:[#allocation29_spill] sm:$0xff]  ;;  %v4692_v24 = vld [vmem:[#allocation2 + $0x11] sm:$0xff] }
 0x2cd   : > { %v424_v43 = vsel %vm423_vm2, 1, %v12452_v54  ;;  %v441_v56 = vand.u32 65535, %v8904_v52  ;;  %v402_v0 = vadd.s32 %v401_v53, %v391_v37  ;;  %v8920_v53 = vadd.s32 24, %v8862_v18 }
 0x2ce   : > { %12450 = vst [vmem:[#allocation8_spill] sm:$0xff] %v8897_v36  ;;  %v4169_v36 = vld [vmem:[#allocation2 + $0x9a] sm:$0xff]  ;;  %v426_v47 = vadd.s32 %v424_v43, %v418_v11  ;;  %vm427_vm3 = vc.u32 %v425_v41, %v421_v2  ;;  %v422_v2 = vshrl.u32 %v8899_v27, 16  ;;  %v12453_v41 = vld [vmem:[#allocation30_spill] sm:$0xff] }
 0x2cf   : > { %v2726_v34 = vpop.f32.mrf.mxu2  ;;  %v3000_v51 = vpop.f32.mrf.mxu3  ;;  %v428_v5 = vsel %vm427_vm3, 1, %v12452_v54  ;;  %v445_v7 = vmul.u32 43690, %v441_v56  ;;  %v444_v25 = vmul.u32 43691, %v441_v56  ;;  %v403_v15 = vadd.s32 %v402_v0, %v393_v35  ;;  %4777 = vmatmul.f32.gmra.mxu1 %v4692_v24  ;;  %v3622_v27 = vld [vmem:[#allocation2 + $0xa0] sm:$0xff] }
 0x2d0   : > { %v2782_v1 = vadd.f32 %v2726_v34, %v12451_v44  ;;  %v3277_v40 = vpop.f32.mrf.mxu0  ;;  %v442_v34 = vshrl.u32 %v8904_v52, 16  ;;  %v430_v44 = vadd.s32 %v428_v5, %v426_v47  ;;  %v470_v35 = vand.u32 65535, %v8920_v53  ;;  %v3896_v43 = vld [vmem:[#allocation2 + $0xa1] sm:$0xff] }
 0x2d1   : > { %v448_v11 = vshll.u32 %v445_v7, 16  ;;  %v404_v56 = vshrl.u32 %v403_v15, 4  ;;  %v8943_v15 = vadd.f32 %v8815_v48, %v8779_v39  ;;  %v8953_v39 = vadd.s32 32, %v8862_v18 }
 0x2d2   : > { %v3056_v4 = vadd.f32 %v3000_v51, %v2782_v1  ;;  %v8916_v13 = vmul.u32 43691, %v442_v34  ;;  %v431_v55 = vadd.s32 %v430_v44, %v420_v22  ;;  %v447_v37 = vmul.u32 43690, %v442_v34  ;;  %v4170_v1 = vld [vmem:[#allocation2 + $0xa2] sm:$0xff] }
 0x2d3   : > { %4276 = vmatmul.f32.gmra.mxu0 %v4169_v36  ;;  %vm452_vm4 = vc.u32 %v444_v25, %v448_v11  ;;  %v454_v0 = vadd.s32 %v448_v11, %v444_v25  ;;  %v8929_v22 = vadd.f32 %v8803_v12, %v8756_v21  ;;  %v449_v44 = vshrl.u32 %v445_v7, 16 }
 0x2d4   : > { %3728 = vmatmul.f32.gmra.mxu2 %v3621_v16  ;;  %4002 = vmatmul.f32.gmra.mxu3 %v3895_v3  ;;  %v8914_v62 = vadd.f32 %v3274_v49, %v3056_v4  ;;  %v450_v51 = vshll.u32 %v8916_v13, 16  ;;  %v453_v16 = vsel %vm452_vm4, 1, %v12452_v54  ;;  %v8934_v3 = vadd.f32 %v8810_v10, %v8772_v19  ;;  %v8936_v5 = vpop.f32.mrf.mxu1 }
 0x2d5   : > { %v432_v34 = vadd.s32 %v431_v55, %v422_v2  ;;  %v455_v25 = vadd.s32 %v453_v16, %v447_v37  ;;  %v471_v21 = vshrl.u32 %v8920_v53, 16  ;;  %v8939_v12 = vmul.u32 43690, %v470_v35 }
 0x2d6   : > { %vm456_vm5 = vc.u32 %v454_v0, %v450_v51  ;;  %v473_v11 = vmul.u32 43691, %v470_v35  ;;  %v405_v2 = vmul.u32 24, %v404_v56  ;;  %v8957_v48 = vadd.f32 %v8824_v32, %v8782_v50  ;;  %v3623_v32 = vld [vmem:[#allocation2 + $0xa8] sm:$0xff] }
 0x2d7   : > { %v2729_v36 = vpop.f32.mrf.mxu2  ;;  %v3003_v47 = vpop.f32.mrf.mxu3  ;;  %v457_v10 = vsel %vm456_vm5, 1, %v12452_v54  ;;  %v8948_v37 = vmul.u32 43691, %v471_v21  ;;  %v477_v7 = vshll.u32 %v8939_v12, 16  ;;  %v476_v51 = vmul.u32 43690, %v471_v21  ;;  %v4688_v21 = vld [vmem:[%s12353_s3 + $0x70] sm:$0xff] }
 0x2d8   : > { %v2783_v4 = vadd.f32 %v2729_v36, %v12453_v41  ;;  %v8924_v49 = vpop.f32.mrf.mxu0  ;;  %v459_v55 = vadd.s32 %v457_v10, %v455_v25  ;;  %v433_v36 = vshrl.u32 %v432_v34, 4  ;;  %v8965_v41 = vadd.f32 %v8839_v31, %v8793_v26  ;;  %4917 = vmatpush.msrb.mxu2 %v4688_v21 }
 0x2d9   : > { %v479_v56 = vshll.u32 %v8948_v37, 16  ;;  %vm481_vm6 = vc.u32 %v473_v11, %v477_v7  ;;  %v483_v50 = vadd.s32 %v477_v7, %v473_v11  ;;  %v8976_v26 = vsub.s32 %v8862_v18, %v405_v2 }
 0x2da   : > { %v3057_v24 = vadd.f32 %v3003_v47, %v2783_v4  ;;  %v451_v47 = vshrl.u32 %v8916_v13, 16  ;;  %v460_v0 = vadd.s32 %v459_v55, %v449_v44  ;;  %v12454_v13 = vld [vmem:[#allocation32_spill] sm:$0xff]  ;;  %v482_v31 = vsel %vm481_vm6, 1, %v12452_v54 }
 0x2db   : > { %4279 = vmatmul.f32.gmra.mxu0 %v4170_v1  ;;  %v499_v16 = vand.u32 65535, %v8953_v39  ;;  %v434_v34 = vmul.u32 24, %v433_v36  ;;  %v484_v44 = vadd.s32 %v482_v31, %v476_v51  ;;  %vm485_vm7 = vc.u32 %v483_v50, %v479_v56 }
 0x2dc   : > { %3731 = vmatmul.f32.gmra.mxu2 %v3622_v27  ;;  %4005 = vmatmul.f32.gmra.mxu3 %v3896_v43  ;;  %v8945_v19 = vadd.f32 %v3277_v40, %v3057_v24  ;;  %v8961_v40 = vadd.f32 %v8829_v14, %v8789_v38  ;;  %v4171_v43 = vld [vmem:[#allocation2 + $0xaa] sm:$0xff]  ;;  %v8973_v38 = vadd.f32 %v8844_v60, %v8797_v23  ;;  %v478_v60 = vshrl.u32 %v8939_v12, 16  ;;  %v8994_v55 = vpop.f32.mrf.mxu1 }
 0x2dd   : > { %v3897_v14 = vld [vmem:[#allocation2 + $0xa9] sm:$0xff]  ;;  %v461_v25 = vadd.s32 %v460_v0, %v451_v47  ;;  %v500_v10 = vshrl.u32 %v8953_v39, 16  ;;  %v8988_v11 = vmul.u32 43690, %v499_v16  ;;  %v8992_v2 = vadd.f32 %v8850_v63, %v8805_v6 }
 0x2de   : > { %v7458_v23 = vld [vmem:[%s12353_s3 + $0x170] sm:$0xff]  ;;  %v486_v36 = vsel %vm485_vm7, 1, %v12452_v54  ;;  %v502_v47 = vmul.u32 43691, %v499_v16  ;;  %vm1772_vm8 = vcmp.ne.s32.totalorder %v8976_v26, 0  ;;  %v9005_v6 = vsub.s32 %v8884_v58, %v434_v34 }
 0x2df   : > { %v2732_v4 = vpop.f32.mrf.mxu2  ;;  %v3006_v1 = vpop.f32.mrf.mxu3  ;;  %5143 = vmatpush.msrb.mxu3 %v7458_v23  ;;  %v488_v12 = vadd.s32 %v486_v36, %v484_v44  ;;  %v9001_v51 = vmul.u32 43691, %v500_v10  ;;  %v506_v63 = vshll.u32 %v8988_v11, 16  ;;  %vm1820_vm10 = vcmp.lt.s32.totalorder %v8976_v26, 0  ;;  %v3898_v34 = vld [vmem:[#allocation2 + $0xb1] sm:$0xff] }
 0x2e0   : > { %v2784_v35 = vadd.f32 %v2732_v4, %v12454_v13  ;;  %v8968_v27 = vpop.f32.mrf.mxu0  ;;  %v480_v4 = vshrl.u32 %v8948_v37, 16  ;;  %v9019_v31 = vadd.f32 %v8858_v57, %v8808_v59  ;;  %v9023_v16 = vadd.f32 %v8880_v20, %v8813_v29  ;;  %vm9029_vm12 = vmand %vm1820_vm10, %vm1772_vm8  ;;  %v7474_v57 = vld [vmem:[%s12353_s3 + $0x1f0] sm:$0xff] }
 0x2e1   : > { %v508_v56 = vshll.u32 %v9001_v51, 16  ;;  %vm510_vm9 = vc.u32 %v502_v47, %v506_v63  ;;  %v512_v37 = vadd.s32 %v506_v63, %v502_v47  ;;  %vm1773_vm13 = vcmp.ne.s32.totalorder %v9005_v6, 0  ;;  %v7490_v20 = vld [vmem:[%s12353_s3 + $0x270] sm:$0xff]  ;;  %5417 = vmatpush.msrb.mxu0 %v7474_v57 }
 0x2e2   : > { %v3058_v24 = vadd.f32 %v3006_v1, %v2784_v35  ;;  %v505_v1 = vmul.u32 43690, %v500_v10  ;;  %v462_v35 = vshrl.u32 %v461_v25, 4  ;;  %v511_v58 = vsel %vm510_vm9, 1, %v12452_v54  ;;  %5691 = vmatpush.msrb.mxu1 %v7490_v20 }
 0x2e3   : > { %4282 = vmatmul.f32.gmra.mxu0 %v4171_v43  ;;  %v489_v43 = vadd.s32 %v488_v12, %v478_v60  ;;  %vm514_vm11 = vc.u32 %v512_v37, %v508_v56  ;;  %vm1821_vm14 = vcmp.lt.s32.totalorder %v9005_v6, 0  ;;  %v507_v47 = vshrl.u32 %v8988_v11, 16 }
 0x2e4   : > { %3734 = vmatmul.f32.gmra.mxu2 %v3623_v32  ;;  %4008 = vmatmul.f32.gmra.mxu3 %v3897_v14  ;;  %v8997_v7 = vadd.f32 %v8924_v49, %v3058_v24  ;;  %v9009_v49 = vadd.s32 40, %v8862_v18  ;;  %v4172_v14 = vld [vmem:[#allocation2 + $0xb2] sm:$0xff]  ;;  %v513_v23 = vadd.s32 %v511_v58, %v505_v1  ;;  %v463_v29 = vmul.u32 24, %v462_v35  ;;  %vm9072_vm15 = vmand %vm1821_vm14, %vm1773_vm13 }
 0x2e5   : > { %v3624_v24 = vld [vmem:[#allocation2 + $0xb0] sm:$0xff]  ;;  %v490_v21 = vadd.s32 %v489_v43, %v480_v4  ;;  %v515_v60 = vsel %vm514_vm11, 1, %v12452_v54  ;;  %v9049_v63 = vadd.f32 %v8906_v61, %v8821_v28  ;;  %v1917_v11 = vadd.s32 24, %v9005_v6 }
 0x2e6   : > { %12455 = vst [vmem:[#allocation10_spill] sm:$0xff] %v8997_v7  ;;  %v528_v25 = vand.u32 65535, %v9009_v49  ;;  %v529_v10 = vshrl.u32 %v9009_v49, 16  ;;  %v517_v12 = vadd.s32 %v515_v60, %v513_v23  ;;  %v9062_v43 = vadd.s32 48, %v8862_v18 }
 0x2e7   : > { %v2735_v0 = vpop.f32.mrf.mxu2  ;;  %v3009_v13 = vpop.f32.mrf.mxu3  ;;  %v491_v35 = vshrl.u32 %v490_v21, 4  ;;  %v9066_v28 = vadd.f32 %v8936_v5, %v8826_v45  ;;  %v9082_v45 = vadd.f32 %v8994_v55, %v8831_v30 }
 0x2e8   : > { %v2785_v50 = vadd.f32 %v2735_v0, %v8545_v8  ;;  %v9013_v32 = vpop.f32.mrf.mxu0  ;;  %v1916_v8 = vadd.s32 24, %v8976_v26  ;;  %v531_v4 = vmul.u32 43691, %v528_v25  ;;  %v9051_v1 = vmul.u32 43690, %v528_v25 }
 0x2e9   : > { %v9053_v0 = vmul.u32 43691, %v529_v10  ;;  %v557_v30 = vand.u32 65535, %v9062_v43  ;;  %v492_v23 = vmul.u32 24, %v491_v35  ;;  %v558_v20 = vshrl.u32 %v9062_v43, 16 }
 0x2ea   : > { %v3059_v44 = vadd.f32 %v3009_v13, %v2785_v50  ;;  %v9055_v13 = vpop.f32.mrf.mxu1  ;;  %v535_v58 = vshll.u32 %v9051_v1, 16 }
 0x2eb   : > { %4285 = vmatmul.f32.gmra.mxu0 %v4172_v14  ;;  %v534_v14 = vmul.u32 43690, %v529_v10  ;;  %v537_v21 = vshll.u32 %v9053_v0, 16 }
 0x2ec   : > { %3737 = vmatmul.f32.gmra.mxu2 %v3624_v24  ;;  %4011 = vmatmul.f32.gmra.mxu3 %v3898_v34  ;;  %v9043_v36 = vadd.f32 %v8968_v27, %v3059_v44  ;;  %v1964_v27 = vsel %vm9029_vm12, %v1916_v8, %v8976_v26  ;;  %v9077_v26 = vsub.s32 %v8904_v52, %v463_v29  ;;  %v4173_v24 = vld [vmem:[#allocation2 + $0xba] sm:$0xff]  ;;  %v509_v34 = vshrl.u32 %v9001_v51, 16 }
 0x2ed   : > { %v518_v8 = vadd.s32 %v517_v12, %v507_v47  ;;  %vm9088_vm0 = vcmp.lt.s32.totalorder %v1964_v27, 16  ;;  %v3625_v52 = vld [vmem:[#allocation2 + $0xb8] sm:$0xff]  ;;  %vm539_vm1 = vc.u32 %v531_v4, %v535_v58  ;;  %v1965_v51 = vsel %vm9072_vm15, %v1917_v11, %v9005_v6 }
 0x2ee   : > { %12458 = vst [vmem:[#allocation13_spill] sm:$0xff] %v9043_v36  ;;  %v3899_v44 = vld [vmem:[#allocation2 + $0xb9] sm:$0xff]  ;;  %v540_v59 = vsel %vm539_vm1, 1, %v12452_v54  ;;  %vm1774_vm2 = vcmp.ne.s32.totalorder %v9077_v26, 0  ;;  %v541_v29 = vadd.s32 %v535_v58, %v531_v4  ;;  %vm1822_vm3 = vcmp.lt.s32.totalorder %v9077_v26, 0 }
 0x2ef   : > { %v3690_v61 = vpop.f32.mrf.mxu2  ;;  %v3964_v56 = vpop.f32.mrf.mxu3  ;;  %v542_v57 = vadd.s32 %v540_v59, %v534_v14  ;;  %v519_v10 = vadd.s32 %v518_v8, %v509_v34  ;;  %v536_v47 = vshrl.u32 %v9051_v1, 16  ;;  %v560_v6 = vmul.u32 43691, %v557_v30  ;;  %vm9126_vm6 = vmand %vm1822_vm3, %vm1774_vm2 }
 0x2f0   : > { %v3834_v5 = vadd.f32 %v3690_v61, %v8558_v46  ;;  %v9085_v37 = vpop.f32.mrf.mxu0  ;;  %v9097_v46 = vld [vmem:[%s12352_s2] ss:$0 sm:$0xff]  ;;  %vm543_vm4 = vc.u32 %v541_v29, %v537_v21  ;;  %v9108_v12 = vmul.u32 43690, %v557_v30  ;;  %v9110_v27 = vmul.u32 43691, %v558_v20 }
 0x2f1   : > { %v9114_v11 = vadd.s32 24, %v9077_v26  ;;  %v544_v35 = vsel %vm543_vm4, 1, %v12452_v54  ;;  %vm9120_vm5 = vcmp.lt.s32.totalorder %v1965_v51, 16  ;;  %v538_v14 = vshrl.u32 %v9053_v0, 16  ;;  %v3900_v51 = vld [vmem:[#allocation2 + $0xc1] sm:$0xff] }
 0x2f2   : > { %v4108_v55 = vadd.f32 %v3964_v56, %v3834_v5  ;;  %v546_v58 = vadd.s32 %v544_v35, %v542_v57  ;;  %v563_v5 = vmul.u32 43690, %v558_v20  ;;  %v520_v21 = vshrl.u32 %v519_v10, 4  ;;  %v7457_v10 = vld [vmem:[%s12353_s3 + $0x168] sm:$0xff] }
 0x2f3   : > { %4288 = vmatmul.f32.gmra.mxu0 %v4173_v24  ;;  %v9132_v24 = vpop.f32.mrf.mxu1  ;;  %v566_v30 = vshll.u32 %v9110_v27, 16  ;;  %v9139_v59 = vadd.s32 56, %v8862_v18  ;;  %5144 = vmatpush.msrb.mxu3 %v7457_v10 }
 0x2f4   : > { %v4382_v60 = vadd.f32 %v9013_v32, %v4108_v55  ;;  %3740 = vmatmul.f32.gmra.mxu2 %v3625_v52  ;;  %4014 = vmatmul.f32.gmra.mxu3 %v3899_v44  ;;  %v9117_v32 = vsub.s32 %v8920_v53, %v492_v23  ;;  %v564_v53 = vshll.u32 %v9108_v12, 16  ;;  %v4174_v44 = vld [vmem:[#allocation2 + $0xc2] sm:$0xff]  ;;  %v547_v23 = vadd.s32 %v546_v58, %v536_v47 }
 0x2f5   : > { %v3626_v55 = vld [vmem:[#allocation2 + $0xc0] sm:$0xff]  ;;  %v521_v25 = vmul.u32 24, %v520_v21 }
 0x2f6   : > { %v4433_v4 = vadd.f32 %v9097_v46, %v4382_v60  ;;  %vm568_vm7 = vc.u32 %v560_v6, %v564_v53  ;;  %v570_v0 = vadd.s32 %v564_v53, %v560_v6  ;;  %vm1775_vm8 = vcmp.ne.s32.totalorder %v9117_v32, 0  ;;  %v4687_v60 = vld [vmem:[%s12353_s3 + $0x68] sm:$0xff] }
 0x2f7   : > { %v3693_v61 = vpop.f32.mrf.mxu2  ;;  %v3967_v1 = vpop.f32.mrf.mxu3  ;;  %v569_v20 = vsel %vm568_vm7, 1, %v12452_v54  ;;  %vm1823_vm9 = vcmp.lt.s32.totalorder %v9117_v32, 0  ;;  %4918 = vmatpush.msrb.mxu2 %v4687_v60 }
 0x2f8   : > { %v4481_v34 = vmax.f32 %v4433_v4, 0.0  ;;  %v3835_v8 = vadd.f32 %v3693_v61, %v8570_v17  ;;  %v9135_v52 = vpop.f32.mrf.mxu0  ;;  %v1966_v17 = vsel %vm9126_vm6, %v9114_v11, %v9077_v26  ;;  %v548_v26 = vadd.s32 %v547_v23, %v538_v14  ;;  %vm9180_vm11 = vmand %vm1823_vm9, %vm1775_vm8 }
 0x2f9   : > { %v571_v47 = vadd.s32 %v569_v20, %v563_v5  ;;  %v565_v4 = vshrl.u32 %v9108_v12, 16  ;;  %vm572_vm10 = vc.u32 %v570_v0, %v566_v30  ;;  %v1919_v11 = vadd.s32 24, %v9117_v32  ;;  %v3901_v20 = vld [vmem:[#allocation2 + $0xc9] sm:$0xff] }
 0x2fa   : > { %v4529_v29 = vsel %vm9088_vm0, %v4481_v34, 0.0  ;;  %v4109_v57 = vadd.f32 %v3967_v1, %v3835_v8  ;;  %7610 = vmatmul.msk.f32.gmra.mxu1 %vm9088_vm0, %v4481_v34  ;;  %v573_v35 = vsel %vm572_vm10, 1, %v12452_v54  ;;  %v586_v61 = vand.u32 65535, %v9139_v59 }
 0x2fb   : > { %4577 = vst [vmem:[#allocation2 + $0x19] sm:$0xff] %v4529_v29  ;;  %4291 = vmatmul.f32.gmra.mxu0 %v4174_v44  ;;  %v587_v1 = vshrl.u32 %v9139_v59, 16  ;;  %v549_v14 = vshrl.u32 %v548_v26, 4  ;;  %v575_v58 = vadd.s32 %v573_v35, %v571_v47  ;;  %v9171_v44 = vadd.s32 64, %v8862_v18  ;;  %v9196_v26 = vpop.f32.mrf.mxu1 }
 0x2fc   : > { %v4383_v6 = vadd.f32 %v9085_v37, %v4109_v57  ;;  %3743 = vmatmul.f32.gmra.mxu2 %v3626_v55  ;;  %4017 = vmatmul.f32.gmra.mxu3 %v3900_v51  ;;  %v567_v37 = vshrl.u32 %v9110_v27, 16  ;;  %v589_v12 = vmul.u32 43691, %v586_v61  ;;  %v9166_v34 = vmul.u32 43690, %v586_v61  ;;  %v4175_v51 = vld [vmem:[#allocation2 + $0xca] sm:$0xff] }
 0x2fd   : > { %v9168_v8 = vmul.u32 43691, %v587_v1  ;;  %v9185_v23 = vsub.s32 %v8953_v39, %v521_v25  ;;  %v576_v0 = vadd.s32 %v575_v58, %v565_v4  ;;  %v9189_v29 = vadd.f32 %v9055_v13, %v8837_v42  ;;  %v3627_v57 = vld [vmem:[#allocation2 + $0xc8] sm:$0xff] }
 0x2fe   : > { %v4434_v50 = vadd.f32 %v9097_v46, %v4383_v6  ;;  %vm9191_vm12 = vcmp.lt.s32.totalorder %v1966_v17, 16  ;;  %v592_v60 = vmul.u32 43690, %v587_v1  ;;  %v593_v10 = vshll.u32 %v9166_v34, 16  ;;  %v7473_v13 = vld [vmem:[%s12353_s3 + $0x1e8] sm:$0xff] }
 0x2ff   : > { %v3696_v5 = vpop.f32.mrf.mxu2  ;;  %v3970_v53 = vpop.f32.mrf.mxu3  ;;  %v550_v6 = vmul.u32 24, %v549_v14  ;;  %v577_v25 = vadd.s32 %v576_v0, %v567_v37  ;;  %v1967_v42 = vsel %vm9180_vm11, %v1919_v11, %v9117_v32  ;;  %v7489_v17 = vld [vmem:[%s12353_s3 + $0x268] sm:$0xff]  ;;  %v595_v4 = vshll.u32 %v9168_v8, 16  ;;  %5418 = vmatpush.msrb.mxu0 %v7473_v13 }
 0x300   : > { %v4482_v21 = vmax.f32 %v4434_v50, 0.0  ;;  %v3836_v30 = vadd.f32 %v3696_v5, %v8579_v33  ;;  %v9174_v55 = vpop.f32.mrf.mxu0  ;;  %vm597_vm13 = vc.u32 %v589_v12, %v593_v10  ;;  %v615_v35 = vand.u32 65535, %v9171_v44  ;;  %5692 = vmatpush.msrb.mxu1 %v7489_v17 }
 0x301   : > { %vm1776_vm14 = vcmp.ne.s32.totalorder %v9185_v23, 0  ;;  %vm1824_vm15 = vcmp.lt.s32.totalorder %v9185_v23, 0  ;;  %v598_v32 = vsel %vm597_vm13, 1, %v12452_v54  ;;  %v9218_v56 = vadd.s32 24, %v9185_v23 }
 0x302   : > { %v4530_v39 = vsel %vm9120_vm5, %v4482_v21, 0.0  ;;  %v4110_v47 = vadd.f32 %v3970_v53, %v3836_v30  ;;  %7611 = vmatmul.msk.f32.gmra.mxu1 %vm9120_vm5, %v4482_v21  ;;  %v599_v11 = vadd.s32 %v593_v10, %v589_v12  ;;  %v600_v1 = vadd.s32 %v598_v32, %v592_v60  ;;  %vm9234_vm1 = vmand %vm1824_vm15, %vm1776_vm14  ;;  %v3628_v10 = vld [vmem:[#allocation2 + $0xd0] sm:$0xff] }
 0x303   : > { %4578 = vst [vmem:[#allocation2 + $0x21] sm:$0xff] %v4530_v39  ;;  %4294 = vmatmul.f32.gmra.mxu0 %v4175_v51  ;;  %v616_v50 = vshrl.u32 %v9171_v44, 16  ;;  %v578_v37 = vshrl.u32 %v577_v25, 4  ;;  %v594_v58 = vshrl.u32 %v9166_v34, 16  ;;  %vm9226_vm0 = vcmp.lt.s32.totalorder %v1967_v42, 16  ;;  %v3902_v39 = vld [vmem:[#allocation2 + $0xd1] sm:$0xff] }
 0x304   : > { %v4384_v61 = vadd.f32 %v9135_v52, %v4110_v47  ;;  %3746 = vmatmul.f32.gmra.mxu2 %v3627_v57  ;;  %4020 = vmatmul.f32.gmra.mxu3 %v3901_v20  ;;  %v9223_v52 = vsub.s32 %v9009_v49, %v550_v6  ;;  %vm601_vm2 = vc.u32 %v599_v11, %v595_v4  ;;  %v618_v49 = vmul.u32 43691, %v615_v35  ;;  %v4176_v57 = vld [vmem:[#allocation2 + $0xd2] sm:$0xff] }
 0x305   : > { %v619_v30 = vmul.u32 43690, %v615_v35  ;;  %v9238_v51 = vmul.u32 43691, %v616_v50  ;;  %v596_v20 = vshrl.u32 %v9168_v8, 16  ;;  %v602_v60 = vsel %vm601_vm2, 1, %v12452_v54  ;;  %v9259_v35 = vpop.f32.mrf.mxu1 }
 0x306   : > { %v4435_v14 = vadd.f32 %v9097_v46, %v4384_v61  ;;  %v604_v47 = vadd.s32 %v602_v60, %v600_v1  ;;  %v621_v6 = vmul.u32 43690, %v616_v50  ;;  %v9246_v42 = vadd.s32 72, %v8862_v18  ;;  %v4177_v60 = vld [vmem:[#allocation2 + $0xda] sm:$0xff] }
 0x307   : > { %v3699_v5 = vpop.f32.mrf.mxu2  ;;  %v3973_v21 = vpop.f32.mrf.mxu3  ;;  %v622_v25 = vshll.u32 %v619_v30, 16  ;;  %v624_v8 = vshll.u32 %v9238_v51, 16  ;;  %vm1777_vm3 = vcmp.ne.s32.totalorder %v9223_v52, 0  ;;  %vm1825_vm4 = vcmp.lt.s32.totalorder %v9223_v52, 0 }
 0x308   : > { %v4483_v34 = vmax.f32 %v4435_v14, 0.0  ;;  %v3837_v27 = vadd.f32 %v3699_v5, %v8587_v9  ;;  %v9241_v0 = vpop.f32.mrf.mxu0  ;;  %v1968_v9 = vsel %vm9234_vm1, %v9218_v56, %v9185_v23  ;;  %v605_v4 = vadd.s32 %v604_v47, %v594_v58  ;;  %v3903_v47 = vld [vmem:[#allocation2 + $0xd9] sm:$0xff]  ;;  %vm9291_vm7 = vmand %vm1825_vm4, %vm1777_vm3 }
 0x309   : > { %vm626_vm5 = vc.u32 %v618_v49, %v622_v25  ;;  %v579_v23 = vmul.u32 24, %v578_v37  ;;  %v628_v56 = vadd.s32 %v622_v25, %v618_v49  ;;  %v623_v1 = vshrl.u32 %v619_v30, 16  ;;  %v12475_v30 = vld [vmem:[#allocation35_spill] sm:$0xff] }
 0x30a   : > { %v4531_v13 = vsel %vm9191_vm12, %v4483_v34, 0.0  ;;  %v4111_v17 = vadd.f32 %v3973_v21, %v3837_v27  ;;  %7612 = vmatmul.msk.f32.gmra.mxu1 %vm9191_vm12, %v4483_v34  ;;  %v627_v32 = vsel %vm626_vm5, 1, %v12452_v54  ;;  %v606_v11 = vadd.s32 %v605_v4, %v596_v20 }
 0x30b   : > { %4579 = vst [vmem:[#allocation2 + $0x29] sm:$0xff] %v4531_v13  ;;  %4297 = vmatmul.f32.gmra.mxu0 %v4176_v57  ;;  %v629_v33 = vadd.s32 %v627_v32, %v621_v6  ;;  %v644_v50 = vand.u32 65535, %v9246_v42  ;;  %v625_v58 = vshrl.u32 %v9238_v51, 16  ;;  %vm630_vm6 = vc.u32 %v628_v56, %v624_v8  ;;  %v3629_v51 = vld [vmem:[#allocation2 + $0xd8] sm:$0xff]  ;;  %v4686_v56 = vld [vmem:[%s12353_s3 + $0x60] sm:$0xff] }
 0x30c   : > { %v4385_v61 = vadd.f32 %v9174_v55, %v4111_v17  ;;  %3749 = vmatmul.f32.gmra.mxu2 %v3628_v10  ;;  %4023 = vmatmul.f32.gmra.mxu3 %v3902_v39  ;;  %v645_v5 = vshrl.u32 %v9246_v42, 16  ;;  %v607_v12 = vshrl.u32 %v606_v11, 4  ;;  %v631_v37 = vsel %vm630_vm6, 1, %v12452_v54  ;;  %v7456_v11 = vld [vmem:[%s12353_s3 + $0x160] sm:$0xff] }
 0x30d   : > { %v647_v34 = vmul.u32 43691, %v644_v50  ;;  %v9268_v27 = vmul.u32 43690, %v644_v50  ;;  %v633_v10 = vadd.s32 %v631_v37, %v629_v33  ;;  %v9276_v6 = vadd.s32 24, %v9223_v52  ;;  %4919 = vmatpush.msrb.mxu2 %v4686_v56  ;;  %5145 = vmatpush.msrb.mxu3 %v7456_v11 }
 0x30e   : > { %v4436_v14 = vadd.f32 %v9097_v46, %v4385_v61  ;;  %v9273_v39 = vmul.u32 43691, %v645_v5  ;;  %v9279_v25 = vsub.s32 %v9062_v43, %v579_v23  ;;  %v9283_v17 = vadd.s32 80, %v8862_v18  ;;  %v3904_v61 = vld [vmem:[#allocation2 + $0xe1] sm:$0xff] }
 0x30f   : > { %v3702_v21 = vpop.f32.mrf.mxu2  ;;  %v3976_v55 = vpop.f32.mrf.mxu3  ;;  %v651_v13 = vshll.u32 %v9268_v27, 16  ;;  %v634_v32 = vadd.s32 %v633_v10, %v623_v1  ;;  %v650_v43 = vmul.u32 43690, %v645_v5  ;;  %vm9295_vm8 = vcmp.lt.s32.totalorder %v1968_v9, 16 }
 0x310   : > { %v4484_v49 = vmax.f32 %v4436_v14, 0.0  ;;  %v3838_v57 = vadd.f32 %v3702_v21, %v12475_v30  ;;  %v9271_v20 = vpop.f32.mrf.mxu0  ;;  %v653_v1 = vshll.u32 %v9273_v39, 16  ;;  %v673_v9 = vand.u32 65535, %v9283_v17 }
 0x311   : > { %vm655_vm9 = vc.u32 %v647_v34, %v651_v13  ;;  %v608_v50 = vmul.u32 24, %v607_v12  ;;  %v635_v53 = vadd.s32 %v634_v32, %v625_v58  ;;  %v1969_v5 = vsel %vm9291_vm7, %v9276_v6, %v9223_v52  ;;  %v4178_v6 = vld [vmem:[#allocation2 + $0xe2] sm:$0xff]  ;;  %v4179_v32 = vld [vmem:[#allocation2 + $0xea] sm:$0xff] }
 0x312   : > { %v4532_v8 = vsel %vm9226_vm0, %v4484_v49, 0.0  ;;  %v4112_v4 = vadd.f32 %v3976_v55, %v3838_v57  ;;  %7613 = vmatmul.msk.f32.gmra.mxu1 %vm9226_vm0, %v4484_v49  ;;  %v656_v14 = vsel %vm655_vm9, 1, %v12452_v54  ;;  %vm1778_vm10 = vcmp.ne.s32.totalorder %v9279_v25, 0  ;;  %v9317_v55 = vpop.f32.mrf.mxu1 }
 0x313   : > { %4580 = vst [vmem:[#allocation2 + $0x31] sm:$0xff] %v4532_v8  ;;  %4300 = vmatmul.f32.gmra.mxu0 %v4177_v60  ;;  %vm1826_vm11 = vcmp.lt.s32.totalorder %v9279_v25, 0  ;;  %v657_v21 = vadd.s32 %v651_v13, %v647_v34  ;;  %v9321_v58 = vadd.s32 24, %v9279_v25  ;;  %v658_v12 = vadd.s32 %v656_v14, %v650_v43 }
 0x314   : > { %v4386_v33 = vadd.f32 %v9241_v0, %v4112_v4  ;;  %3752 = vmatmul.f32.gmra.mxu2 %v3629_v51  ;;  %4026 = vmatmul.f32.gmra.mxu3 %v3903_v47  ;;  %v674_v37 = vshrl.u32 %v9283_v17, 16  ;;  %v636_v52 = vshrl.u32 %v635_v53, 4  ;;  %v676_v57 = vmul.u32 43691, %v673_v9  ;;  %v12480_v51 = vld [vmem:[#allocation9_spill] sm:$0xff]  ;;  %v3630_v4 = vld [vmem:[#allocation2 + $0xe0] sm:$0xff]  ;;  %vm9337_vm13 = vmand %vm1826_vm11, %vm1778_vm10 }
 0x315   : > { %vm659_vm12 = vc.u32 %v657_v21, %v653_v1  ;;  %v9324_v60 = vmul.u32 43690, %v673_v9  ;;  %v9330_v13 = vsub.s32 %v9139_v59, %v608_v50  ;;  %v652_v8 = vshrl.u32 %v9268_v27, 16  ;;  %v7488_v53 = vld [vmem:[%s12353_s3 + $0x260] sm:$0xff] }
 0x316   : > { %v4437_v0 = vadd.f32 %v9097_v46, %v4386_v33  ;;  %v654_v43 = vshrl.u32 %v9273_v39, 16  ;;  %v660_v56 = vsel %vm659_vm12, 1, %v12452_v54  ;;  %v9343_v11 = vmul.u32 43691, %v674_v37  ;;  %v7472_v39 = vld [vmem:[%s12353_s3 + $0x1e0] sm:$0xff]  ;;  %5693 = vmatpush.msrb.mxu1 %v7488_v53 }
 0x317   : > { %v3705_v49 = vpop.f32.mrf.mxu2  ;;  %v3979_v30 = vpop.f32.mrf.mxu3  ;;  %v680_v59 = vshll.u32 %v9324_v60, 16  ;;  %v662_v9 = vadd.s32 %v660_v56, %v658_v12  ;;  %v679_v33 = vmul.u32 43690, %v674_v37  ;;  %v637_v50 = vmul.u32 24, %v636_v52  ;;  %5419 = vmatpush.msrb.mxu0 %v7472_v39 }
 0x318   : > { %v4485_v10 = vmax.f32 %v4437_v0, 0.0  ;;  %v3839_v34 = vadd.f32 %v3705_v49, %v12480_v51  ;;  %v9327_v47 = vpop.f32.mrf.mxu0  ;;  %v682_v14 = vshll.u32 %v9343_v11, 16  ;;  %v12483_v0 = vld [vmem:[#allocation3_spill] sm:$0xff]  ;;  %vm9361_vm15 = vcmp.lt.s32.totalorder %v1969_v5, 16 }
 0x319   : > { %vm684_vm14 = vc.u32 %v676_v57, %v680_v59  ;;  %v686_v21 = vadd.s32 %v680_v59, %v676_v57  ;;  %v9359_v12 = vadd.f32 %v9132_v24, %v12483_v0  ;;  %v1970_v49 = vsel %vm9337_vm13, %v9321_v58, %v9279_v25 }
 0x31a   : > { %v4533_v27 = vsel %vm9295_vm8, %v4485_v10, 0.0  ;;  %v4113_v1 = vadd.f32 %v3979_v30, %v3839_v34  ;;  %7614 = vmatmul.msk.f32.gmra.mxu1 %vm9295_vm8, %v4485_v10  ;;  %vm1779_vm0 = vcmp.ne.s32.totalorder %v9330_v13, 0  ;;  %v663_v30 = vadd.s32 %v662_v9, %v652_v8 }
 0x31b   : > { %4581 = vst [vmem:[#allocation2 + $0x39] sm:$0xff] %v4533_v27  ;;  %4303 = vmatmul.f32.gmra.mxu0 %v4178_v6  ;;  %v685_v24 = vsel %vm684_vm14, 1, %v12452_v54  ;;  %vm688_vm1 = vc.u32 %v686_v21, %v682_v14  ;;  %v681_v52 = vshrl.u32 %v9324_v60, 16  ;;  %vm1827_vm2 = vcmp.lt.s32.totalorder %v9330_v13, 0  ;;  %v9382_v6 = vpop.f32.mrf.mxu1  ;;  %v3631_v27 = vld [vmem:[#allocation2 + $0xe8] sm:$0xff] }
 0x31c   : > { %v4387_v37 = vadd.f32 %v9271_v20, %v4113_v1  ;;  %3755 = vmatmul.f32.gmra.mxu2 %v3630_v4  ;;  %4029 = vmatmul.f32.gmra.mxu3 %v3904_v61  ;;  %v687_v20 = vadd.s32 %v685_v24, %v679_v33  ;;  %v689_v57 = vsel %vm688_vm1, 1, %v12452_v54  ;;  %v9377_v25 = vsub.s32 %v9171_v44, %v637_v50  ;;  %v12486_v4 = vld [vmem:[#allocation11_spill] sm:$0xff]  ;;  %v3905_v1 = vld [vmem:[#allocation2 + $0xe9] sm:$0xff]  ;;  %v12487_v50 = vld [vmem:[#allocation4_spill] sm:$0xff] }
 0x31d   : > { %v664_v58 = vadd.s32 %v663_v30, %v654_v43  ;;  %v9380_v34 = vadd.s32 88, %v8862_v18  ;;  %v683_v56 = vshrl.u32 %v9343_v11, 16  ;;  %v9391_v33 = vadd.s32 96, %v8862_v18  ;;  %vm9412_vm5 = vmand %vm1827_vm2, %vm1779_vm0 }
 0x31e   : > { %v4438_v5 = vadd.f32 %v9097_v46, %v4387_v37  ;;  %v691_v59 = vadd.s32 %v689_v57, %v687_v20  ;;  %v9395_v39 = vadd.f32 %v9196_v26, %v12487_v50  ;;  %vm9399_vm3 = vcmp.lt.s32.totalorder %v1970_v49, 16  ;;  %v3906_v50 = vld [vmem:[#allocation2 + $0xf1] sm:$0xff] }
 0x31f   : > { %v3708_v10 = vpop.f32.mrf.mxu2  ;;  %v3982_v51 = vpop.f32.mrf.mxu3  ;;  %v665_v9 = vshrl.u32 %v664_v58, 4  ;;  %v702_v44 = vand.u32 65535, %v9380_v34  ;;  %v703_v43 = vshrl.u32 %v9380_v34, 16  ;;  %v1923_v0 = vadd.s32 24, %v9330_v13 }
 0x320   : > { %v4486_v8 = vmax.f32 %v4438_v5, 0.0  ;;  %v3840_v61 = vadd.f32 %v3708_v10, %v12486_v4  ;;  %v9385_v60 = vpop.f32.mrf.mxu0  ;;  %v692_v11 = vadd.s32 %v691_v59, %v681_v52  ;;  %vm1780_vm4 = vcmp.ne.s32.totalorder %v9377_v25, 0 }
 0x321   : > { %v666_v26 = vmul.u32 24, %v665_v9  ;;  %v9416_v24 = vmul.u32 43690, %v702_v44  ;;  %v9418_v23 = vmul.u32 43691, %v703_v43  ;;  %vm1828_vm6 = vcmp.lt.s32.totalorder %v9377_v25, 0 }
 0x322   : > { %v4534_v53 = vsel %vm9361_vm15, %v4486_v8, 0.0  ;;  %v4114_v14 = vadd.f32 %v3982_v51, %v3840_v61  ;;  %7615 = vmatmul.msk.f32.gmra.mxu1 %vm9361_vm15, %v4486_v8  ;;  %v693_v30 = vadd.s32 %v692_v11, %v683_v56  ;;  %v731_v52 = vand.u32 65535, %v9391_v33  ;;  %v12492_v56 = vld [vmem:[#allocation12_spill] sm:$0xff]  ;;  %vm9442_vm9 = vmand %vm1828_vm6, %vm1780_vm4 }
 0x323   : > { %4582 = vst [vmem:[#allocation2 + $0x41] sm:$0xff] %v4534_v53  ;;  %4306 = vmatmul.f32.gmra.mxu0 %v4179_v32  ;;  %v9422_v5 = vsub.s32 %v9246_v42, %v666_v26  ;;  %v709_v10 = vshll.u32 %v9416_v24, 16  ;;  %v732_v51 = vshrl.u32 %v9391_v33, 16  ;;  %v1971_v8 = vsel %vm9412_vm5, %v1923_v0, %v9330_v13  ;;  %v9448_v0 = vpop.f32.mrf.mxu1 }
 0x324   : > { %v4388_v37 = vadd.f32 %v9327_v47, %v4114_v14  ;;  %3758 = vmatmul.f32.gmra.mxu2 %v3631_v27  ;;  %4032 = vmatmul.f32.gmra.mxu3 %v3905_v1  ;;  %v705_v47 = vmul.u32 43691, %v702_v44  ;;  %v694_v57 = vshrl.u32 %v693_v30, 4  ;;  %v1924_v61 = vadd.s32 24, %v9377_v25  ;;  %v4180_v1 = vld [vmem:[#allocation2 + $0xf2] sm:$0xff] }
 0x325   : > { %vm1781_vm7 = vcmp.ne.s32.totalorder %v9422_v5, 0  ;;  %v711_v42 = vshll.u32 %v9418_v23, 16  ;;  %vm1829_vm8 = vcmp.lt.s32.totalorder %v9422_v5, 0  ;;  %v3632_v44 = vld [vmem:[#allocation2 + $0xf0] sm:$0xff]  ;;  %v708_v53 = vmul.u32 43690, %v703_v43 }
 0x326   : > { %v4439_v20 = vadd.f32 %v9097_v46, %v4388_v37  ;;  %v695_v9 = vmul.u32 24, %v694_v57  ;;  %vm713_vm10 = vc.u32 %v705_v47, %v709_v10  ;;  %v715_v14 = vadd.s32 %v709_v10, %v705_v47  ;;  %vm9467_vm12 = vmand %vm1829_vm8, %vm1781_vm7  ;;  %v4685_v47 = vld [vmem:[%s12353_s3 + $0x58] sm:$0xff] }
 0x327   : > { %v3711_v58 = vpop.f32.mrf.mxu2  ;;  %v3985_v4 = vpop.f32.mrf.mxu3  ;;  %v9446_v11 = vmul.u32 43690, %v731_v52  ;;  %v9453_v49 = vadd.s32 24, %v9422_v5  ;;  %v9455_v30 = vmul.u32 43691, %v732_v51  ;;  %vm9457_vm11 = vcmp.lt.s32.totalorder %v1971_v8, 16  ;;  %v7455_v57 = vld [vmem:[%s12353_s3 + $0x158] sm:$0xff]  ;;  %4920 = vmatpush.msrb.mxu2 %v4685_v47 }
 0x328   : > { %v4487_v32 = vmax.f32 %v4439_v20, 0.0  ;;  %v3841_v59 = vadd.f32 %v3711_v58, %v12492_v56  ;;  %v9435_v27 = vpop.f32.mrf.mxu0  ;;  %v714_v10 = vsel %vm713_vm10, 1, %v12452_v54  ;;  %vm717_vm13 = vc.u32 %v715_v14, %v711_v42  ;;  %5146 = vmatpush.msrb.mxu3 %v7455_v57  ;;  %v3633_v57 = vld [vmem:[#allocation2 + $0xf8] sm:$0xff] }
 0x329   : > { %v734_v21 = vmul.u32 43691, %v731_v52  ;;  %v1972_v8 = vsel %vm9442_vm9, %v1924_v61, %v9377_v25  ;;  %v716_v56 = vadd.s32 %v714_v10, %v708_v53  ;;  %v737_v42 = vmul.u32 43690, %v732_v51  ;;  %v12501_v53 = vld [vmem:[#allocation14_spill] sm:$0xff]  ;;  %v3907_v10 = vld [vmem:[#allocation2 + $0xf9] sm:$0xff] }
 0x32a   : > { %v4535_v26 = vsel %vm9399_vm3, %v4487_v32, 0.0  ;;  %v4115_v37 = vadd.f32 %v3985_v4, %v3841_v59  ;;  %7616 = vmatmul.msk.f32.gmra.mxu1 %vm9399_vm3, %v4487_v32  ;;  %v9483_v4 = vsub.s32 %v9283_v17, %v695_v9  ;;  %v710_v32 = vshrl.u32 %v9416_v24, 16 }
 0x32b   : > { %4583 = vst [vmem:[#allocation2 + $0x49] sm:$0xff] %v4535_v26  ;;  %4309 = vmatmul.f32.gmra.mxu0 %v4180_v1  ;;  %v718_v59 = vsel %vm717_vm13, 1, %v12452_v54  ;;  %v738_v52 = vshll.u32 %v9446_v11, 16  ;;  %v712_v17 = vshrl.u32 %v9418_v23, 16  ;;  %v740_v61 = vshll.u32 %v9455_v30, 16 }
 0x32c   : > { %v4389_v58 = vadd.f32 %v9385_v60, %v4115_v37  ;;  %3761 = vmatmul.f32.gmra.mxu2 %v3632_v44  ;;  %4035 = vmatmul.f32.gmra.mxu3 %v3906_v50  ;;  %vm9495_vm14 = vcmp.lt.s32.totalorder %v1972_v8, 16  ;;  %v720_v51 = vadd.s32 %v718_v59, %v716_v56  ;;  %v739_v44 = vshrl.u32 %v9446_v11, 16  ;;  %v4181_v37 = vld [vmem:[#allocation2 + $0xfa] sm:$0xff] }
 0x32d   : > { %vm742_vm15 = vc.u32 %v734_v21, %v738_v52  ;;  %v744_v50 = vadd.s32 %v738_v52, %v734_v21  ;;  %v9505_v47 = vadd.s32 104, %v8862_v18  ;;  %vm1782_vm0 = vcmp.ne.s32.totalorder %v9483_v4, 0 }
 0x32e   : > { %v4440_v60 = vadd.f32 %v9097_v46, %v4389_v58  ;;  %v743_v23 = vsel %vm742_vm15, 1, %v12452_v54  ;;  %vm1830_vm1 = vcmp.lt.s32.totalorder %v9483_v4, 0  ;;  %v721_v11 = vadd.s32 %v720_v51, %v710_v32  ;;  %v7471_v32 = vld [vmem:[%s12353_s3 + $0x1d8] sm:$0xff]  ;;  %v9526_v51 = vpop.f32.mrf.mxu1 }
 0x32f   : > { %v3714_v24 = vpop.f32.mrf.mxu2  ;;  %v3988_v9 = vpop.f32.mrf.mxu3  ;;  %v745_v58 = vadd.s32 %v743_v23, %v737_v42  ;;  %vm746_vm2 = vc.u32 %v744_v50, %v740_v61  ;;  %v9510_v21 = vadd.s32 112, %v8862_v18  ;;  %v760_v52 = vand.u32 65535, %v9505_v47  ;;  %v7487_v42 = vld [vmem:[%s12353_s3 + $0x258] sm:$0xff]  ;;  %5420 = vmatpush.msrb.mxu0 %v7471_v32  ;;  %vm9558_vm7 = vmand %vm1830_vm1, %vm1782_vm0 }
 0x330   : > { %v4488_v13 = vmax.f32 %v4440_v60, 0.0  ;;  %v3842_v14 = vadd.f32 %v3714_v24, %v12501_v53  ;;  %v9501_v26 = vpop.f32.mrf.mxu0  ;;  %v747_v59 = vsel %vm746_vm2, 1, %v12452_v54  ;;  %v722_v60 = vadd.s32 %v721_v11, %v712_v17  ;;  %5694 = vmatpush.msrb.mxu1 %v7487_v42  ;;  %v12502_v32 = vld [vmem:[#allocation15_spill] sm:$0xff] }
 0x331   : > { %v741_v61 = vshrl.u32 %v9455_v30, 16  ;;  %v749_v24 = vadd.s32 %v747_v59, %v745_v58  ;;  %v9530_v20 = vadd.s32 24, %v9483_v4  ;;  %v763_v17 = vmul.u32 43691, %v760_v52 }
 0x332   : > { %v4536_v8 = vsel %vm9457_vm11, %v4488_v13, 0.0  ;;  %v4116_v56 = vadd.f32 %v3988_v9, %v3842_v14  ;;  %7617 = vmatmul.msk.f32.gmra.mxu1 %vm9457_vm11, %v4488_v13  ;;  %v761_v9 = vshrl.u32 %v9505_v47, 16  ;;  %v764_v13 = vmul.u32 43690, %v760_v52 }
 0x333   : > { %4584 = vst [vmem:[#allocation2 + $0x51] sm:$0xff] %v4536_v8  ;;  %4312 = vmatmul.f32.gmra.mxu0 %v4181_v37  ;;  %v723_v53 = vshrl.u32 %v722_v60, 4  ;;  %v750_v14 = vadd.s32 %v749_v24, %v739_v44  ;;  %v789_v30 = vand.u32 65535, %v9510_v21  ;;  %v4182_v24 = vld [vmem:[#allocation2 + $0x102] sm:$0xff] }
 0x334   : > { %v4390_v50 = vadd.f32 %v9435_v27, %v4116_v56  ;;  %3764 = vmatmul.f32.gmra.mxu2 %v3633_v57  ;;  %4038 = vmatmul.f32.gmra.mxu3 %v3907_v10  ;;  %v9532_v37 = vmul.u32 43691, %v761_v9  ;;  %v766_v11 = vmul.u32 43690, %v761_v9  ;;  %v767_v58 = vshll.u32 %v764_v13, 16  ;;  %v3908_v9 = vld [vmem:[#allocation2 + $0x101] sm:$0xff] }
 0x335   : > { %v790_v27 = vshrl.u32 %v9510_v21, 16  ;;  %v724_v8 = vmul.u32 24, %v723_v53  ;;  %v751_v56 = vadd.s32 %v750_v14, %v741_v61  ;;  %v768_v59 = vshrl.u32 %v764_v13, 16 }
 0x336   : > { %v4441_v23 = vadd.f32 %v9097_v46, %v4390_v50  ;;  %v769_v52 = vshll.u32 %v9532_v37, 16  ;;  %vm771_vm3 = vc.u32 %v763_v17, %v767_v58  ;;  %v773_v25 = vadd.s32 %v767_v58, %v763_v17  ;;  %v3634_v50 = vld [vmem:[#allocation2 + $0x100] sm:$0xff] }
 0x337   : > { %v3717_v57 = vpop.f32.mrf.mxu2  ;;  %v3991_v10 = vpop.f32.mrf.mxu3  ;;  %v9542_v36 = vsub.s32 %v9380_v34, %v724_v8  ;;  %v752_v7 = vshrl.u32 %v751_v56, 4  ;;  %v772_v53 = vsel %vm771_vm3, 1, %v12452_v54  ;;  %v9545_v61 = vmul.u32 43690, %v789_v30 }
 0x338   : > { %v4489_v60 = vmax.f32 %v4441_v23, 0.0  ;;  %v3843_v44 = vadd.f32 %v3717_v57, %v12502_v32  ;;  %v9539_v42 = vpop.f32.mrf.mxu0  ;;  %v774_v23 = vadd.s32 %v772_v53, %v766_v11  ;;  %vm775_vm4 = vc.u32 %v773_v25, %v769_v52  ;;  %v12508_v52 = vld [vmem:[#allocation6_spill] sm:$0xff]  ;;  %v9580_v32 = vpop.f32.mrf.mxu1 }
 0x339   : > { %vm1783_vm5 = vcmp.ne.s32.totalorder %v9542_v36, 0  ;;  %vm1831_vm6 = vcmp.lt.s32.totalorder %v9542_v36, 0  ;;  %v753_v34 = vmul.u32 24, %v752_v7  ;;  %v792_v17 = vmul.u32 43691, %v789_v30  ;;  %v12505_v7 = vld [vmem:[#allocation5_spill] sm:$0xff] }
 0x33a   : > { %v4537_v13 = vsel %vm9495_vm14, %v4489_v60, 0.0  ;;  %v4117_v14 = vadd.f32 %v3991_v10, %v3843_v44  ;;  %7618 = vmatmul.msk.f32.gmra.mxu1 %vm9495_vm14, %v4489_v60  ;;  %v1927_v1 = vadd.s32 24, %v9542_v36  ;;  %v776_v11 = vsel %vm775_vm4, 1, %v12452_v54  ;;  %vm9570_vm8 = vmand %vm1831_vm6, %vm1783_vm5 }
 0x33b   : > { %4585 = vst [vmem:[#allocation2 + $0x59] sm:$0xff] %v4537_v13  ;;  %4315 = vmatmul.f32.gmra.mxu0 %v4182_v24  ;;  %v9564_v57 = vmul.u32 43691, %v790_v27  ;;  %v9568_v30 = vadd.f32 %v9259_v35, %v12505_v7  ;;  %v770_v10 = vshrl.u32 %v9532_v37, 16  ;;  %v778_v8 = vadd.s32 %v776_v11, %v774_v23 }
 0x33c   : > { %v4391_v58 = vadd.f32 %v9501_v26, %v4117_v14  ;;  %3767 = vmatmul.f32.gmra.mxu2 %v3634_v50  ;;  %4041 = vmatmul.f32.gmra.mxu3 %v3908_v9  ;;  %v796_v56 = vshll.u32 %v9545_v61, 16  ;;  %v9578_v60 = vadd.f32 %v9317_v55, %v12508_v52  ;;  %v9584_v35 = vsub.s32 %v9391_v33, %v753_v34  ;;  %v12512_v14 = vld [vmem:[#allocation19_spill] sm:$0xff]  ;;  %v3635_v34 = vld [vmem:[#allocation2 + $0x108] sm:$0xff] }
 0x33d   : > { %v795_v24 = vmul.u32 43690, %v790_v27  ;;  %v12509_v37 = vsel %vm9467_vm12, %v9453_v49, %v9422_v5  ;;  %v1974_v55 = vsel %vm9558_vm7, %v9530_v20, %v9483_v4  ;;  %v779_v13 = vadd.s32 %v778_v8, %v768_v59  ;;  %v4183_v5 = vld [vmem:[#allocation2 + $0x10a] sm:$0xff] }
 0x33e   : > { %v4442_v44 = vadd.f32 %v9097_v46, %v4391_v58  ;;  %vm9591_vm9 = vcmp.lt.s32.totalorder %v12509_v37, 16  ;;  %v798_v33 = vshll.u32 %v9564_v57, 16  ;;  %v1975_v49 = vsel %vm9570_vm8, %v1927_v1, %v9542_v36  ;;  %v3909_v58 = vld [vmem:[#allocation2 + $0x109] sm:$0xff] }
 0x33f   : > { %v3720_v9 = vpop.f32.mrf.mxu2  ;;  %v3994_v53 = vpop.f32.mrf.mxu3  ;;  %vm800_vm10 = vc.u32 %v792_v17, %v796_v56  ;;  %v780_v11 = vadd.s32 %v779_v13, %v770_v10  ;;  %v797_v4 = vshrl.u32 %v9545_v61, 16  ;;  %v802_v59 = vadd.s32 %v796_v56, %v792_v17  ;;  %v4684_v61 = vld [vmem:[%s12353_s3 + $0x50] sm:$0xff] }
 0x340   : > { %v4490_v27 = vmax.f32 %v4442_v44, 0.0  ;;  %v3844_v43 = vadd.f32 %v3720_v9, %v12512_v14  ;;  %v9601_v23 = vpop.f32.mrf.mxu0  ;;  %v801_v20 = vsel %vm800_vm10, 1, %v12452_v54  ;;  %vm1784_vm11 = vcmp.ne.s32.totalorder %v9584_v35, 0  ;;  %v7454_v17 = vld [vmem:[%s12353_s3 + $0x150] sm:$0xff]  ;;  %4921 = vmatpush.msrb.mxu2 %v4684_v61  ;;  %v12513_v9 = vld [vmem:[#allocation7_spill] sm:$0xff] }
 0x341   : > { %v803_v8 = vadd.s32 %v801_v20, %v795_v24  ;;  %vm1832_vm12 = vcmp.lt.s32.totalorder %v9584_v35, 0  ;;  %v781_v36 = vshrl.u32 %v780_v11, 4  ;;  %vm804_vm13 = vc.u32 %v802_v59, %v798_v33  ;;  %5147 = vmatpush.msrb.mxu3 %v7454_v17  ;;  %v12519_v11 = vld [vmem:[#allocation36_spill] sm:$0xff] }
 0x342   : > { %v4538_v25 = vsel %vm9591_vm9, %v4490_v27, 0.0  ;;  %v4118_v7 = vadd.f32 %v3994_v53, %v3844_v43  ;;  %7619 = vmatmul.msk.f32.gmra.mxu1 %vm9591_vm9, %v4490_v27  ;;  %v9621_v1 = vadd.s32 120, %v8862_v18  ;;  %v799_v10 = vshrl.u32 %v9564_v57, 16  ;;  %v12514_v53 = vld [vmem:[#allocation8_spill] sm:$0xff]  ;;  %vm9663_vm0 = vmand %vm1832_vm12, %vm1784_vm11 }
 0x343   : > { %4586 = vst [vmem:[#allocation2 + $0x61] sm:$0xff] %v4538_v25  ;;  %4318 = vmatmul.f32.gmra.mxu0 %v4183_v5  ;;  %v805_v56 = vsel %vm804_vm13, 1, %v12452_v54  ;;  %v9627_v52 = vadd.s32 128, %v8862_v18  ;;  %v782_v44 = vmul.u32 24, %v781_v36  ;;  %v9637_v57 = vadd.f32 %v9448_v0, %v12514_v53  ;;  %v3636_v25 = vld [vmem:[#allocation2 + $0x110] sm:$0xff] }
 0x344   : > { %v4392_v26 = vadd.f32 %v9539_v42, %v4118_v7  ;;  %3770 = vmatmul.f32.gmra.mxu2 %v3635_v34  ;;  %4044 = vmatmul.f32.gmra.mxu3 %v3909_v58  ;;  %v807_v24 = vadd.s32 %v805_v56, %v803_v8  ;;  %v818_v37 = vand.u32 65535, %v9621_v1  ;;  %v819_v50 = vshrl.u32 %v9621_v1, 16  ;;  %v3910_v7 = vld [vmem:[#allocation2 + $0x111] sm:$0xff] }
 0x345   : > { %v9633_v42 = vadd.f32 %v9382_v6, %v12513_v9  ;;  %vm9639_vm14 = vcmp.lt.s32.totalorder %v1974_v55, 16  ;;  %vm9644_vm15 = vcmp.lt.s32.totalorder %v1975_v49, 16  ;;  %v1928_v5 = vadd.s32 24, %v9584_v35  ;;  %v9654_v55 = vpop.f32.mrf.mxu1  ;;  %v4184_v49 = vld [vmem:[#allocation2 + $0x112] sm:$0xff] }
 0x346   : > { %v4443_v33 = vadd.f32 %v9097_v46, %v4392_v26  ;;  %v9650_v6 = vsub.s32 %v9505_v47, %v782_v44  ;;  %v808_v34 = vadd.s32 %v807_v24, %v797_v4  ;;  %v9652_v0 = vmul.u32 43690, %v818_v37 }
 0x347   : > { %v3723_v27 = vpop.f32.mrf.mxu2  ;;  %v3997_v43 = vpop.f32.mrf.mxu3  ;;  %v821_v47 = vmul.u32 43691, %v818_v37  ;;  %v9667_v4 = vmul.u32 43691, %v819_v50  ;;  %v824_v36 = vmul.u32 43690, %v819_v50  ;;  %v847_v61 = vand.u32 65535, %v9627_v52  ;;  %v7470_v37 = vld [vmem:[%s12353_s3 + $0x1d0] sm:$0xff] }
 0x348   : > { %v4491_v58 = vmax.f32 %v4443_v33, 0.0  ;;  %v3845_v20 = vadd.f32 %v3723_v27, %v12519_v11  ;;  %v9657_v46 = vpop.f32.mrf.mxu0  ;;  %v809_v8 = vadd.s32 %v808_v34, %v799_v10  ;;  %v848_v17 = vshrl.u32 %v9627_v52, 16  ;;  %v7486_v50 = vld [vmem:[%s12353_s3 + $0x250] sm:$0xff]  ;;  %5421 = vmatpush.msrb.mxu0 %v7470_v37  ;;  %v9697_v34 = vld [vmem:[%s12352_s2] ss:$0 sm:$0xff] }
 0x349   : > { %vm1785_vm1 = vcmp.ne.s32.totalorder %v9650_v6, 0  ;;  %v825_v44 = vshll.u32 %v9652_v0, 16  ;;  %v1976_v24 = vsel %vm9663_vm0, %v1928_v5, %v9584_v35  ;;  %vm1833_vm2 = vcmp.lt.s32.totalorder %v9650_v6, 0  ;;  %5695 = vmatpush.msrb.mxu1 %v7486_v50 }
 0x34a   : > { %v4539_v26 = vsel %vm9639_vm14, %v4491_v58, 0.0  ;;  %v4119_v56 = vadd.f32 %v3997_v43, %v3845_v20  ;;  %7620 = vmatmul.msk.f32.gmra.mxu1 %vm9639_vm14, %v4491_v58  ;;  %v810_v10 = vshrl.u32 %v809_v8, 4  ;;  %v827_v9 = vshll.u32 %v9667_v4, 16  ;;  %vm9706_vm5 = vmand %vm1833_vm2, %vm1785_vm1 }
 0x34b   : > { %4587 = vst [vmem:[#allocation2 + $0x69] sm:$0xff] %v4539_v26  ;;  %4321 = vmatmul.f32.gmra.mxu0 %v4184_v49  ;;  %v1929_v35 = vadd.s32 24, %v9650_v6  ;;  %vm829_vm3 = vc.u32 %v821_v47, %v825_v44  ;;  %v831_v13 = vadd.s32 %v825_v44, %v821_v47  ;;  %v826_v27 = vshrl.u32 %v9652_v0, 16  ;;  %v4185_v44 = vld [vmem:[#allocation2 + $0x11a] sm:$0xff] }
 0x34c   : > { %v4393_v53 = vadd.f32 %v9601_v23, %v4119_v56  ;;  %3773 = vmatmul.f32.gmra.mxu2 %v3636_v25  ;;  %4047 = vmatmul.f32.gmra.mxu3 %v3910_v7  ;;  %v811_v33 = vmul.u32 24, %v810_v10  ;;  %v830_v43 = vsel %vm829_vm3, 1, %v12452_v54  ;;  %v9692_v5 = vmul.u32 43690, %v847_v61 }
 0x34d   : > { %v832_v58 = vadd.s32 %v830_v43, %v824_v36  ;;  %vm833_vm4 = vc.u32 %v831_v13, %v827_v9  ;;  %v9700_v11 = vmul.u32 43691, %v848_v17  ;;  %v850_v25 = vmul.u32 43691, %v847_v61  ;;  %v12524_v36 = vld [vmem:[#allocation37_spill] sm:$0xff]  ;;  %v3911_v9 = vld [vmem:[#allocation2 + $0x119] sm:$0xff] }
 0x34e   : > { %v4444_v23 = vadd.f32 %v9697_v34, %v4393_v53  ;;  %v9711_v59 = vsub.s32 %v9510_v21, %v811_v33  ;;  %v834_v47 = vsel %vm833_vm4, 1, %v12452_v54  ;;  %v854_v7 = vshll.u32 %v9692_v5, 16  ;;  %v3637_v21 = vld [vmem:[#allocation2 + $0x118] sm:$0xff]  ;;  %v9727_v33 = vpop.f32.mrf.mxu1 }
 0x34f   : > { %v3726_v20 = vpop.f32.mrf.mxu2  ;;  %v4000_v49 = vpop.f32.mrf.mxu3  ;;  %v828_v10 = vshrl.u32 %v9667_v4, 16  ;;  %v836_v37 = vadd.s32 %v834_v47, %v832_v58  ;;  %vm9719_vm6 = vcmp.lt.s32.totalorder %v1976_v24, 16  ;;  %v853_v53 = vmul.u32 43690, %v848_v17 }
 0x350   : > { %v4492_v8 = vmax.f32 %v4444_v23, 0.0  ;;  %v3846_v26 = vadd.f32 %v3726_v20, %v12524_v36  ;;  %v9716_v56 = vpop.f32.mrf.mxu0  ;;  %v856_v61 = vshll.u32 %v9700_v11, 16  ;;  %v9725_v13 = vadd.s32 136, %v8862_v18 }
 0x351   : > { %v1977_v4 = vsel %vm9706_vm5, %v1929_v35, %v9650_v6  ;;  %v837_v24 = vadd.s32 %v836_v37, %v826_v27  ;;  %vm1786_vm7 = vcmp.ne.s32.totalorder %v9711_v59, 0  ;;  %v855_v17 = vshrl.u32 %v9692_v5, 16 }
 0x352   : > { %v4540_v43 = vsel %vm9644_vm15, %v4492_v8, 0.0  ;;  %v4120_v23 = vadd.f32 %v4000_v49, %v3846_v26  ;;  %7621 = vmatmul.msk.f32.gmra.mxu1 %vm9644_vm15, %v4492_v8  ;;  %vm858_vm8 = vc.u32 %v850_v25, %v854_v7  ;;  %v860_v58 = vadd.s32 %v854_v7, %v850_v25 }
 0x353   : > { %4588 = vst [vmem:[#allocation2 + $0x71] sm:$0xff] %v4540_v43  ;;  %4324 = vmatmul.f32.gmra.mxu0 %v4185_v44  ;;  %vm1834_vm9 = vcmp.lt.s32.totalorder %v9711_v59, 0  ;;  %v838_v49 = vadd.s32 %v837_v24, %v828_v10  ;;  %v859_v6 = vsel %vm858_vm8, 1, %v12452_v54  ;;  %v876_v14 = vand.u32 65535, %v9725_v13 }
 0x354   : > { %v4394_v20 = vadd.f32 %v9657_v46, %v4120_v23  ;;  %3776 = vmatmul.f32.gmra.mxu2 %v3637_v21  ;;  %4050 = vmatmul.f32.gmra.mxu3 %v3911_v9  ;;  %v861_v35 = vadd.s32 %v859_v6, %v853_v53  ;;  %vm862_vm10 = vc.u32 %v860_v58, %v856_v61  ;;  %v877_v27 = vshrl.u32 %v9725_v13, 16  ;;  %v12529_v21 = vld [vmem:[#allocation38_spill] sm:$0xff]  ;;  %v3638_v23 = vld [vmem:[#allocation2 + $0x120] sm:$0xff]  ;;  %vm9762_vm12 = vmand %vm1834_vm9, %vm1786_vm7 }
 0x355   : > { %v839_v5 = vshrl.u32 %v838_v49, 4  ;;  %v857_v47 = vshrl.u32 %v9700_v11, 16  ;;  %v863_v46 = vsel %vm862_vm10, 1, %v12452_v54  ;;  %vm9746_vm11 = vcmp.lt.s32.totalorder %v1977_v4, 16  ;;  %v4186_v11 = vld [vmem:[#allocation2 + $0x122] sm:$0xff] }
 0x356   : > { %v4445_v0 = vadd.f32 %v9697_v34, %v4394_v20  ;;  %v865_v36 = vadd.s32 %v863_v46, %v861_v35  ;;  %v879_v26 = vmul.u32 43691, %v876_v14  ;;  %v9750_v44 = vmul.u32 43690, %v876_v14  ;;  %v3912_v4 = vld [vmem:[#allocation2 + $0x121] sm:$0xff] }
 0x357   : > { %v3729_v25 = vpop.f32.mrf.mxu2  ;;  %v4003_v8 = vpop.f32.mrf.mxu3  ;;  %v9752_v10 = vmul.u32 43691, %v877_v27  ;;  %v1930_v61 = vadd.s32 24, %v9711_v59  ;;  %v840_v43 = vmul.u32 24, %v839_v5  ;;  %v9769_v6 = vadd.s32 144, %v8862_v18 }
 0x358   : > { %v4493_v37 = vmax.f32 %v4445_v0, 0.0  ;;  %v3847_v9 = vadd.f32 %v3729_v25, %v12529_v21  ;;  %v9755_v53 = vpop.f32.mrf.mxu0  ;;  %v866_v58 = vadd.s32 %v865_v36, %v855_v17  ;;  %v883_v20 = vshll.u32 %v9750_v44, 16  ;;  %v9776_v5 = vpop.f32.mrf.mxu1  ;;  %v4683_v25 = vld [vmem:[%s12353_s3 + $0x48] sm:$0xff] }
 0x359   : > { %v885_v49 = vshll.u32 %v9752_v10, 16  ;;  %v9774_v0 = vsub.s32 %v9621_v1, %v840_v43  ;;  %v882_v46 = vmul.u32 43690, %v877_v27  ;;  %v1978_v50 = vsel %vm9762_vm12, %v1930_v61, %v9711_v59  ;;  %4922 = vmatpush.msrb.mxu2 %v4683_v25  ;;  %v3913_v25 = vld [vmem:[#allocation2 + $0x129] sm:$0xff] }
 0x35a   : > { %v4541_v35 = vsel %vm9719_vm6, %v4493_v37, 0.0  ;;  %v4121_v14 = vadd.f32 %v4003_v8, %v3847_v9  ;;  %7622 = vmatmul.msk.f32.gmra.mxu1 %vm9719_vm6, %v4493_v37  ;;  %v867_v17 = vadd.s32 %v866_v58, %v857_v47  ;;  %v7453_v8 = vld [vmem:[%s12353_s3 + $0x148] sm:$0xff]  ;;  %vm887_vm13 = vc.u32 %v879_v26, %v883_v20  ;;  %v12532_v58 = vld [vmem:[#allocation39_spill] sm:$0xff] }
 0x35b   : > { %4589 = vst [vmem:[#allocation2 + $0x79] sm:$0xff] %v4541_v35  ;;  %4327 = vmatmul.f32.gmra.mxu0 %v4186_v11  ;;  %v889_v1 = vadd.s32 %v883_v20, %v879_v26  ;;  %vm1787_vm14 = vcmp.ne.s32.totalorder %v9774_v0, 0  ;;  %vm1835_vm15 = vcmp.lt.s32.totalorder %v9774_v0, 0  ;;  %5148 = vmatpush.msrb.mxu3 %v7453_v8  ;;  %v888_v47 = vsel %vm887_vm13, 1, %v12452_v54  ;;  %v4187_v35 = vld [vmem:[#allocation2 + $0x12a] sm:$0xff] }
 0x35c   : > { %v4395_v36 = vadd.f32 %v9716_v56, %v4121_v14  ;;  %3779 = vmatmul.f32.gmra.mxu2 %v3638_v23  ;;  %4053 = vmatmul.f32.gmra.mxu3 %v3912_v4  ;;  %v868_v27 = vshrl.u32 %v867_v17, 4  ;;  %v905_v26 = vand.u32 65535, %v9769_v6  ;;  %v884_v37 = vshrl.u32 %v9750_v44, 16  ;;  %vm9809_vm1 = vmand %vm1835_vm15, %vm1787_vm14  ;;  %v3639_v17 = vld [vmem:[#allocation2 + $0x128] sm:$0xff] }
 0x35d   : > { %vm891_vm0 = vc.u32 %v889_v1, %v885_v49  ;;  %v890_v21 = vadd.s32 %v888_v47, %v882_v46  ;;  %v9798_v61 = vadd.s32 24, %v9774_v0  ;;  %v886_v23 = vshrl.u32 %v9752_v10, 16 }
 0x35e   : > { %v4446_v56 = vadd.f32 %v9697_v34, %v4395_v36  ;;  %v892_v9 = vsel %vm891_vm0, 1, %v12452_v54  ;;  %v869_v43 = vmul.u32 24, %v868_v27  ;;  %v906_v4 = vshrl.u32 %v9769_v6, 16 }
 0x35f   : > { %v3732_v59 = vpop.f32.mrf.mxu2  ;;  %v4006_v11 = vpop.f32.mrf.mxu3  ;;  %v894_v14 = vadd.s32 %v892_v9, %v890_v21  ;;  %v9813_v46 = vmul.u32 43690, %v905_v26  ;;  %vm9815_vm2 = vcmp.lt.s32.totalorder %v1978_v50, 16  ;;  %v908_v1 = vmul.u32 43691, %v905_v26  ;;  %v7485_v26 = vld [vmem:[%s12353_s3 + $0x248] sm:$0xff] }
 0x360   : > { %v4494_v24 = vmax.f32 %v4446_v56, 0.0  ;;  %v3848_v20 = vadd.f32 %v3732_v59, %v12532_v58  ;;  %v9803_v49 = vpop.f32.mrf.mxu0  ;;  %v9820_v8 = vsub.s32 %v9627_v52, %v869_v43  ;;  %v9822_v36 = vmul.u32 43691, %v906_v4  ;;  %v7469_v52 = vld [vmem:[%s12353_s3 + $0x1c8] sm:$0xff]  ;;  %v9845_v7 = vpop.f32.mrf.mxu1  ;;  %5696 = vmatpush.msrb.mxu1 %v7485_v26 }
 0x361   : > { %v895_v56 = vadd.s32 %v894_v14, %v884_v37  ;;  %v912_v21 = vshll.u32 %v9813_v46, 16  ;;  %v1979_v50 = vsel %vm9809_vm1, %v9798_v61, %v9774_v0  ;;  %v911_v37 = vmul.u32 43690, %v906_v4  ;;  %12537 = vst [vmem:[#allocation16_spill] sm:$0xff] %v9845_v7  ;;  %5422 = vmatpush.msrb.mxu0 %v7469_v52  ;;  %v3914_v52 = vld [vmem:[#allocation2 + $0x131] sm:$0xff] }
 0x362   : > { %v4542_v27 = vsel %vm9746_vm11, %v4494_v24, 0.0  ;;  %v4122_v47 = vadd.f32 %v4006_v11, %v3848_v20  ;;  %7623 = vmatmul.msk.f32.gmra.mxu1 %vm9746_vm11, %v4494_v24  ;;  %vm1788_vm3 = vcmp.ne.s32.totalorder %v9820_v8, 0  ;;  %v9841_v9 = vadd.s32 152, %v8862_v18 }
 0x363   : > { %4590 = vst [vmem:[#allocation2 + $0x81] sm:$0xff] %v4542_v27  ;;  %4330 = vmatmul.f32.gmra.mxu0 %v4187_v35  ;;  %vm1836_vm4 = vcmp.lt.s32.totalorder %v9820_v8, 0  ;;  %v896_v0 = vadd.s32 %v895_v56, %v886_v23  ;;  %v914_v11 = vshll.u32 %v9822_v36, 16  ;;  %v9849_v61 = vadd.s32 24, %v9820_v8  ;;  %v12538_v27 = vld [vmem:[#allocation40_spill] sm:$0xff] }
 0x364   : > { %v4396_v59 = vadd.f32 %v9755_v53, %v4122_v47  ;;  %3782 = vmatmul.f32.gmra.mxu2 %v3639_v17  ;;  %4056 = vmatmul.f32.gmra.mxu3 %v3913_v25  ;;  %v913_v43 = vshrl.u32 %v9813_v46, 16  ;;  %vm916_vm5 = vc.u32 %v908_v1, %v912_v21  ;;  %v918_v4 = vadd.s32 %v912_v21, %v908_v1  ;;  %v4188_v1 = vld [vmem:[#allocation2 + $0x132] sm:$0xff]  ;;  %vm9865_vm7 = vmand %vm1836_vm4, %vm1788_vm3 }
 0x365   : > { %v897_v24 = vshrl.u32 %v896_v0, 4  ;;  %v915_v58 = vshrl.u32 %v9822_v36, 16  ;;  %v917_v20 = vsel %vm916_vm5, 1, %v12452_v54  ;;  %v934_v14 = vand.u32 65535, %v9841_v9  ;;  %v3640_v36 = vld [vmem:[#allocation2 + $0x130] sm:$0xff] }
 0x366   : > { %v4447_v53 = vadd.f32 %v9697_v34, %v4396_v59  ;;  %v919_v44 = vadd.s32 %v917_v20, %v911_v37  ;;  %vm920_vm6 = vc.u32 %v918_v4, %v914_v11  ;;  %v935_v17 = vshrl.u32 %v9841_v9, 16 }
 0x367   : > { %v3735_v35 = vpop.f32.mrf.mxu2  ;;  %v4009_v23 = vpop.f32.mrf.mxu3  ;;  %v898_v56 = vmul.u32 24, %v897_v24  ;;  %v921_v21 = vsel %vm920_vm6, 1, %v12452_v54  ;;  %v937_v59 = vmul.u32 43691, %v934_v14  ;;  %v938_v0 = vmul.u32 43690, %v934_v14 }
 0x368   : > { %v4495_v25 = vmax.f32 %v4447_v53, 0.0  ;;  %v3849_v46 = vadd.f32 %v3735_v35, %v12538_v27  ;;  %v9858_v47 = vpop.f32.mrf.mxu0  ;;  %v923_v37 = vadd.s32 %v921_v21, %v919_v44  ;;  %v9869_v11 = vmul.u32 43691, %v935_v17 }
 0x369   : > { %vm9873_vm8 = vcmp.lt.s32.totalorder %v1979_v50, 16  ;;  %v9878_v20 = vsub.s32 %v9725_v13, %v898_v56  ;;  %v940_v44 = vmul.u32 43690, %v935_v17  ;;  %v941_v14 = vshll.u32 %v938_v0, 16 }
 0x36a   : > { %v4543_v4 = vsel %vm9815_vm2, %v4495_v25, 0.0  ;;  %v4123_v24 = vadd.f32 %v4009_v23, %v3849_v46  ;;  %7624 = vmatmul.msk.f32.gmra.mxu1 %vm9815_vm2, %v4495_v25  ;;  %v924_v35 = vadd.s32 %v923_v37, %v913_v43  ;;  %v943_v27 = vshll.u32 %v9869_v11, 16 }
 0x36b   : > { %4591 = vst [vmem:[#allocation2 + $0x89] sm:$0xff] %v4543_v4  ;;  %4333 = vmatmul.f32.gmra.mxu0 %v4188_v1  ;;  %v1980_v13 = vsel %vm9865_vm7, %v9849_v61, %v9820_v8  ;;  %vm1789_vm9 = vcmp.ne.s32.totalorder %v9878_v20, 0  ;;  %v942_v50 = vshrl.u32 %v938_v0, 16  ;;  %vm1837_vm10 = vcmp.lt.s32.totalorder %v9878_v20, 0 }
 0x36c   : > { %v4397_v21 = vadd.f32 %v9803_v49, %v4123_v24  ;;  %3785 = vmatmul.f32.gmra.mxu2 %v3640_v36  ;;  %4059 = vmatmul.f32.gmra.mxu3 %v3914_v52  ;;  %v925_v10 = vadd.s32 %v924_v35, %v915_v58  ;;  %vm945_vm11 = vc.u32 %v937_v59, %v941_v14  ;;  %v9892_v17 = vadd.s32 24, %v9878_v20  ;;  %v9894_v49 = vpop.f32.mrf.mxu1  ;;  %v12544_v52 = vld [vmem:[#allocation41_spill] sm:$0xff]  ;;  %v3641_v24 = vld [vmem:[#allocation2 + $0x138] sm:$0xff]  ;;  %vm9916_vm13 = vmand %vm1837_vm10, %vm1789_vm9 }
 0x36d   : > { %v947_v43 = vadd.s32 %v941_v14, %v937_v59  ;;  %12543 = vst [vmem:[#allocation17_spill] sm:$0xff] %v9894_v49  ;;  %v946_v25 = vsel %vm945_vm11, 1, %v12452_v54  ;;  %v9898_v46 = vadd.s32 160, %v8862_v18  ;;  %v944_v56 = vshrl.u32 %v9869_v11, 16  ;;  %v4189_v59 = vld [vmem:[#allocation2 + $0x13a] sm:$0xff] }
 0x36e   : > { %v4448_v23 = vadd.f32 %v9697_v34, %v4397_v21  ;;  %v926_v1 = vshrl.u32 %v925_v10, 4  ;;  %v948_v58 = vadd.s32 %v946_v25, %v940_v44  ;;  %v3915_v35 = vld [vmem:[#allocation2 + $0x139] sm:$0xff]  ;;  %v9908_v11 = vadd.s32 168, %v8862_v18 }
 0x36f   : > { %v3738_v8 = vpop.f32.mrf.mxu2  ;;  %v4012_v61 = vpop.f32.mrf.mxu3  ;;  %vm949_vm12 = vc.u32 %v947_v43, %v943_v27  ;;  %v963_v4 = vand.u32 65535, %v9898_v46  ;;  %v964_v10 = vshrl.u32 %v9898_v46, 16  ;;  %vm9935_vm14 = vcmp.lt.s32.totalorder %v1980_v13, 16 }
 0x370   : > { %v4496_v36 = vmax.f32 %v4448_v23, 0.0  ;;  %v3850_v26 = vadd.f32 %v3738_v8, %v12544_v52  ;;  %v9902_v37 = vpop.f32.mrf.mxu0  ;;  %v950_v0 = vsel %vm949_vm12, 1, %v12452_v54  ;;  %v927_v14 = vmul.u32 24, %v926_v1  ;;  %v4682_v1 = vld [vmem:[%s12353_s3 + $0x40] sm:$0xff] }
 0x371   : > { %v952_v21 = vadd.s32 %v950_v0, %v948_v58  ;;  %v966_v23 = vmul.u32 43691, %v963_v4  ;;  %v9920_v25 = vmul.u32 43690, %v963_v4  ;;  %v7452_v58 = vld [vmem:[%s12353_s3 + $0x140] sm:$0xff]  ;;  %v9933_v52 = vmul.u32 43691, %v964_v10  ;;  %4923 = vmatpush.msrb.mxu2 %v4682_v1 }
 0x372   : > { %v4544_v44 = vsel %vm9873_vm8, %v4496_v36, 0.0  ;;  %v4124_v27 = vadd.f32 %v4012_v61, %v3850_v26  ;;  %7625 = vmatmul.msk.f32.gmra.mxu1 %vm9873_vm8, %v4496_v36  ;;  %v9925_v8 = vsub.s32 %v9769_v6, %v927_v14  ;;  %v969_v6 = vmul.u32 43690, %v964_v10  ;;  %5149 = vmatpush.msrb.mxu3 %v7452_v58  ;;  %v3642_v58 = vld [vmem:[#allocation2 + $0x140] sm:$0xff] }
 0x373   : > { %4592 = vst [vmem:[#allocation2 + $0x91] sm:$0xff] %v4544_v44  ;;  %4336 = vmatmul.f32.gmra.mxu0 %v4189_v59  ;;  %v953_v61 = vadd.s32 %v952_v21, %v942_v50  ;;  %v970_v50 = vshll.u32 %v9920_v25, 16  ;;  %v1981_v36 = vsel %vm9916_vm13, %v9892_v17, %v9878_v20  ;;  %v992_v13 = vand.u32 65535, %v9908_v11  ;;  %v12549_v21 = vld [vmem:[#allocation42_spill] sm:$0xff] }
 0x374   : > { %v4398_v53 = vadd.f32 %v9858_v47, %v4124_v27  ;;  %3788 = vmatmul.f32.gmra.mxu2 %v3641_v24  ;;  %4062 = vmatmul.f32.gmra.mxu3 %v3915_v35  ;;  %vm1790_vm15 = vcmp.ne.s32.totalorder %v9925_v8, 0  ;;  %vm1838_vm0 = vcmp.lt.s32.totalorder %v9925_v8, 0  ;;  %v972_v47 = vshll.u32 %v9933_v52, 16  ;;  %v4190_v27 = vld [vmem:[#allocation2 + $0x142] sm:$0xff] }
 0x375   : > { %v954_v59 = vadd.s32 %v953_v61, %v944_v56  ;;  %vm974_vm1 = vc.u32 %v966_v23, %v970_v50  ;;  %v971_v14 = vshrl.u32 %v9920_v25, 16  ;;  %v976_v17 = vadd.s32 %v970_v50, %v966_v23  ;;  %vm9962_vm2 = vmand %vm1838_vm0, %vm1790_vm15 }
 0x376   : > { %v4449_v0 = vadd.f32 %v9697_v34, %v4398_v53  ;;  %v975_v20 = vsel %vm974_vm1, 1, %v12452_v54  ;;  %v1934_v43 = vadd.s32 24, %v9925_v8  ;;  %v3916_v53 = vld [vmem:[#allocation2 + $0x141] sm:$0xff]  ;;  %v993_v50 = vshrl.u32 %v9908_v11, 16 }
 0x377   : > { %v3741_v4 = vpop.f32.mrf.mxu2  ;;  %v4015_v24 = vpop.f32.mrf.mxu3  ;;  %v955_v35 = vshrl.u32 %v954_v59, 4  ;;  %v977_v1 = vadd.s32 %v975_v20, %v969_v6  ;;  %vm978_vm3 = vc.u32 %v976_v17, %v972_v47  ;;  %v995_v59 = vmul.u32 43691, %v992_v13  ;;  %v7468_v17 = vld [vmem:[%s12353_s3 + $0x1c0] sm:$0xff] }
 0x378   : > { %v4497_v56 = vmax.f32 %v4449_v0, 0.0  ;;  %v3851_v10 = vadd.f32 %v3741_v4, %v12549_v21  ;;  %v9953_v44 = vpop.f32.mrf.mxu0  ;;  %v9956_v61 = vpop.f32.mrf.mxu1  ;;  %v979_v6 = vsel %vm978_vm3, 1, %v12452_v54  ;;  %v9970_v20 = vmul.u32 43690, %v992_v13  ;;  %v7484_v13 = vld [vmem:[%s12353_s3 + $0x240] sm:$0xff]  ;;  %5423 = vmatpush.msrb.mxu0 %v7468_v17 }
 0x379   : > { %12550 = vst [vmem:[#allocation18_spill] sm:$0xff] %v9956_v61  ;;  %v956_v23 = vmul.u32 24, %v955_v35  ;;  %v973_v47 = vshrl.u32 %v9933_v52, 16  ;;  %v981_v35 = vadd.s32 %v979_v6, %v977_v1  ;;  %v998_v52 = vmul.u32 43690, %v993_v50  ;;  %5697 = vmatpush.msrb.mxu1 %v7484_v13  ;;  %v3917_v61 = vld [vmem:[#allocation2 + $0x149] sm:$0xff] }
 0x37a   : > { %v4545_v0 = vsel %vm9935_vm14, %v4497_v56, 0.0  ;;  %v4125_v4 = vadd.f32 %v4015_v24, %v3851_v10  ;;  %7626 = vmatmul.msk.f32.gmra.mxu1 %vm9935_vm14, %v4497_v56  ;;  %v9984_v24 = vmul.u32 43691, %v993_v50  ;;  %v999_v26 = vshll.u32 %v9970_v20, 16 }
 0x37b   : > { %4593 = vst [vmem:[#allocation2 + $0x99] sm:$0xff] %v4545_v0  ;;  %4339 = vmatmul.f32.gmra.mxu0 %v4190_v27  ;;  %v9975_v21 = vsub.s32 %v9841_v9, %v956_v23  ;;  %v1982_v9 = vsel %vm9962_vm2, %v1934_v43, %v9925_v8  ;;  %vm9991_vm4 = vcmp.lt.s32.totalorder %v1981_v36, 16  ;;  %v982_v27 = vadd.s32 %v981_v35, %v971_v14  ;;  %v12557_v0 = vld [vmem:[#allocation43_spill] sm:$0xff]  ;;  %v4191_v35 = vld [vmem:[#allocation2 + $0x14a] sm:$0xff] }
 0x37c   : > { %v4399_v10 = vadd.f32 %v9902_v37, %v4125_v4  ;;  %3791 = vmatmul.f32.gmra.mxu2 %v3642_v58  ;;  %4065 = vmatmul.f32.gmra.mxu3 %v3916_v53  ;;  %v9997_v37 = vadd.s32 176, %v8862_v18  ;;  %v1001_v8 = vshll.u32 %v9984_v24, 16  ;;  %vm1003_vm7 = vc.u32 %v995_v59, %v999_v26 }
 0x37d   : > { %vm1791_vm5 = vcmp.ne.s32.totalorder %v9975_v21, 0  ;;  %vm1839_vm6 = vcmp.lt.s32.totalorder %v9975_v21, 0  ;;  %vm10002_vm8 = vcmp.lt.s32.totalorder %v1982_v9, 16  ;;  %v983_v53 = vadd.s32 %v982_v27, %v973_v47  ;;  %v3643_v9 = vld [vmem:[#allocation2 + $0x148] sm:$0xff] }
 0x37e   : > { %v4450_v1 = vadd.f32 %v9697_v34, %v4399_v10  ;;  %v1000_v14 = vshrl.u32 %v9970_v20, 16  ;;  %v1004_v25 = vsel %vm1003_vm7, 1, %v12452_v54  ;;  %v1005_v23 = vadd.s32 %v999_v26, %v995_v59  ;;  %vm10018_vm9 = vmand %vm1839_vm6, %vm1791_vm5 }
 0x37f   : > { %v3744_v43 = vpop.f32.mrf.mxu2  ;;  %v4018_v58 = vpop.f32.mrf.mxu3  ;;  %v1935_v17 = vadd.s32 24, %v9975_v21  ;;  %v1006_v10 = vadd.s32 %v1004_v25, %v998_v52  ;;  %v984_v59 = vshrl.u32 %v983_v53, 4  ;;  %v1021_v47 = vand.u32 65535, %v9997_v37 }
 0x380   : > { %v4498_v50 = vmax.f32 %v4450_v1, 0.0  ;;  %v3852_v4 = vadd.f32 %v3744_v43, %v12557_v0  ;;  %v10009_v6 = vpop.f32.mrf.mxu0  ;;  %v10012_v13 = vpop.f32.mrf.mxu1  ;;  %vm1007_vm10 = vc.u32 %v1005_v23, %v1001_v8  ;;  %v1022_v26 = vshrl.u32 %v9997_v37, 16 }
 0x381   : > { %12558 = vst [vmem:[#allocation20_spill] sm:$0xff] %v10012_v13  ;;  %v1008_v1 = vsel %vm1007_vm10, 1, %v12452_v54  ;;  %v10028_v43 = vadd.s32 184, %v8862_v18  ;;  %v985_v53 = vmul.u32 24, %v984_v59  ;;  %v1002_v8 = vshrl.u32 %v9984_v24, 16  ;;  %v3644_v13 = vld [vmem:[#allocation2 + $0x150] sm:$0xff] }
 0x382   : > { %v4546_v27 = vsel %vm9991_vm4, %v4498_v50, 0.0  ;;  %v4126_v52 = vadd.f32 %v4018_v58, %v3852_v4  ;;  %7627 = vmatmul.msk.f32.gmra.mxu1 %vm9991_vm4, %v4498_v50  ;;  %v1010_v25 = vadd.s32 %v1008_v1, %v1006_v10  ;;  %v10033_v23 = vmul.u32 43690, %v1021_v47 }
 0x383   : > { %4594 = vst [vmem:[#allocation2 + $0xa1] sm:$0xff] %v4546_v27  ;;  %4342 = vmatmul.f32.gmra.mxu0 %v4191_v35  ;;  %v1983_v58 = vsel %vm10018_vm9, %v1935_v17, %v9975_v21  ;;  %v1024_v4 = vmul.u32 43691, %v1021_v47  ;;  %v10039_v27 = vmul.u32 43691, %v1022_v26  ;;  %v986_v56 = vsub.s32 %v9898_v46, %v985_v53  ;;  %v12561_v46 = vld [vmem:[#allocation44_spill] sm:$0xff] }
 0x384   : > { %v4400_v0 = vadd.f32 %v9953_v44, %v4126_v52  ;;  %3794 = vmatmul.f32.gmra.mxu2 %v3643_v9  ;;  %4068 = vmatmul.f32.gmra.mxu3 %v3917_v61  ;;  %v1011_v50 = vadd.s32 %v1010_v25, %v1000_v14  ;;  %v1027_v35 = vmul.u32 43690, %v1022_v26  ;;  %v1028_v24 = vshll.u32 %v10033_v23, 16  ;;  %v4192_v52 = vld [vmem:[#allocation2 + $0x152] sm:$0xff] }
 0x385   : > { %v1030_v59 = vshll.u32 %v10039_v27, 16  ;;  %v1050_v44 = vand.u32 65535, %v10028_v43  ;;  %v1051_v61 = vshrl.u32 %v10028_v43, 16  ;;  %vm1792_vm11 = vcmp.ne.s32.totalorder %v986_v56, 0 }
 0x386   : > { %v4451_v10 = vadd.f32 %v9697_v34, %v4400_v0  ;;  %vm1840_vm12 = vcmp.lt.s32.totalorder %v986_v56, 0  ;;  %v1936_v21 = vadd.s32 24, %v986_v56  ;;  %v1012_v17 = vadd.s32 %v1011_v50, %v1002_v8  ;;  %v3918_v8 = vld [vmem:[#allocation2 + $0x151] sm:$0xff] }
 0x387   : > { %v3747_v9 = vpop.f32.mrf.mxu2  ;;  %v4021_v20 = vpop.f32.mrf.mxu3  ;;  %vm10050_vm13 = vmand %vm1840_vm12, %vm1792_vm11  ;;  %vm1032_vm14 = vc.u32 %v1024_v4, %v1028_v24  ;;  %v1034_v25 = vadd.s32 %v1028_v24, %v1024_v4  ;;  %vm10056_vm15 = vcmp.lt.s32.totalorder %v1983_v58, 16  ;;  %v7451_v4 = vld [vmem:[%s12353_s3 + $0x138] sm:$0xff]  ;;  %v10074_v24 = vmul.u32 43690, %v1050_v44 }
 0x388   : > { %v4499_v47 = vmax.f32 %v4451_v10, 0.0  ;;  %v3853_v14 = vadd.f32 %v3747_v9, %v12561_v46  ;;  %v10048_v26 = vpop.f32.mrf.mxu0  ;;  %v10054_v53 = vpop.f32.mrf.mxu1  ;;  %v1013_v50 = vshrl.u32 %v1012_v17, 4  ;;  %v1029_v10 = vshrl.u32 %v10033_v23, 16  ;;  %v4681_v23 = vld [vmem:[%s12353_s3 + $0x38] sm:$0xff]  ;;  %5150 = vmatpush.msrb.mxu3 %v7451_v4 }
 0x389   : > { %12564 = vst [vmem:[#allocation21_spill] sm:$0xff] %v10054_v53  ;;  %v1033_v9 = vsel %vm1032_vm14, 1, %v12452_v54  ;;  %v1984_v53 = vsel %vm10050_vm13, %v1936_v21, %v986_v56  ;;  %vm1036_vm0 = vc.u32 %v1034_v25, %v1030_v59  ;;  %v10081_v59 = vadd.s32 192, %v8862_v18  ;;  %4924 = vmatpush.msrb.mxu2 %v4681_v23  ;;  %v3919_v23 = vld [vmem:[#allocation2 + $0x159] sm:$0xff] }
 0x38a   : > { %v4547_v46 = vsel %vm10002_vm8, %v4499_v47, 0.0  ;;  %v4127_v49 = vadd.f32 %v4021_v20, %v3853_v14  ;;  %v1035_v7 = vadd.s32 %v1033_v9, %v1027_v35  ;;  %7628 = vmatmul.msk.f32.gmra.mxu1 %vm10002_vm8, %v4499_v47  ;;  %v1014_v58 = vmul.u32 24, %v1013_v50  ;;  %v4193_v9 = vld [vmem:[#allocation2 + $0x15a] sm:$0xff] }
 0x38b   : > { %4595 = vst [vmem:[#allocation2 + $0xa9] sm:$0xff] %v4547_v46  ;;  %4345 = vmatmul.f32.gmra.mxu0 %v4192_v52  ;;  %v10076_v20 = vmul.u32 43691, %v1051_v61  ;;  %v1037_v36 = vsel %vm1036_vm0, 1, %v12452_v54  ;;  %v1053_v35 = vmul.u32 43691, %v1050_v44  ;;  %v1031_v17 = vshrl.u32 %v10039_v27, 16 }
 0x38c   : > { %v4401_v56 = vadd.f32 %v10009_v6, %v4127_v49  ;;  %3797 = vmatmul.f32.gmra.mxu2 %v3644_v13  ;;  %4071 = vmatmul.f32.gmra.mxu3 %v3918_v8  ;;  %v10084_v21 = vsub.s32 %v9908_v11, %v1014_v58  ;;  %v1039_v47 = vadd.s32 %v1037_v36, %v1035_v7  ;;  %v1057_v14 = vshll.u32 %v10074_v24, 16  ;;  %v3645_v58 = vld [vmem:[#allocation2 + $0x158] sm:$0xff] }
 0x38d   : > { %v1056_v6 = vmul.u32 43690, %v1051_v61  ;;  %v1059_v13 = vshll.u32 %v10076_v20, 16  ;;  %v1079_v44 = vand.u32 65535, %v10081_v59  ;;  %vm10091_vm1 = vcmp.lt.s32.totalorder %v1984_v53, 16  ;;  %v12569_v61 = vld [vmem:[#allocation45_spill] sm:$0xff] }
 0x38e   : > { %v4452_v49 = vadd.f32 %v9697_v34, %v4401_v56  ;;  %vm1793_vm2 = vcmp.ne.s32.totalorder %v10084_v21, 0  ;;  %vm1841_vm3 = vcmp.lt.s32.totalorder %v10084_v21, 0  ;;  %v10098_v7 = vadd.s32 24, %v10084_v21 }
 0x38f   : > { %v3750_v52 = vpop.f32.mrf.mxu2  ;;  %v4024_v11 = vpop.f32.mrf.mxu3  ;;  %v1040_v27 = vadd.s32 %v1039_v47, %v1029_v10  ;;  %vm1061_vm4 = vc.u32 %v1053_v35, %v1057_v14  ;;  %v1063_v53 = vadd.s32 %v1057_v14, %v1053_v35  ;;  %vm10105_vm5 = vmand %vm1841_vm3, %vm1793_vm2  ;;  %v1058_v36 = vshrl.u32 %v10074_v24, 16  ;;  %v7467_v24 = vld [vmem:[%s12353_s3 + $0x1b8] sm:$0xff] }
 0x390   : > { %v4500_v25 = vmax.f32 %v4452_v49, 0.0  ;;  %v3854_v8 = vadd.f32 %v3750_v52, %v12569_v61  ;;  %v10101_v50 = vpop.f32.mrf.mxu0  ;;  %v10103_v46 = vpop.f32.mrf.mxu1  ;;  %v1062_v10 = vsel %vm1061_vm4, 1, %v12452_v54  ;;  %v1080_v47 = vshrl.u32 %v10081_v59, 16  ;;  %5424 = vmatpush.msrb.mxu0 %v7467_v24 }
 0x391   : > { %v1041_v56 = vadd.s32 %v1040_v27, %v1031_v17  ;;  %v1060_v61 = vshrl.u32 %v10076_v20, 16  ;;  %v1064_v35 = vadd.s32 %v1062_v10, %v1056_v6  ;;  %vm1065_vm6 = vc.u32 %v1063_v53, %v1059_v13  ;;  %v7483_v17 = vld [vmem:[%s12353_s3 + $0x238] sm:$0xff] }
 0x392   : > { %v4548_v49 = vsel %vm10056_vm15, %v4500_v25, 0.0  ;;  %v4128_v52 = vadd.f32 %v4024_v11, %v3854_v8  ;;  %7629 = vmatmul.msk.f32.gmra.mxu1 %vm10056_vm15, %v4500_v25  ;;  %v1082_v27 = vmul.u32 43691, %v1079_v44  ;;  %v1083_v11 = vmul.u32 43690, %v1079_v44 }
 0x393   : > { %4596 = vst [vmem:[#allocation2 + $0xb1] sm:$0xff] %v4548_v49  ;;  %4348 = vmatmul.f32.gmra.mxu0 %v4193_v9  ;;  %v1042_v14 = vshrl.u32 %v1041_v56, 4  ;;  %v1985_v0 = vsel %vm10105_vm5, %v10098_v7, %v10084_v21  ;;  %v1066_v6 = vsel %vm1065_vm6, 1, %v12452_v54  ;;  %v10129_v13 = vmul.u32 43691, %v1080_v47  ;;  %5698 = vmatpush.msrb.mxu1 %v7483_v17 }
 0x394   : > { %v4402_v20 = vadd.f32 %v10048_v26, %v4128_v52  ;;  %3800 = vmatmul.f32.gmra.mxu2 %v3645_v58  ;;  %4074 = vmatmul.f32.gmra.mxu3 %v3919_v23  ;;  %v1068_v8 = vadd.s32 %v1066_v6, %v1064_v35  ;;  %v1085_v9 = vmul.u32 43690, %v1080_v47  ;;  %v1086_v53 = vshll.u32 %v1083_v11, 16  ;;  %v12572_v52 = vld [vmem:[#allocation31_spill] sm:$0xff]  ;;  %v3920_v6 = vld [vmem:[#allocation2 + $0x161] sm:$0xff] }
 0x395   : > { %v1043_v25 = vmul.u32 24, %v1042_v14  ;;  %v1087_v26 = vshrl.u32 %v1083_v11, 16  ;;  %v1088_v58 = vshll.u32 %v10129_v13, 16  ;;  %v10134_v23 = vadd.s32 200, %v8862_v18  ;;  %v4194_v14 = vld [vmem:[#allocation2 + $0x162] sm:$0xff] }
 0x396   : > { %v4453_v44 = vadd.f32 %v9697_v34, %v4402_v20  ;;  %v1069_v56 = vadd.s32 %v1068_v8, %v1058_v36  ;;  %vm1090_vm7 = vc.u32 %v1082_v27, %v1086_v53  ;;  %v1092_v10 = vadd.s32 %v1086_v53, %v1082_v27  ;;  %v3646_v20 = vld [vmem:[#allocation2 + $0x160] sm:$0xff] }
 0x397   : > { %v3753_v4 = vpop.f32.mrf.mxu2  ;;  %v4027_v21 = vpop.f32.mrf.mxu3  ;;  %v10137_v7 = vsub.s32 %v9997_v37, %v1043_v25  ;;  %v1091_v17 = vsel %vm1090_vm7, 1, %v12452_v54  ;;  %v1108_v11 = vand.u32 65535, %v10134_v23  ;;  %v10153_v53 = vadd.f32 %v9526_v51, %v8914_v62 }
 0x398   : > { %v4501_v49 = vmax.f32 %v4453_v44, 0.0  ;;  %v3855_v47 = vadd.f32 %v3753_v4, %v12572_v52  ;;  %v10140_v35 = vpop.f32.mrf.mxu0  ;;  %v10142_v24 = vpop.f32.mrf.mxu1  ;;  %v1070_v36 = vadd.s32 %v1069_v56, %v1060_v61  ;;  %v1093_v8 = vadd.s32 %v1091_v17, %v1085_v9  ;;  %v3921_v44 = vld [vmem:[#allocation2 + $0x169] sm:$0xff] }
 0x399   : > { %vm1794_vm8 = vcmp.ne.s32.totalorder %v10137_v7, 0  ;;  %vm1842_vm9 = vcmp.lt.s32.totalorder %v10137_v7, 0  ;;  %v1938_v37 = vadd.s32 24, %v10137_v7  ;;  %vm1094_vm10 = vc.u32 %v1092_v10, %v1088_v58 }
 0x39a   : > { %v4549_v27 = vsel %vm10091_vm1, %v4501_v49, 0.0  ;;  %v4129_v25 = vadd.f32 %v4027_v21, %v3855_v47  ;;  %vm10155_vm11 = vmand %vm1842_vm9, %vm1794_vm8  ;;  %7630 = vmatmul.msk.f32.gmra.mxu1 %vm10091_vm1, %v4501_v49  ;;  %v1071_v61 = vshrl.u32 %v1070_v36, 4  ;;  %v1095_v4 = vsel %vm1094_vm10, 1, %v12452_v54  ;;  %v12577_v36 = vld [vmem:[#allocation33_spill] sm:$0xff] }
 0x39b   : > { %4597 = vst [vmem:[#allocation2 + $0xb9] sm:$0xff] %v4549_v27  ;;  %4351 = vmatmul.f32.gmra.mxu0 %v4194_v14  ;;  %v1109_v21 = vshrl.u32 %v10134_v23, 16  ;;  %vm10163_vm12 = vcmp.lt.s32.totalorder %v1985_v0, 16  ;;  %v1089_v51 = vshrl.u32 %v10129_v13, 16  ;;  %v1097_v58 = vadd.s32 %v1095_v4, %v1093_v8  ;;  %v3647_v8 = vld [vmem:[#allocation2 + $0x168] sm:$0xff] }
 0x39c   : > { %v4403_v62 = vadd.f32 %v10101_v50, %v4129_v25  ;;  %3803 = vmatmul.f32.gmra.mxu2 %v3646_v20  ;;  %4077 = vmatmul.f32.gmra.mxu3 %v3920_v6  ;;  %v1072_v56 = vmul.u32 24, %v1071_v61  ;;  %v1111_v10 = vmul.u32 43691, %v1108_v11  ;;  %v10169_v1 = vmul.u32 43690, %v1108_v11 }
 0x39d   : > { %v10171_v49 = vmul.u32 43691, %v1109_v21  ;;  %v1986_v0 = vsel %vm10155_vm11, %v1938_v37, %v10137_v7  ;;  %v1098_v47 = vadd.s32 %v1097_v58, %v1087_v26  ;;  %v1114_v14 = vmul.u32 43690, %v1109_v21  ;;  %v4195_v26 = vld [vmem:[#allocation2 + $0x16a] sm:$0xff] }
 0x39e   : > { %v4454_v52 = vadd.f32 %v9697_v34, %v4403_v62  ;;  %v10178_v20 = vsub.s32 %v10028_v43, %v1072_v56  ;;  %v1115_v13 = vshll.u32 %v10169_v1, 16  ;;  %v10182_v11 = vadd.s32 208, %v8862_v18 }
 0x39f   : > { %v3756_v50 = vpop.f32.mrf.mxu2  ;;  %v4030_v17 = vpop.f32.mrf.mxu3  ;;  %v10185_v6 = vadd.s32 216, %v8862_v18  ;;  %v1099_v37 = vadd.s32 %v1098_v47, %v1089_v51  ;;  %v1117_v43 = vshll.u32 %v10171_v49, 16  ;;  %vm10203_vm1 = vcmp.lt.s32.totalorder %v1986_v0, 16 }
 0x3a0   : > { %v4502_v34 = vmax.f32 %v4454_v52, 0.0  ;;  %v3856_v27 = vadd.f32 %v3756_v50, %v12577_v36  ;;  %v10188_v25 = vpop.f32.mrf.mxu0  ;;  %v10190_v7 = vpop.f32.mrf.mxu1  ;;  %vm1795_vm13 = vcmp.ne.s32.totalorder %v10178_v20, 0  ;;  %vm1843_vm14 = vcmp.lt.s32.totalorder %v10178_v20, 0  ;;  %v4680_v50 = vld [vmem:[%s12353_s3 + $0x30] sm:$0xff] }
 0x3a1   : > { %12578 = vst [vmem:[#allocation22_spill] sm:$0xff] %v10190_v7  ;;  %v1939_v61 = vadd.s32 24, %v10178_v20  ;;  %vm1119_vm15 = vc.u32 %v1111_v10, %v1115_v13  ;;  %vm10198_vm0 = vmand %vm1843_vm14, %vm1795_vm13  ;;  %v1100_v51 = vshrl.u32 %v1099_v37, 4  ;;  %v1121_v52 = vadd.s32 %v1115_v13, %v1111_v10  ;;  %4925 = vmatpush.msrb.mxu2 %v4680_v50  ;;  %v3922_v50 = vld [vmem:[#allocation2 + $0x171] sm:$0xff] }
 0x3a2   : > { %v4550_v4 = vsel %vm10163_vm12, %v4502_v34, 0.0  ;;  %v4130_v21 = vadd.f32 %v4030_v17, %v3856_v27  ;;  %v1120_v58 = vsel %vm1119_vm15, 1, %v12452_v54  ;;  %7631 = vmatmul.msk.f32.gmra.mxu1 %vm10163_vm12, %v4502_v34  ;;  %v7450_v17 = vld [vmem:[%s12353_s3 + $0x130] sm:$0xff]  ;;  %v1116_v27 = vshrl.u32 %v10169_v1, 16 }
 0x3a3   : > { %4598 = vst [vmem:[#allocation2 + $0xc1] sm:$0xff] %v4550_v4  ;;  %4354 = vmatmul.f32.gmra.mxu0 %v4195_v26  ;;  %v1122_v47 = vadd.s32 %v1120_v58, %v1114_v14  ;;  %v1101_v0 = vmul.u32 24, %v1100_v51  ;;  %v1137_v9 = vand.u32 65535, %v10182_v11  ;;  %v1987_v10 = vsel %vm10198_vm0, %v1939_v61, %v10178_v20  ;;  %5151 = vmatpush.msrb.mxu3 %v7450_v17  ;;  %v4196_v58 = vld [vmem:[#allocation2 + $0x172] sm:$0xff] }
 0x3a4   : > { %v4404_v36 = vadd.f32 %v10140_v35, %v4130_v21  ;;  %3806 = vmatmul.f32.gmra.mxu2 %v3647_v8  ;;  %4080 = vmatmul.f32.gmra.mxu3 %v3921_v44  ;;  %v1118_v14 = vshrl.u32 %v10171_v49, 16  ;;  %vm1123_vm2 = vc.u32 %v1121_v52, %v1117_v43  ;;  %v1138_v13 = vshrl.u32 %v10182_v11, 16  ;;  %v10226_v35 = vld [vmem:[%s12352_s2] ss:$0 sm:$0xff]  ;;  %v12583_v21 = vld [vmem:[#allocation34_spill] sm:$0xff] }
 0x3a5   : > { %v1102_v34 = vsub.s32 %v10081_v59, %v1101_v0  ;;  %v1124_v26 = vsel %vm1123_vm2, 1, %v12452_v54  ;;  %v1166_v20 = vand.u32 65535, %v10185_v6  ;;  %v1140_v8 = vmul.u32 43691, %v1137_v9  ;;  %v3648_v52 = vld [vmem:[#allocation2 + $0x170] sm:$0xff] }
 0x3a6   : > { %v4455_v1 = vadd.f32 %v10226_v35, %v4404_v36  ;;  %v1126_v43 = vadd.s32 %v1124_v26, %v1122_v47  ;;  %v10232_v44 = vmul.u32 43690, %v1137_v9  ;;  %v10234_v61 = vmul.u32 43691, %v1138_v13 }
 0x3a7   : > { %v3759_v37 = vpop.f32.mrf.mxu2  ;;  %v4033_v49 = vpop.f32.mrf.mxu3  ;;  %vm1796_vm3 = vcmp.ne.s32.totalorder %v1102_v34, 0  ;;  %vm1844_vm4 = vcmp.lt.s32.totalorder %v1102_v34, 0  ;;  %v1940_v47 = vadd.s32 24, %v1102_v34  ;;  %v1143_v0 = vmul.u32 43690, %v1138_v13 }
 0x3a8   : > { %v4503_v4 = vmax.f32 %v4455_v1, 0.0  ;;  %v3857_v62 = vadd.f32 %v3759_v37, %v12583_v21  ;;  %v10237_v51 = vpop.f32.mrf.mxu0  ;;  %v10239_v59 = vpop.f32.mrf.mxu1  ;;  %vm10241_vm5 = vmand %vm1844_vm4, %vm1796_vm3  ;;  %v1127_v36 = vadd.s32 %v1126_v43, %v1116_v27  ;;  %v1144_v9 = vshll.u32 %v10232_v44, 16  ;;  %v7482_v43 = vld [vmem:[%s12353_s3 + $0x230] sm:$0xff] }
 0x3a9   : > { %12584 = vst [vmem:[#allocation23_spill] sm:$0xff] %v10239_v59  ;;  %v1146_v37 = vshll.u32 %v10234_v61, 16  ;;  %v1167_v21 = vshrl.u32 %v10185_v6, 16  ;;  %vm10250_vm6 = vcmp.lt.s32.totalorder %v1987_v10, 16  ;;  %v1145_v13 = vshrl.u32 %v10232_v44, 16  ;;  %5699 = vmatpush.msrb.mxu1 %v7482_v43  ;;  %v3649_v43 = vld [vmem:[#allocation2 + $0x178] sm:$0xff] }
 0x3aa   : > { %v4551_v1 = vsel %vm10203_vm1, %v4503_v4, 0.0  ;;  %v4131_v26 = vadd.f32 %v4033_v49, %v3857_v62  ;;  %7632 = vmatmul.msk.f32.gmra.mxu1 %vm10203_vm1, %v4503_v4  ;;  %v1128_v27 = vadd.s32 %v1127_v36, %v1118_v14  ;;  %vm1148_vm7 = vc.u32 %v1140_v8, %v1144_v9  ;;  %v7466_v49 = vld [vmem:[%s12353_s3 + $0x1b0] sm:$0xff] }
 0x3ab   : > { %4599 = vst [vmem:[#allocation2 + $0xc9] sm:$0xff] %v4551_v1  ;;  %4357 = vmatmul.f32.gmra.mxu0 %v4196_v58  ;;  %v1988_v56 = vsel %vm10241_vm5, %v1940_v47, %v1102_v34  ;;  %v1149_v14 = vsel %vm1148_vm7, 1, %v12452_v54  ;;  %v1150_v4 = vadd.s32 %v1144_v9, %v1140_v8  ;;  %v1169_v58 = vmul.u32 43691, %v1166_v20  ;;  %v7449_v34 = vld [vmem:[%s12353_s3 + $0x128] sm:$0xff] }
 0x3ac   : > { %v4405_v10 = vadd.f32 %v10188_v25, %v4131_v26  ;;  %3809 = vmatmul.f32.gmra.mxu2 %v3648_v52  ;;  %4083 = vmatmul.f32.gmra.mxu3 %v3922_v50  ;;  %v1129_v44 = vshrl.u32 %v1128_v27, 4  ;;  %v1151_v62 = vadd.s32 %v1149_v14, %v1143_v0  ;;  %v10267_v36 = vmul.u32 43690, %v1166_v20 }
 0x3ad   : > { %5425 = vmatpush.msrb.mxu0 %v7466_v49  ;;  %v1147_v7 = vshrl.u32 %v10234_v61, 16  ;;  %vm1152_vm8 = vc.u32 %v1150_v4, %v1146_v37  ;;  %v10271_v25 = vmul.u32 43691, %v1167_v21  ;;  %vm10273_vm9 = vcmp.lt.s32.totalorder %v1988_v56, 16  ;;  %v4197_v61 = vld [vmem:[#allocation2 + $0x17a] sm:$0xff]  ;;  %5152 = vmatpush.msrb.mxu3 %v7449_v34 }
 0x3ae   : > { %v4456_v1 = vadd.f32 %v10226_v35, %v4405_v10  ;;  %v1130_v50 = vmul.u32 24, %v1129_v44  ;;  %v1153_v17 = vsel %vm1152_vm8, 1, %v12452_v54  ;;  %v1172_v47 = vmul.u32 43690, %v1167_v21  ;;  %v3923_v10 = vld [vmem:[#allocation2 + $0x179] sm:$0xff] }
 0x3af   : > { %v3762_v52 = vpop.f32.mrf.mxu2  ;;  %v4036_v8 = vpop.f32.mrf.mxu3  ;;  %v1173_v20 = vshll.u32 %v10267_v36, 16  ;;  %v1155_v27 = vadd.s32 %v1153_v17, %v1151_v62  ;;  %v1175_v49 = vshll.u32 %v10271_v25, 16  ;;  %v1174_v14 = vshrl.u32 %v10267_v36, 16 }
 0x3b0   : > { %v4504_v0 = vmax.f32 %v4456_v1, 0.0  ;;  %v3858_v9 = vadd.f32 %v3762_v52, %v8929_v22  ;;  %v10280_v26 = vpop.f32.mrf.mxu0  ;;  %v10282_v37 = vpop.f32.mrf.mxu1  ;;  %v1131_v56 = vsub.s32 %v10134_v23, %v1130_v50  ;;  %v10299_v17 = vadd.s32 232, %v8862_v18 }
 0x3b1   : > { %vm1177_vm10 = vc.u32 %v1169_v58, %v1173_v20  ;;  %v1179_v21 = vadd.s32 %v1173_v20, %v1169_v58  ;;  %v1156_v44 = vadd.s32 %v1155_v27, %v1145_v13  ;;  %v10294_v13 = vadd.s32 224, %v8862_v18 }
 0x3b2   : > { %v4552_v4 = vsel %vm10250_vm6, %v4504_v0, 0.0  ;;  %v4132_v22 = vadd.f32 %v4036_v8, %v3858_v9  ;;  %v1178_v1 = vsel %vm1177_vm10, 1, %v12452_v54  ;;  %vm1797_vm11 = vcmp.ne.s32.totalorder %v1131_v56, 0  ;;  %7633 = vmatmul.msk.f32.gmra.mxu1 %vm10250_vm6, %v4504_v0 }
 0x3b3   : > { %4600 = vst [vmem:[#allocation2 + $0xd1] sm:$0xff] %v4552_v4  ;;  %4360 = vmatmul.f32.gmra.mxu0 %v4197_v61  ;;  %vm1845_vm12 = vcmp.lt.s32.totalorder %v1131_v56, 0  ;;  %v1941_v62 = vadd.s32 24, %v1131_v56  ;;  %v1180_v23 = vadd.s32 %v1178_v1, %v1172_v47  ;;  %v1157_v58 = vadd.s32 %v1156_v44, %v1147_v7  ;;  %v3650_v44 = vld [vmem:[#allocation2 + $0x180] sm:$0xff] }
 0x3b4   : > { %v4406_v36 = vadd.f32 %v10237_v51, %v4132_v22  ;;  %3812 = vmatmul.f32.gmra.mxu2 %v3649_v43  ;;  %4086 = vmatmul.f32.gmra.mxu3 %v3923_v10  ;;  %vm1893_vm13 = vmand %vm1845_vm12, %vm1797_vm11  ;;  %vm1181_vm14 = vc.u32 %v1179_v21, %v1175_v49  ;;  %v1176_v8 = vshrl.u32 %v10271_v25, 16  ;;  %v10303_v20 = vadd.s32 240, %v8862_v18  ;;  %v3924_v1 = vld [vmem:[#allocation2 + $0x181] sm:$0xff] }
 0x3b5   : > { %v1989_v52 = vsel %vm1893_vm13, %v1941_v62, %v1131_v56  ;;  %v1182_v50 = vsel %vm1181_vm14, 1, %v12452_v54  ;;  %v1158_v47 = vshrl.u32 %v1157_v58, 4  ;;  %v1195_v25 = vand.u32 65535, %v10294_v13  ;;  %v4198_v56 = vld [vmem:[#allocation2 + $0x182] sm:$0xff] }
 0x3b6   : > { %v4457_v59 = vadd.f32 %v10226_v35, %v4406_v36  ;;  %v1184_v51 = vadd.s32 %v1182_v50, %v1180_v23  ;;  %vm10305_vm15 = vcmp.lt.s32.totalorder %v1989_v52, 16  ;;  %v1196_v61 = vshrl.u32 %v10294_v13, 16 }
 0x3b7   : > { %v3765_v7 = vpop.f32.mrf.mxu2  ;;  %v4039_v9 = vpop.f32.mrf.mxu3  ;;  %v1224_v27 = vand.u32 65535, %v10299_v17  ;;  %v1159_v21 = vmul.u32 24, %v1158_v47  ;;  %v1198_v62 = vmul.u32 43691, %v1195_v25  ;;  %v10317_v23 = vmul.u32 43690, %v1195_v25  ;;  %v4679_v25 = vld [vmem:[%s12353_s3 + $0x28] sm:$0xff] }
 0x3b8   : > { %v4505_v49 = vmax.f32 %v4457_v59, 0.0  ;;  %v3859_v43 = vadd.f32 %v3765_v7, %v8934_v3  ;;  %v10313_v10 = vpop.f32.mrf.mxu0  ;;  %v10315_v4 = vpop.f32.mrf.mxu1  ;;  %v1185_v22 = vadd.s32 %v1184_v51, %v1174_v14  ;;  %v10319_v36 = vmul.u32 43691, %v1196_v61  ;;  %4926 = vmatpush.msrb.mxu2 %v4679_v25 }
 0x3b9   : > { %v1225_v58 = vshrl.u32 %v10299_v17, 16  ;;  %v1160_v50 = vsub.s32 %v10182_v11, %v1159_v21  ;;  %v1201_v14 = vmul.u32 43690, %v1196_v61  ;;  %v1202_v47 = vshll.u32 %v10317_v23, 16 }
 0x3ba   : > { %v4553_v52 = vsel %vm10273_vm9, %v4505_v49, 0.0  ;;  %v4133_v3 = vadd.f32 %v4039_v9, %v3859_v43  ;;  %v1186_v59 = vadd.s32 %v1185_v22, %v1176_v8  ;;  %7634 = vmatmul.msk.f32.gmra.mxu1 %vm10273_vm9, %v4505_v49  ;;  %v1203_v51 = vshrl.u32 %v10317_v23, 16 }
 0x3bb   : > { %4601 = vst [vmem:[#allocation2 + $0xd9] sm:$0xff] %v4553_v52  ;;  %4363 = vmatmul.f32.gmra.mxu0 %v4198_v56  ;;  %v1204_v7 = vshll.u32 %v10319_v36, 16  ;;  %vm1798_vm0 = vcmp.ne.s32.totalorder %v1160_v50, 0  ;;  %vm1846_vm1 = vcmp.lt.s32.totalorder %v1160_v50, 0  ;;  %v1942_v11 = vadd.s32 24, %v1160_v50 }
 0x3bc   : > { %v4407_v9 = vadd.f32 %v10280_v26, %v4133_v3  ;;  %3815 = vmatmul.f32.gmra.mxu2 %v3650_v44  ;;  %4089 = vmatmul.f32.gmra.mxu3 %v3924_v1  ;;  %vm10337_vm2 = vmand %vm1846_vm1, %vm1798_vm0  ;;  %v1187_v61 = vshrl.u32 %v1186_v59, 4  ;;  %v1205_v49 = vshrl.u32 %v10319_v36, 16  ;;  %vm1206_vm3 = vc.u32 %v1198_v62, %v1202_v47 }
 0x3bd   : > { %v1208_v43 = vadd.s32 %v1202_v47, %v1198_v62  ;;  %v1990_v56 = vsel %vm10337_vm2, %v1942_v11, %v1160_v50  ;;  %v1207_v21 = vsel %vm1206_vm3, 1, %v12452_v54  ;;  %v10346_v22 = vmul.u32 43690, %v1224_v27  ;;  %v4199_v47 = vld [vmem:[#allocation2 + $0x18a] sm:$0xff] }
 0x3be   : > { %v4458_v26 = vadd.f32 %v10226_v35, %v4407_v9  ;;  %v1188_v23 = vmul.u32 24, %v1187_v61  ;;  %v1209_v52 = vadd.s32 %v1207_v21, %v1201_v14  ;;  %v1227_v3 = vmul.u32 43691, %v1224_v27  ;;  %v7465_v11 = vld [vmem:[%s12353_s3 + $0x1a8] sm:$0xff]  ;;  %v4674_v14 = vld [vmem:[%s12353_s3] sm:$0xff] }
 0x3bf   : > { %v3768_v44 = vpop.f32.mrf.mxu2  ;;  %v4042_v1 = vpop.f32.mrf.mxu3  ;;  %vm1210_vm4 = vc.u32 %v1208_v43, %v1204_v7  ;;  %v10354_v9 = vmul.u32 43691, %v1225_v58  ;;  %vm10359_vm5 = vcmp.lt.s32.totalorder %v1990_v56, 16  ;;  %v3651_v27 = vld [vmem:[#allocation2 + $0x188] sm:$0xff]  ;;  %v1231_v8 = vshll.u32 %v10346_v22, 16  ;;  %5426 = vmatpush.msrb.mxu0 %v7465_v11  ;;  %v4678_v56 = vld [vmem:[%s12353_s3 + $0x20] sm:$0xff] }
 0x3c0   : > { %v4506_v36 = vmax.f32 %v4458_v26, 0.0  ;;  %v3860_v62 = vadd.f32 %v3768_v44, %v8943_v15  ;;  %v10349_v59 = vpop.f32.mrf.mxu0  ;;  %v10351_v25 = vpop.f32.mrf.mxu1  ;;  %v1211_v50 = vsel %vm1210_vm4, 1, %v12452_v54  ;;  %v3925_v7 = vld [vmem:[#allocation2 + $0x189] sm:$0xff]  ;;  %v1189_v15 = vsub.s32 %v10185_v6, %v1188_v23  ;;  %v7448_v44 = vld [vmem:[%s12353_s3 + $0x120] sm:$0xff]  ;;  %4927 = vmatpush.msrb.mxu2 %v4678_v56 }
 0x3c1   : > { %12595 = vst [vmem:[#allocation24_spill] sm:$0xff] %v10351_v25  ;;  %v1213_v34 = vadd.s32 %v1211_v50, %v1209_v52  ;;  %v1230_v26 = vmul.u32 43690, %v1225_v58  ;;  %v1233_v21 = vshll.u32 %v10354_v9, 16  ;;  %v7481_v58 = vld [vmem:[%s12353_s3 + $0x228] sm:$0xff]  ;;  %v7464_v23 = vld [vmem:[%s12353_s3 + $0x1a0] sm:$0xff]  ;;  %v1232_v0 = vshrl.u32 %v10346_v22, 16  ;;  %5153 = vmatpush.msrb.mxu3 %v7448_v44 }
 0x3c2   : > { %v4554_v61 = vsel %vm10305_vm15, %v4506_v36, 0.0  ;;  %v4134_v43 = vadd.f32 %v4042_v1, %v3860_v62  ;;  %vm1799_vm6 = vcmp.ne.s32.totalorder %v1189_v15, 0  ;;  %vm1847_vm7 = vcmp.lt.s32.totalorder %v1189_v15, 0  ;;  %7635 = vmatmul.msk.f32.gmra.mxu1 %vm10305_vm15, %v4506_v36  ;;  %v4677_v36 = vld [vmem:[%s12353_s3 + $0x18] sm:$0xff]  ;;  %5427 = vmatpush.msrb.mxu0 %v7464_v23 }
 0x3c3   : > { %4602 = vst [vmem:[#allocation2 + $0xe1] sm:$0xff] %v4554_v61  ;;  %4366 = vmatmul.f32.gmra.mxu0 %v4199_v47  ;;  %v1943_v6 = vadd.s32 24, %v1189_v15  ;;  %v1214_v1 = vadd.s32 %v1213_v34, %v1203_v51  ;;  %vm10383_vm8 = vmand %vm1847_vm7, %vm1799_vm6  ;;  %vm1235_vm9 = vc.u32 %v1227_v3, %v1231_v8  ;;  %v1237_v51 = vadd.s32 %v1231_v8, %v1227_v3  ;;  %v7447_v22 = vld [vmem:[%s12353_s3 + $0x118] sm:$0xff] }
 0x3c4   : > { %v4408_v52 = vadd.f32 %v10313_v10, %v4134_v43  ;;  %3818 = vmatmul.f32.gmra.mxu2 %v3651_v27  ;;  %4092 = vmatmul.f32.gmra.mxu3 %v3925_v7  ;;  %v1236_v10 = vsel %vm1235_vm9, 1, %v12452_v54  ;;  %v1253_v11 = vand.u32 65535, %v10303_v20  ;;  %v7463_v3 = vld [vmem:[%s12353_s3 + $0x198] sm:$0xff]  ;;  %v1234_v7 = vshrl.u32 %v10354_v9, 16 }
 0x3c5   : > { %v1991_v47 = vsel %vm10383_vm8, %v1943_v6, %v1189_v15  ;;  %v1215_v50 = vadd.s32 %v1214_v1, %v1205_v49  ;;  %5700 = vmatpush.msrb.mxu1 %v7481_v58  ;;  %v1238_v15 = vadd.s32 %v1236_v10, %v1230_v26  ;;  %vm1239_vm10 = vc.u32 %v1237_v51, %v1233_v21  ;;  %v4676_v49 = vld [vmem:[%s12353_s3 + $0x10] sm:$0xff] }
 0x3c6   : > { %v4459_v27 = vadd.f32 %v10226_v35, %v4408_v52  ;;  %vm10406_vm11 = vcmp.lt.s32.totalorder %v1991_v47, 16  ;;  %v1240_v56 = vsel %vm1239_vm10, 1, %v12452_v54  ;;  %v1254_v6 = vshrl.u32 %v10303_v20, 16  ;;  %4928 = vmatpush.msrb.mxu2 %v4677_v36  ;;  %v7446_v26 = vld [vmem:[%s12353_s3 + $0x110] sm:$0xff]  ;;  %5154 = vmatpush.msrb.mxu3 %v7447_v22  ;;  %v4675_v22 = vld [vmem:[%s12353_s3 + $0x8] sm:$0xff] }
 0x3c7   : > { %v3771_v34 = vpop.f32.mrf.mxu2  ;;  %v4045_v61 = vpop.f32.mrf.mxu3  ;;  %v1216_v43 = vshrl.u32 %v1215_v50, 4  ;;  %v1256_v9 = vmul.u32 43691, %v1253_v11  ;;  %v7462_v21 = vld [vmem:[%s12353_s3 + $0x190] sm:$0xff]  ;;  %v1242_v62 = vadd.s32 %v1240_v56, %v1238_v15  ;;  %v10423_v51 = vmul.u32 43690, %v1253_v11  ;;  %5428 = vmatpush.msrb.mxu0 %v7463_v3  ;;  %v7445_v3 = vld [vmem:[%s12353_s3 + $0x108] sm:$0xff] }
 0x3c8   : > { %v4507_v44 = vmax.f32 %v4459_v27, 0.0  ;;  %v3861_v1 = vadd.f32 %v3771_v34, %v8957_v48  ;;  %v10419_v58 = vpop.f32.mrf.mxu0  ;;  %v4200_v23 = vld [vmem:[#allocation2 + $0x192] sm:$0xff]  ;;  %v10421_v52 = vpop.f32.mrf.mxu1  ;;  %v10425_v10 = vmul.u32 43691, %v1254_v6  ;;  %v1259_v25 = vmul.u32 43690, %v1254_v6  ;;  %4929 = vmatpush.msrb.mxu2 %v4676_v49  ;;  %5155 = vmatpush.msrb.mxu3 %v7446_v26  ;;  %v7444_v26 = vld [vmem:[%s12353_s3 + $0x100] sm:$0xff] }
 0x3c9   : > { %12602 = vst [vmem:[#allocation25_spill] sm:$0xff] %v10421_v52  ;;  %v3652_v36 = vld [vmem:[#allocation2 + $0x190] sm:$0xff]  ;;  %v1217_v50 = vmul.u32 24, %v1216_v43  ;;  %v10428_v27 = vadd.s32 248, %v8862_v18  ;;  %v1243_v52 = vadd.s32 %v1242_v62, %v1232_v0  ;;  %v1260_v11 = vshll.u32 %v10423_v51, 16  ;;  %5429 = vmatpush.msrb.mxu0 %v7462_v21  ;;  %v7461_v43 = vld [vmem:[%s12353_s3 + $0x188] sm:$0xff] }
 0x3ca   : > { %v3926_v47 = vld [vmem:[#allocation2 + $0x191] sm:$0xff]  ;;  %v4555_v48 = vsel %vm10359_vm5, %v4507_v44, 0.0  ;;  %v4135_v34 = vadd.f32 %v4045_v61, %v3861_v1  ;;  %7636 = vmatmul.msk.f32.gmra.mxu1 %vm10359_vm5, %v4507_v44  ;;  %v1261_v0 = vshrl.u32 %v10423_v51, 16  ;;  %v1262_v49 = vshll.u32 %v10425_v10, 16  ;;  %4930 = vmatpush.msrb.mxu2 %v4675_v22 }
 0x3cb   : > { %4603 = vst [vmem:[#allocation2 + $0xe9] sm:$0xff] %v4555_v48  ;;  %4369 = vmatmul.f32.gmra.mxu0 %v4200_v23  ;;  %v1218_v15 = vsub.s32 %v10294_v13, %v1217_v50  ;;  %v1263_v61 = vshrl.u32 %v10425_v10, 16  ;;  %v1244_v6 = vadd.s32 %v1243_v52, %v1234_v7  ;;  %vm1264_vm12 = vc.u32 %v1256_v9, %v1260_v11 }
 0x3cc   : > { %v4409_v56 = vadd.f32 %v10349_v59, %v4135_v34  ;;  %3821 = vmatmul.f32.gmra.mxu2 %v3652_v36  ;;  %4095 = vmatmul.f32.gmra.mxu3 %v3926_v47  ;;  %v1282_v13 = vand.u32 65535, %v10428_v27  ;;  %v1265_v44 = vsel %vm1264_vm12, 1, %v12452_v54  ;;  %v7460_v59 = vld [vmem:[%s12353_s3 + $0x180] sm:$0xff]  ;;  %v1266_v23 = vadd.s32 %v1260_v11, %v1256_v9 }
 0x3cd   : > { %vm1800_vm13 = vcmp.ne.s32.totalorder %v1218_v15, 0  ;;  %vm1848_vm14 = vcmp.lt.s32.totalorder %v1218_v15, 0  ;;  %v1944_v21 = vadd.s32 24, %v1218_v15  ;;  %5156 = vmatpush.msrb.mxu3 %v7445_v3  ;;  %v1245_v1 = vshrl.u32 %v1244_v6, 4  ;;  %5430 = vmatpush.msrb.mxu0 %v7461_v43  ;;  %v3653_v43 = vld [vmem:[#allocation2 + $0x198] sm:$0xff] }
 0x3ce   : > { %v4460_v7 = vadd.f32 %v10226_v35, %v4409_v56  ;;  %vm1896_vm15 = vmand %vm1848_vm14, %vm1800_vm13  ;;  %v1267_v52 = vadd.s32 %v1265_v44, %v1259_v25  ;;  %v1283_v50 = vshrl.u32 %v10428_v27, 16  ;;  %v1285_v48 = vmul.u32 43691, %v1282_v13  ;;  %4931 = vmatpush.msrb.mxu2 %v4674_v14  ;;  %v4201_v25 = vld [vmem:[#allocation2 + $0x19a] sm:$0xff] }
 0x3cf   : > { %v3774_v62 = vpop.f32.mrf.mxu2  ;;  %v1992_v36 = vsel %vm1896_vm15, %v1944_v21, %v1218_v15  ;;  %v4048_v47 = vpop.f32.mrf.mxu3  ;;  %v10462_v34 = vmul.u32 43690, %v1282_v13  ;;  %5157 = vmatpush.msrb.mxu3 %v7444_v26  ;;  %v1246_v11 = vmul.u32 24, %v1245_v1  ;;  %5431 = vmatpush.msrb.mxu0 %v7460_v59  ;;  %v3927_v6 = vld [vmem:[#allocation2 + $0x199] sm:$0xff]  ;;  %vm1268_vm1 = vc.u32 %v1266_v23, %v1262_v49 }
 0x3d0   : > { %v4508_v22 = vmax.f32 %v4460_v7, 0.0  ;;  %v3862_v3 = vadd.f32 %v3774_v62, %v8961_v40  ;;  %vm10465_vm0 = vcmp.lt.s32.totalorder %v1992_v36, 16  ;;  %v10469_v9 = vpop.f32.mrf.mxu0  ;;  %v10471_v15 = vpop.f32.mrf.mxu1  ;;  %v10473_v13 = vmul.u32 43691, %v1283_v50 }
 0x3d1   : > { %v1288_v14 = vmul.u32 43690, %v1283_v50  ;;  %v1289_v26 = vshll.u32 %v10462_v34, 16  ;;  %v1247_v44 = vsub.s32 %v10299_v17, %v1246_v11  ;;  %v1269_v7 = vsel %vm1268_vm1, 1, %v12452_v54 }
 0x3d2   : > { %v4556_v40 = vsel %vm10406_vm11, %v4508_v22, 0.0  ;;  %v4136_v21 = vadd.f32 %v4048_v47, %v3862_v3  ;;  %7637 = vmatmul.msk.f32.gmra.mxu1 %vm10406_vm11, %v4508_v22  ;;  %v1271_v59 = vadd.s32 %v1269_v7, %v1267_v52  ;;  %v1290_v49 = vshrl.u32 %v10462_v34, 16 }
 0x3d3   : > { %4604 = vst [vmem:[#allocation2 + $0xf1] sm:$0xff] %v4556_v40  ;;  %4372 = vmatmul.f32.gmra.mxu0 %v4201_v25  ;;  %v1291_v1 = vshll.u32 %v10473_v13, 16  ;;  %v1292_v23 = vshrl.u32 %v10473_v13, 16  ;;  %vm1801_vm2 = vcmp.ne.s32.totalorder %v1247_v44, 0  ;;  %vm1849_vm3 = vcmp.lt.s32.totalorder %v1247_v44, 0 }
 0x3d4   : > { %v4410_v62 = vadd.f32 %v10419_v58, %v4136_v21  ;;  %3824 = vmatmul.f32.gmra.mxu2 %v3653_v43  ;;  %4098 = vmatmul.f32.gmra.mxu3 %v3927_v6  ;;  %v1945_v17 = vadd.s32 24, %v1247_v44  ;;  %vm1897_vm4 = vmand %vm1849_vm3, %vm1801_vm2  ;;  %v1272_v36 = vadd.s32 %v1271_v59, %v1261_v0  ;;  %vm1293_vm5 = vc.u32 %v1285_v48, %v1289_v26  ;;  %v4202_v6 = vld [vmem:[#allocation2 + $0x1a2] sm:$0xff] }
 0x3d5   : > { %v1295_v8 = vadd.s32 %v1289_v26, %v1285_v48  ;;  %v10489_v52 = vadd.s32 256, %v8862_v18  ;;  %v1294_v34 = vsel %vm1293_vm5, 1, %v12452_v54  ;;  %v10494_v58 = vadd.s32 264, %v8862_v18  ;;  %v3928_v21 = vld [vmem:[#allocation2 + $0x1a1] sm:$0xff] }
 0x3d6   : > { %v4461_v47 = vadd.f32 %v10226_v35, %v4410_v62  ;;  %v1993_v50 = vsel %vm1897_vm4, %v1945_v17, %v1247_v44  ;;  %v1273_v0 = vadd.s32 %v1272_v36, %v1263_v61  ;;  %v1296_v48 = vadd.s32 %v1294_v34, %v1288_v14  ;;  %v10523_v34 = vld [vmem:[#allocation2] sm:$0xff] }
 0x3d7   : > { %v3777_v22 = vpop.f32.mrf.mxu2  ;;  %vm10496_vm6 = vcmp.lt.s32.totalorder %v1993_v50, 16  ;;  %v4051_v51 = vpop.f32.mrf.mxu3  ;;  %vm1297_vm7 = vc.u32 %v1295_v8, %v1291_v1  ;;  %v1311_v40 = vand.u32 65535, %v10489_v52  ;;  %v1312_v10 = vshrl.u32 %v10489_v52, 16 }
 0x3d8   : > { %v4509_v25 = vmax.f32 %v4461_v47, 0.0  ;;  %v3863_v11 = vadd.f32 %v3777_v22, %v8965_v41  ;;  %v10503_v43 = vpop.f32.mrf.mxu0  ;;  %v10505_v13 = vpop.f32.mrf.mxu1  ;;  %v1298_v26 = vsel %vm1297_vm7, 1, %v12452_v54  ;;  %v1274_v44 = vshrl.u32 %v1273_v0, 4  ;;  %v7480_v47 = vld [vmem:[%s12353_s3 + $0x220] sm:$0xff] }
 0x3d9   : > { %v1300_v7 = vadd.s32 %v1298_v26, %v1296_v48  ;;  %v1340_v61 = vand.u32 65535, %v10494_v58  ;;  %v1314_v59 = vmul.u32 43691, %v1311_v40  ;;  %v10513_v1 = vmul.u32 43690, %v1311_v40  ;;  %5701 = vmatpush.msrb.mxu1 %v7480_v47 }
 0x3da   : > { %v4557_v14 = vsel %vm10465_vm0, %v4509_v25, 0.0  ;;  %v4137_v41 = vadd.f32 %v4051_v51, %v3863_v11  ;;  %v1275_v62 = vmul.u32 24, %v1274_v44  ;;  %7638 = vmatmul.msk.f32.gmra.mxu1 %vm10465_vm0, %v4509_v25  ;;  %v10517_v36 = vmul.u32 43691, %v1312_v10 }
 0x3db   : > { %4605 = vst [vmem:[#allocation2 + $0xf9] sm:$0xff] %v4557_v14  ;;  %4375 = vmatmul.f32.gmra.mxu0 %v4202_v6  ;;  %v1301_v17 = vadd.s32 %v1300_v7, %v1290_v49  ;;  %v1317_v8 = vmul.u32 43690, %v1312_v10  ;;  %v1318_v22 = vshll.u32 %v10513_v1, 16  ;;  %v1319_v56 = vshrl.u32 %v10513_v1, 16  ;;  %v4203_v10 = vld [vmem:[#allocation2 + $0x1aa] sm:$0xff] }
 0x3dc   : > { %v4411_v50 = vadd.f32 %v10469_v9, %v4137_v41  ;;  %3827 = vmatmul.f32.gmra.mxu2 %v10523_v34  ;;  %4101 = vmatmul.f32.gmra.mxu3 %v3928_v21  ;;  %v1341_v49 = vshrl.u32 %v10494_v58, 16  ;;  %v1276_v51 = vsub.s32 %v10303_v20, %v1275_v62  ;;  %v1320_v48 = vshll.u32 %v10517_v36, 16  ;;  %v3929_v1 = vld [vmem:[#allocation2 + $0x1a9] sm:$0xff] }
 0x3dd   : > { %v1302_v0 = vadd.s32 %v1301_v17, %v1292_v23  ;;  %v1321_v25 = vshrl.u32 %v10517_v36, 16  ;;  %vm1322_vm8 = vc.u32 %v1314_v59, %v1318_v22  ;;  %v1324_v11 = vadd.s32 %v1318_v22, %v1314_v59 }
 0x3de   : > { %v4462_v9 = vadd.f32 %v10226_v35, %v4411_v50  ;;  %v1343_v6 = vmul.u32 43691, %v1340_v61  ;;  %vm1802_vm9 = vcmp.ne.s32.totalorder %v1276_v51, 0  ;;  %vm1850_vm10 = vcmp.lt.s32.totalorder %v1276_v51, 0 }
 0x3df   : > { %v3780_v26 = vpop.f32.mrf.mxu2  ;;  %v1946_v40 = vadd.s32 24, %v1276_v51  ;;  %v4054_v21 = vpop.f32.mrf.mxu3  ;;  %v1303_v44 = vshrl.u32 %v1302_v0, 4  ;;  %vm1898_vm11 = vmand %vm1850_vm10, %vm1802_vm9  ;;  %v1323_v41 = vsel %vm1322_vm8, 1, %v12452_v54  ;;  %vm1326_vm12 = vc.u32 %v1324_v11, %v1320_v48 }
 0x3e0   : > { %v4510_v7 = vmax.f32 %v4462_v9, 0.0  ;;  %v3864_v20 = vadd.f32 %v3780_v26, %v8973_v38  ;;  %v10534_v23 = vpop.f32.mrf.mxu0  ;;  %v10536_v14 = vpop.f32.mrf.mxu1  ;;  %v1325_v17 = vadd.s32 %v1323_v41, %v1317_v8  ;;  %v1327_v36 = vsel %vm1326_vm12, 1, %v12452_v54 }
 0x3e1   : > { %v1994_v59 = vsel %vm1898_vm11, %v1946_v40, %v1276_v51  ;;  %v1304_v62 = vmul.u32 24, %v1303_v44  ;;  %v1344_v22 = vmul.u32 43690, %v1340_v61  ;;  %v10549_v8 = vmul.u32 43691, %v1341_v49 }
 0x3e2   : > { %v4558_v47 = vsel %vm10496_vm6, %v4510_v7, 0.0  ;;  %vm10542_vm13 = vcmp.lt.s32.totalorder %v1994_v59, 16  ;;  %v4138_v50 = vadd.f32 %v4054_v21, %v3864_v20  ;;  %7639 = vmatmul.msk.f32.gmra.mxu1 %vm10496_vm6, %v4510_v7  ;;  %v1329_v51 = vadd.s32 %v1327_v36, %v1325_v17 }
 0x3e3   : > { %4606 = vst [vmem:[#allocation2 + $0x101] sm:$0xff] %v4558_v47  ;;  %4378 = vmatmul.f32.gmra.mxu0 %v4203_v10  ;;  %v1305_v0 = vsub.s32 %v10428_v27, %v1304_v62  ;;  %v1346_v48 = vmul.u32 43690, %v1341_v49  ;;  %v1347_v11 = vshll.u32 %v1344_v22, 16  ;;  %v1348_v26 = vshrl.u32 %v1344_v22, 16  ;;  %v5077_v47 = vld [vmem:[#allocation2 + $0x2] sm:$0xff] }
 0x3e4   : > { %v4412_v9 = vadd.f32 %v10503_v43, %v4138_v50  ;;  %3830 = vmatmul.f32.gmra.mxu2 %v10523_v34  ;;  %4104 = vmatmul.f32.gmra.mxu3 %v3929_v1  ;;  %v10554_v61 = vadd.s32 272, %v8862_v18  ;;  %v1330_v40 = vadd.s32 %v1329_v51, %v1319_v56  ;;  %v1349_v21 = vshll.u32 %v10549_v8, 16 }
 0x3e5   : > { %vm1803_vm14 = vcmp.ne.s32.totalorder %v1305_v0, 0  ;;  %vm1851_vm15 = vcmp.lt.s32.totalorder %v1305_v0, 0  ;;  %v1947_v27 = vadd.s32 24, %v1305_v0  ;;  %v1350_v49 = vshrl.u32 %v10549_v8, 16 }
 0x3e6   : > { %v4463_v3 = vadd.f32 %v10226_v35, %v4412_v9  ;;  %vm1899_vm0 = vmand %vm1851_vm15, %vm1803_vm14  ;;  %vm1351_vm1 = vc.u32 %v1343_v6, %v1347_v11  ;;  %v1331_v20 = vadd.s32 %v1330_v40, %v1321_v25  ;;  %v1353_v41 = vadd.s32 %v1347_v11, %v1343_v6 }
 0x3e7   : > { %v3783_v43 = vpop.f32.mrf.mxu2  ;;  %v1995_v44 = vsel %vm1899_vm0, %v1947_v27, %v1305_v0  ;;  %v4057_v7 = vpop.f32.mrf.mxu3  ;;  %v1352_v10 = vsel %vm1351_vm1, 1, %v12452_v54  ;;  %v1369_v25 = vand.u32 65535, %v10554_v61  ;;  %v1370_v22 = vshrl.u32 %v10554_v61, 16  ;;  %v10573_v0 = vld [vmem:[#allocation2 + $0x18] sm:$0xff] }
 0x3e8   : > { %v4511_v59 = vmax.f32 %v4463_v3, 0.0  ;;  %v3865_v1 = vadd.f32 %v3783_v43, %v8992_v2  ;;  %vm10561_vm2 = vcmp.lt.s32.totalorder %v1995_v44, 16  ;;  %v10565_v62 = vpop.f32.mrf.mxu0  ;;  %v10567_v17 = vpop.f32.mrf.mxu1  ;;  %v1354_v36 = vadd.s32 %v1352_v10, %v1346_v48 }
 0x3e9   : > { %v1332_v50 = vshrl.u32 %v1331_v20, 4  ;;  %vm1355_vm3 = vc.u32 %v1353_v41, %v1349_v21  ;;  %v10577_v8 = vadd.s32 280, %v8862_v18  ;;  %v1372_v11 = vmul.u32 43691, %v1369_v25 }
 0x3ea   : > { %v4559_v6 = vsel %vm10542_vm13, %v4511_v59, 0.0  ;;  %v4139_v2 = vadd.f32 %v4057_v7, %v3865_v1  ;;  %v1356_v51 = vsel %vm1355_vm3, 1, %v12452_v54  ;;  %7640 = vmatmul.msk.f32.gmra.mxu1 %vm10542_vm13, %v4511_v59  ;;  %v10582_v27 = vmul.u32 43690, %v1369_v25 }
 0x3eb   : > { %4607 = vst [vmem:[#allocation2 + $0x109] sm:$0xff] %v4559_v6  ;;  %5432 = vmatmul.f32.vlgmr.msrb.gmra.mxu0 %v10573_v0  ;;  %v1333_v48 = vmul.u32 24, %v1332_v50  ;;  %v1358_v9 = vadd.s32 %v1356_v51, %v1354_v36  ;;  %v10586_v3 = vmul.u32 43691, %v1370_v22  ;;  %v1375_v21 = vmul.u32 43690, %v1370_v22  ;;  %v5078_v51 = vld [vmem:[#allocation2 + $0xa] sm:$0xff] }
 0x3ec   : > { %v4413_v40 = vadd.f32 %v10534_v23, %v4139_v2  ;;  %4932 = vmatmul.f32.vlgmr.msrb.gmra.mxu2 %v10523_v34  ;;  %5158 = vmatmul.f32.vlgmr.msrb.gmra.mxu3 %v5077_v47  ;;  %v1398_v43 = vand.u32 65535, %v10577_v8  ;;  %v1376_v38 = vshll.u32 %v10582_v27, 16  ;;  %v1377_v20 = vshrl.u32 %v10582_v27, 16 }
 0x3ed   : > { %v1334_v44 = vsub.s32 %v10489_v52, %v1333_v48  ;;  %v1359_v7 = vadd.s32 %v1358_v9, %v1348_v26  ;;  %v1378_v41 = vshll.u32 %v10586_v3, 16  ;;  %v1379_v23 = vshrl.u32 %v10586_v3, 16 }
 0x3ee   : > { %v4464_v10 = vadd.f32 %v10226_v35, %v4413_v40  ;;  %v1399_v59 = vshrl.u32 %v10577_v8, 16  ;;  %vm1380_vm7 = vc.u32 %v1372_v11, %v1376_v38  ;;  %v1382_v6 = vadd.s32 %v1376_v38, %v1372_v11 }
 0x3ef   : > { %v3786_v1 = vpop.f32.mrf.mxu2  ;;  %vm1804_vm4 = vcmp.ne.s32.totalorder %v1334_v44, 0  ;;  %vm1852_vm5 = vcmp.lt.s32.totalorder %v1334_v44, 0  ;;  %v1948_v36 = vadd.s32 24, %v1334_v44  ;;  %v4060_v47 = vpop.f32.mrf.mxu3  ;;  %v1360_v50 = vadd.s32 %v1359_v7, %v1350_v49  ;;  %v10608_v7 = vld [vmem:[#allocation2 + $0x20] sm:$0xff] }
 0x3f0   : > { %v4512_v52 = vmax.f32 %v4464_v10, 0.0  ;;  %v3866_v26 = vadd.f32 %v3786_v1, %v9019_v31  ;;  %vm1900_vm6 = vmand %vm1852_vm5, %vm1804_vm4  ;;  %v10597_v25 = vpop.f32.mrf.mxu0  ;;  %v10599_v22 = vpop.f32.mrf.mxu1  ;;  %v1381_v9 = vsel %vm1380_vm7, 1, %v12452_v54  ;;  %v1401_v27 = vmul.u32 43691, %v1398_v43  ;;  %v7479_v1 = vld [vmem:[%s12353_s3 + $0x218] sm:$0xff]  ;;  %v10661_v49 = vld [vmem:[%s12352_s2] ss:$0 sm:$0xff] }
 0x3f1   : > { %v1996_v2 = vsel %vm1900_vm6, %v1948_v36, %v1334_v44  ;;  %v1361_v48 = vshrl.u32 %v1360_v50, 4  ;;  %v1383_v10 = vadd.s32 %v1381_v9, %v1375_v21  ;;  %vm1384_vm9 = vc.u32 %v1382_v6, %v1378_v41  ;;  %5702 = vmatpush.msrb.mxu1 %v7479_v1 }
 0x3f2   : > { %v4560_v40 = vsel %vm10561_vm2, %v4512_v52, 0.0  ;;  %vm10604_vm8 = vcmp.lt.s32.totalorder %v1996_v2, 16  ;;  %v4140_v31 = vadd.f32 %v4060_v47, %v3866_v26  ;;  %7641 = vmatmul.msk.f32.gmra.mxu1 %vm10561_vm2, %v4512_v52  ;;  %v10613_v44 = vmul.u32 43690, %v1398_v43 }
 0x3f3   : > { %4608 = vst [vmem:[#allocation2 + $0x111] sm:$0xff] %v4560_v40  ;;  %5435 = vmatmul.f32.gmra.mxu0 %v10608_v7  ;;  %v1362_v11 = vmul.u32 24, %v1361_v48  ;;  %v10615_v38 = vmul.u32 43691, %v1399_v59  ;;  %v1385_v21 = vsel %vm1384_vm9, 1, %v12452_v54  ;;  %v1404_v47 = vmul.u32 43690, %v1399_v59 }
 0x3f4   : > { %v4414_v36 = vadd.f32 %v10565_v62, %v4140_v31  ;;  %4935 = vmatmul.f32.gmra.mxu2 %v10523_v34  ;;  %5161 = vmatmul.f32.gmra.mxu3 %v5078_v51  ;;  %v10624_v56 = vadd.s32 288, %v8862_v18  ;;  %v1387_v41 = vadd.s32 %v1385_v21, %v1383_v10  ;;  %v1405_v50 = vshll.u32 %v10613_v44, 16  ;;  %v10648_v21 = vld [vmem:[#allocation2 + $0x28] sm:$0xff] }
 0x3f5   : > { %v1363_v43 = vsub.s32 %v10494_v58, %v1362_v11  ;;  %v1406_v52 = vshrl.u32 %v10613_v44, 16  ;;  %v1407_v62 = vshll.u32 %v10615_v38, 16  ;;  %v1408_v6 = vshrl.u32 %v10615_v38, 16 }
 0x3f6   : > { %v4465_v26 = vadd.f32 %v10226_v35, %v4414_v36  ;;  %v1427_v2 = vand.u32 65535, %v10624_v56  ;;  %v1388_v58 = vadd.s32 %v1387_v41, %v1377_v20  ;;  %vm1409_vm13 = vc.u32 %v1401_v27, %v1405_v50 }
 0x3f7   : > { %v3789_v59 = vpop.f32.mrf.mxu2  ;;  %vm1805_vm10 = vcmp.ne.s32.totalorder %v1363_v43, 0  ;;  %vm1853_vm11 = vcmp.lt.s32.totalorder %v1363_v43, 0  ;;  %v1949_v51 = vadd.s32 24, %v1363_v43  ;;  %v4063_v48 = vpop.f32.mrf.mxu3  ;;  %v1411_v35 = vadd.s32 %v1405_v50, %v1401_v27  ;;  %v5079_v27 = vld [vmem:[#allocation2 + $0x12] sm:$0xff] }
 0x3f8   : > { %v4513_v9 = vmax.f32 %v4465_v26, 0.0  ;;  %v3867_v40 = vadd.f32 %v3789_v59, %v9023_v16  ;;  %vm1901_vm12 = vmand %vm1853_vm11, %vm1805_vm10  ;;  %v10634_v31 = vpop.f32.mrf.mxu0  ;;  %v10636_v10 = vpop.f32.mrf.mxu1  ;;  %v1389_v44 = vadd.s32 %v1388_v58, %v1379_v23  ;;  %v1410_v38 = vsel %vm1409_vm13, 1, %v12452_v54 }
 0x3f9   : > { %v1997_v11 = vsel %vm1901_vm12, %v1949_v51, %v1363_v43  ;;  %v1428_v1 = vshrl.u32 %v10624_v56, 16  ;;  %v1412_v41 = vadd.s32 %v1410_v38, %v1404_v47  ;;  %vm1413_vm15 = vc.u32 %v1411_v35, %v1407_v62 }
 0x3fa   : > { %v4561_v20 = vsel %vm10604_vm8, %v4513_v9, 0.0  ;;  %vm10644_vm14 = vcmp.lt.s32.totalorder %v1997_v11, 16  ;;  %v4141_v36 = vadd.f32 %v4063_v48, %v3867_v40  ;;  %v1390_v3 = vshrl.u32 %v1389_v44, 4  ;;  %7642 = vmatmul.msk.f32.gmra.mxu1 %vm10604_vm8, %v4513_v9 }
 0x3fb   : > { %4609 = vst [vmem:[#allocation2 + $0x119] sm:$0xff] %v4561_v20  ;;  %5438 = vmatmul.f32.gmra.mxu0 %v10648_v21  ;;  %v1430_v23 = vmul.u32 43691, %v1427_v2  ;;  %v1431_v43 = vmul.u32 43690, %v1427_v2  ;;  %v1414_v26 = vsel %vm1413_vm15, 1, %v12452_v54  ;;  %v10656_v59 = vmul.u32 43691, %v1428_v1 }
 0x3fc   : > { %v4415_v50 = vadd.f32 %v10597_v25, %v4141_v36  ;;  %4938 = vmatmul.f32.gmra.mxu2 %v10523_v34  ;;  %5164 = vmatmul.f32.gmra.mxu3 %v5079_v27  ;;  %v1433_v47 = vmul.u32 43690, %v1428_v1  ;;  %v1391_v51 = vmul.u32 24, %v1390_v3  ;;  %v1416_v48 = vadd.s32 %v1414_v26, %v1412_v41 }
 0x3fd   : > { %v1434_v58 = vshll.u32 %v1431_v43, 16  ;;  %v1435_v40 = vshrl.u32 %v1431_v43, 16  ;;  %v1436_v25 = vshll.u32 %v10656_v59, 16  ;;  %v1437_v34 = vshrl.u32 %v10656_v59, 16  ;;  %v5080_v59 = vld [vmem:[#allocation2 + $0x1a] sm:$0xff] }
 0x3fe   : > { %v4466_v62 = vadd.f32 %v10661_v49, %v4415_v50  ;;  %v10667_v2 = vadd.s32 296, %v8862_v18  ;;  %v1392_v35 = vsub.s32 %v10554_v61, %v1391_v51  ;;  %v1417_v44 = vadd.s32 %v1416_v48, %v1406_v52 }
 0x3ff   : > { %v3792_v9 = vpop.f32.mrf.mxu2  ;;  %v4066_v11 = vpop.f32.mrf.mxu3  ;;  %vm1438_vm0 = vc.u32 %v1430_v23, %v1434_v58  ;;  %v1440_v38 = vadd.s32 %v1434_v58, %v1430_v23  ;;  %v10679_v23 = vld [vmem:[#allocation2 + $0x30] sm:$0xff] }
 0x400   : > { %v4514_v1 = vmax.f32 %v4466_v62, 0.0  ;;  %v3868_v20 = vadd.f32 %v3792_v9, %v9049_v63  ;;  %v10671_v36 = vpop.f32.mrf.mxu0  ;;  %v10673_v41 = vpop.f32.mrf.mxu1  ;;  %v1439_v27 = vsel %vm1438_vm0, 1, %v12452_v54  ;;  %v1456_v3 = vand.u32 65535, %v10667_v2 }
 0x401   : > { %vm1806_vm1 = vcmp.ne.s32.totalorder %v1392_v35, 0  ;;  %vm1854_vm2 = vcmp.lt.s32.totalorder %v1392_v35, 0  ;;  %v1950_v43 = vadd.s32 24, %v1392_v35  ;;  %v1418_v50 = vadd.s32 %v1417_v44, %v1408_v6 }
 0x402   : > { %v4562_v61 = vsel %vm10644_vm14, %v4514_v1, 0.0  ;;  %vm1902_vm3 = vmand %vm1854_vm2, %vm1806_vm1  ;;  %v4142_v52 = vadd.f32 %v4066_v11, %v3868_v20  ;;  %v1441_v63 = vadd.s32 %v1439_v27, %v1433_v47  ;;  %vm1442_vm4 = vc.u32 %v1440_v38, %v1436_v25  ;;  %7643 = vmatmul.msk.f32.gmra.mxu1 %vm10644_vm14, %v4514_v1 }
 0x403   : > { %4610 = vst [vmem:[#allocation2 + $0x121] sm:$0xff] %v4562_v61  ;;  %v1998_v26 = vsel %vm1902_vm3, %v1950_v43, %v1392_v35  ;;  %5441 = vmatmul.f32.gmra.mxu0 %v10679_v23  ;;  %v1419_v51 = vshrl.u32 %v1418_v50, 4  ;;  %v1443_v6 = vsel %vm1442_vm4, 1, %v12452_v54  ;;  %v1457_v48 = vshrl.u32 %v10667_v2, 16 }
 0x404   : > { %vm10686_vm5 = vcmp.lt.s32.totalorder %v1998_v26, 16  ;;  %v4416_v47 = vadd.f32 %v10634_v31, %v4142_v52  ;;  %4941 = vmatmul.f32.gmra.mxu2 %v10573_v0  ;;  %5167 = vmatmul.f32.gmra.mxu3 %v5080_v59  ;;  %v1445_v62 = vadd.s32 %v1443_v6, %v1441_v63  ;;  %v1459_v25 = vmul.u32 43691, %v1456_v3 }
 0x405   : > { %v1420_v9 = vmul.u32 24, %v1419_v51  ;;  %v10692_v35 = vmul.u32 43690, %v1456_v3  ;;  %v10694_v16 = vmul.u32 43691, %v1457_v48  ;;  %v1462_v11 = vmul.u32 43690, %v1457_v48  ;;  %v10715_v48 = vld [vmem:[#allocation2 + $0x38] sm:$0xff] }
 0x406   : > { %v4467_v44 = vadd.f32 %v10661_v49, %v4416_v47  ;;  %v1446_v38 = vadd.s32 %v1445_v62, %v1435_v40  ;;  %v10698_v1 = vadd.s32 304, %v8862_v18  ;;  %v10701_v20 = vadd.s32 312, %v8862_v18  ;;  %v5081_v62 = vld [vmem:[#allocation2 + $0x22] sm:$0xff] }
 0x407   : > { %v3795_v31 = vpop.f32.mrf.mxu2  ;;  %v1421_v0 = vsub.s32 %v10577_v8, %v1420_v9  ;;  %v4069_v27 = vpop.f32.mrf.mxu3  ;;  %v1463_v43 = vshll.u32 %v10692_v35, 16  ;;  %v1464_v3 = vshrl.u32 %v10692_v35, 16  ;;  %v1465_v50 = vshll.u32 %v10694_v16, 16 }
 0x408   : > { %v4515_v61 = vmax.f32 %v4467_v44, 0.0  ;;  %v3869_v52 = vadd.f32 %v3795_v31, %v9066_v28  ;;  %v10708_v40 = vpop.f32.mrf.mxu0  ;;  %v1447_v63 = vadd.s32 %v1446_v38, %v1437_v34  ;;  %v10710_v26 = vpop.f32.mrf.mxu1  ;;  %v1466_v59 = vshrl.u32 %v10694_v16, 16  ;;  %v7478_v16 = vld [vmem:[%s12353_s3 + $0x210] sm:$0xff] }
 0x409   : > { %vm1807_vm6 = vcmp.ne.s32.totalorder %v1421_v0, 0  ;;  %vm1855_vm7 = vcmp.lt.s32.totalorder %v1421_v0, 0  ;;  %v1951_v8 = vadd.s32 24, %v1421_v0  ;;  %vm1467_vm8 = vc.u32 %v1459_v25, %v1463_v43  ;;  %5703 = vmatpush.msrb.mxu1 %v7478_v16 }
 0x40a   : > { %v4563_v51 = vsel %vm10686_vm5, %v4515_v61, 0.0  ;;  %vm1903_vm9 = vmand %vm1855_vm7, %vm1807_vm6  ;;  %v4143_v6 = vadd.f32 %v4069_v27, %v3869_v52  ;;  %v1448_v47 = vshrl.u32 %v1447_v63, 4  ;;  %v1468_v28 = vsel %vm1467_vm8, 1, %v12452_v54  ;;  %7644 = vmatmul.msk.f32.gmra.mxu1 %vm10686_vm5, %v4515_v61 }
 0x40b   : > { %4611 = vst [vmem:[#allocation2 + $0x129] sm:$0xff] %v4563_v51  ;;  %v1999_v34 = vsel %vm1903_vm9, %v1951_v8, %v1421_v0  ;;  %5444 = vmatmul.f32.gmra.mxu0 %v10715_v48  ;;  %v1469_v9 = vadd.s32 %v1463_v43, %v1459_v25  ;;  %v1470_v35 = vadd.s32 %v1468_v28, %v1462_v11  ;;  %v1485_v0 = vand.u32 65535, %v10698_v1 }
 0x40c   : > { %vm10724_vm10 = vcmp.lt.s32.totalorder %v1999_v34, 16  ;;  %v4417_v38 = vadd.f32 %v10671_v36, %v4143_v6  ;;  %4944 = vmatmul.f32.gmra.mxu2 %v10608_v7  ;;  %5170 = vmatmul.f32.gmra.mxu3 %v5081_v62  ;;  %v1449_v31 = vmul.u32 24, %v1448_v47  ;;  %v1486_v58 = vshrl.u32 %v10698_v1, 16 }
 0x40d   : > { %vm1471_vm11 = vc.u32 %v1469_v9, %v1465_v50  ;;  %v1514_v25 = vand.u32 65535, %v10701_v20  ;;  %v1515_v11 = vshrl.u32 %v10701_v20, 16  ;;  %v1488_v61 = vmul.u32 43691, %v1485_v0 }
 0x40e   : > { %v4468_v27 = vadd.f32 %v10661_v49, %v4417_v38  ;;  %v1450_v43 = vsub.s32 %v10624_v56, %v1449_v31  ;;  %v1472_v36 = vsel %vm1471_vm11, 1, %v12452_v54  ;;  %v1489_v8 = vmul.u32 43690, %v1485_v0  ;;  %v10750_v0 = vld [vmem:[#allocation2 + $0x40] sm:$0xff] }
 0x40f   : > { %v3798_v7 = vpop.f32.mrf.mxu2  ;;  %v4072_v52 = vpop.f32.mrf.mxu3  ;;  %v1474_v63 = vadd.s32 %v1472_v36, %v1470_v35  ;;  %v10737_v51 = vmul.u32 43691, %v1486_v58  ;;  %v1491_v50 = vmul.u32 43690, %v1486_v58  ;;  %v5082_v36 = vld [vmem:[#allocation2 + $0x2a] sm:$0xff]  ;;  %v1520_v56 = vmul.u32 43690, %v1515_v11 }
 0x410   : > { %v4516_v6 = vmax.f32 %v4468_v27, 0.0  ;;  %v3870_v47 = vadd.f32 %v3798_v7, %v9082_v45  ;;  %vm1808_vm12 = vcmp.ne.s32.totalorder %v1450_v43, 0  ;;  %vm1856_vm13 = vcmp.lt.s32.totalorder %v1450_v43, 0  ;;  %v10740_v28 = vpop.f32.mrf.mxu0  ;;  %v10742_v34 = vpop.f32.mrf.mxu1 }
 0x411   : > { %vm10744_vm14 = vmand %vm1856_vm13, %vm1808_vm12  ;;  %v1952_v62 = vadd.s32 24, %v1450_v43  ;;  %v1475_v9 = vadd.s32 %v1474_v63, %v1464_v3  ;;  %v1492_v35 = vshll.u32 %v1489_v8, 16  ;;  %v1493_v16 = vshrl.u32 %v1489_v8, 16 }
 0x412   : > { %v4564_v38 = vsel %vm10724_vm10, %v4516_v6, 0.0  ;;  %v4144_v31 = vadd.f32 %v4072_v52, %v3870_v47  ;;  %v1494_v45 = vshll.u32 %v10737_v51, 16  ;;  %v1495_v58 = vshrl.u32 %v10737_v51, 16  ;;  %7645 = vmatmul.msk.f32.gmra.mxu1 %vm10724_vm10, %v4516_v6 }
 0x413   : > { %4612 = vst [vmem:[#allocation2 + $0x131] sm:$0xff] %v4564_v38  ;;  %v2000_v27 = vsel %vm10744_vm14, %v1952_v62, %v1450_v43  ;;  %5447 = vmatmul.f32.gmra.mxu0 %v10750_v0  ;;  %v1476_v3 = vadd.s32 %v1475_v9, %v1466_v59  ;;  %vm1496_vm15 = vc.u32 %v1488_v61, %v1492_v35  ;;  %v1517_v47 = vmul.u32 43691, %v1514_v25 }
 0x414   : > { %vm10759_vm0 = vcmp.lt.s32.totalorder %v2000_v27, 16  ;;  %v4418_v52 = vadd.f32 %v10708_v40, %v4144_v31  ;;  %4947 = vmatmul.f32.gmra.mxu2 %v10648_v21  ;;  %5173 = vmatmul.f32.gmra.mxu3 %v5082_v36  ;;  %v1497_v63 = vsel %vm1496_vm15, 1, %v12452_v54  ;;  %v1498_v43 = vadd.s32 %v1492_v35, %v1488_v61 }
 0x415   : > { %v1477_v8 = vshrl.u32 %v1476_v3, 4  ;;  %v1499_v51 = vadd.s32 %v1497_v63, %v1491_v50  ;;  %v1518_v59 = vmul.u32 43690, %v1514_v25  ;;  %v10767_v6 = vmul.u32 43691, %v1515_v11 }
 0x416   : > { %v4469_v44 = vadd.f32 %v10661_v49, %v4418_v52  ;;  %vm1500_vm1 = vc.u32 %v1498_v43, %v1494_v45  ;;  %v10780_v43 = vld [vmem:[#allocation2 + $0x48] sm:$0xff]  ;;  %v10796_v7 = vadd.s32 336, %v8862_v18 }
 0x417   : > { %v3801_v62 = vpop.f32.mrf.mxu2  ;;  %v1478_v9 = vmul.u32 24, %v1477_v8  ;;  %v4075_v38 = vpop.f32.mrf.mxu3  ;;  %v1501_v40 = vsel %vm1500_vm1, 1, %v12452_v54  ;;  %v1521_v21 = vshll.u32 %v1518_v59, 16  ;;  %v1522_v31 = vshrl.u32 %v1518_v59, 16  ;;  %v5083_v59 = vld [vmem:[#allocation2 + $0x32] sm:$0xff] }
 0x418   : > { %v4517_v27 = vmax.f32 %v4469_v44, 0.0  ;;  %v3871_v61 = vadd.f32 %v3801_v62, %v9189_v29  ;;  %v10771_v35 = vpop.f32.mrf.mxu0  ;;  %v1503_v50 = vadd.s32 %v1501_v40, %v1499_v51  ;;  %v10773_v25 = vpop.f32.mrf.mxu1  ;;  %v1523_v45 = vshll.u32 %v10767_v6, 16 }
 0x419   : > { %v1479_v36 = vsub.s32 %v10667_v2, %v1478_v9  ;;  %v1524_v11 = vshrl.u32 %v10767_v6, 16  ;;  %vm1525_vm2 = vc.u32 %v1517_v47, %v1521_v21  ;;  %v1527_v3 = vadd.s32 %v1521_v21, %v1517_v47 }
 0x41a   : > { %v4565_v52 = vsel %vm10759_vm0, %v4517_v27, 0.0  ;;  %v4145_v63 = vadd.f32 %v4075_v38, %v3871_v61  ;;  %v1504_v29 = vadd.s32 %v1503_v50, %v1493_v16  ;;  %v1526_v8 = vsel %vm1525_vm2, 1, %v12452_v54  ;;  %7646 = vmatmul.msk.f32.gmra.mxu1 %vm10759_vm0, %v4517_v27 }
 0x41b   : > { %4613 = vst [vmem:[#allocation2 + $0x139] sm:$0xff] %v4565_v52  ;;  %vm1809_vm3 = vcmp.ne.s32.totalorder %v1479_v36, 0  ;;  %vm1857_vm4 = vcmp.lt.s32.totalorder %v1479_v36, 0  ;;  %v1953_v51 = vadd.s32 24, %v1479_v36  ;;  %5450 = vmatmul.f32.gmra.mxu0 %v10780_v43  ;;  %v1528_v2 = vadd.s32 %v1526_v8, %v1520_v56 }
 0x41c   : > { %vm1905_vm5 = vmand %vm1857_vm4, %vm1809_vm3  ;;  %v4419_v47 = vadd.f32 %v10740_v28, %v4145_v63  ;;  %4950 = vmatmul.f32.gmra.mxu2 %v10679_v23  ;;  %5176 = vmatmul.f32.gmra.mxu3 %v5083_v59  ;;  %v1505_v16 = vadd.s32 %v1504_v29, %v1495_v58  ;;  %vm1529_vm6 = vc.u32 %v1527_v3, %v1523_v45  ;;  %v10789_v44 = vadd.s32 320, %v8862_v18 }
 0x41d   : > { %v2001_v6 = vsel %vm1905_vm5, %v1953_v51, %v1479_v36  ;;  %v1530_v62 = vsel %vm1529_vm6, 1, %v12452_v54  ;;  %v10793_v9 = vadd.s32 328, %v8862_v18 }
 0x41e   : > { %vm10798_vm7 = vcmp.lt.s32.totalorder %v2001_v6, 16  ;;  %v4470_v23 = vadd.f32 %v10661_v49, %v4419_v47  ;;  %v1506_v28 = vshrl.u32 %v1505_v16, 4  ;;  %v1532_v58 = vadd.s32 %v1530_v62, %v1528_v2  ;;  %v5084_v62 = vld [vmem:[#allocation2 + $0x3a] sm:$0xff] }
 0x41f   : > { %v3804_v38 = vpop.f32.mrf.mxu2  ;;  %v4078_v40 = vpop.f32.mrf.mxu3  ;;  %v1543_v21 = vand.u32 65535, %v10789_v44  ;;  %v1544_v27 = vshrl.u32 %v10789_v44, 16  ;;  %v1572_v61 = vand.u32 65535, %v10793_v9  ;;  %v1573_v50 = vshrl.u32 %v10793_v9, 16 }
 0x420   : > { %v4518_v45 = vmax.f32 %v4470_v23, 0.0  ;;  %v3872_v36 = vadd.f32 %v3804_v38, %v9359_v12  ;;  %v1507_v3 = vmul.u32 24, %v1506_v28  ;;  %v10808_v52 = vpop.f32.mrf.mxu0  ;;  %v1533_v63 = vadd.s32 %v1532_v58, %v1522_v31  ;;  %v10810_v29 = vpop.f32.mrf.mxu1  ;;  %v10817_v23 = vld [vmem:[#allocation2 + $0x50] sm:$0xff] }
 0x421   : > { %v1546_v8 = vmul.u32 43691, %v1543_v21  ;;  %v1547_v51 = vmul.u32 43690, %v1543_v21  ;;  %v10812_v59 = vmul.u32 43691, %v1544_v27  ;;  %v1549_v2 = vmul.u32 43690, %v1544_v27 }
 0x422   : > { %v4566_v47 = vsel %vm10798_vm7, %v4518_v45, 0.0  ;;  %v1508_v16 = vsub.s32 %v10698_v1, %v1507_v3  ;;  %v4146_v6 = vadd.f32 %v4078_v40, %v3872_v36  ;;  %v1534_v12 = vadd.s32 %v1533_v63, %v1524_v11  ;;  %7647 = vmatmul.msk.f32.gmra.mxu1 %vm10798_vm7, %v4518_v45  ;;  %v7477_v1 = vld [vmem:[%s12353_s3 + $0x208] sm:$0xff] }
 0x423   : > { %4614 = vst [vmem:[#allocation2 + $0x141] sm:$0xff] %v4566_v47  ;;  %5453 = vmatmul.f32.gmra.mxu0 %v10817_v23  ;;  %v1550_v31 = vshll.u32 %v1547_v51, 16  ;;  %v1551_v28 = vshrl.u32 %v1547_v51, 16  ;;  %v1552_v58 = vshll.u32 %v10812_v59, 16  ;;  %v1553_v38 = vshrl.u32 %v10812_v59, 16  ;;  %5704 = vmatpush.msrb.mxu1 %v7477_v1 }
 0x424   : > { %vm1810_vm8 = vcmp.ne.s32.totalorder %v1508_v16, 0  ;;  %vm1858_vm9 = vcmp.lt.s32.totalorder %v1508_v16, 0  ;;  %v1954_v40 = vadd.s32 24, %v1508_v16  ;;  %v4420_v11 = vadd.f32 %v10771_v35, %v4146_v6  ;;  %4953 = vmatmul.f32.gmra.mxu2 %v10715_v48  ;;  %5179 = vmatmul.f32.gmra.mxu3 %v5084_v62 }
 0x425   : > { %vm1906_vm10 = vmand %vm1858_vm9, %vm1810_vm8  ;;  %v1535_v56 = vshrl.u32 %v1534_v12, 4  ;;  %vm1554_vm11 = vc.u32 %v1546_v8, %v1550_v31  ;;  %v1556_v21 = vadd.s32 %v1550_v31, %v1546_v8  ;;  %v1575_v27 = vmul.u32 43691, %v1572_v61 }
 0x426   : > { %v2002_v45 = vsel %vm1906_vm10, %v1954_v40, %v1508_v16  ;;  %v4471_v36 = vadd.f32 %v10661_v49, %v4420_v11  ;;  %v1555_v3 = vsel %vm1554_vm11, 1, %v12452_v54  ;;  %v10831_v63 = vmul.u32 43690, %v1572_v61 }
 0x427   : > { %vm10833_vm12 = vcmp.lt.s32.totalorder %v2002_v45, 16  ;;  %v3807_v35 = vpop.f32.mrf.mxu2  ;;  %v1536_v48 = vmul.u32 24, %v1535_v56  ;;  %v4081_v59 = vpop.f32.mrf.mxu3  ;;  %v1557_v47 = vadd.s32 %v1555_v3, %v1549_v2  ;;  %vm1558_vm13 = vc.u32 %v1556_v21, %v1552_v58  ;;  %v10849_v56 = vld [vmem:[#allocation2 + $0x58] sm:$0xff] }
 0x428   : > { %v4519_v6 = vmax.f32 %v4471_v36, 0.0  ;;  %v3873_v8 = vadd.f32 %v3807_v35, %v9395_v39  ;;  %v10838_v62 = vpop.f32.mrf.mxu0  ;;  %v1559_v16 = vsel %vm1558_vm13, 1, %v12452_v54  ;;  %v10841_v12 = vpop.f32.mrf.mxu1  ;;  %v10843_v61 = vmul.u32 43691, %v1573_v50  ;;  %v5085_v36 = vld [vmem:[#allocation2 + $0x42] sm:$0xff] }
 0x429   : > { %v1537_v31 = vsub.s32 %v10701_v20, %v1536_v48  ;;  %v1561_v1 = vadd.s32 %v1559_v16, %v1557_v47  ;;  %v1578_v40 = vmul.u32 43690, %v1573_v50  ;;  %v1579_v11 = vshll.u32 %v10831_v63, 16 }
 0x42a   : > { %v4567_v2 = vsel %vm10833_vm12, %v4519_v6, 0.0  ;;  %v4147_v58 = vadd.f32 %v4081_v59, %v3873_v8  ;;  %v1580_v39 = vshrl.u32 %v10831_v63, 16  ;;  %v1581_v21 = vshll.u32 %v10843_v61, 16  ;;  %7648 = vmatmul.msk.f32.gmra.mxu1 %vm10833_vm12, %v4519_v6 }
 0x42b   : > { %4615 = vst [vmem:[#allocation2 + $0x149] sm:$0xff] %v4567_v2  ;;  %vm1811_vm14 = vcmp.ne.s32.totalorder %v1537_v31, 0  ;;  %vm1859_vm15 = vcmp.lt.s32.totalorder %v1537_v31, 0  ;;  %v1955_v45 = vadd.s32 24, %v1537_v31  ;;  %5456 = vmatmul.f32.gmra.mxu0 %v10849_v56  ;;  %v1562_v20 = vadd.s32 %v1561_v1, %v1551_v28 }
 0x42c   : > { %vm1907_vm0 = vmand %vm1859_vm15, %vm1811_vm14  ;;  %v4421_v50 = vadd.f32 %v10808_v52, %v4147_v58  ;;  %4956 = vmatmul.f32.gmra.mxu2 %v10750_v0  ;;  %5182 = vmatmul.f32.gmra.mxu3 %v5085_v36  ;;  %v1582_v3 = vshrl.u32 %v10843_v61, 16  ;;  %vm1583_vm1 = vc.u32 %v1575_v27, %v1579_v11  ;;  %v1585_v63 = vadd.s32 %v1579_v11, %v1575_v27 }
 0x42d   : > { %v2003_v35 = vsel %vm1907_vm0, %v1955_v45, %v1537_v31  ;;  %v1563_v48 = vadd.s32 %v1562_v20, %v1553_v38  ;;  %v1584_v59 = vsel %vm1583_vm1, 1, %v12452_v54  ;;  %v1601_v47 = vand.u32 65535, %v10796_v7 }
 0x42e   : > { %vm10861_vm2 = vcmp.lt.s32.totalorder %v2003_v35, 16  ;;  %v4472_v51 = vadd.f32 %v10661_v49, %v4421_v50  ;;  %v1586_v52 = vadd.s32 %v1584_v59, %v1578_v40  ;;  %vm1587_vm3 = vc.u32 %v1585_v63, %v1581_v21  ;;  %v10886_v50 = vld [vmem:[#allocation2 + $0x60] sm:$0xff] }
 0x42f   : > { %v3810_v0 = vpop.f32.mrf.mxu2  ;;  %v1564_v6 = vshrl.u32 %v1563_v48, 4  ;;  %v4084_v8 = vpop.f32.mrf.mxu3  ;;  %v1588_v16 = vsel %vm1587_vm3, 1, %v12452_v54  ;;  %v1602_v27 = vshrl.u32 %v10796_v7, 16  ;;  %v1604_v38 = vmul.u32 43691, %v1601_v47 }
 0x430   : > { %v4520_v61 = vmax.f32 %v4472_v51, 0.0  ;;  %v3874_v31 = vadd.f32 %v3810_v0, %v9568_v30  ;;  %v10869_v1 = vpop.f32.mrf.mxu0  ;;  %v1590_v11 = vadd.s32 %v1588_v16, %v1586_v52  ;;  %v10871_v2 = vpop.f32.mrf.mxu1  ;;  %v10873_v58 = vmul.u32 43690, %v1601_v47 }
 0x431   : > { %v10877_v40 = vadd.f32 %v9580_v32, %v8945_v19  ;;  %v1565_v21 = vmul.u32 24, %v1564_v6  ;;  %v10879_v45 = vmul.u32 43691, %v1602_v27  ;;  %v10882_v36 = vadd.s32 344, %v8862_v18  ;;  %v5086_v19 = vld [vmem:[#allocation2 + $0x4a] sm:$0xff] }
 0x432   : > { %v4568_v30 = vsel %vm10861_vm2, %v4520_v61, 0.0  ;;  %v4148_v20 = vadd.f32 %v4084_v8, %v3874_v31  ;;  %v1591_v63 = vadd.s32 %v1590_v11, %v1580_v39  ;;  %v1608_v35 = vshll.u32 %v10873_v58, 16  ;;  %7649 = vmatmul.msk.f32.gmra.mxu1 %vm10861_vm2, %v4520_v61 }
 0x433   : > { %4616 = vst [vmem:[#allocation2 + $0x151] sm:$0xff] %v4568_v30  ;;  %v1566_v48 = vsub.s32 %v10789_v44, %v1565_v21  ;;  %5459 = vmatmul.f32.gmra.mxu0 %v10886_v50  ;;  %v1607_v32 = vmul.u32 43690, %v1602_v27  ;;  %v1609_v59 = vshrl.u32 %v10873_v58, 16  ;;  %v1610_v47 = vshll.u32 %v10879_v45, 16 }
 0x434   : > { %v4422_v51 = vadd.f32 %v10838_v62, %v4148_v20  ;;  %4959 = vmatmul.f32.gmra.mxu2 %v10780_v43  ;;  %5185 = vmatmul.f32.gmra.mxu3 %v5086_v19  ;;  %v1592_v39 = vadd.s32 %v1591_v63, %v1582_v3  ;;  %vm1612_vm4 = vc.u32 %v1604_v38, %v1608_v35  ;;  %v1630_v44 = vand.u32 65535, %v10882_v36 }
 0x435   : > { %vm1812_vm5 = vcmp.ne.s32.totalorder %v1566_v48, 0  ;;  %vm1860_vm6 = vcmp.lt.s32.totalorder %v1566_v48, 0  ;;  %v1956_v52 = vadd.s32 24, %v1566_v48  ;;  %v1613_v28 = vsel %vm1612_vm4, 1, %v12452_v54 }
 0x436   : > { %vm1908_vm7 = vmand %vm1860_vm6, %vm1812_vm5  ;;  %v4473_v0 = vadd.f32 %v10661_v49, %v4422_v51  ;;  %v1593_v6 = vshrl.u32 %v1592_v39, 4  ;;  %v1611_v8 = vshrl.u32 %v10879_v45, 16  ;;  %v1614_v16 = vadd.s32 %v1608_v35, %v1604_v38  ;;  %v10919_v51 = vld [vmem:[#allocation2 + $0x68] sm:$0xff]  ;;  %v5087_v39 = vld [vmem:[#allocation2 + $0x52] sm:$0xff] }
 0x437   : > { %v2004_v62 = vsel %vm1908_vm7, %v1956_v52, %v1566_v48  ;;  %v3813_v27 = vpop.f32.mrf.mxu2  ;;  %v4087_v43 = vpop.f32.mrf.mxu3  ;;  %v1615_v61 = vadd.s32 %v1613_v28, %v1607_v32  ;;  %v1631_v3 = vshrl.u32 %v10882_v36, 16  ;;  %v10902_v31 = vmul.u32 43690, %v1630_v44 }
 0x438   : > { %vm10904_vm8 = vcmp.lt.s32.totalorder %v2004_v62, 16  ;;  %v4521_v58 = vmax.f32 %v4473_v0, 0.0  ;;  %v3875_v21 = vadd.f32 %v3813_v27, %v9578_v60  ;;  %v1594_v30 = vmul.u32 24, %v1593_v6  ;;  %v10909_v20 = vpop.f32.mrf.mxu0  ;;  %v10911_v45 = vpop.f32.mrf.mxu1  ;;  %v7476_v6 = vld [vmem:[%s12353_s3 + $0x200] sm:$0xff] }
 0x439   : > { %vm1616_vm9 = vc.u32 %v1614_v16, %v1610_v47  ;;  %v1633_v38 = vmul.u32 43691, %v1630_v44  ;;  %v10913_v63 = vmul.u32 43691, %v1631_v3  ;;  %v1637_v35 = vshll.u32 %v10902_v31, 16  ;;  %5705 = vmatpush.msrb.mxu1 %v7476_v6  ;;  %v5088_v6 = vld [vmem:[#allocation2 + $0x5a] sm:$0xff] }
 0x43a   : > { %v4569_v48 = vsel %vm10904_vm8, %v4521_v58, 0.0  ;;  %v1595_v19 = vsub.s32 %v10793_v9, %v1594_v30  ;;  %v4149_v32 = vadd.f32 %v4087_v43, %v3875_v21  ;;  %v1617_v60 = vsel %vm1616_vm9, 1, %v12452_v54  ;;  %7650 = vmatmul.msk.f32.gmra.mxu1 %vm10904_vm8, %v4521_v58 }
 0x43b   : > { %4617 = vst [vmem:[#allocation2 + $0x159] sm:$0xff] %v4569_v48  ;;  %5462 = vmatmul.f32.gmra.mxu0 %v10919_v51  ;;  %v1619_v47 = vadd.s32 %v1617_v60, %v1615_v61  ;;  %v1636_v44 = vmul.u32 43690, %v1631_v3  ;;  %v1638_v52 = vshrl.u32 %v10902_v31, 16  ;;  %v1639_v28 = vshll.u32 %v10913_v63, 16 }
 0x43c   : > { %vm1813_vm10 = vcmp.ne.s32.totalorder %v1595_v19, 0  ;;  %vm1861_vm11 = vcmp.lt.s32.totalorder %v1595_v19, 0  ;;  %v1957_v9 = vadd.s32 24, %v1595_v19  ;;  %v4423_v0 = vadd.f32 %v10869_v1, %v4149_v32  ;;  %4962 = vmatmul.f32.gmra.mxu2 %v10817_v23  ;;  %5188 = vmatmul.f32.gmra.mxu3 %v5087_v39 }
 0x43d   : > { %vm1909_vm12 = vmand %vm1861_vm11, %vm1813_vm10  ;;  %v1620_v16 = vadd.s32 %v1619_v47, %v1609_v59  ;;  %vm1641_vm13 = vc.u32 %v1633_v38, %v1637_v35  ;;  %v1643_v62 = vadd.s32 %v1637_v35, %v1633_v38  ;;  %v10933_v27 = vadd.s32 352, %v8862_v18 }
 0x43e   : > { %v2005_v43 = vsel %vm1909_vm12, %v1957_v9, %v1595_v19  ;;  %v4474_v61 = vadd.f32 %v10661_v49, %v4423_v0  ;;  %v1642_v1 = vsel %vm1641_vm13, 1, %v12452_v54  ;;  %v10938_v23 = vadd.s32 360, %v8862_v18 }
 0x43f   : > { %vm10940_vm14 = vcmp.lt.s32.totalorder %v2005_v43, 16  ;;  %v3816_v31 = vpop.f32.mrf.mxu2  ;;  %v1621_v59 = vadd.s32 %v1620_v16, %v1611_v8  ;;  %v4090_v11 = vpop.f32.mrf.mxu3  ;;  %v1644_v58 = vadd.s32 %v1642_v1, %v1636_v44  ;;  %vm1645_vm15 = vc.u32 %v1643_v62, %v1639_v28  ;;  %v10955_v28 = vld [vmem:[#allocation2 + $0x70] sm:$0xff] }
 0x440   : > { %v4522_v21 = vmax.f32 %v4474_v61, 0.0  ;;  %v3876_v30 = vadd.f32 %v3816_v31, %v9633_v42  ;;  %v10945_v38 = vpop.f32.mrf.mxu0  ;;  %v1646_v35 = vsel %vm1645_vm15, 1, %v12452_v54  ;;  %v10948_v48 = vpop.f32.mrf.mxu1  ;;  %v1659_v19 = vand.u32 65535, %v10933_v27 }
 0x441   : > { %v1622_v32 = vshrl.u32 %v1621_v59, 4  ;;  %v1640_v60 = vshrl.u32 %v10913_v63, 16  ;;  %v1648_v39 = vadd.s32 %v1646_v35, %v1644_v58  ;;  %v1660_v8 = vshrl.u32 %v10933_v27, 16 }
 0x442   : > { %v4570_v47 = vsel %vm10940_vm14, %v4522_v21, 0.0  ;;  %v4150_v44 = vadd.f32 %v4090_v11, %v3876_v30  ;;  %v1662_v42 = vmul.u32 43691, %v1659_v19  ;;  %v1663_v9 = vmul.u32 43690, %v1659_v19  ;;  %7651 = vmatmul.msk.f32.gmra.mxu1 %vm10940_vm14, %v4522_v21 }
 0x443   : > { %4618 = vst [vmem:[#allocation2 + $0x161] sm:$0xff] %v4570_v47  ;;  %v1623_v0 = vmul.u32 24, %v1622_v32  ;;  %5465 = vmatmul.f32.gmra.mxu0 %v10955_v28  ;;  %v1649_v16 = vadd.s32 %v1648_v39, %v1638_v52  ;;  %v10960_v63 = vmul.u32 43691, %v1660_v8  ;;  %v1688_v62 = vand.u32 65535, %v10938_v23 }
 0x444   : > { %v4424_v43 = vadd.f32 %v10909_v20, %v4150_v44  ;;  %4965 = vmatmul.f32.gmra.mxu2 %v10849_v56  ;;  %5191 = vmatmul.f32.gmra.mxu3 %v5088_v6  ;;  %v1665_v61 = vmul.u32 43690, %v1660_v8  ;;  %v1666_v1 = vshll.u32 %v1663_v9, 16  ;;  %v1667_v31 = vshrl.u32 %v1663_v9, 16 }
 0x445   : > { %v1624_v59 = vsub.s32 %v10796_v7, %v1623_v0  ;;  %v1650_v11 = vadd.s32 %v1649_v16, %v1640_v60  ;;  %v1668_v52 = vshll.u32 %v10960_v63, 16  ;;  %v1689_v3 = vshrl.u32 %v10938_v23, 16  ;;  %v10980_v16 = vld [vmem:[#allocation2 + $0x78] sm:$0xff] }
 0x446   : > { %v4475_v58 = vadd.f32 %v10661_v49, %v4424_v43  ;;  %vm1670_vm0 = vc.u32 %v1662_v42, %v1666_v1  ;;  %v1672_v21 = vadd.s32 %v1666_v1, %v1662_v42  ;;  %v1691_v30 = vmul.u32 43691, %v1688_v62 }
 0x447   : > { %vm1814_vm1 = vcmp.ne.s32.totalorder %v1624_v59, 0  ;;  %vm1862_vm2 = vcmp.lt.s32.totalorder %v1624_v59, 0  ;;  %v1958_v20 = vadd.s32 24, %v1624_v59  ;;  %v3819_v56 = vpop.f32.mrf.mxu2  ;;  %v1651_v35 = vshrl.u32 %v1650_v11, 4  ;;  %v4093_v19 = vpop.f32.mrf.mxu3  ;;  %v5089_v11 = vld [vmem:[#allocation2 + $0x62] sm:$0xff] }
 0x448   : > { %vm1910_vm3 = vmand %vm1862_vm2, %vm1814_vm1  ;;  %v4523_v32 = vmax.f32 %v4475_v58, 0.0  ;;  %v3877_v7 = vadd.f32 %v3819_v56, %v9637_v57  ;;  %v10970_v60 = vpop.f32.mrf.mxu0  ;;  %v1671_v39 = vsel %vm1670_vm0, 1, %v12452_v54  ;;  %vm1674_vm4 = vc.u32 %v1672_v21, %v1668_v52  ;;  %v10973_v8 = vpop.f32.mrf.mxu1 }
 0x449   : > { %v2006_v47 = vsel %vm1910_vm3, %v1958_v20, %v1624_v59  ;;  %v1652_v44 = vmul.u32 24, %v1651_v35  ;;  %v1673_v42 = vadd.s32 %v1671_v39, %v1665_v61  ;;  %v1675_v9 = vsel %vm1674_vm4, 1, %v12452_v54 }
 0x44a   : > { %vm10976_vm5 = vcmp.lt.s32.totalorder %v2006_v47, 16  ;;  %v4151_v6 = vadd.f32 %v4093_v19, %v3877_v7  ;;  %v10982_v57 = vmul.u32 43690, %v1688_v62  ;;  %v10984_v43 = vmul.u32 43691, %v1689_v3 }
 0x44b   : > { %v4571_v1 = vsel %vm10976_vm5, %v4523_v32, 0.0  ;;  %v1653_v59 = vsub.s32 %v10882_v36, %v1652_v44  ;;  %5468 = vmatmul.f32.gmra.mxu0 %v10980_v16  ;;  %v1669_v61 = vshrl.u32 %v10960_v63, 16  ;;  %v1677_v52 = vadd.s32 %v1675_v9, %v1673_v42  ;;  %7652 = vmatmul.msk.f32.gmra.mxu1 %vm10976_vm5, %v4523_v32  ;;  %v7507_v63 = vld [vmem:[%s12353_s3 + $0x2f8] sm:$0xff] }
 0x44c   : > { %4619 = vst [vmem:[#allocation2 + $0x169] sm:$0xff] %v4571_v1  ;;  %v4425_v58 = vadd.f32 %v10945_v38, %v4151_v6  ;;  %4968 = vmatmul.f32.gmra.mxu2 %v10886_v50  ;;  %5194 = vmatmul.f32.gmra.mxu3 %v5089_v11  ;;  %v1694_v62 = vmul.u32 43690, %v1689_v3  ;;  %v1695_v21 = vshll.u32 %v10982_v57, 16  ;;  %v1697_v20 = vshll.u32 %v10984_v43, 16  ;;  %v7523_v50 = vld [vmem:[%s12353_s3 + $0x378] sm:$0xff] }
 0x44d   : > { %vm1815_vm6 = vcmp.ne.s32.totalorder %v1653_v59, 0  ;;  %vm1863_vm7 = vcmp.lt.s32.totalorder %v1653_v59, 0  ;;  %v1959_v36 = vadd.s32 24, %v1653_v59  ;;  %v1678_v56 = vadd.s32 %v1677_v52, %v1667_v31  ;;  %5964 = vmatpush.msra.mxu2 %v7507_v63  ;;  %6238 = vmatpush.msra.mxu3 %v7523_v50  ;;  %v11022_v52 = vld [vmem:[#allocation2 + $0x80] sm:$0xff] }
 0x44e   : > { %vm1911_vm8 = vmand %vm1863_vm7, %vm1815_vm6  ;;  %v4476_v38 = vadd.f32 %v10661_v49, %v4425_v58  ;;  %v1696_v3 = vshrl.u32 %v10982_v57, 16  ;;  %vm1699_vm9 = vc.u32 %v1691_v30, %v1695_v21  ;;  %v1701_v35 = vadd.s32 %v1695_v21, %v1691_v30  ;;  %v5090_v21 = vld [vmem:[#allocation2 + $0x6a] sm:$0xff] }
 0x44f   : > { %v2007_v31 = vsel %vm1911_vm8, %v1959_v36, %v1653_v59  ;;  %v3822_v19 = vpop.f32.mrf.mxu2  ;;  %v1679_v32 = vadd.s32 %v1678_v56, %v1669_v61  ;;  %v4096_v7 = vpop.f32.mrf.mxu3  ;;  %v1700_v39 = vsel %vm1699_vm9, 1, %v12452_v54  ;;  %v11007_v47 = vadd.s32 368, %v8862_v18 }
 0x450   : > { %vm11009_vm10 = vcmp.lt.s32.totalorder %v2007_v31, 16  ;;  %v4524_v42 = vmax.f32 %v4476_v38, 0.0  ;;  %v3878_v9 = vadd.f32 %v3822_v19, %v10153_v53  ;;  %v11014_v0 = vpop.f32.mrf.mxu0  ;;  %v1702_v30 = vadd.s32 %v1700_v39, %v1694_v62  ;;  %v11016_v6 = vpop.f32.mrf.mxu1 }
 0x451   : > { %v1680_v57 = vshrl.u32 %v1679_v32, 4  ;;  %vm1703_vm11 = vc.u32 %v1701_v35, %v1697_v20  ;;  %v1717_v1 = vand.u32 65535, %v11007_v47  ;;  %v1718_v59 = vshrl.u32 %v11007_v47, 16 }
 0x452   : > { %v4572_v11 = vsel %vm11009_vm10, %v4524_v42, 0.0  ;;  %v4152_v61 = vadd.f32 %v4096_v7, %v3878_v9  ;;  %v1704_v58 = vsel %vm1703_vm11, 1, %v12452_v54  ;;  %v11026_v53 = vadd.s32 376, %v8862_v18 }
 0x453   : > { %4620 = vst [vmem:[#allocation2 + $0x171] sm:$0xff] %v4572_v11  ;;  %v1681_v62 = vmul.u32 24, %v1680_v57  ;;  %5471 = vmatmul.f32.gmra.mxu0 %v11022_v52  ;;  %v1698_v20 = vshrl.u32 %v10984_v43, 16  ;;  %v1706_v36 = vadd.s32 %v1704_v58, %v1702_v30  ;;  %v11030_v56 = vmul.u32 43690, %v1717_v1  ;;  %7653 = vmatmul.msk.f32.gmra.mxu1 %vm11009_vm10, %v4524_v42 }
 0x454   : > { %v4426_v63 = vadd.f32 %v10970_v60, %v4152_v61  ;;  %4971 = vmatmul.f32.gmra.mxu2 %v10919_v51  ;;  %5197 = vmatmul.f32.gmra.mxu3 %v5090_v21  ;;  %v1720_v50 = vmul.u32 43691, %v1717_v1  ;;  %v11034_v38 = vmul.u32 43691, %v1718_v59  ;;  %v1723_v18 = vmul.u32 43690, %v1718_v59 }
 0x455   : > { %v1682_v35 = vsub.s32 %v10933_v27, %v1681_v62  ;;  %v1707_v31 = vadd.s32 %v1706_v36, %v1696_v3  ;;  %v1724_v43 = vshll.u32 %v11030_v56, 16  ;;  %v1746_v19 = vand.u32 65535, %v11026_v53  ;;  %v7539_v27 = vld [vmem:[%s12353_s3 + $0x3f8] sm:$0xff]  ;;  %v11061_v36 = vld [vmem:[#allocation2 + $0x88] sm:$0xff] }
 0x456   : > { %v4477_v32 = vadd.f32 %v10661_v49, %v4426_v63  ;;  %v1725_v60 = vshrl.u32 %v11030_v56, 16  ;;  %v1726_v51 = vshll.u32 %v11034_v38, 16  ;;  %v1747_v7 = vshrl.u32 %v11026_v53, 16  ;;  %v7555_v3 = vld [vmem:[%s12353_s3 + $0x478] sm:$0xff]  ;;  %6512 = vmatpush.msra.mxu0 %v7539_v27  ;;  %v7522_v63 = vld [vmem:[%s12353_s3 + $0x370] sm:$0xff] }
 0x457   : > { %vm1816_vm12 = vcmp.ne.s32.totalorder %v1682_v35, 0  ;;  %vm1864_vm13 = vcmp.lt.s32.totalorder %v1682_v35, 0  ;;  %v1960_v39 = vadd.s32 24, %v1682_v35  ;;  %v3825_v44 = vpop.f32.mrf.mxu2  ;;  %v1708_v42 = vadd.s32 %v1707_v31, %v1698_v20  ;;  %v4099_v49 = vpop.f32.mrf.mxu3  ;;  %6786 = vmatpush.msra.mxu1 %v7555_v3  ;;  %v5091_v31 = vld [vmem:[#allocation2 + $0x72] sm:$0xff]  ;;  %6239 = vmatpush.msra.mxu3 %v7522_v63 }
 0x458   : > { %vm1912_vm14 = vmand %vm1864_vm13, %vm1816_vm12  ;;  %v4525_v9 = vmax.f32 %v4477_v32, 0.0  ;;  %v3879_v30 = vadd.f32 %v3825_v44, %v10877_v40  ;;  %v11052_v57 = vpop.f32.mrf.mxu0  ;;  %vm1728_vm15 = vc.u32 %v1720_v50, %v1724_v43  ;;  %v1730_v1 = vadd.s32 %v1724_v43, %v1720_v50  ;;  %v11054_v59 = vpop.f32.mrf.mxu1  ;;  %v7506_v40 = vld [vmem:[%s12353_s3 + $0x2f0] sm:$0xff] }
 0x459   : > { %v2008_v11 = vsel %vm1912_vm14, %v1960_v39, %v1682_v35  ;;  %v1709_v61 = vshrl.u32 %v1708_v42, 4  ;;  %v1729_v58 = vsel %vm1728_vm15, 1, %v12452_v54  ;;  %v1749_v62 = vmul.u32 43691, %v1746_v19  ;;  %5965 = vmatpush.msra.mxu2 %v7506_v40  ;;  %v12639_v42 = vld [vmem:[#allocation10_spill] sm:$0xff] }
 0x45a   : > { %vm11057_vm0 = vcmp.lt.s32.totalorder %v2008_v11, 16  ;;  %v4153_v20 = vadd.f32 %v4099_v49, %v3879_v30  ;;  %v1731_v56 = vadd.s32 %v1729_v58, %v1723_v18  ;;  %vm1732_vm1 = vc.u32 %v1730_v1, %v1726_v51 }
 0x45b   : > { %v4573_v50 = vsel %vm11057_vm0, %v4525_v9, 0.0  ;;  %v1710_v35 = vmul.u32 24, %v1709_v61  ;;  %5474 = vmatmul.f32.gmra.mxu0 %v11061_v36  ;;  %v1733_v43 = vsel %vm1732_vm1, 1, %v12452_v54  ;;  %v11073_v32 = vmul.u32 43690, %v1746_v19  ;;  %7654 = vmatmul.msk.f32.gmra.mxu1 %vm11057_vm0, %v4525_v9 }
 0x45c   : > { %4621 = vst [vmem:[#allocation2 + $0x179] sm:$0xff] %v4573_v50  ;;  %v4427_v18 = vadd.f32 %v11014_v0, %v4153_v20  ;;  %4974 = vmatmul.f32.gmra.mxu2 %v10955_v28  ;;  %5200 = vmatmul.f32.gmra.mxu3 %v5091_v31  ;;  %v1727_v51 = vshrl.u32 %v11034_v38, 16  ;;  %v1735_v27 = vadd.s32 %v1733_v43, %v1731_v56  ;;  %v11078_v3 = vmul.u32 43691, %v1747_v7  ;;  %v11089_v28 = vld [vmem:[%s12352_s2] ss:$0 sm:$0xff]  ;;  %v11096_v50 = vld [vmem:[#allocation2 + $0x90] sm:$0xff] }
 0x45d   : > { %v1711_v39 = vsub.s32 %v10938_v23, %v1710_v35  ;;  %v1752_v44 = vmul.u32 43690, %v1747_v7  ;;  %v1753_v19 = vshll.u32 %v11073_v32, 16  ;;  %v3606_v0 = vadd.f32 %v9654_v55, %v12639_v42  ;;  %v7538_v35 = vld [vmem:[%s12353_s3 + $0x3f0] sm:$0xff] }
 0x45e   : > { %v4478_v38 = vadd.f32 %v11089_v28, %v4427_v18  ;;  %v1736_v49 = vadd.s32 %v1735_v27, %v1725_v60  ;;  %v1755_v23 = vshll.u32 %v11078_v3, 16  ;;  %v7554_v31 = vld [vmem:[%s12353_s3 + $0x470] sm:$0xff]  ;;  %v5092_v18 = vld [vmem:[#allocation2 + $0x7a] sm:$0xff]  ;;  %6513 = vmatpush.msra.mxu0 %v7538_v35 }
 0x45f   : > { %vm1817_vm2 = vcmp.ne.s32.totalorder %v1711_v39, 0  ;;  %vm1865_vm3 = vcmp.lt.s32.totalorder %v1711_v39, 0  ;;  %v1961_v9 = vadd.s32 24, %v1711_v39  ;;  %v3828_v7 = vpop.f32.mrf.mxu2  ;;  %v4102_v30 = vpop.f32.mrf.mxu3  ;;  %vm1757_vm4 = vc.u32 %v1749_v62, %v1753_v19  ;;  %6787 = vmatpush.msra.mxu1 %v7554_v31 }
 0x460   : > { %vm1913_vm5 = vmand %vm1865_vm3, %vm1817_vm2  ;;  %v4526_v1 = vmax.f32 %v4478_v38, 0.0  ;;  %v3880_v11 = vadd.f32 %v3828_v7, %v3606_v0  ;;  %v1737_v55 = vadd.s32 %v1736_v49, %v1727_v51  ;;  %v4379_v61 = vpop.f32.mrf.mxu0  ;;  %v1758_v58 = vsel %vm1757_vm4, 1, %v12452_v54  ;;  %v11094_v21 = vpop.f32.mrf.mxu1  ;;  %v12640_v38 = vld [vmem:[#allocation13_spill] sm:$0xff] }
 0x461   : > { %v2009_v20 = vsel %vm1913_vm5, %v1961_v9, %v1711_v39  ;;  %v1759_v56 = vadd.s32 %v1753_v19, %v1749_v62  ;;  %v1760_v60 = vadd.s32 %v1758_v58, %v1752_v44  ;;  %v1754_v62 = vshrl.u32 %v11073_v32, 16  ;;  %v5625_v44 = vld [vmem:[#allocation2 + $0x19] sm:$0xff] }
 0x462   : > { %vm2057_vm6 = vcmp.lt.s32.totalorder %v2009_v20, 16  ;;  %v1738_v40 = vshrl.u32 %v1737_v55, 4  ;;  %v4154_v63 = vadd.f32 %v4102_v30, %v3880_v11  ;;  %v1756_v19 = vshrl.u32 %v11078_v3, 16 }
 0x463   : > { %v4574_v43 = vsel %vm2057_vm6, %v4526_v1, 0.0  ;;  %5477 = vmatmul.f32.gmra.mxu0 %v11096_v50  ;;  %vm1761_vm7 = vc.u32 %v1759_v56, %v1755_v23  ;;  %5706 = vmatmul.f32.vlgmr.msrb.gmra.mxu1 %v5625_v44  ;;  %v3607_v49 = vadd.f32 %v9727_v33, %v12640_v38  ;;  %v5093_v33 = vld [vmem:[#allocation2 + $0x82] sm:$0xff] }
 0x464   : > { %4622 = vst [vmem:[#allocation2 + $0x181] sm:$0xff] %v4574_v43  ;;  %v1739_v51 = vmul.u32 24, %v1738_v40  ;;  %v4428_v27 = vadd.f32 %v11052_v57, %v4154_v63  ;;  %4977 = vmatmul.f32.gmra.mxu2 %v10980_v16  ;;  %5203 = vmatmul.f32.gmra.mxu3 %v5092_v18  ;;  %v1762_v39 = vsel %vm1761_vm7, 1, %v12452_v54  ;;  %v5626_v56 = vld [vmem:[#allocation2 + $0x21] sm:$0xff] }
 0x465   : > { %v1764_v42 = vadd.s32 %v1762_v39, %v1760_v60  ;;  %v5368_v39 = vld [vmem:[#allocation2 + $0xa0] sm:$0xff] }
 0x466   : > { %v1740_v0 = vsub.s32 %v11007_v47, %v1739_v51  ;;  %v4479_v32 = vadd.f32 %v11089_v28, %v4428_v27  ;;  %v11116_v47 = vld [vmem:[#allocation2 + $0x98] sm:$0xff] }
 0x467   : > { %v3831_v23 = vpop.f32.mrf.mxu2  ;;  %v1765_v57 = vadd.s32 %v1764_v42, %v1754_v62  ;;  %v4105_v9 = vpop.f32.mrf.mxu3 }
 0x468   : > { %vm1818_vm8 = vcmp.ne.s32.totalorder %v1740_v0, 0  ;;  %vm1866_vm9 = vcmp.lt.s32.totalorder %v1740_v0, 0  ;;  %v1962_v16 = vadd.s32 24, %v1740_v0  ;;  %v4527_v54 = vmax.f32 %v4479_v32, 0.0  ;;  %v5433_v7 = vpop.f32.mrf.mxu0  ;;  %v11114_v30 = vpop.f32.mrf.mxu1 }
 0x469   : > { %vm1914_vm10 = vmand %vm1866_vm9, %vm1818_vm8  ;;  %v3881_v3 = vadd.f32 %v3831_v23, %v3607_v49  ;;  %v1766_v1 = vadd.s32 %v1765_v57, %v1756_v19  ;;  %v5627_v19 = vld [vmem:[#allocation2 + $0x29] sm:$0xff]  ;;  %v12641_v49 = vld [vmem:[#allocation16_spill] sm:$0xff] }
 0x46a   : > { %v2010_v11 = vsel %vm1914_vm10, %v1962_v16, %v1740_v0 }
 0x46b   : > { %vm2058_vm11 = vcmp.lt.s32.totalorder %v2010_v11, 16  ;;  %v1767_v55 = vshrl.u32 %v1766_v1, 4  ;;  %v4155_v58 = vadd.f32 %v4105_v9, %v3881_v3  ;;  %5480 = vmatmul.f32.gmra.mxu0 %v11116_v47  ;;  %5709 = vmatmul.f32.gmra.mxu1 %v5626_v56  ;;  %v5095_v3 = vld [vmem:[#allocation2 + $0x92] sm:$0xff] }
 0x46c   : > { %v4575_v20 = vsel %vm2058_vm11, %v4527_v54, 0.0  ;;  %4980 = vmatmul.f32.gmra.mxu2 %v11022_v52  ;;  %5206 = vmatmul.f32.gmra.mxu3 %v5093_v33  ;;  %v5369_v54 = vld [vmem:[#allocation2 + $0xa8] sm:$0xff]  ;;  %v5628_v1 = vld [vmem:[#allocation2 + $0x31] sm:$0xff] }
 0x46d   : > { %4623 = vst [vmem:[#allocation2 + $0x189] sm:$0xff] %v4575_v20  ;;  %v1768_v60 = vmul.u32 24, %v1767_v55  ;;  %v4429_v40 = vadd.f32 %v4379_v61, %v4155_v58  ;;  %v12642_v33 = vld [vmem:[#allocation17_spill] sm:$0xff] }
 0x46f   : > { %v1769_v63 = vsub.s32 %v11026_v53, %v1768_v60  ;;  %v4480_v35 = vadd.f32 %v11089_v28, %v4429_v40  ;;  %v4933_v31 = vpop.f32.mrf.mxu2  ;;  %v5159_v43 = vpop.f32.mrf.mxu3  ;;  %v7505_v53 = vld [vmem:[%s12353_s3 + $0x2e8] sm:$0xff] }
 0x470   : > { %v4934_v18 = vadd.f32 %v4933_v31, %v9776_v5  ;;  %v5436_v62 = vpop.f32.mrf.mxu0  ;;  %v11123_v51 = vpop.f32.mrf.mxu1  ;;  %v7521_v28 = vld [vmem:[%s12353_s3 + $0x368] sm:$0xff]  ;;  %5966 = vmatpush.msra.mxu2 %v7505_v53 }
 0x471   : > { %vm1819_vm12 = vcmp.ne.s32.totalorder %v1769_v63, 0  ;;  %vm1867_vm13 = vcmp.lt.s32.totalorder %v1769_v63, 0  ;;  %v1963_v52 = vadd.s32 24, %v1769_v63  ;;  %v4528_v27 = vmax.f32 %v4480_v35, 0.0  ;;  %v5094_v5 = vld [vmem:[#allocation2 + $0x8a] sm:$0xff]  ;;  %6240 = vmatpush.msra.mxu3 %v7521_v28  ;;  %v5096_v35 = vld [vmem:[#allocation2 + $0x9a] sm:$0xff] }
 0x472   : > { %vm1915_vm14 = vmand %vm1867_vm13, %vm1819_vm12  ;;  %v5303_v44 = vadd.f32 %v5159_v43, %v4934_v18  ;;  %v5371_v28 = vld [vmem:[#allocation2 + $0xb8] sm:$0xff] }
 0x473   : > { %v2011_v61 = vsel %vm1915_vm14, %v1963_v52, %v1769_v63  ;;  %5483 = vmatmul.f32.gmra.mxu0 %v5368_v39  ;;  %5712 = vmatmul.f32.gmra.mxu1 %v5627_v19  ;;  %v5370_v63 = vld [vmem:[#allocation2 + $0xb0] sm:$0xff]  ;;  %v5630_v19 = vld [vmem:[#allocation2 + $0x41] sm:$0xff] }
 0x474   : > { %vm2059_vm15 = vcmp.lt.s32.totalorder %v2011_v61, 16  ;;  %4983 = vmatmul.f32.gmra.mxu2 %v11061_v36  ;;  %5209 = vmatmul.f32.gmra.mxu3 %v5094_v5  ;;  %v11132_v42 = vadd.f32 %v5433_v7, %v5303_v44  ;;  %v7537_v36 = vld [vmem:[%s12353_s3 + $0x3e8] sm:$0xff]  ;;  %v7504_v61 = vld [vmem:[%s12353_s3 + $0x2e0] sm:$0xff] }
 0x475   : > { %v4576_v0 = vsel %vm2059_vm15, %v4528_v27, 0.0  ;;  %v7553_v7 = vld [vmem:[%s12353_s3 + $0x468] sm:$0xff]  ;;  %6514 = vmatpush.msra.mxu0 %v7537_v36  ;;  %5967 = vmatpush.msra.mxu2 %v7504_v61 }
 0x476   : > { %4624 = vst [vmem:[#allocation2 + $0x191] sm:$0xff] %v4576_v0  ;;  %6788 = vmatpush.msra.mxu1 %v7553_v7  ;;  %v5097_v5 = vld [vmem:[#allocation2 + $0xa2] sm:$0xff] }
 0x477   : > { %v4936_v32 = vpop.f32.mrf.mxu2  ;;  %v5162_v38 = vpop.f32.mrf.mxu3  ;;  %v5372_v7 = vld [vmem:[#allocation2 + $0xc0] sm:$0xff] }
 0x478   : > { %v4937_v23 = vadd.f32 %v4936_v32, %v12641_v49  ;;  %v5439_v57 = vpop.f32.mrf.mxu0  ;;  %v11135_v9 = vpop.f32.mrf.mxu1  ;;  %v12644_v49 = vld [vmem:[#allocation20_spill] sm:$0xff] }
 0x47a   : > { %v5304_v16 = vadd.f32 %v5162_v38, %v4937_v23 }
 0x47b   : > { %5486 = vmatmul.f32.gmra.mxu0 %v5369_v54  ;;  %5715 = vmatmul.f32.gmra.mxu1 %v5628_v1  ;;  %v5098_v1 = vld [vmem:[#allocation2 + $0xaa] sm:$0xff] }
 0x47c   : > { %4986 = vmatmul.f32.gmra.mxu2 %v11096_v50  ;;  %5212 = vmatmul.f32.gmra.mxu3 %v5095_v3  ;;  %v11144_v11 = vadd.f32 %v5436_v62, %v5304_v16  ;;  %v5629_v50 = vld [vmem:[#allocation2 + $0x39] sm:$0xff]  ;;  %v12643_v62 = vld [vmem:[#allocation18_spill] sm:$0xff] }
 0x47d   : > { %v7536_v3 = vld [vmem:[%s12353_s3 + $0x3e0] sm:$0xff] }
 0x47e   : > { %6515 = vmatpush.msra.mxu0 %v7536_v3 }
 0x47f   : > { %v4939_v55 = vpop.f32.mrf.mxu2  ;;  %v5165_v58 = vpop.f32.mrf.mxu3 }
 0x480   : > { %v4940_v20 = vadd.f32 %v4939_v55, %v12642_v33  ;;  %v5442_v56 = vpop.f32.mrf.mxu0  ;;  %v11147_v60 = vpop.f32.mrf.mxu1  ;;  %v5631_v55 = vld [vmem:[#allocation2 + $0x49] sm:$0xff] }
 0x482   : > { %v5305_v40 = vadd.f32 %v5165_v58, %v4940_v20 }
 0x483   : > { %5489 = vmatmul.f32.gmra.mxu0 %v5370_v63  ;;  %5718 = vmatmul.f32.gmra.mxu1 %v5629_v50 }
 0x484   : > { %4989 = vmatmul.f32.gmra.mxu2 %v11116_v47  ;;  %5215 = vmatmul.f32.gmra.mxu3 %v5096_v35  ;;  %v11150_v31 = vadd.f32 %v5439_v57, %v5305_v40  ;;  %v7520_v47 = vld [vmem:[%s12353_s3 + $0x360] sm:$0xff] }
 0x485   : > { %6241 = vmatpush.msra.mxu3 %v7520_v47 }
 0x487   : > { %v4942_v43 = vpop.f32.mrf.mxu2  ;;  %v5168_v18 = vpop.f32.mrf.mxu3 }
 0x488   : > { %v4943_v52 = vadd.f32 %v4942_v43, %v12643_v62  ;;  %v5445_v27 = vpop.f32.mrf.mxu0  ;;  %v11153_v44 = vpop.f32.mrf.mxu1  ;;  %v5099_v62 = vld [vmem:[#allocation2 + $0xb2] sm:$0xff] }
 0x48a   : > { %v5306_v53 = vadd.f32 %v5168_v18, %v4943_v52  ;;  %v5373_v18 = vld [vmem:[#allocation2 + $0xc8] sm:$0xff] }
 0x48b   : > { %5492 = vmatmul.f32.gmra.mxu0 %v5371_v28  ;;  %5721 = vmatmul.f32.gmra.mxu1 %v5630_v19 }
 0x48c   : > { %4992 = vmatmul.f32.gmra.mxu2 %v5368_v39  ;;  %5218 = vmatmul.f32.gmra.mxu3 %v5097_v5  ;;  %v11161_v0 = vadd.f32 %v5442_v56, %v5306_v53  ;;  %v7552_v39 = vld [vmem:[%s12353_s3 + $0x460] sm:$0xff]  ;;  %v12645_v56 = vld [vmem:[#allocation21_spill] sm:$0xff] }
 0x48d   : > { %6789 = vmatpush.msra.mxu1 %v7552_v39 }
 0x48f   : > { %v4945_v32 = vpop.f32.mrf.mxu2  ;;  %v5171_v38 = vpop.f32.mrf.mxu3 }
 0x490   : > { %v4946_v23 = vadd.f32 %v4945_v32, %v12644_v49  ;;  %v5448_v57 = vpop.f32.mrf.mxu0  ;;  %v11164_v16 = vpop.f32.mrf.mxu1  ;;  %v5374_v32 = vld [vmem:[#allocation2 + $0xd0] sm:$0xff]  ;;  %v5100_v49 = vld [vmem:[#allocation2 + $0xba] sm:$0xff] }
 0x492   : > { %v5307_v36 = vadd.f32 %v5171_v38, %v4946_v23  ;;  %v7503_v38 = vld [vmem:[%s12353_s3 + $0x2d8] sm:$0xff] }
 0x493   : > { %5495 = vmatmul.f32.gmra.mxu0 %v5372_v7  ;;  %5724 = vmatmul.f32.gmra.mxu1 %v5631_v55  ;;  %v5633_v23 = vld [vmem:[#allocation2 + $0x59] sm:$0xff] }
 0x494   : > { %4995 = vmatmul.f32.gmra.mxu2 %v5369_v54  ;;  %5221 = vmatmul.f32.gmra.mxu3 %v5098_v1  ;;  %v11172_v58 = vadd.f32 %v5445_v27, %v5307_v36  ;;  %v5632_v54 = vld [vmem:[#allocation2 + $0x51] sm:$0xff] }
 0x495   : > { %5968 = vmatpush.msra.mxu2 %v7503_v38  ;;  %v5102_v38 = vld [vmem:[#allocation2 + $0xca] sm:$0xff] }
 0x497   : > { %v4948_v33 = vpop.f32.mrf.mxu2  ;;  %v5174_v20 = vpop.f32.mrf.mxu3 }
 0x498   : > { %v4949_v40 = vadd.f32 %v4948_v33, %v12645_v56  ;;  %v5451_v35 = vpop.f32.mrf.mxu0  ;;  %v11175_v50 = vpop.f32.mrf.mxu1  ;;  %v5375_v33 = vld [vmem:[#allocation2 + $0xd8] sm:$0xff]  ;;  %v5101_v56 = vld [vmem:[#allocation2 + $0xc2] sm:$0xff] }
 0x49a   : > { %v5308_v43 = vadd.f32 %v5174_v20, %v4949_v40  ;;  %v7535_v20 = vld [vmem:[%s12353_s3 + $0x3d8] sm:$0xff]  ;;  %v5634_v40 = vld [vmem:[#allocation2 + $0x61] sm:$0xff] }
 0x49b   : > { %5498 = vmatmul.f32.gmra.mxu0 %v5373_v18  ;;  %5727 = vmatmul.f32.gmra.mxu1 %v5632_v54 }
 0x49c   : > { %4998 = vmatmul.f32.gmra.mxu2 %v5370_v63  ;;  %5224 = vmatmul.f32.gmra.mxu3 %v5099_v62  ;;  %v11177_v52 = vadd.f32 %v5448_v57, %v5308_v43  ;;  %v7519_v63 = vld [vmem:[%s12353_s3 + $0x358] sm:$0xff]  ;;  %v12647_v62 = vld [vmem:[#allocation22_spill] sm:$0xff] }
 0x49d   : > { %6242 = vmatpush.msra.mxu3 %v7519_v63  ;;  %6516 = vmatpush.msra.mxu0 %v7535_v20  ;;  %v5377_v20 = vld [vmem:[#allocation2 + $0xe8] sm:$0xff] }
 0x49f   : > { %v4951_v27 = vpop.f32.mrf.mxu2  ;;  %v5177_v53 = vpop.f32.mrf.mxu3 }
 0x4a0   : > { %v4952_v61 = vadd.f32 %v4951_v27, %v10103_v46  ;;  %v5454_v47 = vpop.f32.mrf.mxu0  ;;  %v11180_v5 = vpop.f32.mrf.mxu1 }
 0x4a2   : > { %v5309_v19 = vadd.f32 %v5177_v53, %v4952_v61 }
 0x4a3   : > { %5501 = vmatmul.f32.gmra.mxu0 %v5374_v32  ;;  %5730 = vmatmul.f32.gmra.mxu1 %v5633_v23  ;;  %v12649_v23 = vld [vmem:[#allocation23_spill] sm:$0xff] }
 0x4a4   : > { %5001 = vmatmul.f32.gmra.mxu2 %v5371_v28  ;;  %5227 = vmatmul.f32.gmra.mxu3 %v5100_v49  ;;  %v11188_v46 = vadd.f32 %v5451_v35, %v5309_v19  ;;  %v7551_v28 = vld [vmem:[%s12353_s3 + $0x458] sm:$0xff]  ;;  %v5376_v19 = vld [vmem:[#allocation2 + $0xe0] sm:$0xff] }
 0x4a5   : > { %6790 = vmatpush.msra.mxu1 %v7551_v28  ;;  %v7502_v28 = vld [vmem:[%s12353_s3 + $0x2d0] sm:$0xff] }
 0x4a6   : > { %5969 = vmatpush.msra.mxu2 %v7502_v28 }
 0x4a7   : > { %v4954_v57 = vpop.f32.mrf.mxu2  ;;  %v5180_v36 = vpop.f32.mrf.mxu3 }
 0x4a8   : > { %v4955_v3 = vadd.f32 %v4954_v57, %v10142_v24  ;;  %v5457_v39 = vpop.f32.mrf.mxu0  ;;  %v11191_v1 = vpop.f32.mrf.mxu1 }
 0x4aa   : > { %v5310_v55 = vadd.f32 %v5180_v36, %v4955_v3 }
 0x4ab   : > { %5504 = vmatmul.f32.gmra.mxu0 %v5375_v33  ;;  %5733 = vmatmul.f32.gmra.mxu1 %v5634_v40 }
 0x4ac   : > { %5004 = vmatmul.f32.gmra.mxu2 %v5372_v7  ;;  %5230 = vmatmul.f32.gmra.mxu3 %v5101_v56  ;;  %v11199_v24 = vadd.f32 %v5454_v47, %v5310_v55  ;;  %v5635_v7 = vld [vmem:[#allocation2 + $0x69] sm:$0xff]  ;;  %v5636_v56 = vld [vmem:[#allocation2 + $0x71] sm:$0xff] }
 0x4ae   : > { %12646 = vst [vmem:[#allocation26_spill] sm:$0xff] %v11199_v24  ;;  %v11727_v24 = vld [vmem:[#allocation2 + $0xea] sm:$0xff] }
 0x4af   : > { %v4957_v35 = vpop.f32.mrf.mxu2  ;;  %v5183_v43 = vpop.f32.mrf.mxu3  ;;  %12732 = vst [vmem:[#allocation85_spill] sm:$0xff] %v11727_v24 }
 0x4b0   : > { %v4958_v54 = vadd.f32 %v4957_v35, %v12647_v62  ;;  %v5460_v27 = vpop.f32.mrf.mxu0  ;;  %v11202_v53 = vpop.f32.mrf.mxu1 }
 0x4b2   : > { %v5311_v61 = vadd.f32 %v5183_v43, %v4958_v54 }
 0x4b3   : > { %5507 = vmatmul.f32.gmra.mxu0 %v5376_v19  ;;  %5736 = vmatmul.f32.gmra.mxu1 %v5635_v7  ;;  %v5378_v7 = vld [vmem:[#allocation2 + $0xf0] sm:$0xff] }
 0x4b4   : > { %5007 = vmatmul.f32.gmra.mxu2 %v5373_v18  ;;  %5233 = vmatmul.f32.gmra.mxu3 %v5102_v38  ;;  %v11204_v63 = vadd.f32 %v5457_v39, %v5311_v61  ;;  %v7518_v18 = vld [vmem:[%s12353_s3 + $0x350] sm:$0xff] }
 0x4b5   : > { %v5103_v39 = vld [vmem:[#allocation2 + $0xd2] sm:$0xff]  ;;  %6243 = vmatpush.msra.mxu3 %v7518_v18 }
 0x4b6   : > { %12648 = vst [vmem:[#allocation27_spill] sm:$0xff] %v11204_v63  ;;  %v11715_v63 = vld [vmem:[#allocation2 + $0xe2] sm:$0xff] }
 0x4b7   : > { %v4960_v47 = vpop.f32.mrf.mxu2  ;;  %v5186_v49 = vpop.f32.mrf.mxu3  ;;  %12729 = vst [vmem:[#allocation82_spill] sm:$0xff] %v11715_v63 }
 0x4b8   : > { %v4961_v57 = vadd.f32 %v4960_v47, %v12649_v23  ;;  %v5463_v36 = vpop.f32.mrf.mxu0  ;;  %v11207_v3 = vpop.f32.mrf.mxu1  ;;  %v7534_v47 = vld [vmem:[%s12353_s3 + $0x3d0] sm:$0xff] }
 0x4b9   : > { %6517 = vmatpush.msra.mxu0 %v7534_v47 }
 0x4ba   : > { %v5312_v55 = vadd.f32 %v5186_v49, %v4961_v57  ;;  %v5637_v49 = vld [vmem:[#allocation2 + $0x79] sm:$0xff] }
 0x4bb   : > { %5510 = vmatmul.f32.gmra.mxu0 %v5377_v20  ;;  %5739 = vmatmul.f32.gmra.mxu1 %v5636_v56 }
 0x4bc   : > { %5010 = vmatmul.f32.gmra.mxu2 %v5374_v32  ;;  %5236 = vmatmul.f32.gmra.mxu3 %v5103_v39  ;;  %v11215_v40 = vadd.f32 %v5460_v27, %v5312_v55  ;;  %v7550_v32 = vld [vmem:[%s12353_s3 + $0x450] sm:$0xff]  ;;  %v5104_v27 = vld [vmem:[#allocation2 + $0xda] sm:$0xff] }
 0x4bd   : > { %6791 = vmatpush.msra.mxu1 %v7550_v32  ;;  %v5379_v39 = vld [vmem:[#allocation2 + $0xf8] sm:$0xff] }
 0x4be   : > { %12650 = vst [vmem:[#allocation28_spill] sm:$0xff] %v11215_v40 }
 0x4bf   : > { %v4963_v35 = vpop.f32.mrf.mxu2  ;;  %v5189_v43 = vpop.f32.mrf.mxu3 }
 0x4c0   : > { %v4964_v62 = vadd.f32 %v4963_v35, %v10282_v37  ;;  %v5466_v54 = vpop.f32.mrf.mxu0  ;;  %v11218_v61 = vpop.f32.mrf.mxu1  ;;  %v5105_v35 = vld [vmem:[#allocation2 + $0xe2] sm:$0xff] }
 0x4c2   : > { %v5313_v38 = vadd.f32 %v5189_v43, %v4964_v62 }
 0x4c3   : > { %5513 = vmatmul.f32.gmra.mxu0 %v5378_v7  ;;  %5742 = vmatmul.f32.gmra.mxu1 %v5637_v49 }
 0x4c4   : > { %5013 = vmatmul.f32.gmra.mxu2 %v5375_v33  ;;  %5239 = vmatmul.f32.gmra.mxu3 %v5104_v27  ;;  %v11226_v37 = vadd.f32 %v5463_v36, %v5313_v38  ;;  %v5638_v33 = vld [vmem:[#allocation2 + $0x81] sm:$0xff] }
 0x4c5   : > { %v12653_v38 = vld [vmem:[#allocation24_spill] sm:$0xff] }
 0x4c6   : > { %12651 = vst [vmem:[#allocation29_spill] sm:$0xff] %v11226_v37  ;;  %v5108_v37 = vld [vmem:[#allocation2 + $0xfa] sm:$0xff] }
 0x4c7   : > { %v4966_v23 = vpop.f32.mrf.mxu2  ;;  %v5192_v57 = vpop.f32.mrf.mxu3 }
 0x4c8   : > { %v4967_v55 = vadd.f32 %v4966_v23, %v10315_v4  ;;  %v5469_v28 = vpop.f32.mrf.mxu0  ;;  %v11229_v56 = vpop.f32.mrf.mxu1  ;;  %v5380_v4 = vld [vmem:[#allocation2 + $0x100] sm:$0xff]  ;;  %v7501_v23 = vld [vmem:[%s12353_s3 + $0x2c8] sm:$0xff] }
 0x4c9   : > { %5970 = vmatpush.msra.mxu2 %v7501_v23  ;;  %v7533_v23 = vld [vmem:[%s12353_s3 + $0x3c8] sm:$0xff] }
 0x4ca   : > { %v5314_v18 = vadd.f32 %v5192_v57, %v4967_v55  ;;  %v5639_v57 = vld [vmem:[#allocation2 + $0x89] sm:$0xff]  ;;  %6518 = vmatpush.msra.mxu0 %v7533_v23 }
 0x4cb   : > { %5516 = vmatmul.f32.gmra.mxu0 %v5379_v39  ;;  %5745 = vmatmul.f32.gmra.mxu1 %v5638_v33  ;;  %v12655_v33 = vld [vmem:[#allocation25_spill] sm:$0xff] }
 0x4cc   : > { %5016 = vmatmul.f32.gmra.mxu2 %v5376_v19  ;;  %5242 = vmatmul.f32.gmra.mxu3 %v5105_v35  ;;  %v11231_v43 = vadd.f32 %v5466_v54, %v5314_v18  ;;  %v7517_v19 = vld [vmem:[%s12353_s3 + $0x348] sm:$0xff] }
 0x4cd   : > { %v5106_v54 = vld [vmem:[#allocation2 + $0xea] sm:$0xff]  ;;  %6244 = vmatpush.msra.mxu3 %v7517_v19 }
 0x4ce   : > { %12652 = vst [vmem:[#allocation30_spill] sm:$0xff] %v11231_v43 }
 0x4cf   : > { %v4969_v36 = vpop.f32.mrf.mxu2  ;;  %v5195_v62 = vpop.f32.mrf.mxu3 }
 0x4d0   : > { %v4970_v47 = vadd.f32 %v4969_v36, %v12653_v38  ;;  %v5472_v32 = vpop.f32.mrf.mxu0  ;;  %v11234_v49 = vpop.f32.mrf.mxu1 }
 0x4d2   : > { %v5315_v27 = vadd.f32 %v5195_v62, %v4970_v47  ;;  %v5381_v47 = vld [vmem:[#allocation2 + $0x108] sm:$0xff] }
 0x4d3   : > { %5519 = vmatmul.f32.gmra.mxu0 %v5380_v4  ;;  %5748 = vmatmul.f32.gmra.mxu1 %v5639_v57 }
 0x4d4   : > { %5019 = vmatmul.f32.gmra.mxu2 %v5377_v20  ;;  %5245 = vmatmul.f32.gmra.mxu3 %v5106_v54  ;;  %v11242_v55 = vadd.f32 %v5469_v28, %v5315_v27  ;;  %v7549_v20 = vld [vmem:[%s12353_s3 + $0x448] sm:$0xff]  ;;  %v5107_v28 = vld [vmem:[#allocation2 + $0xf2] sm:$0xff] }
 0x4d5   : > { %6792 = vmatpush.msra.mxu1 %v7549_v20  ;;  %v5640_v27 = vld [vmem:[#allocation2 + $0x91] sm:$0xff] }
 0x4d6   : > { %12654 = vst [vmem:[#allocation32_spill] sm:$0xff] %v11242_v55 }
 0x4d7   : > { %v4972_v18 = vpop.f32.mrf.mxu2  ;;  %v5198_v35 = vpop.f32.mrf.mxu3 }
 0x4d8   : > { %v4973_v36 = vadd.f32 %v4972_v18, %v12655_v33  ;;  %v5475_v62 = vpop.f32.mrf.mxu0  ;;  %v11245_v43 = vpop.f32.mrf.mxu1 }
 0x4da   : > { %v5316_v38 = vadd.f32 %v5198_v35, %v4973_v36  ;;  %v5382_v36 = vld [vmem:[#allocation2 + $0x110] sm:$0xff] }
 0x4db   : > { %5522 = vmatmul.f32.gmra.mxu0 %v5381_v47  ;;  %5751 = vmatmul.f32.gmra.mxu1 %v5640_v27 }
 0x4dc   : > { %5022 = vmatmul.f32.gmra.mxu2 %v5378_v7  ;;  %5248 = vmatmul.f32.gmra.mxu3 %v5107_v28  ;;  %v11253_v19 = vadd.f32 %v5472_v32, %v5316_v38  ;;  %v5641_v7 = vld [vmem:[#allocation2 + $0x99] sm:$0xff] }
 0x4de   : > { %12656 = vst [vmem:[#allocation35_spill] sm:$0xff] %v11253_v19  ;;  %v5111_v19 = vld [vmem:[#allocation2 + $0x112] sm:$0xff] }
 0x4df   : > { %v4975_v54 = vpop.f32.mrf.mxu2  ;;  %v5201_v57 = vpop.f32.mrf.mxu3 }
 0x4e0   : > { %v4976_v18 = vadd.f32 %v4975_v54, %v10471_v15  ;;  %v5478_v35 = vpop.f32.mrf.mxu0  ;;  %v11256_v55 = vpop.f32.mrf.mxu1  ;;  %v5383_v15 = vld [vmem:[#allocation2 + $0x118] sm:$0xff] }
 0x4e2   : > { %v5317_v33 = vadd.f32 %v5201_v57, %v4976_v18  ;;  %v7500_v57 = vld [vmem:[%s12353_s3 + $0x2c0] sm:$0xff] }
 0x4e3   : > { %5525 = vmatmul.f32.gmra.mxu0 %v5382_v36  ;;  %5754 = vmatmul.f32.gmra.mxu1 %v5641_v7 }
 0x4e4   : > { %5025 = vmatmul.f32.gmra.mxu2 %v5379_v39  ;;  %5251 = vmatmul.f32.gmra.mxu3 %v5108_v37  ;;  %v11258_v20 = vadd.f32 %v5475_v62, %v5317_v33  ;;  %v7516_v37 = vld [vmem:[%s12353_s3 + $0x340] sm:$0xff] }
 0x4e5   : > { %v5109_v39 = vld [vmem:[#allocation2 + $0x102] sm:$0xff]  ;;  %5971 = vmatpush.msra.mxu2 %v7500_v57  ;;  %6245 = vmatpush.msra.mxu3 %v7516_v37 }
 0x4e6   : > { %12657 = vst [vmem:[#allocation9_spill] sm:$0xff] %v11258_v20  ;;  %v5642_v62 = vld [vmem:[#allocation2 + $0xa1] sm:$0xff] }
 0x4e7   : > { %v4978_v32 = vpop.f32.mrf.mxu2  ;;  %v5204_v38 = vpop.f32.mrf.mxu3  ;;  %v7532_v57 = vld [vmem:[%s12353_s3 + $0x3c0] sm:$0xff] }
 0x4e8   : > { %v4979_v23 = vadd.f32 %v4978_v32, %v10505_v13  ;;  %v5481_v28 = vpop.f32.mrf.mxu0  ;;  %v11261_v54 = vpop.f32.mrf.mxu1  ;;  %6519 = vmatpush.msra.mxu0 %v7532_v57 }
 0x4ea   : > { %v5318_v27 = vadd.f32 %v5204_v38, %v4979_v23  ;;  %v5384_v23 = vld [vmem:[#allocation2 + $0x120] sm:$0xff] }
 0x4eb   : > { %5528 = vmatmul.f32.gmra.mxu0 %v5383_v15  ;;  %5757 = vmatmul.f32.gmra.mxu1 %v5642_v62 }
 0x4ec   : > { %5028 = vmatmul.f32.gmra.mxu2 %v5380_v4  ;;  %5254 = vmatmul.f32.gmra.mxu3 %v5109_v39  ;;  %v11269_v13 = vadd.f32 %v5478_v35, %v5318_v27  ;;  %v7548_v4 = vld [vmem:[%s12353_s3 + $0x440] sm:$0xff]  ;;  %v5110_v35 = vld [vmem:[#allocation2 + $0x10a] sm:$0xff] }
 0x4ed   : > { %6793 = vmatpush.msra.mxu1 %v7548_v4  ;;  %v5643_v27 = vld [vmem:[#allocation2 + $0xa9] sm:$0xff] }
 0x4ee   : > { %12658 = vst [vmem:[#allocation3_spill] sm:$0xff] %v11269_v13 }
 0x4ef   : > { %v4981_v18 = vpop.f32.mrf.mxu2  ;;  %v5207_v33 = vpop.f32.mrf.mxu3 }
 0x4f0   : > { %v4982_v7 = vadd.f32 %v4981_v18, %v10536_v14  ;;  %v5484_v32 = vpop.f32.mrf.mxu0  ;;  %v11272_v20 = vpop.f32.mrf.mxu1 }
 0x4f2   : > { %v5319_v38 = vadd.f32 %v5207_v33, %v4982_v7  ;;  %v5385_v7 = vld [vmem:[#allocation2 + $0x128] sm:$0xff] }
 0x4f3   : > { %5531 = vmatmul.f32.gmra.mxu0 %v5384_v23  ;;  %5760 = vmatmul.f32.gmra.mxu1 %v5643_v27 }
 0x4f4   : > { %5031 = vmatmul.f32.gmra.mxu2 %v5381_v47  ;;  %5257 = vmatmul.f32.gmra.mxu3 %v5110_v35  ;;  %v11280_v14 = vadd.f32 %v5481_v28, %v5319_v38  ;;  %v5644_v47 = vld [vmem:[#allocation2 + $0xb1] sm:$0xff] }
 0x4f6   : > { %12659 = vst [vmem:[#allocation11_spill] sm:$0xff] %v11280_v14  ;;  %v5114_v14 = vld [vmem:[#allocation2 + $0x12a] sm:$0xff] }
 0x4f7   : > { %v4984_v37 = vpop.f32.mrf.mxu2  ;;  %v5210_v39 = vpop.f32.mrf.mxu3 }
 0x4f8   : > { %v4985_v62 = vadd.f32 %v4984_v37, %v10567_v17  ;;  %v5487_v18 = vpop.f32.mrf.mxu0  ;;  %v11283_v13 = vpop.f32.mrf.mxu1  ;;  %v5386_v17 = vld [vmem:[#allocation2 + $0x130] sm:$0xff] }
 0x4fa   : > { %v5320_v33 = vadd.f32 %v5210_v39, %v4985_v62  ;;  %v7499_v39 = vld [vmem:[%s12353_s3 + $0x2b8] sm:$0xff] }
 0x4fb   : > { %5534 = vmatmul.f32.gmra.mxu0 %v5385_v7  ;;  %5763 = vmatmul.f32.gmra.mxu1 %v5644_v47 }
 0x4fc   : > { %5034 = vmatmul.f32.gmra.mxu2 %v5382_v36  ;;  %5260 = vmatmul.f32.gmra.mxu3 %v5111_v19  ;;  %v11285_v4 = vadd.f32 %v5484_v32, %v5320_v33  ;;  %v7515_v19 = vld [vmem:[%s12353_s3 + $0x338] sm:$0xff] }
 0x4fd   : > { %v5112_v36 = vld [vmem:[#allocation2 + $0x11a] sm:$0xff]  ;;  %5972 = vmatpush.msra.mxu2 %v7499_v39  ;;  %6246 = vmatpush.msra.mxu3 %v7515_v19 }
 0x4fe   : > { %12660 = vst [vmem:[#allocation4_spill] sm:$0xff] %v11285_v4  ;;  %v5645_v32 = vld [vmem:[#allocation2 + $0xb9] sm:$0xff] }
 0x4ff   : > { %v4987_v28 = vpop.f32.mrf.mxu2  ;;  %v5213_v38 = vpop.f32.mrf.mxu3  ;;  %v7531_v39 = vld [vmem:[%s12353_s3 + $0x3b8] sm:$0xff] }
 0x500   : > { %v4988_v57 = vadd.f32 %v4987_v28, %v10599_v22  ;;  %v5490_v35 = vpop.f32.mrf.mxu0  ;;  %v11288_v37 = vpop.f32.mrf.mxu1  ;;  %6520 = vmatpush.msra.mxu0 %v7531_v39 }
 0x502   : > { %v5321_v27 = vadd.f32 %v5213_v38, %v4988_v57  ;;  %v5387_v57 = vld [vmem:[#allocation2 + $0x138] sm:$0xff] }
 0x503   : > { %5537 = vmatmul.f32.gmra.mxu0 %v5386_v17  ;;  %5766 = vmatmul.f32.gmra.mxu1 %v5645_v32 }
 0x504   : > { %5037 = vmatmul.f32.gmra.mxu2 %v5383_v15  ;;  %5263 = vmatmul.f32.gmra.mxu3 %v5112_v36  ;;  %v11296_v22 = vadd.f32 %v5487_v18, %v5321_v27  ;;  %v7547_v15 = vld [vmem:[%s12353_s3 + $0x438] sm:$0xff]  ;;  %v5113_v18 = vld [vmem:[#allocation2 + $0x122] sm:$0xff] }
 0x505   : > { %6794 = vmatpush.msra.mxu1 %v7547_v15  ;;  %v5646_v27 = vld [vmem:[#allocation2 + $0xc1] sm:$0xff] }
 0x506   : > { %12661 = vst [vmem:[#allocation12_spill] sm:$0xff] %v11296_v22 }
 0x507   : > { %v4990_v62 = vpop.f32.mrf.mxu2  ;;  %v5216_v33 = vpop.f32.mrf.mxu3 }
 0x508   : > { %v4991_v47 = vadd.f32 %v4990_v62, %v10636_v10  ;;  %v5493_v28 = vpop.f32.mrf.mxu0  ;;  %v11299_v4 = vpop.f32.mrf.mxu1 }
 0x50a   : > { %v5322_v38 = vadd.f32 %v5216_v33, %v4991_v47  ;;  %v5388_v47 = vld [vmem:[#allocation2 + $0x140] sm:$0xff] }
 0x50b   : > { %5540 = vmatmul.f32.gmra.mxu0 %v5387_v57  ;;  %5769 = vmatmul.f32.gmra.mxu1 %v5646_v27 }
 0x50c   : > { %5040 = vmatmul.f32.gmra.mxu2 %v5384_v23  ;;  %5266 = vmatmul.f32.gmra.mxu3 %v5113_v18  ;;  %v11307_v10 = vadd.f32 %v5490_v35, %v5322_v38  ;;  %v5647_v23 = vld [vmem:[#allocation2 + $0xc9] sm:$0xff] }
 0x50e   : > { %12662 = vst [vmem:[#allocation14_spill] sm:$0xff] %v11307_v10  ;;  %v5117_v10 = vld [vmem:[#allocation2 + $0x142] sm:$0xff] }
 0x50f   : > { %v4993_v19 = vpop.f32.mrf.mxu2  ;;  %v5219_v36 = vpop.f32.mrf.mxu3 }
 0x510   : > { %v4994_v32 = vadd.f32 %v4993_v19, %v10673_v41  ;;  %v5496_v62 = vpop.f32.mrf.mxu0  ;;  %v11310_v22 = vpop.f32.mrf.mxu1  ;;  %v5389_v41 = vld [vmem:[#allocation2 + $0x148] sm:$0xff] }
 0x512   : > { %v5323_v33 = vadd.f32 %v5219_v36, %v4994_v32  ;;  %v7498_v36 = vld [vmem:[%s12353_s3 + $0x2b0] sm:$0xff] }
 0x513   : > { %5543 = vmatmul.f32.gmra.mxu0 %v5388_v47  ;;  %5772 = vmatmul.f32.gmra.mxu1 %v5647_v23 }
 0x514   : > { %5043 = vmatmul.f32.gmra.mxu2 %v5385_v7  ;;  %5269 = vmatmul.f32.gmra.mxu3 %v5114_v14  ;;  %v11312_v15 = vadd.f32 %v5493_v28, %v5323_v33  ;;  %v7514_v14 = vld [vmem:[%s12353_s3 + $0x330] sm:$0xff] }
 0x515   : > { %v5115_v7 = vld [vmem:[#allocation2 + $0x132] sm:$0xff]  ;;  %5973 = vmatpush.msra.mxu2 %v7498_v36  ;;  %6247 = vmatpush.msra.mxu3 %v7514_v14 }
 0x516   : > { %12663 = vst [vmem:[#allocation15_spill] sm:$0xff] %v11312_v15  ;;  %v5648_v28 = vld [vmem:[#allocation2 + $0xd1] sm:$0xff] }
 0x517   : > { %v4996_v35 = vpop.f32.mrf.mxu2  ;;  %v5222_v38 = vpop.f32.mrf.mxu3  ;;  %v7530_v36 = vld [vmem:[%s12353_s3 + $0x3b0] sm:$0xff] }
 0x518   : > { %v4997_v39 = vadd.f32 %v4996_v35, %v10710_v26  ;;  %v5499_v18 = vpop.f32.mrf.mxu0  ;;  %v11315_v19 = vpop.f32.mrf.mxu1  ;;  %6521 = vmatpush.msra.mxu0 %v7530_v36 }
 0x519   : > { %12664 = vst [vmem:[#allocation5_spill] sm:$0xff] %v11315_v19 }
 0x51a   : > { %v5324_v27 = vadd.f32 %v5222_v38, %v4997_v39  ;;  %v5390_v39 = vld [vmem:[#allocation2 + $0x150] sm:$0xff] }
 0x51b   : > { %5546 = vmatmul.f32.gmra.mxu0 %v5389_v41  ;;  %5775 = vmatmul.f32.gmra.mxu1 %v5648_v28 }
 0x51c   : > { %5046 = vmatmul.f32.gmra.mxu2 %v5386_v17  ;;  %5272 = vmatmul.f32.gmra.mxu3 %v5115_v7  ;;  %v11323_v26 = vadd.f32 %v5496_v62, %v5324_v27  ;;  %v7546_v17 = vld [vmem:[%s12353_s3 + $0x430] sm:$0xff]  ;;  %v5116_v62 = vld [vmem:[#allocation2 + $0x13a] sm:$0xff] }
 0x51d   : > { %6795 = vmatpush.msra.mxu1 %v7546_v17  ;;  %v5649_v27 = vld [vmem:[#allocation2 + $0xd9] sm:$0xff] }
 0x51e   : > { %12665 = vst [vmem:[#allocation6_spill] sm:$0xff] %v11323_v26 }
 0x51f   : > { %v4999_v32 = vpop.f32.mrf.mxu2  ;;  %v5225_v33 = vpop.f32.mrf.mxu3 }
 0x520   : > { %v5000_v23 = vadd.f32 %v4999_v32, %v10742_v34  ;;  %v5502_v35 = vpop.f32.mrf.mxu0  ;;  %v11326_v15 = vpop.f32.mrf.mxu1 }
 0x521   : > { %12666 = vst [vmem:[#allocation19_spill] sm:$0xff] %v11326_v15 }
 0x522   : > { %v5325_v38 = vadd.f32 %v5225_v33, %v5000_v23  ;;  %v5391_v23 = vld [vmem:[#allocation2 + $0x158] sm:$0xff] }
 0x523   : > { %5549 = vmatmul.f32.gmra.mxu0 %v5390_v39  ;;  %5778 = vmatmul.f32.gmra.mxu1 %v5649_v27 }
 0x524   : > { %5049 = vmatmul.f32.gmra.mxu2 %v5387_v57  ;;  %5275 = vmatmul.f32.gmra.mxu3 %v5116_v62  ;;  %v11334_v34 = vadd.f32 %v5499_v18, %v5325_v38  ;;  %v5650_v57 = vld [vmem:[#allocation2 + $0xe1] sm:$0xff] }
 0x526   : > { %12667 = vst [vmem:[#allocation7_spill] sm:$0xff] %v11334_v34  ;;  %v5900_v34 = vld [vmem:[#allocation2 + $0x22] sm:$0xff] }
 0x527   : > { %v5002_v14 = vpop.f32.mrf.mxu2  ;;  %v5228_v7 = vpop.f32.mrf.mxu3 }
 0x528   : > { %v5003_v28 = vadd.f32 %v5002_v14, %v10773_v25  ;;  %v5505_v32 = vpop.f32.mrf.mxu0  ;;  %v11337_v26 = vpop.f32.mrf.mxu1  ;;  %v11342_v25 = vld [vmem:[#allocation2 + $0x160] sm:$0xff] }
 0x529   : > { %12668 = vst [vmem:[#allocation8_spill] sm:$0xff] %v11337_v26 }
 0x52a   : > { %v5326_v33 = vadd.f32 %v5228_v7, %v5003_v28  ;;  %v7497_v7 = vld [vmem:[%s12353_s3 + $0x2a8] sm:$0xff] }
 0x52b   : > { %5552 = vmatmul.f32.gmra.mxu0 %v5391_v23  ;;  %5781 = vmatmul.f32.gmra.mxu1 %v5650_v57 }
 0x52c   : > { %5052 = vmatmul.f32.gmra.mxu2 %v5388_v47  ;;  %5278 = vmatmul.f32.gmra.mxu3 %v5117_v10  ;;  %v11339_v17 = vadd.f32 %v5502_v35, %v5326_v33  ;;  %v7513_v10 = vld [vmem:[%s12353_s3 + $0x328] sm:$0xff] }
 0x52d   : > { %v5118_v47 = vld [vmem:[#allocation2 + $0x14a] sm:$0xff]  ;;  %5974 = vmatpush.msra.mxu2 %v7497_v7  ;;  %6248 = vmatpush.msra.mxu3 %v7513_v10 }
 0x52e   : > { %12669 = vst [vmem:[#allocation36_spill] sm:$0xff] %v11339_v17 }
 0x52f   : > { %v5005_v18 = vpop.f32.mrf.mxu2  ;;  %v5231_v38 = vpop.f32.mrf.mxu3 }
 0x530   : > { %v5006_v36 = vadd.f32 %v5005_v18, %v10810_v29  ;;  %v5508_v62 = vpop.f32.mrf.mxu0  ;;  %v11344_v14 = vpop.f32.mrf.mxu1  ;;  %v5651_v29 = vld [vmem:[#allocation2 + $0xe9] sm:$0xff] }
 0x531   : > { %12670 = vst [vmem:[#allocation37_spill] sm:$0xff] %v11344_v14  ;;  %v11693_v14 = vld [vmem:[#allocation2 + $0xd2] sm:$0xff] }
 0x532   : > { %v5327_v27 = vadd.f32 %v5231_v38, %v5006_v36  ;;  %v11356_v36 = vld [vmem:[#allocation2 + $0x168] sm:$0xff] }
 0x533   : > { %5555 = vmatmul.f32.gmra.mxu0 %v11342_v25  ;;  %5784 = vmatmul.f32.gmra.mxu1 %v5651_v29 }
 0x534   : > { %5055 = vmatmul.f32.gmra.mxu2 %v5389_v41  ;;  %5281 = vmatmul.f32.gmra.mxu3 %v5118_v47  ;;  %v11353_v35 = vadd.f32 %v5505_v32, %v5327_v27  ;;  %v7529_v41 = vld [vmem:[%s12353_s3 + $0x3a8] sm:$0xff]  ;;  %v5119_v27 = vld [vmem:[#allocation2 + $0x152] sm:$0xff] }
 0x535   : > { %v7545_v32 = vld [vmem:[%s12353_s3 + $0x428] sm:$0xff]  ;;  %6522 = vmatpush.msra.mxu0 %v7529_v41  ;;  %v5653_v41 = vld [vmem:[#allocation2 + $0xf9] sm:$0xff] }
 0x536   : > { %12671 = vst [vmem:[#allocation38_spill] sm:$0xff] %v11353_v35  ;;  %6796 = vmatpush.msra.mxu1 %v7545_v32  ;;  %v7495_v32 = vld [vmem:[%s12353_s3 + $0x298] sm:$0xff] }
 0x537   : > { %v5008_v28 = vpop.f32.mrf.mxu2  ;;  %v5234_v33 = vpop.f32.mrf.mxu3 }
 0x538   : > { %v5009_v57 = vadd.f32 %v5008_v28, %v10841_v12  ;;  %v5511_v18 = vpop.f32.mrf.mxu0  ;;  %v11358_v17 = vpop.f32.mrf.mxu1  ;;  %v5652_v12 = vld [vmem:[#allocation2 + $0xf1] sm:$0xff] }
 0x539   : > { %12672 = vst [vmem:[#allocation39_spill] sm:$0xff] %v11358_v17  ;;  %v6195_v17 = vld [vmem:[#allocation2 + $0xe0] sm:$0xff] }
 0x53a   : > { %v5328_v38 = vadd.f32 %v5234_v33, %v5009_v57  ;;  %v11370_v57 = vld [vmem:[#allocation2 + $0x170] sm:$0xff] }
 0x53b   : > { %5558 = vmatmul.f32.gmra.mxu0 %v11356_v36  ;;  %5787 = vmatmul.f32.gmra.mxu1 %v5652_v12 }
 0x53c   : > { %5058 = vmatmul.f32.gmra.mxu2 %v5390_v39  ;;  %5284 = vmatmul.f32.gmra.mxu3 %v5119_v27  ;;  %v11367_v7 = vadd.f32 %v5508_v62, %v5328_v38  ;;  %v7496_v39 = vld [vmem:[%s12353_s3 + $0x2a0] sm:$0xff]  ;;  %v7511_v27 = vld [vmem:[%s12353_s3 + $0x318] sm:$0xff] }
 0x53d   : > { %v7512_v62 = vld [vmem:[%s12353_s3 + $0x320] sm:$0xff]  ;;  %5975 = vmatpush.msra.mxu2 %v7496_v39 }
 0x53e   : > { %12673 = vst [vmem:[#allocation40_spill] sm:$0xff] %v11367_v7  ;;  %v5120_v38 = vld [vmem:[#allocation2 + $0x15a] sm:$0xff]  ;;  %6249 = vmatpush.msra.mxu3 %v7512_v62  ;;  %v7510_v62 = vld [vmem:[%s12353_s3 + $0x310] sm:$0xff] }
 0x53f   : > { %v5011_v10 = vpop.f32.mrf.mxu2  ;;  %v5237_v47 = vpop.f32.mrf.mxu3  ;;  %5976 = vmatpush.msra.mxu2 %v7495_v32  ;;  %v11396_v7 = vld [vmem:[#allocation2 + $0x178] sm:$0xff]  ;;  %v5654_v32 = vld [vmem:[#allocation2 + $0x101] sm:$0xff] }
 0x540   : > { %v5012_v29 = vadd.f32 %v5011_v10, %v10871_v2  ;;  %v5514_v28 = vpop.f32.mrf.mxu0  ;;  %v11372_v35 = vpop.f32.mrf.mxu1  ;;  %v7528_v2 = vld [vmem:[%s12353_s3 + $0x3a0] sm:$0xff]  ;;  %v7527_v10 = vld [vmem:[%s12353_s3 + $0x398] sm:$0xff]  ;;  %6250 = vmatpush.msra.mxu3 %v7511_v27  ;;  %v7509_v27 = vld [vmem:[%s12353_s3 + $0x308] sm:$0xff] }
 0x541   : > { %12674 = vst [vmem:[#allocation41_spill] sm:$0xff] %v11372_v35  ;;  %6523 = vmatpush.msra.mxu0 %v7528_v2  ;;  %v5121_v2 = vld [vmem:[#allocation2 + $0x162] sm:$0xff]  ;;  %v11574_v35 = vld [vmem:[#allocation2 + $0x6a] sm:$0xff] }
 0x542   : > { %v5329_v33 = vadd.f32 %v5237_v47, %v5012_v29  ;;  %6251 = vmatpush.msra.mxu3 %v7510_v62 }
 0x543   : > { %5561 = vmatmul.f32.gmra.mxu0 %v11370_v57  ;;  %5790 = vmatmul.f32.gmra.mxu1 %v5653_v41  ;;  %v7493_v41 = vld [vmem:[%s12353_s3 + $0x288] sm:$0xff] }
 0x544   : > { %5061 = vmatmul.f32.gmra.mxu2 %v5391_v23  ;;  %5287 = vmatmul.f32.gmra.mxu3 %v5120_v38  ;;  %v11390_v12 = vadd.f32 %v5511_v18, %v5329_v33  ;;  %v7494_v33 = vld [vmem:[%s12353_s3 + $0x290] sm:$0xff] }
 0x545   : > { %6524 = vmatpush.msra.mxu0 %v7527_v10  ;;  %5977 = vmatpush.msra.mxu2 %v7494_v33 }
 0x546   : > { %12675 = vst [vmem:[#allocation42_spill] sm:$0xff] %v11390_v12  ;;  %6252 = vmatpush.msra.mxu3 %v7509_v27  ;;  %v5122_v27 = vld [vmem:[#allocation2 + $0x16a] sm:$0xff] }
 0x547   : > { %v5014_v23 = vpop.f32.mrf.mxu2  ;;  %v5240_v47 = vpop.f32.mrf.mxu3  ;;  %5978 = vmatpush.msra.mxu2 %v7493_v41 }
 0x548   : > { %v5015_v29 = vadd.f32 %v5014_v23, %v10911_v45  ;;  %v5517_v39 = vpop.f32.mrf.mxu0  ;;  %v11398_v18 = vpop.f32.mrf.mxu1  ;;  %v7526_v45 = vld [vmem:[%s12353_s3 + $0x390] sm:$0xff]  ;;  %v7525_v23 = vld [vmem:[%s12353_s3 + $0x388] sm:$0xff] }
 0x549   : > { %12676 = vst [vmem:[#allocation43_spill] sm:$0xff] %v11398_v18  ;;  %6525 = vmatpush.msra.mxu0 %v7526_v45  ;;  %v5396_v45 = vld [vmem:[#allocation2 + $0x180] sm:$0xff] }
 0x54a   : > { %v5330_v38 = vadd.f32 %v5240_v47, %v5015_v29  ;;  %v7492_v47 = vld [vmem:[%s12353_s3 + $0x280] sm:$0xff] }
 0x54b   : > { %5564 = vmatmul.f32.gmra.mxu0 %v11396_v7  ;;  %5793 = vmatmul.f32.gmra.mxu1 %v5654_v32  ;;  %v7544_v32 = vld [vmem:[%s12353_s3 + $0x420] sm:$0xff] }
 0x54c   : > { %5064 = vmatmul.f32.gmra.mxu2 %v11342_v25  ;;  %5290 = vmatmul.f32.gmra.mxu3 %v5121_v2  ;;  %v11417_v10 = vadd.f32 %v5514_v28, %v5330_v38  ;;  %v7508_v25 = vld [vmem:[%s12353_s3 + $0x300] sm:$0xff] }
 0x54d   : > { %v7524_v28 = vld [vmem:[%s12353_s3 + $0x380] sm:$0xff]  ;;  %6526 = vmatpush.msra.mxu0 %v7525_v23  ;;  %5979 = vmatpush.msra.mxu2 %v7492_v47 }
 0x54e   : > { %12677 = vst [vmem:[#allocation44_spill] sm:$0xff] %v11417_v10  ;;  %6253 = vmatpush.msra.mxu3 %v7508_v25  ;;  %6797 = vmatpush.msra.mxu1 %v7544_v32 }
 0x54f   : > { %v5017_v29 = vpop.f32.mrf.mxu2  ;;  %v5243_v33 = vpop.f32.mrf.mxu3  ;;  %6527 = vmatpush.msra.mxu0 %v7524_v28 }
 0x550   : > { %v5018_v38 = vadd.f32 %v5017_v29, %v10948_v48  ;;  %v5520_v62 = vpop.f32.mrf.mxu0  ;;  %v11432_v41 = vpop.f32.mrf.mxu1  ;;  %v11438_v48 = vld [vmem:[#allocation2 + $0x109] sm:$0xff] }
 0x551   : > { %12678 = vst [vmem:[#allocation45_spill] sm:$0xff] %v11432_v41  ;;  %v6182_v41 = vld [vmem:[#allocation2 + $0x78] sm:$0xff] }
 0x552   : > { %v5331_v2 = vadd.f32 %v5243_v33, %v5018_v38  ;;  %v5397_v38 = vld [vmem:[#allocation2 + $0x188] sm:$0xff] }
 0x553   : > { %5567 = vmatmul.f32.gmra.mxu0 %v5396_v45  ;;  %5796 = vmatmul.f32.gmra.mxu1 %v11438_v48  ;;  %v5123_v45 = vld [vmem:[#allocation2 + $0x172] sm:$0xff] }
 0x554   : > { %5067 = vmatmul.f32.gmra.mxu2 %v11356_v36  ;;  %5293 = vmatmul.f32.gmra.mxu3 %v5122_v27  ;;  %v11440_v23 = vadd.f32 %v5517_v39, %v5331_v2  ;;  %v11447_v36 = vld [vmem:[#allocation2 + $0x111] sm:$0xff] }
 0x556   : > { %12679 = vst [vmem:[#allocation31_spill] sm:$0xff] %v11440_v23  ;;  %v5124_v23 = vld [vmem:[#allocation2 + $0x17a] sm:$0xff] }
 0x557   : > { %v5020_v47 = vpop.f32.mrf.mxu2  ;;  %v5246_v25 = vpop.f32.mrf.mxu3 }
 0x558   : > { %v5021_v29 = vadd.f32 %v5020_v47, %v10973_v8  ;;  %v5523_v33 = vpop.f32.mrf.mxu0  ;;  %v11444_v10 = vpop.f32.mrf.mxu1 }
 0x559   : > { %12680 = vst [vmem:[#allocation33_spill] sm:$0xff] %v11444_v10  ;;  %v11552_v10 = vld [vmem:[#allocation2 + $0x5a] sm:$0xff] }
 0x55a   : > { %v5332_v28 = vadd.f32 %v5246_v25, %v5021_v29  ;;  %v5398_v25 = vld [vmem:[#allocation2 + $0x190] sm:$0xff] }
 0x55b   : > { %5570 = vmatmul.f32.gmra.mxu0 %v5397_v38  ;;  %5799 = vmatmul.f32.gmra.mxu1 %v11447_v36 }
 0x55c   : > { %5070 = vmatmul.f32.gmra.mxu2 %v11370_v57  ;;  %5296 = vmatmul.f32.gmra.mxu3 %v5123_v45  ;;  %v11449_v39 = vadd.f32 %v5520_v62, %v5332_v28  ;;  %v11456_v57 = vld [vmem:[#allocation2 + $0x119] sm:$0xff] }
 0x55e   : > { %12681 = vst [vmem:[#allocation34_spill] sm:$0xff] %v11449_v39  ;;  %v6448_v39 = vld [vmem:[#allocation2 + $0x39] sm:$0xff] }
 0x55f   : > { %v5023_v2 = vpop.f32.mrf.mxu2  ;;  %v5249_v32 = vpop.f32.mrf.mxu3 }
 0x560   : > { %v5024_v8 = vadd.f32 %v5023_v2, %v11016_v6  ;;  %v5526_v27 = vpop.f32.mrf.mxu0  ;;  %v11453_v29 = vpop.f32.mrf.mxu1 }
 0x561   : > { %12682 = vst [vmem:[#allocation10_spill] sm:$0xff] %v11453_v29 }
 0x562   : > { %v5333_v47 = vadd.f32 %v5249_v32, %v5024_v8  ;;  %v6447_v32 = vld [vmem:[#allocation2 + $0x31] sm:$0xff] }
 0x563   : > { %5573 = vmatmul.f32.gmra.mxu0 %v5398_v25  ;;  %5802 = vmatmul.f32.gmra.mxu1 %v11456_v57  ;;  %v6173_v25 = vld [vmem:[#allocation2 + $0x30] sm:$0xff] }
 0x564   : > { %5073 = vmatmul.f32.gmra.mxu2 %v11396_v7  ;;  %5299 = vmatmul.f32.gmra.mxu3 %v5124_v23  ;;  %v11458_v62 = vadd.f32 %v5523_v33, %v5333_v47  ;;  %v7543_v7 = vld [vmem:[%s12353_s3 + $0x418] sm:$0xff]  ;;  %v11467_v33 = vld [vmem:[#allocation2 + $0x121] sm:$0xff] }
 0x565   : > { %v5899_v23 = vld [vmem:[#allocation2 + $0x1a] sm:$0xff]  ;;  %6798 = vmatpush.msra.mxu1 %v7543_v7  ;;  %v11475_v7 = vld [vmem:[#allocation2 + $0x129] sm:$0xff] }
 0x566   : > { %12683 = vst [vmem:[#allocation13_spill] sm:$0xff] %v11458_v62 }
 0x567   : > { %v5026_v28 = vpop.f32.mrf.mxu2  ;;  %v5252_v38 = vpop.f32.mrf.mxu3 }
 0x568   : > { %v5027_v6 = vadd.f32 %v5026_v28, %v11054_v59  ;;  %v5529_v45 = vpop.f32.mrf.mxu0  ;;  %v11462_v8 = vpop.f32.mrf.mxu1 }
 0x569   : > { %12684 = vst [vmem:[#allocation16_spill] sm:$0xff] %v11462_v8  ;;  %v6179_v8 = vld [vmem:[#allocation2 + $0x60] sm:$0xff] }
 0x56a   : > { %v5334_v2 = vadd.f32 %v5252_v38, %v5027_v6 }
 0x56b   : > { %6528 = vmatmul.f32.vlgmr.msra.gmra.mxu0 %v6447_v32  ;;  %5805 = vmatmul.f32.gmra.mxu1 %v11467_v33  ;;  %v6174_v32 = vld [vmem:[#allocation2 + $0x38] sm:$0xff] }
 0x56c   : > { %5980 = vmatmul.f32.vlgmr.msra.gmra.mxu2 %v5899_v23  ;;  %6254 = vmatmul.f32.vlgmr.msra.gmra.mxu3 %v6173_v25  ;;  %v11469_v47 = vadd.f32 %v5526_v27, %v5334_v2 }
 0x56e   : > { %12685 = vst [vmem:[#allocation17_spill] sm:$0xff] %v11469_v47  ;;  %v5901_v47 = vld [vmem:[#allocation2 + $0x2a] sm:$0xff] }
 0x56f   : > { %v5029_v59 = vpop.f32.mrf.mxu2  ;;  %v5255_v28 = vpop.f32.mrf.mxu3 }
 0x570   : > { %v5030_v38 = vadd.f32 %v5029_v59, %v11094_v21  ;;  %v5532_v6 = vpop.f32.mrf.mxu0  ;;  %v11473_v12 = vpop.f32.mrf.mxu1 }
 0x571   : > { %12686 = vst [vmem:[#allocation18_spill] sm:$0xff] %v11473_v12  ;;  %v6175_v12 = vld [vmem:[#allocation2 + $0x40] sm:$0xff] }
 0x572   : > { %v5335_v62 = vadd.f32 %v5255_v28, %v5030_v38  ;;  %v6449_v28 = vld [vmem:[#allocation2 + $0x41] sm:$0xff] }
 0x573   : > { %6531 = vmatmul.f32.gmra.mxu0 %v6448_v39  ;;  %5808 = vmatmul.f32.gmra.mxu1 %v11475_v7 }
 0x574   : > { %5983 = vmatmul.f32.gmra.mxu2 %v5900_v34  ;;  %6257 = vmatmul.f32.gmra.mxu3 %v6174_v32  ;;  %v11477_v27 = vadd.f32 %v5529_v45, %v5335_v62  ;;  %v11483_v34 = vld [vmem:[#allocation2 + $0x131] sm:$0xff] }
 0x576   : > { %12687 = vst [vmem:[#allocation20_spill] sm:$0xff] %v11477_v27  ;;  %v6451_v27 = vld [vmem:[#allocation2 + $0x51] sm:$0xff] }
 0x577   : > { %v5032_v2 = vpop.f32.mrf.mxu2  ;;  %v5258_v23 = vpop.f32.mrf.mxu3 }
 0x578   : > { %v5033_v21 = vadd.f32 %v5032_v2, %v11114_v30  ;;  %v5535_v25 = vpop.f32.mrf.mxu0  ;;  %v11481_v38 = vpop.f32.mrf.mxu1 }
 0x579   : > { %12688 = vst [vmem:[#allocation21_spill] sm:$0xff] %v11481_v38  ;;  %v11516_v38 = vld [vmem:[#allocation2 + $0x42] sm:$0xff] }
 0x57a   : > { %v5336_v59 = vadd.f32 %v5258_v23, %v5033_v21  ;;  %v6450_v23 = vld [vmem:[#allocation2 + $0x49] sm:$0xff] }
 0x57b   : > { %6534 = vmatmul.f32.gmra.mxu0 %v6449_v28  ;;  %5811 = vmatmul.f32.gmra.mxu1 %v11483_v34  ;;  %v6176_v28 = vld [vmem:[#allocation2 + $0x48] sm:$0xff] }
 0x57c   : > { %5986 = vmatmul.f32.gmra.mxu2 %v5901_v47  ;;  %6260 = vmatmul.f32.gmra.mxu3 %v6175_v12  ;;  %v11485_v39 = vadd.f32 %v5532_v6, %v5336_v59  ;;  %v7542_v47 = vld [vmem:[%s12353_s3 + $0x410] sm:$0xff]  ;;  %v11497_v6 = vld [vmem:[#allocation2 + $0x139] sm:$0xff] }
 0x57d   : > { %v11494_v12 = vld [vmem:[#allocation2 + $0x32] sm:$0xff]  ;;  %6799 = vmatpush.msra.mxu1 %v7542_v47 }
 0x57e   : > { %12689 = vst [vmem:[#allocation22_spill] sm:$0xff] %v11485_v39  ;;  %v6177_v47 = vld [vmem:[#allocation2 + $0x50] sm:$0xff] }
 0x57f   : > { %v5035_v62 = vpop.f32.mrf.mxu2  ;;  %v5261_v45 = vpop.f32.mrf.mxu3 }
 0x580   : > { %v5036_v30 = vadd.f32 %v5035_v62, %v11123_v51  ;;  %v5538_v32 = vpop.f32.mrf.mxu0  ;;  %v11489_v21 = vpop.f32.mrf.mxu1 }
 0x581   : > { %12690 = vst [vmem:[#allocation23_spill] sm:$0xff] %v11489_v21 }
 0x582   : > { %v5337_v2 = vadd.f32 %v5261_v45, %v5036_v30 }
 0x583   : > { %6537 = vmatmul.f32.gmra.mxu0 %v6450_v23  ;;  %5814 = vmatmul.f32.gmra.mxu1 %v11497_v6  ;;  %v11505_v23 = vld [vmem:[#allocation2 + $0x3a] sm:$0xff] }
 0x584   : > { %5989 = vmatmul.f32.gmra.mxu2 %v11494_v12  ;;  %6263 = vmatmul.f32.gmra.mxu3 %v6176_v28  ;;  %v11499_v51 = vadd.f32 %v5535_v25, %v5337_v2  ;;  %v11508_v25 = vld [vmem:[#allocation2 + $0x141] sm:$0xff] }
 0x586   : > { %12691 = vst [vmem:[#allocation24_spill] sm:$0xff] %v11499_v51  ;;  %v6452_v51 = vld [vmem:[#allocation2 + $0x59] sm:$0xff] }
 0x587   : > { %v5038_v59 = vpop.f32.mrf.mxu2  ;;  %v5264_v62 = vpop.f32.mrf.mxu3 }
 0x588   : > { %v5039_v45 = vadd.f32 %v5038_v59, %v11135_v9  ;;  %v5541_v30 = vpop.f32.mrf.mxu0  ;;  %v11503_v21 = vpop.f32.mrf.mxu1 }
 0x589   : > { %12692 = vst [vmem:[#allocation25_spill] sm:$0xff] %v11503_v21 }
 0x58a   : > { %v5338_v39 = vadd.f32 %v5264_v62, %v5039_v45 }
 0x58b   : > { %6540 = vmatmul.f32.gmra.mxu0 %v6451_v27  ;;  %5817 = vmatmul.f32.gmra.mxu1 %v11508_v25  ;;  %v6178_v27 = vld [vmem:[#allocation2 + $0x58] sm:$0xff] }
 0x58c   : > { %5992 = vmatmul.f32.gmra.mxu2 %v11505_v23  ;;  %6266 = vmatmul.f32.gmra.mxu3 %v6177_v47  ;;  %v11510_v2 = vadd.f32 %v5538_v32, %v5338_v39  ;;  %v11519_v39 = vld [vmem:[#allocation2 + $0x149] sm:$0xff] }
 0x58e   : > { %12693 = vst [vmem:[#allocation46_spill] sm:$0xff] %v11510_v2  ;;  %v6453_v2 = vld [vmem:[#allocation2 + $0x61] sm:$0xff] }
 0x58f   : > { %v5041_v28 = vpop.f32.mrf.mxu2  ;;  %v5267_v9 = vpop.f32.mrf.mxu3 }
 0x590   : > { %v5042_v59 = vadd.f32 %v5041_v28, %v11147_v60  ;;  %v5544_v62 = vpop.f32.mrf.mxu0  ;;  %v11514_v21 = vpop.f32.mrf.mxu1 }
 0x591   : > { %12694 = vst [vmem:[#allocation47_spill] sm:$0xff] %v11514_v21 }
 0x592   : > { %v5339_v45 = vadd.f32 %v5267_v9, %v5042_v59 }
 0x593   : > { %6543 = vmatmul.f32.gmra.mxu0 %v6452_v51  ;;  %5820 = vmatmul.f32.gmra.mxu1 %v11519_v39  ;;  %v7541_v51 = vld [vmem:[%s12353_s3 + $0x408] sm:$0xff] }
 0x594   : > { %5995 = vmatmul.f32.gmra.mxu2 %v11516_v38  ;;  %6269 = vmatmul.f32.gmra.mxu3 %v6178_v27  ;;  %v11521_v32 = vadd.f32 %v5541_v30, %v5339_v45  ;;  %v11530_v27 = vld [vmem:[#allocation2 + $0x4a] sm:$0xff] }
 0x595   : > { %6800 = vmatpush.msra.mxu1 %v7541_v51  ;;  %v11533_v30 = vld [vmem:[#allocation2 + $0x151] sm:$0xff]  ;;  %v6180_v51 = vld [vmem:[#allocation2 + $0x68] sm:$0xff] }
 0x596   : > { %12695 = vst [vmem:[#allocation48_spill] sm:$0xff] %v11521_v32 }
 0x597   : > { %v5044_v47 = vpop.f32.mrf.mxu2  ;;  %v5270_v60 = vpop.f32.mrf.mxu3 }
 0x598   : > { %v5045_v28 = vadd.f32 %v5044_v47, %v11153_v44  ;;  %v5547_v9 = vpop.f32.mrf.mxu0  ;;  %v11525_v21 = vpop.f32.mrf.mxu1 }
 0x599   : > { %12696 = vst [vmem:[#allocation49_spill] sm:$0xff] %v11525_v21  ;;  %v6454_v21 = vld [vmem:[#allocation2 + $0x69] sm:$0xff] }
 0x59a   : > { %v5340_v59 = vadd.f32 %v5270_v60, %v5045_v28 }
 0x59b   : > { %6546 = vmatmul.f32.gmra.mxu0 %v6453_v2  ;;  %5823 = vmatmul.f32.gmra.mxu1 %v11533_v30  ;;  %v11541_v2 = vld [vmem:[#allocation2 + $0x52] sm:$0xff] }
 0x59c   : > { %5998 = vmatmul.f32.gmra.mxu2 %v11530_v27  ;;  %6272 = vmatmul.f32.gmra.mxu3 %v6179_v8  ;;  %v11535_v44 = vadd.f32 %v5544_v62, %v5340_v59  ;;  %v11544_v8 = vld [vmem:[#allocation2 + $0x159] sm:$0xff] }
 0x59d   : > { %12699 = vst [vmem:[#allocation52_spill] sm:$0xff] %v11544_v8 }
 0x59e   : > { %12697 = vst [vmem:[#allocation50_spill] sm:$0xff] %v11535_v44  ;;  %v6455_v44 = vld [vmem:[#allocation2 + $0x71] sm:$0xff] }
 0x59f   : > { %v5047_v45 = vpop.f32.mrf.mxu2  ;;  %v5273_v47 = vpop.f32.mrf.mxu3 }
 0x5a0   : > { %v5048_v60 = vadd.f32 %v5047_v45, %v11164_v16  ;;  %v5550_v28 = vpop.f32.mrf.mxu0  ;;  %v11539_v29 = vpop.f32.mrf.mxu1 }
 0x5a1   : > { %12698 = vst [vmem:[#allocation51_spill] sm:$0xff] %v11539_v29 }
 0x5a2   : > { %v5341_v32 = vadd.f32 %v5273_v47, %v5048_v60 }
 0x5a3   : > { %6549 = vmatmul.f32.gmra.mxu0 %v6454_v21  ;;  %5826 = vmatmul.f32.gmra.mxu1 %v11544_v8  ;;  %v6181_v21 = vld [vmem:[#allocation2 + $0x70] sm:$0xff]  ;;  %v6198_v8 = vld [vmem:[#allocation2 + $0xf8] sm:$0xff] }
 0x5a4   : > { %6001 = vmatmul.f32.gmra.mxu2 %v11541_v2  ;;  %6275 = vmatmul.f32.gmra.mxu3 %v6180_v51  ;;  %v11546_v62 = vadd.f32 %v5547_v9, %v5341_v32  ;;  %v11555_v32 = vld [vmem:[#allocation2 + $0x161] sm:$0xff] }
 0x5a5   : > { %12702 = vst [vmem:[#allocation55_spill] sm:$0xff] %v11555_v32 }
 0x5a6   : > { %12700 = vst [vmem:[#allocation53_spill] sm:$0xff] %v11546_v62  ;;  %v6456_v62 = vld [vmem:[#allocation2 + $0x79] sm:$0xff] }
 0x5a7   : > { %v5050_v59 = vpop.f32.mrf.mxu2  ;;  %v5276_v16 = vpop.f32.mrf.mxu3 }
 0x5a8   : > { %v5051_v45 = vadd.f32 %v5050_v59, %v11175_v50  ;;  %v5553_v47 = vpop.f32.mrf.mxu0  ;;  %v11550_v29 = vpop.f32.mrf.mxu1 }
 0x5a9   : > { %12701 = vst [vmem:[#allocation54_spill] sm:$0xff] %v11550_v29 }
 0x5aa   : > { %v5342_v60 = vadd.f32 %v5276_v16, %v5051_v45 }
 0x5ab   : > { %6552 = vmatmul.f32.gmra.mxu0 %v6455_v44  ;;  %5829 = vmatmul.f32.gmra.mxu1 %v11555_v32  ;;  %v7540_v44 = vld [vmem:[%s12353_s3 + $0x400] sm:$0xff] }
 0x5ac   : > { %6004 = vmatmul.f32.gmra.mxu2 %v11552_v10  ;;  %6278 = vmatmul.f32.gmra.mxu3 %v6181_v21  ;;  %v11557_v9 = vadd.f32 %v5550_v28, %v5342_v60  ;;  %v11566_v21 = vld [vmem:[#allocation2 + $0x62] sm:$0xff]  ;;  %v11705_v32 = vld [vmem:[#allocation2 + $0xda] sm:$0xff] }
 0x5ad   : > { %6801 = vmatpush.msra.mxu1 %v7540_v44  ;;  %v5667_v28 = vld [vmem:[#allocation2 + $0x169] sm:$0xff] }
 0x5ae   : > { %12703 = vst [vmem:[#allocation56_spill] sm:$0xff] %v11557_v9 }
 0x5af   : > { %v5053_v51 = vpop.f32.mrf.mxu2  ;;  %v5279_v50 = vpop.f32.mrf.mxu3 }
 0x5b0   : > { %v5054_v59 = vadd.f32 %v5053_v51, %v11180_v5  ;;  %v5556_v16 = vpop.f32.mrf.mxu0  ;;  %v11561_v29 = vpop.f32.mrf.mxu1 }
 0x5b1   : > { %12704 = vst [vmem:[#allocation57_spill] sm:$0xff] %v11561_v29  ;;  %v6457_v29 = vld [vmem:[#allocation2 + $0x81] sm:$0xff] }
 0x5b2   : > { %v5343_v45 = vadd.f32 %v5279_v50, %v5054_v59 }
 0x5b3   : > { %6555 = vmatmul.f32.gmra.mxu0 %v6456_v62  ;;  %5832 = vmatmul.f32.gmra.mxu1 %v5667_v28  ;;  %v6183_v62 = vld [vmem:[#allocation2 + $0x80] sm:$0xff] }
 0x5b4   : > { %6007 = vmatmul.f32.gmra.mxu2 %v11566_v21  ;;  %6281 = vmatmul.f32.gmra.mxu3 %v6182_v41  ;;  %v11569_v60 = vadd.f32 %v5553_v47, %v5343_v45  ;;  %v5668_v41 = vld [vmem:[#allocation2 + $0x171] sm:$0xff] }
 0x5b6   : > { %12705 = vst [vmem:[#allocation58_spill] sm:$0xff] %v11569_v60  ;;  %v11582_v60 = vld [vmem:[#allocation2 + $0x72] sm:$0xff] }
 0x5b7   : > { %v5056_v5 = vpop.f32.mrf.mxu2  ;;  %v5282_v51 = vpop.f32.mrf.mxu3 }
 0x5b8   : > { %v5057_v50 = vadd.f32 %v5056_v5, %v11191_v1  ;;  %v5559_v59 = vpop.f32.mrf.mxu0  ;;  %v11572_v18 = vpop.f32.mrf.mxu1 }
 0x5b9   : > { %12706 = vst [vmem:[#allocation59_spill] sm:$0xff] %v11572_v18  ;;  %v6184_v18 = vld [vmem:[#allocation2 + $0x88] sm:$0xff] }
 0x5ba   : > { %v5344_v9 = vadd.f32 %v5282_v51, %v5057_v50  ;;  %v6458_v51 = vld [vmem:[#allocation2 + $0x89] sm:$0xff] }
 0x5bb   : > { %6558 = vmatmul.f32.gmra.mxu0 %v6457_v29  ;;  %5835 = vmatmul.f32.gmra.mxu1 %v5668_v41  ;;  %v5669_v29 = vld [vmem:[#allocation2 + $0x179] sm:$0xff] }
 0x5bc   : > { %6010 = vmatmul.f32.gmra.mxu2 %v11574_v35  ;;  %6284 = vmatmul.f32.gmra.mxu3 %v6183_v62  ;;  %v11577_v47 = vadd.f32 %v5556_v16, %v5344_v9 }
 0x5be   : > { %12707 = vst [vmem:[#allocation60_spill] sm:$0xff] %v11577_v47  ;;  %v6185_v47 = vld [vmem:[#allocation2 + $0x90] sm:$0xff] }
 0x5bf   : > { %v5059_v45 = vpop.f32.mrf.mxu2  ;;  %v5285_v44 = vpop.f32.mrf.mxu3 }
 0x5c0   : > { %v5060_v1 = vadd.f32 %v5059_v45, %v11202_v53  ;;  %v5562_v5 = vpop.f32.mrf.mxu0  ;;  %v11580_v50 = vpop.f32.mrf.mxu1  ;;  %v6459_v45 = vld [vmem:[#allocation2 + $0x91] sm:$0xff] }
 0x5c1   : > { %12708 = vst [vmem:[#allocation61_spill] sm:$0xff] %v11580_v50  ;;  %v11683_v50 = vld [vmem:[#allocation2 + $0xca] sm:$0xff] }
 0x5c2   : > { %v5345_v28 = vadd.f32 %v5285_v44, %v5060_v1  ;;  %v11590_v1 = vld [vmem:[#allocation2 + $0x7a] sm:$0xff] }
 0x5c3   : > { %6561 = vmatmul.f32.gmra.mxu0 %v6458_v51  ;;  %5838 = vmatmul.f32.gmra.mxu1 %v5669_v29 }
 0x5c4   : > { %6013 = vmatmul.f32.gmra.mxu2 %v11582_v60  ;;  %6287 = vmatmul.f32.gmra.mxu3 %v6184_v18  ;;  %v11585_v9 = vadd.f32 %v5559_v59, %v5345_v28  ;;  %v5670_v18 = vld [vmem:[#allocation2 + $0x181] sm:$0xff] }
 0x5c6   : > { %12709 = vst [vmem:[#allocation62_spill] sm:$0xff] %v11585_v9  ;;  %v11598_v9 = vld [vmem:[#allocation2 + $0x82] sm:$0xff] }
 0x5c7   : > { %v5062_v16 = vpop.f32.mrf.mxu2  ;;  %v5288_v62 = vpop.f32.mrf.mxu3 }
 0x5c8   : > { %v5063_v53 = vadd.f32 %v5062_v16, %v11207_v3  ;;  %v11588_v44 = vpop.f32.mrf.mxu1  ;;  %v5565_v51 = vpop.f32.mrf.mxu0 }
 0x5c9   : > { %12710 = vst [vmem:[#allocation63_spill] sm:$0xff] %v11588_v44  ;;  %v6186_v44 = vld [vmem:[#allocation2 + $0x98] sm:$0xff] }
 0x5ca   : > { %v5346_v41 = vadd.f32 %v5288_v62, %v5063_v53  ;;  %v6460_v62 = vld [vmem:[#allocation2 + $0x99] sm:$0xff] }
 0x5cb   : > { %6564 = vmatmul.f32.gmra.mxu0 %v6459_v45  ;;  %5841 = vmatmul.f32.gmra.mxu1 %v5670_v18 }
 0x5cc   : > { %6016 = vmatmul.f32.gmra.mxu2 %v11590_v1  ;;  %6290 = vmatmul.f32.gmra.mxu3 %v6185_v47  ;;  %v11593_v59 = vadd.f32 %v5562_v5, %v5346_v41  ;;  %v5671_v47 = vld [vmem:[#allocation2 + $0x189] sm:$0xff] }
 0x5ce   : > { %12711 = vst [vmem:[#allocation64_spill] sm:$0xff] %v11593_v59  ;;  %v11606_v59 = vld [vmem:[#allocation2 + $0x8a] sm:$0xff] }
 0x5cf   : > { %v5065_v28 = vpop.f32.mrf.mxu2  ;;  %v5291_v29 = vpop.f32.mrf.mxu3 }
 0x5d0   : > { %v5066_v3 = vadd.f32 %v5065_v28, %v11218_v61  ;;  %v11596_v53 = vpop.f32.mrf.mxu1  ;;  %v5568_v5 = vpop.f32.mrf.mxu0 }
 0x5d1   : > { %12712 = vst [vmem:[#allocation65_spill] sm:$0xff] %v11596_v53  ;;  %v6187_v53 = vld [vmem:[#allocation2 + $0xa0] sm:$0xff] }
 0x5d2   : > { %v5347_v16 = vadd.f32 %v5291_v29, %v5066_v3  ;;  %v6461_v29 = vld [vmem:[#allocation2 + $0xa1] sm:$0xff] }
 0x5d3   : > { %6567 = vmatmul.f32.gmra.mxu0 %v6460_v62  ;;  %5844 = vmatmul.f32.gmra.mxu1 %v5671_v47 }
 0x5d4   : > { %6019 = vmatmul.f32.gmra.mxu2 %v11598_v9  ;;  %6293 = vmatmul.f32.gmra.mxu3 %v6186_v44  ;;  %v11601_v45 = vadd.f32 %v5565_v51, %v5347_v16  ;;  %v5672_v44 = vld [vmem:[#allocation2 + $0x191] sm:$0xff] }
 0x5d6   : > { %12713 = vst [vmem:[#allocation66_spill] sm:$0xff] %v11601_v45  ;;  %v11614_v45 = vld [vmem:[#allocation2 + $0x92] sm:$0xff] }
 0x5d7   : > { %v5068_v41 = vpop.f32.mrf.mxu2  ;;  %v5294_v18 = vpop.f32.mrf.mxu3 }
 0x5d8   : > { %v5069_v61 = vadd.f32 %v5068_v41, %v11229_v56  ;;  %v11604_v3 = vpop.f32.mrf.mxu1  ;;  %v5571_v56 = vpop.f32.mrf.mxu0 }
 0x5d9   : > { %12714 = vst [vmem:[#allocation67_spill] sm:$0xff] %v11604_v3  ;;  %v6188_v3 = vld [vmem:[#allocation2 + $0xa8] sm:$0xff] }
 0x5da   : > { %v5348_v28 = vadd.f32 %v5294_v18, %v5069_v61  ;;  %v6462_v18 = vld [vmem:[#allocation2 + $0xa9] sm:$0xff] }
 0x5db   : > { %6570 = vmatmul.f32.gmra.mxu0 %v6461_v29  ;;  %5847 = vmatmul.f32.gmra.mxu1 %v5672_v44  ;;  %v6463_v44 = vld [vmem:[#allocation2 + $0xb1] sm:$0xff] }
 0x5dc   : > { %6022 = vmatmul.f32.gmra.mxu2 %v11606_v59  ;;  %6296 = vmatmul.f32.gmra.mxu3 %v6187_v53  ;;  %v11609_v51 = vadd.f32 %v5568_v5, %v5348_v28 }
 0x5de   : > { %12715 = vst [vmem:[#allocation68_spill] sm:$0xff] %v11609_v51  ;;  %v6189_v51 = vld [vmem:[#allocation2 + $0xb0] sm:$0xff] }
 0x5df   : > { %v5071_v16 = vpop.f32.mrf.mxu2  ;;  %v5297_v62 = vpop.f32.mrf.mxu3 }
 0x5e0   : > { %v5072_v47 = vadd.f32 %v5071_v16, %v11234_v49  ;;  %v11612_v61 = vpop.f32.mrf.mxu1 }
 0x5e1   : > { %12716 = vst [vmem:[#allocation69_spill] sm:$0xff] %v11612_v61 }
 0x5e2   : > { %v5349_v41 = vadd.f32 %v5297_v62, %v5072_v47  ;;  %v5574_v62 = vpop.f32.mrf.mxu0  ;;  %v11623_v47 = vld [vmem:[#allocation2 + $0x9a] sm:$0xff] }
 0x5e3   : > { %6573 = vmatmul.f32.gmra.mxu0 %v6462_v18  ;;  %6802 = vmatmul.f32.vlgmr.msra.gmra.mxu1 %v11494_v12  ;;  %v6464_v12 = vld [vmem:[#allocation2 + $0xb9] sm:$0xff] }
 0x5e4   : > { %6025 = vmatmul.f32.gmra.mxu2 %v11614_v45  ;;  %6299 = vmatmul.f32.gmra.mxu3 %v6188_v3  ;;  %v11617_v53 = vadd.f32 %v5571_v56, %v5349_v41  ;;  %v6190_v41 = vld [vmem:[#allocation2 + $0xb8] sm:$0xff] }
 0x5e6   : > { %12717 = vst [vmem:[#allocation70_spill] sm:$0xff] %v11617_v53  ;;  %v11661_v53 = vld [vmem:[#allocation2 + $0xba] sm:$0xff] }
 0x5e7   : > { %v5074_v5 = vpop.f32.mrf.mxu2  ;;  %v5300_v49 = vpop.f32.mrf.mxu3 }
 0x5e8   : > { %v5075_v28 = vadd.f32 %v5074_v5, %v11245_v43  ;;  %v11621_v16 = vpop.f32.mrf.mxu1  ;;  %v11631_v43 = vld [vmem:[#allocation2 + $0xa2] sm:$0xff] }
 0x5e9   : > { %12718 = vst [vmem:[#allocation71_spill] sm:$0xff] %v11621_v16  ;;  %v6465_v5 = vld [vmem:[#allocation2 + $0xc1] sm:$0xff] }
 0x5ea   : > { %v5350_v29 = vadd.f32 %v5300_v49, %v5075_v28  ;;  %v11639_v28 = vld [vmem:[#allocation2 + $0xaa] sm:$0xff]  ;;  %v11642_v49 = vpop.f32.mrf.mxu0  ;;  %v11673_v16 = vld [vmem:[#allocation2 + $0xc2] sm:$0xff] }
 0x5eb   : > { %6576 = vmatmul.f32.gmra.mxu0 %v6463_v44  ;;  %6805 = vmatmul.f32.gmra.mxu1 %v11505_v23  ;;  %v6191_v23 = vld [vmem:[#allocation2 + $0xc0] sm:$0xff] }
 0x5ec   : > { %6028 = vmatmul.f32.gmra.mxu2 %v11623_v47  ;;  %6302 = vmatmul.f32.gmra.mxu3 %v6189_v51  ;;  %v11626_v3 = vadd.f32 %v5574_v62, %v5350_v29 }
 0x5ee   : > { %12719 = vst [vmem:[#allocation72_spill] sm:$0xff] %v11626_v3 }
 0x5ef   : > { %v11635_v18 = vpop.f32.mrf.mxu2  ;;  %v11645_v29 = vpop.f32.mrf.mxu3 }
 0x5f0   : > { %v11629_v56 = vpop.f32.mrf.mxu1 }
 0x5f1   : > { %12720 = vst [vmem:[#allocation73_spill] sm:$0xff] %v11629_v56 }
 0x5f3   : > { %6579 = vmatmul.f32.gmra.mxu0 %v6464_v12  ;;  %6808 = vmatmul.f32.gmra.mxu1 %v11516_v38  ;;  %v6466_v38 = vld [vmem:[#allocation2 + $0xc9] sm:$0xff]  ;;  %v11651_v12 = vld [vmem:[#allocation2 + $0xb2] sm:$0xff] }
 0x5f4   : > { %6031 = vmatmul.f32.gmra.mxu2 %v11631_v43  ;;  %6305 = vmatmul.f32.gmra.mxu3 %v6190_v41  ;;  %v6192_v41 = vld [vmem:[#allocation2 + $0xc8] sm:$0xff] }
 0x5f7   : > { %v11647_v44 = vpop.f32.mrf.mxu2 }
 0x5f8   : > { %v11637_v51 = vpop.f32.mrf.mxu1 }
 0x5f9   : > { %12721 = vst [vmem:[#allocation74_spill] sm:$0xff] %v11637_v51  ;;  %v6193_v51 = vld [vmem:[#allocation2 + $0xd0] sm:$0xff] }
 0x5fb   : > { %6582 = vmatmul.f32.gmra.mxu0 %v6465_v5  ;;  %6811 = vmatmul.f32.gmra.mxu1 %v11530_v27  ;;  %v11655_v5 = vpop.f32.mrf.mxu0  ;;  %v6467_v27 = vld [vmem:[#allocation2 + $0xd1] sm:$0xff] }
 0x5fc   : > { %6034 = vmatmul.f32.gmra.mxu2 %v11639_v28  ;;  %6308 = vmatmul.f32.gmra.mxu3 %v6191_v23  ;;  %v11657_v23 = vpop.f32.mrf.mxu3 }
 0x600   : > { %v11649_v62 = vpop.f32.mrf.mxu1 }
 0x601   : > { %12722 = vst [vmem:[#allocation75_spill] sm:$0xff] %v11649_v62  ;;  %v11663_v62 = vpop.f32.mrf.mxu2 }
 0x603   : > { %6585 = vmatmul.f32.gmra.mxu0 %v6466_v38  ;;  %6814 = vmatmul.f32.gmra.mxu1 %v11541_v2  ;;  %v11667_v38 = vpop.f32.mrf.mxu0 }
 0x604   : > { %6037 = vmatmul.f32.gmra.mxu2 %v11651_v12  ;;  %6311 = vmatmul.f32.gmra.mxu3 %v6192_v41  ;;  %v11669_v2 = vpop.f32.mrf.mxu3  ;;  %v6468_v41 = vld [vmem:[#allocation2 + $0xd9] sm:$0xff] }
 0x608   : > { %v11659_v3 = vpop.f32.mrf.mxu1 }
 0x609   : > { %12723 = vst [vmem:[#allocation76_spill] sm:$0xff] %v11659_v3  ;;  %v6194_v3 = vld [vmem:[#allocation2 + $0xd8] sm:$0xff] }
 0x60b   : > { %6588 = vmatmul.f32.gmra.mxu0 %v6467_v27  ;;  %6817 = vmatmul.f32.gmra.mxu1 %v11552_v10  ;;  %v11677_v27 = vpop.f32.mrf.mxu2  ;;  %v11681_v61 = vpop.f32.mrf.mxu0 }
 0x60c   : > { %6040 = vmatmul.f32.gmra.mxu2 %v11661_v53  ;;  %6314 = vmatmul.f32.gmra.mxu3 %v6193_v51  ;;  %v6469_v51 = vld [vmem:[#allocation2 + $0xe1] sm:$0xff] }
 0x610   : > { %v11671_v56 = vpop.f32.mrf.mxu1 }
 0x611   : > { %12724 = vst [vmem:[#allocation77_spill] sm:$0xff] %v11671_v56  ;;  %v11685_v56 = vpop.f32.mrf.mxu3 }
 0x613   : > { %6591 = vmatmul.f32.gmra.mxu0 %v6468_v41  ;;  %6820 = vmatmul.f32.gmra.mxu1 %v11566_v21  ;;  %v6470_v21 = vld [vmem:[#allocation2 + $0xe9] sm:$0xff] }
 0x614   : > { %6043 = vmatmul.f32.gmra.mxu2 %v11673_v16  ;;  %6317 = vmatmul.f32.gmra.mxu3 %v6194_v3  ;;  %v11689_v3 = vpop.f32.mrf.mxu2 }
 0x618   : > { %v11679_v10 = vpop.f32.mrf.mxu1 }
 0x619   : > { %12725 = vst [vmem:[#allocation78_spill] sm:$0xff] %v11679_v10  ;;  %v6196_v10 = vld [vmem:[#allocation2 + $0xe8] sm:$0xff]  ;;  %v11699_v26 = vpop.f32.mrf.mxu3 }
 0x61b   : > { %6594 = vmatmul.f32.gmra.mxu0 %v6469_v51  ;;  %6823 = vmatmul.f32.gmra.mxu1 %v11574_v35  ;;  %v11696_v51 = vpop.f32.mrf.mxu0  ;;  %v6471_v35 = vld [vmem:[#allocation2 + $0xf1] sm:$0xff] }
 0x61c   : > { %6046 = vmatmul.f32.gmra.mxu2 %v11683_v50  ;;  %6320 = vmatmul.f32.gmra.mxu3 %v6195_v17  ;;  %v11701_v17 = vpop.f32.mrf.mxu2 }
 0x620   : > { %v11691_v41 = vpop.f32.mrf.mxu1 }
 0x621   : > { %12726 = vst [vmem:[#allocation79_spill] sm:$0xff] %v11691_v41  ;;  %v6197_v41 = vld [vmem:[#allocation2 + $0xf0] sm:$0xff] }
 0x623   : > { %6597 = vmatmul.f32.gmra.mxu0 %v6470_v21  ;;  %6826 = vmatmul.f32.gmra.mxu1 %v11582_v60  ;;  %v11711_v21 = vpop.f32.mrf.mxu3  ;;  %v6472_v60 = vld [vmem:[#allocation2 + $0xf9] sm:$0xff] }
 0x624   : > { %6049 = vmatmul.f32.gmra.mxu2 %v11693_v14  ;;  %6323 = vmatmul.f32.gmra.mxu3 %v6196_v10  ;;  %v11709_v10 = vpop.f32.mrf.mxu0 }
 0x628   : > { %v11703_v40 = vpop.f32.mrf.mxu1 }
 0x629   : > { %12727 = vst [vmem:[#allocation80_spill] sm:$0xff] %v11703_v40  ;;  %v11717_v40 = vpop.f32.mrf.mxu2 }
 0x62b   : > { %6600 = vmatmul.f32.gmra.mxu0 %v6471_v35  ;;  %6829 = vmatmul.f32.gmra.mxu1 %v11590_v1  ;;  %v11723_v1 = vpop.f32.mrf.mxu3  ;;  %v6473_v35 = vld [vmem:[#allocation2 + $0x101] sm:$0xff] }
 0x62c   : > { %6052 = vmatmul.f32.gmra.mxu2 %v11705_v32  ;;  %6326 = vmatmul.f32.gmra.mxu3 %v6197_v41  ;;  %v11721_v41 = vpop.f32.mrf.mxu0 }
 0x62d   : > { %12730 = vst [vmem:[#allocation83_spill] sm:$0xff] %v11721_v41  ;;  %v6200_v41 = vld [vmem:[#allocation2 + $0x108] sm:$0xff] }
 0x630   : > { %v11713_v15 = vpop.f32.mrf.mxu1 }
 0x631   : > { %12728 = vst [vmem:[#allocation81_spill] sm:$0xff] %v11713_v15  ;;  %v6199_v15 = vld [vmem:[#allocation2 + $0x100] sm:$0xff] }
 0x633   : > { %6603 = vmatmul.f32.gmra.mxu0 %v6472_v60  ;;  %6832 = vmatmul.f32.gmra.mxu1 %v11598_v9  ;;  %v11731_v60 = vpop.f32.mrf.mxu2 }
 0x634   : > { %6055 = vmatmul.f32.gmra.mxu2 %v11715_v63  ;;  %6329 = vmatmul.f32.gmra.mxu3 %v6198_v8  ;;  %v11735_v9 = vpop.f32.mrf.mxu0  ;;  %v11737_v63 = vld [vmem:[#allocation2 + $0xf2] sm:$0xff] }
 0x635   : > { %12734 = vst [vmem:[#allocation87_spill] sm:$0xff] %v11737_v63 }
 0x638   : > { %v11725_v19 = vpop.f32.mrf.mxu1 }
 0x639   : > { %12731 = vst [vmem:[#allocation84_spill] sm:$0xff] %v11725_v19  ;;  %v11740_v19 = vpop.f32.mrf.mxu3 }
 0x63b   : > { %6606 = vmatmul.f32.gmra.mxu0 %v6473_v35  ;;  %6835 = vmatmul.f32.gmra.mxu1 %v11606_v59  ;;  %v11748_v35 = vld [vmem:[#allocation2 + $0xfa] sm:$0xff] }
 0x63c   : > { %6058 = vmatmul.f32.gmra.mxu2 %v11727_v24  ;;  %6332 = vmatmul.f32.gmra.mxu3 %v6199_v15  ;;  %v11744_v15 = vpop.f32.mrf.mxu2  ;;  %12736 = vst [vmem:[#allocation89_spill] sm:$0xff] %v11748_v35  ;;  %v11761_v24 = vld [vmem:[#allocation2 + $0x102] sm:$0xff] }
 0x640   : > { %v11733_v8 = vpop.f32.mrf.mxu1 }
 0x641   : > { %12733 = vst [vmem:[#allocation86_spill] sm:$0xff] %v11733_v8  ;;  %v6201_v8 = vld [vmem:[#allocation2 + $0x110] sm:$0xff] }
 0x643   : > { %6609 = vmatmul.f32.gmra.mxu0 %v11438_v48  ;;  %6838 = vmatmul.f32.gmra.mxu1 %v11614_v45  ;;  %v11752_v48 = vpop.f32.mrf.mxu0 }
 0x644   : > { %6061 = vmatmul.f32.gmra.mxu2 %v11737_v63  ;;  %6335 = vmatmul.f32.gmra.mxu3 %v6200_v41  ;;  %12737 = vst [vmem:[#allocation90_spill] sm:$0xff] %v11752_v48  ;;  %v11755_v63 = vpop.f32.mrf.mxu3  ;;  %v11757_v41 = vpop.f32.mrf.mxu2  ;;  %v11775_v48 = vld [vmem:[#allocation2 + $0x10a] sm:$0xff] }
 0x645   : > { %12738 = vst [vmem:[#allocation91_spill] sm:$0xff] %v11757_v41  ;;  %v6203_v41 = vld [vmem:[#allocation2 + $0x120] sm:$0xff] }
 0x648   : > { %v11746_v59 = vpop.f32.mrf.mxu1 }
 0x649   : > { %12735 = vst [vmem:[#allocation88_spill] sm:$0xff] %v11746_v59  ;;  %v6202_v59 = vld [vmem:[#allocation2 + $0x118] sm:$0xff] }
 0x64b   : > { %6612 = vmatmul.f32.gmra.mxu0 %v11447_v36  ;;  %6841 = vmatmul.f32.gmra.mxu1 %v11623_v47  ;;  %v5851_v36 = vadd.f32 %v11256_v55, %v11132_v42  ;;  %v11768_v47 = vpop.f32.mrf.mxu0  ;;  %v5852_v55 = vadd.f32 %v11261_v54, %v11144_v11  ;;  %v7046_v54 = vld [vmem:[%s7752_s22] sm:$0xff] }
 0x64c   : > { %6064 = vmatmul.f32.gmra.mxu2 %v11748_v35  ;;  %6338 = vmatmul.f32.gmra.mxu3 %v6201_v8  ;;  %v11770_v8 = vpop.f32.mrf.mxu3 }
 0x64d   : > { %v6125_v35 = vadd.f32 %v11635_v18, %v5851_v36 }
 0x64f   : > { %v6399_v42 = vadd.f32 %v11645_v29, %v6125_v35  ;;  %v11796_v35 = vld [vmem:[#allocation2 + $0x112] sm:$0xff] }
 0x650   : > { %v11759_v45 = vpop.f32.mrf.mxu1 }
 0x651   : > { %12739 = vst [vmem:[#allocation92_spill] sm:$0xff] %v11759_v45 }
 0x653   : > { %6615 = vmatmul.f32.gmra.mxu0 %v11456_v57  ;;  %6844 = vmatmul.f32.gmra.mxu1 %v11631_v43  ;;  %v11778_v57 = vpop.f32.mrf.mxu2  ;;  %v6126_v43 = vadd.f32 %v11647_v44, %v5852_v55  ;;  %v11786_v18 = vpop.f32.mrf.mxu0 }
 0x654   : > { %6067 = vmatmul.f32.gmra.mxu2 %v11761_v24  ;;  %6341 = vmatmul.f32.gmra.mxu3 %v6202_v59  ;;  %v6673_v59 = vadd.f32 %v11642_v49, %v6399_v42  ;;  %v5853_v42 = vadd.f32 %v11272_v20, %v11150_v31  ;;  %v6205_v31 = vld [vmem:[#allocation2 + $0x130] sm:$0xff] }
 0x655   : > { %v6400_v49 = vadd.f32 %v11657_v23, %v6126_v43 }
 0x657   : > { %v6674_v43 = vadd.f32 %v11655_v5, %v6400_v49 }
 0x658   : > { %v11773_v45 = vpop.f32.mrf.mxu1 }
 0x65b   : > { %6618 = vmatmul.f32.gmra.mxu0 %v11467_v33  ;;  %6847 = vmatmul.f32.gmra.mxu1 %v11639_v28  ;;  %v11792_v33 = vld [vmem:[%s12354_s4] ss:$0 sm:$0xff]  ;;  %v6204_v28 = vld [vmem:[#allocation2 + $0x128] sm:$0xff]  ;;  %v11804_v36 = vpop.f32.mrf.mxu2 }
 0x65c   : > { %6070 = vmatmul.f32.gmra.mxu2 %v11775_v48  ;;  %6344 = vmatmul.f32.gmra.mxu3 %v6203_v41  ;;  %v11794_v41 = vpop.f32.mrf.mxu3 }
 0x660   : > { %v6803_v29 = vpop.f32.mrf.mxu1 }
 0x661   : > { %v6947_v11 = vadd.f32 %v6803_v29, %v6673_v59  ;;  %v11817_v59 = vpop.f32.mrf.mxu0  ;;  %v11820_v29 = vld [vmem:[#allocation2 + $0x11a] sm:$0xff] }
 0x663   : > { %6621 = vmatmul.f32.gmra.mxu0 %v11475_v7  ;;  %v6998_v44 = vadd.f32 %v11792_v33, %v6947_v11  ;;  %6850 = vmatmul.f32.gmra.mxu1 %v11651_v12  ;;  %v6127_v7 = vadd.f32 %v11663_v62, %v5853_v42  ;;  %v7047_v62 = vld [vmem:[%s7752_s22 + $0x8] sm:$0xff] }
 0x664   : > { %6073 = vmatmul.f32.gmra.mxu2 %v11796_v35  ;;  %6347 = vmatmul.f32.gmra.mxu3 %v6204_v28  ;;  %v11823_v28 = vpop.f32.mrf.mxu3 }
 0x665   : > { %v7094_v55 = vadd.f32 %v7046_v54, %v6998_v44  ;;  %v6401_v11 = vadd.f32 %v11669_v2, %v6127_v7  ;;  %v5854_v54 = vadd.f32 %v11283_v13, %v11161_v0  ;;  %v6206_v2 = vld [vmem:[#allocation2 + $0x138] sm:$0xff]  ;;  %v7048_v0 = vld [vmem:[%s7752_s22 + $0x10] sm:$0xff] }
 0x667   : > { %v7142_v23 = vmax.f32 %v7094_v55, 0.0  ;;  %v6128_v44 = vadd.f32 %v11677_v27, %v5854_v54  ;;  %v6675_v55 = vadd.f32 %v11667_v38, %v6401_v11  ;;  %v6207_v54 = vld [vmem:[#allocation2 + $0x140] sm:$0xff] }
 0x668   : > { %v6806_v12 = vpop.f32.mrf.mxu1 }
 0x669   : > { %7190 = vst [vmem:[%s11813_s24] sm:$0xff] %v7142_v23  ;;  %v6948_v20 = vadd.f32 %v6806_v12, %v6674_v43  ;;  %v11837_v43 = vld [vmem:[#allocation2 + $0x122] sm:$0xff]  ;;  %v6402_v13 = vadd.f32 %v11685_v56, %v6128_v44 }
 0x66b   : > { %6624 = vmatmul.f32.gmra.mxu0 %v11483_v34  ;;  %v6999_v5 = vadd.f32 %v11792_v33, %v6948_v20  ;;  %6853 = vmatmul.f32.gmra.mxu1 %v11661_v53  ;;  %v11832_v34 = vpop.f32.mrf.mxu2  ;;  %v11843_v53 = vpop.f32.mrf.mxu0 }
 0x66c   : > { %6076 = vmatmul.f32.gmra.mxu2 %v11820_v29  ;;  %6350 = vmatmul.f32.gmra.mxu3 %v6205_v31  ;;  %v11847_v38 = vpop.f32.mrf.mxu3 }
 0x66d   : > { %v7095_v49 = vadd.f32 %v7047_v62, %v6999_v5  ;;  %v6676_v62 = vadd.f32 %v11681_v61, %v6402_v13  ;;  %v11856_v5 = vld [vmem:[#allocation2 + $0x12a] sm:$0xff]  ;;  %v5856_v61 = vadd.f32 %v11299_v4, %v11177_v52  ;;  %v7050_v4 = vld [vmem:[%s7752_s22 + $0x20] sm:$0xff] }
 0x66f   : > { %v7143_v42 = vmax.f32 %v7095_v49, 0.0 }
 0x670   : > { %v6809_v23 = vpop.f32.mrf.mxu1 }
 0x671   : > { %7191 = vst [vmem:[%s11813_s24 + $0x8] sm:$0xff] %v7143_v42  ;;  %v6949_v7 = vadd.f32 %v6809_v23, %v6675_v55  ;;  %v6130_v42 = vadd.f32 %v11701_v17, %v5856_v61 }
 0x673   : > { %6627 = vmatmul.f32.gmra.mxu0 %v11497_v6  ;;  %v7000_v27 = vadd.f32 %v11792_v33, %v6949_v7  ;;  %6856 = vmatmul.f32.gmra.mxu1 %v11673_v16  ;;  %v5855_v6 = vadd.f32 %v11288_v37, %v11172_v58  ;;  %v11853_v11 = vpop.f32.mrf.mxu2  ;;  %v7049_v58 = vld [vmem:[%s7752_s22 + $0x18] sm:$0xff]  ;;  %v11866_v49 = vpop.f32.mrf.mxu0  ;;  %v6208_v7 = vld [vmem:[#allocation2 + $0x148] sm:$0xff]  ;;  %v6404_v17 = vadd.f32 %v11711_v21, %v6130_v42 }
 0x674   : > { %6079 = vmatmul.f32.gmra.mxu2 %v11837_v43  ;;  %6353 = vmatmul.f32.gmra.mxu3 %v6206_v2  ;;  %v11892_v21 = vld [vmem:[#allocation2 + $0x13a] sm:$0xff] }
 0x675   : > { %v7096_v12 = vadd.f32 %v7048_v0, %v7000_v27  ;;  %v6129_v31 = vadd.f32 %v11689_v3, %v5855_v6 }
 0x677   : > { %v7144_v20 = vmax.f32 %v7096_v12, 0.0  ;;  %v6403_v37 = vadd.f32 %v11699_v26, %v6129_v31  ;;  %v11873_v26 = vld [vmem:[#allocation2 + $0x132] sm:$0xff]  ;;  %v6678_v12 = vadd.f32 %v11709_v10, %v6404_v17 }
 0x678   : > { %v6812_v56 = vpop.f32.mrf.mxu1  ;;  %v12745_v17 = vld [vmem:[#allocation27_spill] sm:$0xff] }
 0x679   : > { %7192 = vst [vmem:[%s11813_s24 + $0x10] sm:$0xff] %v7144_v20  ;;  %v6950_v16 = vadd.f32 %v6812_v56, %v6676_v62  ;;  %v6677_v23 = vadd.f32 %v11696_v51, %v6403_v37  ;;  %v5857_v51 = vadd.f32 %v11310_v22, %v11188_v46  ;;  %v6209_v62 = vld [vmem:[#allocation2 + $0x150] sm:$0xff]  ;;  %v7051_v46 = vld [vmem:[%s7752_s22 + $0x28] sm:$0xff] }
 0x67a   : > { %v12740_v56 = vld [vmem:[#allocation26_spill] sm:$0xff] }
 0x67b   : > { %6630 = vmatmul.f32.gmra.mxu0 %v11508_v25  ;;  %v7001_v3 = vadd.f32 %v11792_v33, %v6950_v16  ;;  %6859 = vmatmul.f32.gmra.mxu1 %v11683_v50  ;;  %v11868_v25 = vpop.f32.mrf.mxu3  ;;  %v11876_v52 = vpop.f32.mrf.mxu2 }
 0x67c   : > { %6082 = vmatmul.f32.gmra.mxu2 %v11856_v5  ;;  %6356 = vmatmul.f32.gmra.mxu3 %v6207_v54  ;;  %v11886_v27 = vpop.f32.mrf.mxu0  ;;  %v12741_v54 = vld [vmem:[#allocation5_spill] sm:$0xff] }
 0x67d   : > { %v7097_v44 = vadd.f32 %v7049_v58, %v7001_v3  ;;  %v5858_v16 = vadd.f32 %v12741_v54, %v12740_v56  ;;  %v12742_v3 = vld [vmem:[#allocation83_spill] sm:$0xff] }
 0x67f   : > { %v7145_v55 = vmax.f32 %v7097_v44, 0.0 }
 0x680   : > { %v6815_v2 = vpop.f32.mrf.mxu1 }
 0x681   : > { %7193 = vst [vmem:[%s11813_s24 + $0x18] sm:$0xff] %v7145_v55  ;;  %v6951_v50 = vadd.f32 %v6815_v2, %v6677_v23  ;;  %v6210_v55 = vld [vmem:[#allocation2 + $0x158] sm:$0xff] }
 0x683   : > { %6633 = vmatmul.f32.gmra.mxu0 %v11519_v39  ;;  %v7002_v0 = vadd.f32 %v11792_v33, %v6951_v50  ;;  %6862 = vmatmul.f32.gmra.mxu1 %v11693_v14  ;;  %v6131_v39 = vadd.f32 %v11717_v40, %v5857_v51  ;;  %v11889_v31 = vpop.f32.mrf.mxu3  ;;  %v11900_v10 = vpop.f32.mrf.mxu2 }
 0x684   : > { %6085 = vmatmul.f32.gmra.mxu2 %v11873_v26  ;;  %6359 = vmatmul.f32.gmra.mxu3 %v6208_v7  ;;  %v11906_v42 = vpop.f32.mrf.mxu0 }
 0x685   : > { %v7098_v13 = vadd.f32 %v7050_v4, %v7002_v0  ;;  %v6405_v40 = vadd.f32 %v11723_v1, %v6131_v39  ;;  %v11909_v1 = vld [vmem:[#allocation2 + $0x142] sm:$0xff]  ;;  %v12744_v4 = vld [vmem:[#allocation82_spill] sm:$0xff]  ;;  %v12746_v0 = vld [vmem:[#allocation19_spill] sm:$0xff] }
 0x686   : > { %v5859_v51 = vadd.f32 %v12746_v0, %v12745_v17  ;;  %v7054_v0 = vld [vmem:[%s7752_s22 + $0x40] sm:$0xff] }
 0x687   : > { %v7146_v6 = vmax.f32 %v7098_v13, 0.0  ;;  %v6679_v61 = vadd.f32 %v12742_v3, %v6405_v40 }
 0x688   : > { %v6818_v20 = vpop.f32.mrf.mxu1 }
 0x689   : > { %7194 = vst [vmem:[%s11813_s24 + $0x20] sm:$0xff] %v7146_v6  ;;  %v6952_v14 = vadd.f32 %v6818_v20, %v6678_v12  ;;  %v6133_v6 = vadd.f32 %v11744_v15, %v5859_v51 }
 0x68b   : > { %6636 = vmatmul.f32.gmra.mxu0 %v11533_v30  ;;  %v7003_v22 = vadd.f32 %v11792_v33, %v6952_v14  ;;  %6865 = vmatmul.f32.gmra.mxu1 %v11705_v32  ;;  %v6132_v30 = vadd.f32 %v11731_v60, %v5858_v16  ;;  %v12743_v32 = vld [vmem:[#allocation52_spill] sm:$0xff]  ;;  %v11912_v2 = vpop.f32.mrf.mxu3  ;;  %v7052_v60 = vld [vmem:[%s7752_s22 + $0x30] sm:$0xff]  ;;  %v11921_v39 = vpop.f32.mrf.mxu2  ;;  %v6407_v56 = vadd.f32 %v11755_v63, %v6133_v6  ;;  %v12753_v6 = vld [vmem:[#allocation87_spill] sm:$0xff] }
 0x68c   : > { %6088 = vmatmul.f32.gmra.mxu2 %v11892_v21  ;;  %6362 = vmatmul.f32.gmra.mxu3 %v6209_v62  ;;  %v11926_v14 = vld [vmem:[#allocation2 + $0x14a] sm:$0xff]  ;;  %v11932_v54 = vpop.f32.mrf.mxu0 }
 0x68d   : > { %v7099_v58 = vadd.f32 %v7051_v46, %v7003_v22  ;;  %v6406_v7 = vadd.f32 %v11740_v19, %v6132_v30  ;;  %v6211_v19 = vld [vmem:[#allocation2 + $0x160] sm:$0xff]  ;;  %v12747_v46 = vld [vmem:[#allocation55_spill] sm:$0xff]  ;;  %v6486_v63 = vld [vmem:[#allocation2 + $0x169] sm:$0xff] }
 0x68e   : > { %v7053_v22 = vld [vmem:[%s7752_s22 + $0x38] sm:$0xff]  ;;  %v12750_v30 = vld [vmem:[#allocation8_spill] sm:$0xff] }
 0x68f   : > { %v7147_v37 = vmax.f32 %v7099_v58, 0.0  ;;  %v6680_v20 = vadd.f32 %v11735_v9, %v6406_v7  ;;  %v12748_v9 = vld [vmem:[#allocation85_spill] sm:$0xff]  ;;  %v12749_v58 = vld [vmem:[#allocation28_spill] sm:$0xff] }
 0x690   : > { %v6821_v44 = vpop.f32.mrf.mxu1 }
 0x691   : > { %7195 = vst [vmem:[%s11813_s24 + $0x28] sm:$0xff] %v7147_v37  ;;  %v6953_v23 = vadd.f32 %v6821_v44, %v6679_v61  ;;  %v5860_v37 = vadd.f32 %v12750_v30, %v12749_v58  ;;  %v12751_v61 = vld [vmem:[#allocation91_spill] sm:$0xff]  ;;  %v6213_v30 = vld [vmem:[#allocation2 + $0x170] sm:$0xff] }
 0x692   : > { %v11961_v58 = vld [vmem:[#allocation2 + $0x15a] sm:$0xff] }
 0x693   : > { %6639 = vmatmul.f32.gmra.mxu0 %v12743_v32  ;;  %v7004_v50 = vadd.f32 %v11792_v33, %v6953_v23  ;;  %6868 = vmatmul.f32.gmra.mxu1 %v12744_v4  ;;  %v11936_v16 = vpop.f32.mrf.mxu3  ;;  %v6134_v44 = vadd.f32 %v12751_v61, %v5860_v37  ;;  %v12752_v32 = vld [vmem:[#allocation90_spill] sm:$0xff]  ;;  %v6212_v4 = vld [vmem:[#allocation2 + $0x168] sm:$0xff] }
 0x694   : > { %6091 = vmatmul.f32.gmra.mxu2 %v11909_v1  ;;  %6365 = vmatmul.f32.gmra.mxu3 %v6210_v55  ;;  %v6681_v23 = vadd.f32 %v12752_v32, %v6407_v56  ;;  %v7055_v61 = vld [vmem:[%s7752_s22 + $0x48] sm:$0xff]  ;;  %v12758_v32 = vld [vmem:[#allocation39_spill] sm:$0xff] }
 0x695   : > { %v7100_v13 = vadd.f32 %v7052_v60, %v7004_v50  ;;  %v11942_v60 = vpop.f32.mrf.mxu2  ;;  %v11945_v50 = vld [vmem:[#allocation2 + $0x152] sm:$0xff]  ;;  %v6408_v51 = vadd.f32 %v11770_v8, %v6134_v44 }
 0x697   : > { %v7148_v12 = vmax.f32 %v7100_v13, 0.0 }
 0x698   : > { %v6824_v62 = vpop.f32.mrf.mxu1 }
 0x699   : > { %7196 = vst [vmem:[%s11813_s24 + $0x30] sm:$0xff] %v7148_v12  ;;  %v6954_v40 = vadd.f32 %v6824_v62, %v6680_v20  ;;  %v12754_v12 = vld [vmem:[#allocation29_spill] sm:$0xff] }
 0x69a   : > { %v12755_v20 = vld [vmem:[#allocation37_spill] sm:$0xff] }
 0x69b   : > { %6642 = vmatmul.f32.gmra.mxu0 %v12747_v46  ;;  %v7005_v15 = vadd.f32 %v11792_v33, %v6954_v40  ;;  %6871 = vmatmul.f32.gmra.mxu1 %v12748_v9  ;;  %v5861_v62 = vadd.f32 %v12755_v20, %v12754_v12  ;;  %v11956_v40 = vpop.f32.mrf.mxu3  ;;  %v6487_v9 = vld [vmem:[#allocation2 + $0x171] sm:$0xff] }
 0x69c   : > { %6094 = vmatmul.f32.gmra.mxu2 %v11926_v14  ;;  %6368 = vmatmul.f32.gmra.mxu3 %v6211_v19  ;;  %v11954_v19 = vpop.f32.mrf.mxu0  ;;  %v6214_v12 = vld [vmem:[#allocation2 + $0x178] sm:$0xff] }
 0x69d   : > { %v7101_v3 = vadd.f32 %v7053_v22, %v7005_v15  ;;  %v6135_v22 = vadd.f32 %v11778_v57, %v5861_v62  ;;  %v6682_v15 = vadd.f32 %v11768_v47, %v6408_v51  ;;  %v12756_v47 = vld [vmem:[#allocation89_spill] sm:$0xff] }
 0x69f   : > { %v7149_v55 = vmax.f32 %v7101_v3, 0.0  ;;  %v11963_v3 = vpop.f32.mrf.mxu2  ;;  %v6409_v57 = vadd.f32 %v11794_v41, %v6135_v22  ;;  %v12759_v22 = vld [vmem:[#allocation32_spill] sm:$0xff] }
 0x6a0   : > { %v6827_v7 = vpop.f32.mrf.mxu1 }
 0x6a1   : > { %7197 = vst [vmem:[%s11813_s24 + $0x38] sm:$0xff] %v7149_v55  ;;  %v6955_v17 = vadd.f32 %v6827_v7, %v6681_v23  ;;  %v12757_v55 = vld [vmem:[#allocation30_spill] sm:$0xff] }
 0x6a2   : > { %v5862_v23 = vadd.f32 %v12758_v32, %v12757_v55 }
 0x6a3   : > { %6645 = vmatmul.f32.gmra.mxu0 %v6486_v63  ;;  %v7006_v13 = vadd.f32 %v11792_v33, %v6955_v17  ;;  %6874 = vmatmul.f32.gmra.mxu1 %v12753_v6  ;;  %v11976_v51 = vpop.f32.mrf.mxu3  ;;  %v11979_v6 = vld [vmem:[#allocation2 + $0x162] sm:$0xff] }
 0x6a4   : > { %6097 = vmatmul.f32.gmra.mxu2 %v11945_v50  ;;  %6371 = vmatmul.f32.gmra.mxu3 %v6212_v4  ;;  %v6136_v7 = vadd.f32 %v11804_v36, %v5862_v23  ;;  %v11973_v4 = vpop.f32.mrf.mxu0  ;;  %v7056_v36 = vld [vmem:[%s7752_s22 + $0x50] sm:$0xff]  ;;  %v12761_v23 = vld [vmem:[#allocation35_spill] sm:$0xff] }
 0x6a5   : > { %v7102_v46 = vadd.f32 %v7054_v0, %v7006_v13  ;;  %v6683_v0 = vadd.f32 %v11786_v18, %v6409_v57  ;;  %v6488_v13 = vld [vmem:[#allocation2 + $0x179] sm:$0xff] }
 0x6a6   : > { %v6410_v62 = vadd.f32 %v11823_v28, %v6136_v7  ;;  %v11995_v28 = vld [vmem:[#allocation2 + $0x16a] sm:$0xff] }
 0x6a7   : > { %v7150_v56 = vmax.f32 %v7102_v46, 0.0  ;;  %v11986_v18 = vpop.f32.mrf.mxu2 }
 0x6a8   : > { %v6830_v8 = vpop.f32.mrf.mxu1 }
 0x6a9   : > { %7198 = vst [vmem:[%s11813_s24 + $0x40] sm:$0xff] %v7150_v56  ;;  %v6956_v37 = vadd.f32 %v6830_v8, %v6682_v15  ;;  %v12760_v56 = vld [vmem:[#allocation41_spill] sm:$0xff] }
 0x6aa   : > { %v5863_v15 = vadd.f32 %v12760_v56, %v12759_v22 }
 0x6ab   : > { %6648 = vmatmul.f32.gmra.mxu0 %v6487_v9  ;;  %v7007_v44 = vadd.f32 %v11792_v33, %v6956_v37  ;;  %6877 = vmatmul.f32.gmra.mxu1 %v12756_v47  ;;  %v6684_v37 = vadd.f32 %v11817_v59, %v6410_v62  ;;  %v11997_v55 = vpop.f32.mrf.mxu3  ;;  %v6216_v62 = vld [vmem:[#allocation2 + $0x188] sm:$0xff] }
 0x6ac   : > { %6100 = vmatmul.f32.gmra.mxu2 %v11961_v58  ;;  %6374 = vmatmul.f32.gmra.mxu3 %v6213_v30  ;;  %v6137_v8 = vadd.f32 %v11832_v34, %v5863_v15  ;;  %v7057_v34 = vld [vmem:[%s7752_s22 + $0x58] sm:$0xff]  ;;  %v12763_v15 = vld [vmem:[#allocation9_spill] sm:$0xff] }
 0x6ad   : > { %v7103_v63 = vadd.f32 %v7055_v61, %v7007_v44  ;;  %v6489_v61 = vld [vmem:[#allocation2 + $0x181] sm:$0xff]  ;;  %v11992_v44 = vpop.f32.mrf.mxu0 }
 0x6ae   : > { %v6411_v32 = vadd.f32 %v11847_v38, %v6137_v8  ;;  %v12011_v38 = vld [vmem:[#allocation2 + $0x172] sm:$0xff] }
 0x6af   : > { %v7151_v17 = vmax.f32 %v7103_v63, 0.0  ;;  %v12762_v63 = vld [vmem:[#allocation43_spill] sm:$0xff] }
 0x6b0   : > { %v6833_v41 = vpop.f32.mrf.mxu1  ;;  %v5864_v7 = vadd.f32 %v12762_v63, %v12761_v23  ;;  %v12766_v63 = vld [vmem:[#allocation33_spill] sm:$0xff] }
 0x6b1   : > { %7199 = vst [vmem:[%s11813_s24 + $0x48] sm:$0xff] %v7151_v17  ;;  %v6957_v20 = vadd.f32 %v6833_v41, %v6683_v0  ;;  %v12006_v0 = vpop.f32.mrf.mxu2 }
 0x6b3   : > { %6651 = vmatmul.f32.gmra.mxu0 %v6488_v13  ;;  %v7008_v46 = vadd.f32 %v11792_v33, %v6957_v20  ;;  %6880 = vmatmul.f32.gmra.mxu1 %v11761_v24  ;;  %v6215_v24 = vld [vmem:[#allocation2 + $0x180] sm:$0xff]  ;;  %v6138_v13 = vadd.f32 %v11853_v11, %v5864_v7  ;;  %v6490_v20 = vld [vmem:[#allocation2 + $0x189] sm:$0xff] }
 0x6b4   : > { %6103 = vmatmul.f32.gmra.mxu2 %v11979_v6  ;;  %6377 = vmatmul.f32.gmra.mxu3 %v6214_v12  ;;  %v6685_v12 = vadd.f32 %v11843_v53, %v6411_v32  ;;  %v12020_v53 = vpop.f32.mrf.mxu3 }
 0x6b5   : > { %v7104_v9 = vadd.f32 %v7056_v36, %v7008_v46  ;;  %v7058_v46 = vld [vmem:[%s7752_s22 + $0x60] sm:$0xff]  ;;  %v6412_v22 = vadd.f32 %v11868_v25, %v6138_v13  ;;  %v12016_v56 = vpop.f32.mrf.mxu0  ;;  %v6491_v25 = vld [vmem:[#allocation2 + $0x191] sm:$0xff] }
 0x6b7   : > { %v7152_v30 = vmax.f32 %v7104_v9, 0.0  ;;  %v12764_v9 = vld [vmem:[#allocation45_spill] sm:$0xff] }
 0x6b8   : > { %v6836_v57 = vpop.f32.mrf.mxu1  ;;  %v5865_v8 = vadd.f32 %v12764_v9, %v12763_v15  ;;  %v12768_v9 = vld [vmem:[#allocation10_spill] sm:$0xff] }
 0x6b9   : > { %7200 = vst [vmem:[%s11813_s24 + $0x50] sm:$0xff] %v7152_v30  ;;  %v6958_v47 = vadd.f32 %v6836_v57, %v6684_v37  ;;  %v6686_v57 = vadd.f32 %v11866_v49, %v6412_v22  ;;  %v12765_v49 = vld [vmem:[#allocation3_spill] sm:$0xff] }
 0x6ba   : > { %v6139_v37 = vadd.f32 %v11876_v52, %v5865_v8  ;;  %v5866_v7 = vadd.f32 %v12766_v63, %v12765_v49  ;;  %v12769_v49 = vld [vmem:[#allocation4_spill] sm:$0xff] }
 0x6bb   : > { %6654 = vmatmul.f32.gmra.mxu0 %v6489_v61  ;;  %v7009_v59 = vadd.f32 %v11792_v33, %v6958_v47  ;;  %6883 = vmatmul.f32.gmra.mxu1 %v11775_v48  ;;  %v12770_v63 = vld [vmem:[#allocation16_spill] sm:$0xff] }
 0x6bc   : > { %6106 = vmatmul.f32.gmra.mxu2 %v11995_v28  ;;  %6380 = vmatmul.f32.gmra.mxu3 %v6215_v24  ;;  %v12026_v24 = vpop.f32.mrf.mxu2  ;;  %v6413_v52 = vadd.f32 %v11889_v31, %v6139_v37  ;;  %v6493_v37 = vld [vmem:[#allocation2 + $0x1a1] sm:$0xff] }
 0x6bd   : > { %v7105_v17 = vadd.f32 %v7057_v34, %v7009_v59  ;;  %v12029_v34 = vld [vmem:[#allocation2 + $0x17a] sm:$0xff]  ;;  %v7059_v59 = vld [vmem:[%s7752_s22 + $0x68] sm:$0xff] }
 0x6bf   : > { %v7153_v41 = vmax.f32 %v7105_v17, 0.0  ;;  %v12038_v17 = vpop.f32.mrf.mxu0 }
 0x6c0   : > { %v6839_v36 = vpop.f32.mrf.mxu1 }
 0x6c1   : > { %7201 = vst [vmem:[%s11813_s24 + $0x58] sm:$0xff] %v7153_v41  ;;  %v6959_v48 = vadd.f32 %v6839_v36, %v6685_v12  ;;  %v12040_v41 = vpop.f32.mrf.mxu3  ;;  %v6492_v12 = vld [vmem:[#allocation2 + $0x199] sm:$0xff] }
 0x6c3   : > { %6657 = vmatmul.f32.gmra.mxu0 %v6490_v20  ;;  %v7010_v11 = vadd.f32 %v11792_v33, %v6959_v48  ;;  %6886 = vmatmul.f32.gmra.mxu1 %v11796_v35  ;;  %v6217_v35 = vld [vmem:[#allocation2 + $0x190] sm:$0xff]  ;;  %v6140_v20 = vadd.f32 %v11900_v10, %v5866_v7  ;;  %v12045_v48 = vld [vmem:[#allocation2 + $0x182] sm:$0xff]  ;;  %v5868_v7 = vadd.f32 %v12770_v63, %v12769_v49 }
 0x6c4   : > { %6109 = vmatmul.f32.gmra.mxu2 %v12011_v38  ;;  %6383 = vmatmul.f32.gmra.mxu3 %v6216_v62  ;;  %v6687_v62 = vadd.f32 %v11886_v27, %v6413_v52  ;;  %v12047_v22 = vpop.f32.mrf.mxu2  ;;  %v12767_v27 = vld [vmem:[#allocation11_spill] sm:$0xff] }
 0x6c5   : > { %v7106_v30 = vadd.f32 %v7058_v46, %v7010_v11  ;;  %v7060_v11 = vld [vmem:[%s7752_s22 + $0x70] sm:$0xff]  ;;  %v6414_v15 = vadd.f32 %v11912_v2, %v6140_v20  ;;  %v5867_v8 = vadd.f32 %v12768_v9, %v12767_v27  ;;  %v7061_v52 = vld [vmem:[%s7752_s22 + $0x78] sm:$0xff]  ;;  %v6142_v20 = vadd.f32 %v11942_v60, %v5868_v7 }
 0x6c7   : > { %v7154_v61 = vmax.f32 %v7106_v30, 0.0  ;;  %v6416_v60 = vadd.f32 %v11956_v40, %v6142_v20  ;;  %v7063_v40 = vld [vmem:[%s7752_s22 + $0x88] sm:$0xff] }
 0x6c8   : > { %v6842_v47 = vpop.f32.mrf.mxu1 }
 0x6c9   : > { %7202 = vst [vmem:[%s11813_s24 + $0x60] sm:$0xff] %v7154_v61  ;;  %v6960_v32 = vadd.f32 %v6842_v47, %v6686_v57  ;;  %v6141_v61 = vadd.f32 %v11921_v39, %v5867_v8  ;;  %v12057_v57 = vpop.f32.mrf.mxu0  ;;  %v6688_v47 = vadd.f32 %v11906_v42, %v6414_v15  ;;  %v12771_v15 = vld [vmem:[#allocation12_spill] sm:$0xff] }
 0x6cb   : > { %6660 = vmatmul.f32.gmra.mxu0 %v6491_v25  ;;  %v7011_v23 = vadd.f32 %v11792_v33, %v6960_v32  ;;  %6889 = vmatmul.f32.gmra.mxu1 %v11820_v29  ;;  %v6218_v29 = vld [vmem:[#allocation2 + $0x198] sm:$0xff]  ;;  %v12063_v32 = vld [vmem:[#allocation2 + $0x18a] sm:$0xff]  ;;  %v6415_v39 = vadd.f32 %v11936_v16, %v6141_v61  ;;  %v6690_v61 = vadd.f32 %v11954_v19, %v6416_v60 }
 0x6cc   : > { %6112 = vmatmul.f32.gmra.mxu2 %v12029_v34  ;;  %6386 = vmatmul.f32.gmra.mxu3 %v6217_v35  ;;  %v12060_v35 = vpop.f32.mrf.mxu3  ;;  %v12070_v42 = vpop.f32.mrf.mxu2  ;;  %v12079_v16 = vld [vmem:[#allocation2 + $0x192] sm:$0xff] }
 0x6cd   : > { %v7107_v13 = vadd.f32 %v7059_v59, %v7011_v23  ;;  %v7608_v59 = vld [vmem:[#allocation2] sm:$0xff] }
 0x6cf   : > { %v7155_v36 = vmax.f32 %v7107_v13, 0.0 }
 0x6d0   : > { %v6845_v31 = vpop.f32.mrf.mxu1 }
 0x6d1   : > { %7203 = vst [vmem:[%s11813_s24 + $0x68] sm:$0xff] %v7155_v36  ;;  %v6961_v46 = vadd.f32 %v6845_v31, %v6687_v62  ;;  %v6689_v62 = vadd.f32 %v11932_v54, %v6415_v39 }
 0x6d3   : > { %6663 = vmatmul.f32.gmra.mxu0 %v6492_v12  ;;  %v7012_v10 = vadd.f32 %v11792_v33, %v6961_v46  ;;  %6892 = vmatmul.f32.gmra.mxu1 %v11837_v43  ;;  %v6494_v12 = vld [vmem:[#allocation2 + $0x1a9] sm:$0xff] }
 0x6d4   : > { %6115 = vmatmul.f32.gmra.mxu2 %v12045_v48  ;;  %6389 = vmatmul.f32.gmra.mxu3 %v6218_v29  ;;  %v12076_v29 = vpop.f32.mrf.mxu0  ;;  %v12081_v46 = vpop.f32.mrf.mxu3 }
 0x6d5   : > { %v7108_v30 = vadd.f32 %v7060_v11, %v7012_v10  ;;  %v7062_v11 = vld [vmem:[%s7752_s22 + $0x80] sm:$0xff]  ;;  %v12772_v10 = vld [vmem:[#allocation18_spill] sm:$0xff]  ;;  %v12090_v8 = vpop.f32.mrf.mxu2 }
 0x6d6   : > { %v5869_v27 = vadd.f32 %v12772_v10, %v12771_v15 }
 0x6d7   : > { %v7156_v25 = vmax.f32 %v7108_v30, 0.0 }
 0x6d8   : > { %v6848_v2 = vpop.f32.mrf.mxu1  ;;  %v6143_v30 = vadd.f32 %v11963_v3, %v5869_v27 }
 0x6d9   : > { %7204 = vst [vmem:[%s11813_s24 + $0x70] sm:$0xff] %v7156_v25  ;;  %v6962_v43 = vadd.f32 %v6848_v2, %v6688_v47 }
 0x6da   : > { %v6417_v2 = vadd.f32 %v11976_v51, %v6143_v30  ;;  %v12778_v30 = vld [vmem:[#allocation25_spill] sm:$0xff] }
 0x6db   : > { %6666 = vmatmul.f32.gmra.mxu0 %v6493_v37  ;;  %v7013_v23 = vadd.f32 %v11792_v33, %v6962_v43  ;;  %6895 = vmatmul.f32.gmra.mxu1 %v11856_v5 }
 0x6dc   : > { %6118 = vmatmul.f32.gmra.mxu2 %v12063_v32  ;;  %6392 = vmatmul.f32.gmra.mxu3 %v7608_v59  ;;  %v12099_v43 = vpop.f32.mrf.mxu3  ;;  %v6691_v63 = vadd.f32 %v11973_v4, %v6417_v2 }
 0x6dd   : > { %v7109_v13 = vadd.f32 %v7061_v52, %v7013_v23  ;;  %v12774_v52 = vld [vmem:[#allocation21_spill] sm:$0xff]  ;;  %v12104_v23 = vpop.f32.mrf.mxu0  ;;  %v12107_v7 = vpop.f32.mrf.mxu2 }
 0x6df   : > { %v7157_v36 = vmax.f32 %v7109_v13, 0.0 }
 0x6e0   : > { %v6851_v31 = vpop.f32.mrf.mxu1 }
 0x6e1   : > { %7205 = vst [vmem:[%s11813_s24 + $0x78] sm:$0xff] %v7157_v36  ;;  %v6963_v5 = vadd.f32 %v6851_v31, %v6689_v62  ;;  %v12776_v36 = vld [vmem:[#allocation23_spill] sm:$0xff] }
 0x6e3   : > { %6669 = vmatmul.f32.gmra.mxu0 %v6494_v12  ;;  %v7014_v54 = vadd.f32 %v11792_v33, %v6963_v5  ;;  %6898 = vmatmul.f32.gmra.mxu1 %v11873_v26 }
 0x6e4   : > { %6121 = vmatmul.f32.gmra.mxu2 %v12079_v16  ;;  %6395 = vmatmul.f32.gmra.mxu3 %v7608_v59  ;;  %v12773_v59 = vld [vmem:[#allocation14_spill] sm:$0xff]  ;;  %v12116_v5 = vpop.f32.mrf.mxu3 }
 0x6e5   : > { %v7110_v9 = vadd.f32 %v7062_v11, %v7014_v54  ;;  %v5870_v3 = vadd.f32 %v12774_v52, %v12773_v59  ;;  %v12120_v15 = vpop.f32.mrf.mxu0  ;;  %v12123_v10 = vpop.f32.mrf.mxu2 }
 0x6e7   : > { %v7158_v37 = vmax.f32 %v7110_v9, 0.0  ;;  %v6144_v19 = vadd.f32 %v11986_v18, %v5870_v3  ;;  %v12775_v18 = vld [vmem:[#allocation15_spill] sm:$0xff] }
 0x6e8   : > { %v6854_v25 = vpop.f32.mrf.mxu1  ;;  %v5871_v62 = vadd.f32 %v12776_v36, %v12775_v18  ;;  %v12779_v3 = vld [vmem:[#allocation7_spill] sm:$0xff]  ;;  %v12781_v18 = vld [vmem:[#allocation36_spill] sm:$0xff]  ;;  %v12782_v36 = vld [vmem:[#allocation49_spill] sm:$0xff] }
 0x6e9   : > { %7206 = vst [vmem:[%s11813_s24 + $0x80] sm:$0xff] %v7158_v37  ;;  %v6964_v47 = vadd.f32 %v6854_v25, %v6690_v61  ;;  %v6418_v12 = vadd.f32 %v11997_v55, %v6144_v19 }
 0x6ea   : > { %v6145_v4 = vadd.f32 %v12006_v0, %v5871_v62  ;;  %v12777_v0 = vld [vmem:[#allocation6_spill] sm:$0xff] }
 0x6eb   : > { %v7015_v26 = vadd.f32 %v11792_v33, %v6964_v47  ;;  %6901 = vmatmul.f32.gmra.mxu1 %v11892_v21  ;;  %v7064_v21 = vld [vmem:[%s7752_s22 + $0x90] sm:$0xff]  ;;  %v6692_v60 = vadd.f32 %v11992_v44, %v6418_v12  ;;  %v5872_v37 = vadd.f32 %v12778_v30, %v12777_v0  ;;  %v7067_v12 = vld [vmem:[%s7752_s22 + $0xa8] sm:$0xff]  ;;  %v12784_v0 = vld [vmem:[#allocation51_spill] sm:$0xff] }
 0x6ec   : > { %v6419_v27 = vadd.f32 %v12020_v53, %v6145_v4  ;;  %v7066_v53 = vld [vmem:[%s7752_s22 + $0xa0] sm:$0xff] }
 0x6ed   : > { %v7111_v39 = vadd.f32 %v7063_v40, %v7015_v26  ;;  %v6146_v61 = vadd.f32 %v12026_v24, %v5872_v37  ;;  %v12133_v40 = vpop.f32.mrf.mxu3  ;;  %v12142_v24 = vpop.f32.mrf.mxu2 }
 0x6ee   : > { %v6693_v47 = vadd.f32 %v12016_v56, %v6419_v27  ;;  %v12780_v56 = vld [vmem:[#allocation47_spill] sm:$0xff] }
 0x6ef   : > { %v7159_v49 = vmax.f32 %v7111_v39, 0.0  ;;  %v6420_v59 = vadd.f32 %v12040_v41, %v6146_v61  ;;  %v5873_v39 = vadd.f32 %v12780_v56, %v12779_v3 }
 0x6f0   : > { %v6857_v51 = vpop.f32.mrf.mxu1 }
 0x6f1   : > { %7207 = vst [vmem:[%s11813_s24 + $0x88] sm:$0xff] %v7159_v49  ;;  %v6965_v13 = vadd.f32 %v6857_v51, %v6691_v63  ;;  %v6147_v49 = vadd.f32 %v12047_v22, %v5873_v39  ;;  %v6694_v51 = vadd.f32 %v12038_v17, %v6420_v59  ;;  %v5874_v22 = vadd.f32 %v12782_v36, %v12781_v18 }
 0x6f3   : > { %v7016_v20 = vadd.f32 %v11792_v33, %v6965_v13  ;;  %6904 = vmatmul.f32.gmra.mxu1 %v11909_v1  ;;  %v7065_v1 = vld [vmem:[%s7752_s22 + $0x98] sm:$0xff]  ;;  %v6148_v4 = vadd.f32 %v12070_v42, %v5874_v22 }
 0x6f5   : > { %v7112_v31 = vadd.f32 %v7064_v21, %v7016_v20  ;;  %v12149_v21 = vpop.f32.mrf.mxu3 }
 0x6f7   : > { %v7160_v11 = vmax.f32 %v7112_v31, 0.0  ;;  %v12159_v31 = vpop.f32.mrf.mxu2 }
 0x6f8   : > { %v6860_v54 = vpop.f32.mrf.mxu1 }
 0x6f9   : > { %7208 = vst [vmem:[%s11813_s24 + $0x90] sm:$0xff] %v7160_v11  ;;  %v6966_v55 = vadd.f32 %v6860_v54, %v6692_v60 }
 0x6fb   : > { %v7017_v9 = vadd.f32 %v11792_v33, %v6966_v55  ;;  %6907 = vmatmul.f32.gmra.mxu1 %v11926_v14  ;;  %v12138_v14 = vpop.f32.mrf.mxu0  ;;  %v7068_v55 = vld [vmem:[%s7752_s22 + $0xb0] sm:$0xff] }
 0x6fd   : > { %v7113_v44 = vadd.f32 %v7065_v1, %v7017_v9  ;;  %v12168_v27 = vpop.f32.mrf.mxu3  ;;  %v12783_v9 = vld [vmem:[#allocation38_spill] sm:$0xff] }
 0x6fe   : > { %v5875_v42 = vadd.f32 %v12784_v0, %v12783_v9 }
 0x6ff   : > { %v7161_v25 = vmax.f32 %v7113_v44, 0.0 }
 0x700   : > { %v6863_v2 = vpop.f32.mrf.mxu1 }
 0x701   : > { %7209 = vst [vmem:[%s11813_s24 + $0x98] sm:$0xff] %v7161_v25  ;;  %v6967_v26 = vadd.f32 %v6863_v2, %v6693_v47  ;;  %v12176_v25 = vpop.f32.mrf.mxu2 }
 0x703   : > { %v7018_v52 = vadd.f32 %v11792_v33, %v6967_v26  ;;  %6910 = vmatmul.f32.gmra.mxu1 %v11945_v50  ;;  %v6421_v50 = vadd.f32 %v12060_v35, %v6147_v49  ;;  %v12157_v62 = vpop.f32.mrf.mxu0 }
 0x705   : > { %v7114_v19 = vadd.f32 %v7066_v53, %v7018_v52  ;;  %v6695_v60 = vadd.f32 %v12057_v57, %v6421_v50  ;;  %v6149_v57 = vadd.f32 %v12090_v8, %v5875_v42  ;;  %v12785_v8 = vld [vmem:[#allocation40_spill] sm:$0xff]  ;;  %v12786_v53 = vld [vmem:[#allocation54_spill] sm:$0xff]  ;;  %v12185_v3 = vpop.f32.mrf.mxu3 }
 0x706   : > { %v5876_v59 = vadd.f32 %v12786_v53, %v12785_v8  ;;  %v7072_v42 = vld [vmem:[%s7752_s22 + $0xd0] sm:$0xff]  ;;  %v7073_v8 = vld [vmem:[%s7752_s22 + $0xd8] sm:$0xff] }
 0x707   : > { %v7162_v63 = vmax.f32 %v7114_v19, 0.0  ;;  %v6423_v2 = vadd.f32 %v12099_v43, %v6149_v57  ;;  %v12791_v57 = vld [vmem:[#allocation31_spill] sm:$0xff] }
 0x708   : > { %v6866_v13 = vpop.f32.mrf.mxu1 }
 0x709   : > { %7210 = vst [vmem:[%s11813_s24 + $0xa0] sm:$0xff] %v7162_v63  ;;  %v6968_v41 = vadd.f32 %v6866_v13, %v6694_v51  ;;  %v6697_v39 = vadd.f32 %v12104_v23, %v6423_v2  ;;  %v12192_v63 = vpop.f32.mrf.mxu2 }
 0x70b   : > { %v7019_v20 = vadd.f32 %v11792_v33, %v6968_v41  ;;  %6913 = vmatmul.f32.gmra.mxu1 %v11961_v58  ;;  %v6422_v58 = vadd.f32 %v12081_v46, %v6148_v4  ;;  %v12173_v37 = vpop.f32.mrf.mxu0  ;;  %v12788_v41 = vld [vmem:[#allocation57_spill] sm:$0xff] }
 0x70d   : > { %v7115_v17 = vadd.f32 %v7067_v12, %v7019_v20  ;;  %v6696_v61 = vadd.f32 %v12076_v29, %v6422_v58  ;;  %v6150_v29 = vadd.f32 %v12107_v7, %v5876_v59  ;;  %v12787_v7 = vld [vmem:[#allocation42_spill] sm:$0xff]  ;;  %v12202_v36 = vpop.f32.mrf.mxu3 }
 0x70e   : > { %v5877_v12 = vadd.f32 %v12788_v41, %v12787_v7  ;;  %v12795_v41 = vld [vmem:[#allocation13_spill] sm:$0xff] }
 0x70f   : > { %v7163_v11 = vmax.f32 %v7115_v17, 0.0  ;;  %v6424_v51 = vadd.f32 %v12116_v5, %v6150_v29  ;;  %v7071_v5 = vld [vmem:[%s7752_s22 + $0xc8] sm:$0xff]  ;;  %v12794_v29 = vld [vmem:[#allocation63_spill] sm:$0xff] }
 0x710   : > { %v6869_v54 = vpop.f32.mrf.mxu1  ;;  %v6151_v50 = vadd.f32 %v12123_v10, %v5877_v12 }
 0x711   : > { %7211 = vst [vmem:[%s11813_s24 + $0xa8] sm:$0xff] %v7163_v11  ;;  %v6969_v35 = vadd.f32 %v6869_v54, %v6695_v60  ;;  %v6698_v18 = vadd.f32 %v12120_v15, %v6424_v51  ;;  %v6074_v10 = vpop.f32.mrf.mxu2  ;;  %v12789_v60 = vld [vmem:[#allocation44_spill] sm:$0xff]  ;;  %v12790_v54 = vld [vmem:[#allocation59_spill] sm:$0xff] }
 0x712   : > { %v6425_v4 = vadd.f32 %v12133_v40, %v6151_v50  ;;  %v5878_v15 = vadd.f32 %v12790_v54, %v12789_v60  ;;  %v12798_v60 = vld [vmem:[#allocation67_spill] sm:$0xff] }
 0x713   : > { %v7020_v1 = vadd.f32 %v11792_v33, %v6969_v35  ;;  %6916 = vmatmul.f32.gmra.mxu1 %v11979_v6  ;;  %v7069_v6 = vld [vmem:[%s7752_s22 + $0xb8] sm:$0xff]  ;;  %v12189_v49 = vpop.f32.mrf.mxu0 }
 0x715   : > { %v7116_v30 = vadd.f32 %v7068_v55, %v7020_v1  ;;  %v6152_v55 = vadd.f32 %v12142_v24, %v5878_v15  ;;  %v6699_v1 = vadd.f32 %v12138_v14, %v6425_v4  ;;  %v6348_v0 = vpop.f32.mrf.mxu3 }
 0x717   : > { %v7164_v44 = vmax.f32 %v7116_v30, 0.0  ;;  %v6426_v30 = vadd.f32 %v12149_v21, %v6152_v55 }
 0x718   : > { %v6872_v46 = vpop.f32.mrf.mxu1 }
 0x719   : > { %7212 = vst [vmem:[%s11813_s24 + $0xb0] sm:$0xff] %v7164_v44  ;;  %v6970_v47 = vadd.f32 %v6872_v46, %v6696_v61  ;;  %v12792_v44 = vld [vmem:[#allocation61_spill] sm:$0xff]  ;;  %v6077_v14 = vpop.f32.mrf.mxu2  ;;  %v6700_v2 = vadd.f32 %v12157_v62, %v6426_v30 }
 0x71a   : > { %v5879_v61 = vadd.f32 %v12792_v44, %v12791_v57 }
 0x71b   : > { %v7021_v26 = vadd.f32 %v11792_v33, %v6970_v47  ;;  %6919 = vmatmul.f32.gmra.mxu1 %v11995_v28  ;;  %v7070_v28 = vld [vmem:[%s7752_s22 + $0xc0] sm:$0xff] }
 0x71c   : > { %v6153_v47 = vadd.f32 %v12159_v31, %v5879_v61  ;;  %v12799_v61 = vld [vmem:[#allocation20_spill] sm:$0xff] }
 0x71d   : > { %v7117_v52 = vadd.f32 %v7069_v6, %v7021_v26  ;;  %v6351_v59 = vpop.f32.mrf.mxu3 }
 0x71f   : > { %v7165_v56 = vmax.f32 %v7117_v52, 0.0  ;;  %v12793_v52 = vld [vmem:[#allocation34_spill] sm:$0xff] }
 0x720   : > { %v6875_v19 = vpop.f32.mrf.mxu1 }
 0x721   : > { %7213 = vst [vmem:[%s11813_s24 + $0xb8] sm:$0xff] %v7165_v56  ;;  %v6971_v43 = vadd.f32 %v6875_v19, %v6697_v39  ;;  %v5880_v56 = vadd.f32 %v12794_v29, %v12793_v52  ;;  %v12801_v29 = vld [vmem:[#allocation22_spill] sm:$0xff] }
 0x723   : > { %v7022_v13 = vadd.f32 %v11792_v33, %v6971_v43  ;;  %6922 = vmatmul.f32.gmra.mxu1 %v12011_v38  ;;  %v12207_v38 = vpop.f32.mrf.mxu0  ;;  %v6154_v39 = vadd.f32 %v12176_v25, %v5880_v56  ;;  %v12796_v25 = vld [vmem:[#allocation65_spill] sm:$0xff]  ;;  %v12802_v56 = vld [vmem:[#allocation71_spill] sm:$0xff] }
 0x724   : > { %v5881_v12 = vadd.f32 %v12796_v25, %v12795_v41  ;;  %v12803_v25 = vld [vmem:[#allocation24_spill] sm:$0xff] }
 0x725   : > { %v7118_v23 = vadd.f32 %v7070_v28, %v7022_v13  ;;  %v6080_v28 = vpop.f32.mrf.mxu2  ;;  %v7074_v13 = vld [vmem:[%s7752_s22 + $0xe0] sm:$0xff]  ;;  %v6354_v50 = vpop.f32.mrf.mxu3 }
 0x727   : > { %v7166_v20 = vmax.f32 %v7118_v23, 0.0 }
 0x728   : > { %v6878_v22 = vpop.f32.mrf.mxu1 }
 0x729   : > { %7214 = vst [vmem:[%s11813_s24 + $0xc0] sm:$0xff] %v7166_v20  ;;  %v6972_v17 = vadd.f32 %v6878_v22, %v6698_v18 }
 0x72b   : > { %v7023_v11 = vadd.f32 %v11792_v33, %v6972_v17  ;;  %6925 = vmatmul.f32.gmra.mxu1 %v12029_v34  ;;  %v12222_v24 = vpop.f32.mrf.mxu0  ;;  %v6766_v17 = vld [vmem:[#allocation2 + $0x19a] sm:$0xff] }
 0x72d   : > { %v7119_v35 = vadd.f32 %v7071_v5, %v7023_v11  ;;  %v6083_v4 = vpop.f32.mrf.mxu2  ;;  %v12252_v11 = vld [vmem:[%s12354_s4] ss:$0 sm:$0xff] }
 0x72f   : > { %v7167_v58 = vmax.f32 %v7119_v35, 0.0 }
 0x730   : > { %v6881_v9 = vpop.f32.mrf.mxu1 }
 0x731   : > { %7215 = vst [vmem:[%s11813_s24 + $0xc8] sm:$0xff] %v7167_v58  ;;  %v6973_v40 = vadd.f32 %v6881_v9, %v6699_v1  ;;  %v6357_v1 = vpop.f32.mrf.mxu3 }
 0x733   : > { %v7024_v34 = vadd.f32 %v11792_v33, %v6973_v40  ;;  %6928 = vmatmul.f32.gmra.mxu1 %v12045_v48  ;;  %v6427_v48 = vadd.f32 %v12168_v27, %v6153_v47  ;;  %v12234_v62 = vpop.f32.mrf.mxu0  ;;  %v6767_v40 = vld [vmem:[#allocation2 + $0x1a2] sm:$0xff] }
 0x735   : > { %v7120_v46 = vadd.f32 %v7072_v42, %v7024_v34  ;;  %v6701_v43 = vadd.f32 %v12173_v37, %v6427_v48  ;;  %v6155_v37 = vadd.f32 %v12192_v63, %v5881_v12  ;;  %v7076_v42 = vld [vmem:[%s7752_s22 + $0xf0] sm:$0xff]  ;;  %v6086_v44 = vpop.f32.mrf.mxu2  ;;  %v7077_v48 = vld [vmem:[%s7752_s22 + $0xf8] sm:$0xff]  ;;  %v12804_v12 = vld [vmem:[#allocation73_spill] sm:$0xff] }
 0x737   : > { %v7168_v6 = vmax.f32 %v7120_v46, 0.0  ;;  %v12800_v46 = vld [vmem:[#allocation69_spill] sm:$0xff] }
 0x738   : > { %v6884_v26 = vpop.f32.mrf.mxu1 }
 0x739   : > { %7216 = vst [vmem:[%s11813_s24 + $0xd0] sm:$0xff] %v7168_v6  ;;  %v6974_v21 = vadd.f32 %v6884_v26, %v6700_v2 }
 0x73b   : > { %v7025_v53 = vadd.f32 %v11792_v33, %v6974_v21  ;;  %6931 = vmatmul.f32.gmra.mxu1 %v12063_v32  ;;  %v6428_v32 = vadd.f32 %v12185_v3, %v6154_v39  ;;  %v6628_v5 = vpop.f32.mrf.mxu0  ;;  %v6768_v21 = vld [vmem:[#allocation2 + $0x1aa] sm:$0xff] }
 0x73d   : > { %v7121_v31 = vadd.f32 %v7073_v8, %v7025_v53  ;;  %v6702_v18 = vadd.f32 %v12189_v49, %v6428_v32  ;;  %v12797_v49 = vld [vmem:[#allocation17_spill] sm:$0xff]  ;;  %v7078_v32 = vld [vmem:[%s7752_s22 + $0x100] sm:$0xff] }
 0x73e   : > { %v5882_v54 = vadd.f32 %v12798_v60, %v12797_v49  ;;  %v12806_v49 = vld [vmem:[#allocation74_spill] sm:$0xff] }
 0x73f   : > { %v7169_v19 = vmax.f32 %v7121_v31, 0.0  ;;  %v5884_v31 = vadd.f32 %v12802_v56, %v12801_v29 }
 0x740   : > { %v6887_v51 = vpop.f32.mrf.mxu1  ;;  %v6156_v35 = vadd.f32 %v6074_v10, %v5882_v54  ;;  %v5883_v10 = vadd.f32 %v12800_v46, %v12799_v61 }
 0x741   : > { %7217 = vst [vmem:[%s11813_s24 + $0xd8] sm:$0xff] %v7169_v19  ;;  %v6975_v27 = vadd.f32 %v6887_v51, %v6701_v43  ;;  %v6089_v19 = vpop.f32.mrf.mxu2  ;;  %v6158_v43 = vadd.f32 %v6080_v28, %v5884_v31 }
 0x742   : > { %v6430_v30 = vadd.f32 %v6348_v0, %v6156_v35  ;;  %v6157_v6 = vadd.f32 %v6077_v14, %v5883_v10  ;;  %v6360_v0 = vpop.f32.mrf.mxu3 }
 0x743   : > { %v7026_v7 = vadd.f32 %v11792_v33, %v6975_v27  ;;  %6934 = vmatmul.f32.gmra.mxu1 %v12079_v16  ;;  %v7075_v33 = vld [vmem:[%s7752_s22 + $0xe8] sm:$0xff]  ;;  %v6429_v16 = vadd.f32 %v12202_v36, %v6155_v37  ;;  %v6631_v34 = vpop.f32.mrf.mxu0 }
 0x744   : > { %v6704_v2 = vadd.f32 %v12222_v24, %v6430_v30  ;;  %v6431_v53 = vadd.f32 %v6351_v59, %v6157_v6  ;;  %v6432_v59 = vadd.f32 %v6354_v50, %v6158_v43  ;;  %v12807_v30 = vld [vmem:[#allocation48_spill] sm:$0xff] }
 0x745   : > { %v7122_v23 = vadd.f32 %v7074_v13, %v7026_v7  ;;  %v6703_v58 = vadd.f32 %v12207_v38, %v6429_v16 }
 0x746   : > { %v6705_v51 = vadd.f32 %v12234_v62, %v6431_v53  ;;  %v12810_v53 = vld [vmem:[#allocation76_spill] sm:$0xff] }
 0x747   : > { %v7170_v20 = vmax.f32 %v7122_v23, 0.0  ;;  %v5885_v23 = vadd.f32 %v12804_v12, %v12803_v25 }
 0x748   : > { %v6890_v22 = vpop.f32.mrf.mxu1 }
 0x749   : > { %7218 = vst [vmem:[%s11813_s24 + $0xe0] sm:$0xff] %v7170_v20  ;;  %v6976_v3 = vadd.f32 %v6890_v22, %v6702_v18  ;;  %v6159_v20 = vadd.f32 %v6083_v4, %v5885_v23  ;;  %v6706_v22 = vadd.f32 %v6628_v5, %v6432_v59  ;;  %v6092_v62 = vpop.f32.mrf.mxu2 }
 0x74a   : > { %v6363_v41 = vpop.f32.mrf.mxu3 }
 0x74b   : > { %v7027_v63 = vadd.f32 %v12252_v11, %v6976_v3  ;;  %6937 = vmatmul.f32.gmra.mxu1 %v6766_v17  ;;  %v6634_v39 = vpop.f32.mrf.mxu0  ;;  %v6433_v16 = vadd.f32 %v6357_v1, %v6159_v20 }
 0x74d   : > { %v7123_v15 = vadd.f32 %v7075_v33, %v7027_v63  ;;  %v7079_v33 = vld [vmem:[%s7752_s22 + $0x108] sm:$0xff]  ;;  %v12805_v63 = vld [vmem:[#allocation46_spill] sm:$0xff] }
 0x74e   : > { %v5886_v60 = vadd.f32 %v12806_v49, %v12805_v63 }
 0x74f   : > { %v7171_v55 = vmax.f32 %v7123_v15, 0.0 }
 0x750   : > { %v6893_v9 = vpop.f32.mrf.mxu1  ;;  %v6160_v35 = vadd.f32 %v6086_v44, %v5886_v60 }
 0x751   : > { %7219 = vst [vmem:[%s11813_s24 + $0xe8] sm:$0xff] %v7171_v55  ;;  %v6977_v36 = vadd.f32 %v6893_v9, %v6703_v58  ;;  %v6707_v55 = vadd.f32 %v6631_v34, %v6433_v16 }
 0x752   : > { %v6366_v15 = vpop.f32.mrf.mxu3 }
 0x753   : > { %v7028_v57 = vadd.f32 %v12252_v11, %v6977_v36  ;;  %6940 = vmatmul.f32.gmra.mxu1 %v6767_v40  ;;  %v6637_v18 = vpop.f32.mrf.mxu0  ;;  %v6095_v40 = vpop.f32.mrf.mxu2  ;;  %v7080_v36 = vld [vmem:[%s7752_s22 + $0x110] sm:$0xff] }
 0x755   : > { %v7124_v47 = vadd.f32 %v7076_v42, %v7028_v57  ;;  %v6434_v42 = vadd.f32 %v6360_v0, %v6160_v35  ;;  %v12808_v57 = vld [vmem:[#allocation75_spill] sm:$0xff] }
 0x756   : > { %v5887_v61 = vadd.f32 %v12808_v57, %v12807_v30 }
 0x757   : > { %v7172_v38 = vmax.f32 %v7124_v47, 0.0  ;;  %v6708_v44 = vadd.f32 %v6634_v39, %v6434_v42 }
 0x758   : > { %v6896_v26 = vpop.f32.mrf.mxu1  ;;  %v6161_v10 = vadd.f32 %v6089_v19, %v5887_v61 }
 0x759   : > { %7220 = vst [vmem:[%s11813_s24 + $0xf0] sm:$0xff] %v7172_v38  ;;  %v6978_v8 = vadd.f32 %v6896_v26, %v6704_v2  ;;  %v7081_v2 = vld [vmem:[%s7752_s22 + $0x118] sm:$0xff] }
 0x75a   : > { %v6369_v34 = vpop.f32.mrf.mxu3  ;;  %v6435_v26 = vadd.f32 %v6363_v41, %v6161_v10 }
 0x75b   : > { %v7029_v52 = vadd.f32 %v12252_v11, %v6978_v8  ;;  %6943 = vmatmul.f32.gmra.mxu1 %v6768_v21  ;;  %v6640_v58 = vpop.f32.mrf.mxu0  ;;  %v6098_v0 = vpop.f32.mrf.mxu2 }
 0x75d   : > { %v7125_v14 = vadd.f32 %v7077_v48, %v7029_v52  ;;  %v12809_v48 = vld [vmem:[#allocation50_spill] sm:$0xff] }
 0x75e   : > { %v5888_v52 = vadd.f32 %v12810_v53, %v12809_v48 }
 0x75f   : > { %v7173_v24 = vmax.f32 %v7125_v14, 0.0  ;;  %v6709_v14 = vadd.f32 %v6637_v18, %v6435_v26  ;;  %v12818_v26 = vld [vmem:[#allocation80_spill] sm:$0xff] }
 0x760   : > { %v6899_v27 = vpop.f32.mrf.mxu1  ;;  %v6162_v56 = vadd.f32 %v6092_v62, %v5888_v52 }
 0x761   : > { %7221 = vst [vmem:[%s11813_s24 + $0xf8] sm:$0xff] %v7173_v24  ;;  %v6979_v13 = vadd.f32 %v6899_v27, %v6705_v51  ;;  %v7082_v24 = vld [vmem:[%s7752_s22 + $0x120] sm:$0xff] }
 0x762   : > { %v6372_v43 = vpop.f32.mrf.mxu3  ;;  %v6436_v51 = vadd.f32 %v6366_v15, %v6162_v56 }
 0x763   : > { %v7030_v7 = vadd.f32 %v12252_v11, %v6979_v13  ;;  %v6643_v21 = vpop.f32.mrf.mxu0  ;;  %v12811_v13 = vld [vmem:[#allocation53_spill] sm:$0xff]  ;;  %v6101_v25 = vpop.f32.mrf.mxu2 }
 0x765   : > { %v7126_v37 = vadd.f32 %v7078_v32, %v7030_v7  ;;  %v12812_v32 = vld [vmem:[#allocation77_spill] sm:$0xff] }
 0x766   : > { %v5889_v59 = vadd.f32 %v12812_v32, %v12811_v13 }
 0x767   : > { %v7174_v28 = vmax.f32 %v7126_v37, 0.0  ;;  %v6710_v37 = vadd.f32 %v6640_v58, %v6436_v51  ;;  %v12820_v51 = vld [vmem:[#allocation81_spill] sm:$0xff] }
 0x768   : > { %v6902_v17 = vpop.f32.mrf.mxu1  ;;  %v6163_v12 = vadd.f32 %v6095_v40, %v5889_v59  ;;  %v12816_v40 = vld [vmem:[#allocation79_spill] sm:$0xff] }
 0x769   : > { %7222 = vst [vmem:[%s11813_s24 + $0x100] sm:$0xff] %v7174_v28  ;;  %v6980_v3 = vadd.f32 %v6902_v17, %v6706_v22  ;;  %v7083_v28 = vld [vmem:[%s7752_s22 + $0x128] sm:$0xff] }
 0x76a   : > { %v6437_v22 = vadd.f32 %v6369_v34, %v6163_v12  ;;  %v6375_v17 = vpop.f32.mrf.mxu3  ;;  %v7085_v34 = vld [vmem:[%s7752_s22 + $0x138] sm:$0xff] }
 0x76b   : > { %v7031_v50 = vadd.f32 %v12252_v11, %v6980_v3  ;;  %v6646_v7 = vpop.f32.mrf.mxu0  ;;  %v12813_v3 = vld [vmem:[#allocation56_spill] sm:$0xff]  ;;  %v6104_v15 = vpop.f32.mrf.mxu2 }
 0x76d   : > { %v7127_v54 = vadd.f32 %v7079_v33, %v7031_v50  ;;  %v12814_v33 = vld [vmem:[#allocation78_spill] sm:$0xff] }
 0x76e   : > { %v5890_v16 = vadd.f32 %v12814_v33, %v12813_v3 }
 0x76f   : > { %v7175_v4 = vmax.f32 %v7127_v54, 0.0  ;;  %v6711_v54 = vadd.f32 %v6643_v21, %v6437_v22 }
 0x770   : > { %v6905_v5 = vpop.f32.mrf.mxu1  ;;  %v6164_v63 = vadd.f32 %v6098_v0, %v5890_v16 }
 0x771   : > { %7223 = vst [vmem:[%s11813_s24 + $0x108] sm:$0xff] %v7175_v4  ;;  %v6981_v9 = vadd.f32 %v6905_v5, %v6707_v55  ;;  %v7084_v55 = vld [vmem:[%s7752_s22 + $0x130] sm:$0xff] }
 0x772   : > { %v6438_v5 = vadd.f32 %v6372_v43, %v6164_v63 }
 0x773   : > { %v7032_v1 = vadd.f32 %v12252_v11, %v6981_v9  ;;  %v6649_v49 = vpop.f32.mrf.mxu0  ;;  %v12815_v9 = vld [vmem:[#allocation58_spill] sm:$0xff] }
 0x774   : > { %v6712_v61 = vadd.f32 %v6646_v7, %v6438_v5 }
 0x775   : > { %v7128_v46 = vadd.f32 %v7080_v36, %v7032_v1  ;;  %v5891_v36 = vadd.f32 %v12816_v40, %v12815_v9  ;;  %v6378_v1 = vpop.f32.mrf.mxu3 }
 0x777   : > { %v7176_v47 = vmax.f32 %v7128_v46, 0.0  ;;  %v6165_v30 = vadd.f32 %v6101_v25, %v5891_v36 }
 0x778   : > { %v6908_v6 = vpop.f32.mrf.mxu1 }
 0x779   : > { %7224 = vst [vmem:[%s11813_s24 + $0x110] sm:$0xff] %v7176_v47  ;;  %v6982_v38 = vadd.f32 %v6908_v6, %v6708_v44  ;;  %v6107_v44 = vpop.f32.mrf.mxu2  ;;  %v6439_v6 = vadd.f32 %v6375_v17, %v6165_v30 }
 0x77b   : > { %v7033_v8 = vadd.f32 %v12252_v11, %v6982_v38  ;;  %v6652_v10 = vpop.f32.mrf.mxu0  ;;  %v6713_v53 = vadd.f32 %v6649_v49, %v6439_v6 }
 0x77d   : > { %v7129_v29 = vadd.f32 %v7081_v2, %v7033_v8  ;;  %v12817_v2 = vld [vmem:[#allocation60_spill] sm:$0xff]  ;;  %v6381_v52 = vpop.f32.mrf.mxu3 }
 0x77e   : > { %v5892_v21 = vadd.f32 %v12818_v26, %v12817_v2 }
 0x77f   : > { %v7177_v31 = vmax.f32 %v7129_v29, 0.0 }
 0x780   : > { %v6911_v39 = vpop.f32.mrf.mxu1  ;;  %v6166_v0 = vadd.f32 %v6104_v15, %v5892_v21 }
 0x781   : > { %7225 = vst [vmem:[%s11813_s24 + $0x118] sm:$0xff] %v7177_v31  ;;  %v6983_v19 = vadd.f32 %v6911_v39, %v6709_v14  ;;  %v7086_v31 = vld [vmem:[%s7752_s22 + $0x140] sm:$0xff]  ;;  %v6110_v43 = vpop.f32.mrf.mxu2 }
 0x782   : > { %v6440_v14 = vadd.f32 %v6378_v1, %v6166_v0 }
 0x783   : > { %v7034_v27 = vadd.f32 %v12252_v11, %v6983_v19  ;;  %v6655_v39 = vpop.f32.mrf.mxu0 }
 0x784   : > { %v6714_v7 = vadd.f32 %v6652_v10, %v6440_v14  ;;  %v12828_v14 = vld [vmem:[#allocation92_spill] sm:$0xff] }
 0x785   : > { %v7130_v41 = vadd.f32 %v7082_v24, %v7034_v27  ;;  %v12819_v24 = vld [vmem:[#allocation62_spill] sm:$0xff]  ;;  %v6384_v12 = vpop.f32.mrf.mxu3 }
 0x786   : > { %v5893_v27 = vadd.f32 %v12820_v51, %v12819_v24 }
 0x787   : > { %v7178_v23 = vmax.f32 %v7130_v41, 0.0 }
 0x788   : > { %v6914_v20 = vpop.f32.mrf.mxu1  ;;  %v6167_v32 = vadd.f32 %v6107_v44, %v5893_v27  ;;  %v12826_v44 = vld [vmem:[#allocation88_spill] sm:$0xff] }
 0x789   : > { %7226 = vst [vmem:[%s11813_s24 + $0x120] sm:$0xff] %v7178_v23  ;;  %v6984_v18 = vadd.f32 %v6914_v20, %v6710_v37  ;;  %v7087_v23 = vld [vmem:[%s7752_s22 + $0x148] sm:$0xff]  ;;  %v6113_v3 = vpop.f32.mrf.mxu2 }
 0x78a   : > { %v6441_v37 = vadd.f32 %v6381_v52, %v6167_v32  ;;  %v7090_v52 = vld [vmem:[%s7752_s22 + $0x160] sm:$0xff] }
 0x78b   : > { %v7035_v62 = vadd.f32 %v12252_v11, %v6984_v18  ;;  %v12821_v18 = vld [vmem:[#allocation64_spill] sm:$0xff] }
 0x78d   : > { %v7131_v50 = vadd.f32 %v7083_v28, %v7035_v62  ;;  %v12822_v28 = vld [vmem:[#allocation84_spill] sm:$0xff]  ;;  %v6658_v62 = vpop.f32.mrf.mxu0 }
 0x78e   : > { %v5894_v22 = vadd.f32 %v12822_v28, %v12821_v18 }
 0x78f   : > { %v7179_v60 = vmax.f32 %v7131_v50, 0.0  ;;  %v6715_v50 = vadd.f32 %v6655_v39, %v6441_v37 }
 0x790   : > { %v6917_v35 = vpop.f32.mrf.mxu1  ;;  %v6168_v33 = vadd.f32 %v6110_v43, %v5894_v22 }
 0x791   : > { %7227 = vst [vmem:[%s11813_s24 + $0x128] sm:$0xff] %v7179_v60  ;;  %v6985_v4 = vadd.f32 %v6917_v35, %v6711_v54  ;;  %v7088_v60 = vld [vmem:[%s7752_s22 + $0x150] sm:$0xff]  ;;  %v6387_v35 = vpop.f32.mrf.mxu3  ;;  %v6116_v1 = vpop.f32.mrf.mxu2 }
 0x792   : > { %v6442_v54 = vadd.f32 %v6384_v12, %v6168_v33  ;;  %v7092_v33 = vld [vmem:[%s7752_s22 + $0x170] sm:$0xff] }
 0x793   : > { %v7036_v58 = vadd.f32 %v12252_v11, %v6985_v4  ;;  %v12823_v4 = vld [vmem:[#allocation66_spill] sm:$0xff] }
 0x795   : > { %v7132_v42 = vadd.f32 %v7084_v55, %v7036_v58  ;;  %v12824_v55 = vld [vmem:[#allocation86_spill] sm:$0xff]  ;;  %v6661_v9 = vpop.f32.mrf.mxu0 }
 0x796   : > { %v5895_v5 = vadd.f32 %v12824_v55, %v12823_v4 }
 0x797   : > { %v7180_v57 = vmax.f32 %v7132_v42, 0.0  ;;  %v6716_v42 = vadd.f32 %v6658_v62, %v6442_v54 }
 0x798   : > { %v6920_v46 = vpop.f32.mrf.mxu1  ;;  %v6169_v40 = vadd.f32 %v6113_v3, %v5895_v5 }
 0x799   : > { %7228 = vst [vmem:[%s11813_s24 + $0x130] sm:$0xff] %v7180_v57  ;;  %v6986_v47 = vadd.f32 %v6920_v46, %v6712_v61  ;;  %v7089_v61 = vld [vmem:[%s7752_s22 + $0x158] sm:$0xff] }
 0x79a   : > { %v6443_v46 = vadd.f32 %v6387_v35, %v6169_v40  ;;  %v7093_v35 = vld [vmem:[%s7752_s22 + $0x178] sm:$0xff] }
 0x79b   : > { %v7037_v38 = vadd.f32 %v12252_v11, %v6986_v47  ;;  %v12825_v47 = vld [vmem:[#allocation68_spill] sm:$0xff] }
 0x79c   : > { %v6717_v21 = vadd.f32 %v6661_v9, %v6443_v46 }
 0x79d   : > { %v7133_v8 = vadd.f32 %v7085_v34, %v7037_v38  ;;  %v5896_v34 = vadd.f32 %v12826_v44, %v12825_v47  ;;  %v6390_v38 = vpop.f32.mrf.mxu3 }
 0x79f   : > { %v7181_v48 = vmax.f32 %v7133_v8, 0.0  ;;  %v6170_v2 = vadd.f32 %v6116_v1, %v5896_v34  ;;  %v6664_v8 = vpop.f32.mrf.mxu0 }
 0x7a0   : > { %v6923_v29 = vpop.f32.mrf.mxu1 }
 0x7a1   : > { %7229 = vst [vmem:[%s11813_s24 + $0x138] sm:$0xff] %v7181_v48  ;;  %v6987_v56 = vadd.f32 %v6923_v29, %v6713_v53  ;;  %v6119_v53 = vpop.f32.mrf.mxu2  ;;  %v6444_v29 = vadd.f32 %v6390_v38, %v6170_v2 }
 0x7a3   : > { %v7038_v19 = vadd.f32 %v12252_v11, %v6987_v56  ;;  %v6718_v24 = vadd.f32 %v6664_v8, %v6444_v29 }
 0x7a5   : > { %v7134_v13 = vadd.f32 %v7086_v31, %v7038_v19  ;;  %v12827_v31 = vld [vmem:[#allocation70_spill] sm:$0xff]  ;;  %v6393_v43 = vpop.f32.mrf.mxu3 }
 0x7a6   : > { %v5897_v39 = vadd.f32 %v12828_v14, %v12827_v31 }
 0x7a7   : > { %v7182_v59 = vmax.f32 %v7134_v13, 0.0 }
 0x7a8   : > { %v6926_v41 = vpop.f32.mrf.mxu1  ;;  %v6171_v51 = vadd.f32 %v6119_v53, %v5897_v39 }
 0x7a9   : > { %7230 = vst [vmem:[%s11813_s24 + $0x140] sm:$0xff] %v7182_v59  ;;  %v6988_v25 = vadd.f32 %v6926_v41, %v6714_v7  ;;  %v6667_v59 = vpop.f32.mrf.mxu0  ;;  %v7091_v7 = vld [vmem:[%s7752_s22 + $0x168] sm:$0xff]  ;;  %v6122_v12 = vpop.f32.mrf.mxu2 }
 0x7aa   : > { %v6445_v41 = vadd.f32 %v6393_v43, %v6171_v51 }
 0x7ab   : > { %v7039_v20 = vadd.f32 %v12252_v11, %v6988_v25 }
 0x7ac   : > { %v6719_v18 = vadd.f32 %v6667_v59, %v6445_v41 }
 0x7ad   : > { %v7135_v17 = vadd.f32 %v7087_v23, %v7039_v20  ;;  %v12829_v23 = vld [vmem:[#allocation72_spill] sm:$0xff]  ;;  %v6396_v62 = vpop.f32.mrf.mxu3 }
 0x7ae   : > { %v5898_v37 = vadd.f32 %v11773_v45, %v12829_v23 }
 0x7af   : > { %v7183_v16 = vmax.f32 %v7135_v17, 0.0 }
 0x7b0   : > { %v6929_v63 = vpop.f32.mrf.mxu1  ;;  %v6172_v28 = vadd.f32 %v6122_v12, %v5898_v37 }
 0x7b1   : > { %7231 = vst [vmem:[%s11813_s24 + $0x148] sm:$0xff] %v7183_v16  ;;  %v6989_v49 = vadd.f32 %v6929_v63, %v6715_v50  ;;  %v6670_v63 = vpop.f32.mrf.mxu0 }
 0x7b2   : > { %v6446_v16 = vadd.f32 %v6396_v62, %v6172_v28 }
 0x7b3   : > { %v7040_v15 = vadd.f32 %v12252_v11, %v6989_v49 }
 0x7b5   : > { %v7136_v58 = vadd.f32 %v7088_v60, %v7040_v15  ;;  %v6720_v60 = vadd.f32 %v6670_v63, %v6446_v16 }
 0x7b7   : > { %v7184_v36 = vmax.f32 %v7136_v58, 0.0 }
 0x7b8   : > { %v6932_v30 = vpop.f32.mrf.mxu1 }
 0x7b9   : > { %7232 = vst [vmem:[%s11813_s24 + $0x150] sm:$0xff] %v7184_v36  ;;  %v6990_v57 = vadd.f32 %v6932_v30, %v6716_v42 }
 0x7bb   : > { %v7041_v10 = vadd.f32 %v12252_v11, %v6990_v57 }
 0x7bd   : > { %v7137_v6 = vadd.f32 %v7089_v61, %v7041_v10 }
 0x7bf   : > { %v7185_v26 = vmax.f32 %v7137_v6, 0.0 }
 0x7c0   : > { %v6935_v0 = vpop.f32.mrf.mxu1 }
 0x7c1   : > { %7233 = vst [vmem:[%s11813_s24 + $0x158] sm:$0xff] %v7185_v26  ;;  %v6991_v48 = vadd.f32 %v6935_v0, %v6717_v21 }
 0x7c3   : > { %v7042_v56 = vadd.f32 %v12252_v11, %v6991_v48 }
 0x7c5   : > { %v7138_v19 = vadd.f32 %v7090_v52, %v7042_v56 }
 0x7c7   : > { %v7186_v27 = vmax.f32 %v7138_v19, 0.0 }
 0x7c8   : > { %v6938_v13 = vpop.f32.mrf.mxu1 }
 0x7c9   : > { %7234 = vst [vmem:[%s11813_s24 + $0x160] sm:$0xff] %v7186_v27  ;;  %v6992_v32 = vadd.f32 %v6938_v13, %v6718_v24 }
 0x7cb   : > { %v7043_v25 = vadd.f32 %v12252_v11, %v6992_v32 }
 0x7cd   : > { %v7139_v20 = vadd.f32 %v7091_v7, %v7043_v25 }
 0x7cf   : > { %v7187_v22 = vmax.f32 %v7139_v20, 0.0 }
 0x7d0   : > { %v6941_v17 = vpop.f32.mrf.mxu1 }
 0x7d1   : > { %7235 = vst [vmem:[%s11813_s24 + $0x168] sm:$0xff] %v7187_v22  ;;  %v6993_v3 = vadd.f32 %v6941_v17, %v6719_v18 }
 0x7d3   : > { %v7044_v50 = vadd.f32 %v12252_v11, %v6993_v3 }
 0x7d5   : > { %v7140_v49 = vadd.f32 %v7092_v33, %v7044_v50 }
 0x7d7   : > { %v7188_v54 = vmax.f32 %v7140_v49, 0.0 }
 0x7d8   : > { %v6944_v45 = vpop.f32.mrf.mxu1 }
 0x7d9   : > { %7236 = vst [vmem:[%s11813_s24 + $0x170] sm:$0xff] %v7188_v54  ;;  %v6994_v15 = vadd.f32 %v6944_v45, %v6720_v60 }
 0x7db   : > { %v7045_v4 = vadd.f32 %v12252_v11, %v6994_v15 }
 0x7dd   : > { %v7141_v55 = vadd.f32 %v7093_v35, %v7045_v4 }
 0x7df   : > { %v7189_v5 = vmax.f32 %v7141_v55, 0.0 }
 0x7e1   : > { %7237 = vst [vmem:[%s11813_s24 + $0x178] sm:$0xff] %v7189_v5 }
 0x7e2 PF: > { %s15_s18 = sadd.s32 1, %s7661_s18  }
 0x7e3   : > { %p12_p4 = scmp.ge.s32.totalorder %s15_s18, 4  }
 0x7e5   :  { %14 = sbr.rel (!%p12_p4) target bundleno = 1 (0x1), region = 86 }

</bundles_post_ra>
